<compile_context>
chip_gen: v6e
topology: v6e:2x2x1
jax: 0.10.0
libtpu: 0.0.40
codegen_flags: <defaults>
</compile_context>

<pallas_src>
import math

import jax
import jax.numpy as jnp
from jax.experimental import pallas as pl
from jax.experimental.pallas import tpu as pltpu

DFF = 16          # dim_feedforward in the PyTorch module
QR = 8            # decoder query rows per batch (one sublane tile; rows identical)
NEG_BIG = -1e9    # additive bias masking padded key positions


# ----------------------------------------------------------------------------
# Host-side parameter packing (plain-JAX glue)
# ----------------------------------------------------------------------------
def sinusoidal_pe(L, D):
    pos = jnp.arange(L, dtype=jnp.float32)[:, None]
    i = jnp.arange(0, D, 2, dtype=jnp.float32)
    div = jnp.exp(-math.log(10000.0) * i / D)
    pe = jnp.zeros((L, D), dtype=jnp.float32)
    pe = pe.at[:, 0::2].set(jnp.sin(pos * div))
    pe = pe.at[:, 1::2].set(jnp.cos(pos * div))
    return pe


def build_packed_params(feats, n_window, bb, key):
    """Pack every weight/bias/constant into one (rows, COLS) f32 slab.

    Returns (layout, slab, n_head, LP) where layout[name] = (row_off, rows, cols),
    every row_off is 8-aligned and LP is the sublane-padded sequence length.
    """
    F, L = feats, n_window
    D = 2 * F
    LP = ((L + 7) // 8) * 8
    N = bb * LP
    n_head = 2 if feats > 1 and D % 2 == 0 else 1
    if D % n_head != 0:
        n_head = 1
    H = n_head
    hd = D // H

    keys = iter(jax.random.split(key, 256))

    def wmat(shape):
        return 0.1 * jax.random.normal(next(keys), shape, dtype=jnp.float32)

    def bvec(shape):
        return 0.01 * jax.random.normal(next(keys), shape, dtype=jnp.float32)

    def ln_row(x, g, b):
        mu = jnp.mean(x, axis=-1, keepdims=True)
        var = jnp.mean((x - mu) ** 2, axis=-1, keepdims=True)
        return (x - mu) * jax.lax.rsqrt(var + 1e-5) * g + b

    entries = []

    def add(name, arr):
        entries.append((name, jnp.asarray(arr, jnp.float32)))

    # ---- shared transformer_encoder layer (post-norm, ReLU FFN) ----
    wq, bq = wmat((D, D)), bvec((1, D))
    wk, bk = wmat((D, D)), bvec((1, D))
    wv, bv = wmat((D, D)), bvec((1, D))
    add("enc_wqkv", jnp.concatenate([wq, wk, wv], axis=1))        # fused QKV
    add("enc_bqkv", jnp.concatenate([bq, bk, bv], axis=1))
    add("enc_wo", wmat((D, D))); add("enc_bo", bvec((1, D)))
    add("enc_ln1_g", jnp.ones((1, D))); add("enc_ln1_b", bvec((1, D)))
    add("enc_ff_w1", wmat((D, DFF))); add("enc_ff_b1", bvec((1, DFF)))
    add("enc_ff_w2", wmat((DFF, D))); add("enc_ff_b2", bvec((1, D)))
    add("enc_ln2_g", jnp.ones((1, D))); add("enc_ln2_b", bvec((1, D)))

    # ---- transformer_decoder1 / transformer_decoder2 (1 layer each) ----
    for d in ("dec1_", "dec2_"):
        # Self-attention with tgt == 0 collapses to the constant row
        #   x0 = LayerNorm(bv @ Wo + bo)   -> precomputed here (data independent).
        sa_bv, sa_wo, sa_bo = bvec((1, D)), wmat((D, D)), bvec((1, D))
        ln1_g, ln1_b = jnp.ones((1, D)), bvec((1, D))
        x0 = ln_row(sa_bv @ sa_wo + sa_bo, ln1_g, ln1_b)
        add(d + "x0", x0)
        ca_wq, ca_bq = wmat((D, D)), bvec((1, D))
        ca_wk, ca_bk = wmat((D, D)), bvec((1, D))
        ca_wv, ca_bv = wmat((D, D)), bvec((1, D))
        add(d + "q0", x0 @ ca_wq + ca_bq)                         # precomputed query row
        add(d + "ca_wkv", jnp.concatenate([ca_wk, ca_wv], axis=1))
        add(d + "ca_bkv", jnp.concatenate([ca_bk, ca_bv], axis=1))
        add(d + "ca_wo", wmat((D, D))); add(d + "ca_bo", bvec((1, D)))
        add(d + "ln2_g", jnp.ones((1, D))); add(d + "ln2_b", bvec((1, D)))
        add(d + "ff_w1", wmat((D, DFF))); add(d + "ff_b1", bvec((1, DFF)))
        add(d + "ff_w2", wmat((DFF, D))); add(d + "ff_b2", bvec((1, D)))
        add(d + "ln3_g", jnp.ones((1, D))); add(d + "ln3_b", bvec((1, D)))

    # fcn = Linear(d_model, feats) + Sigmoid, duplicated across both F-lane
    # halves so the kernel gets [x_out | x_out] without lane concatenation.
    fw, fb = wmat((D, F)), bvec((1, F))
    add("fcn_w_dup", jnp.concatenate([fw, fw], axis=1))
    add("fcn_b_dup", jnp.concatenate([fb, fb], axis=1))

    # positional encoding, padded to LP rows and pre-tiled over the bb batches
    pe_pad = jnp.zeros((LP, D), jnp.float32).at[:L].set(sinusoidal_pe(L, D))
    add("pe_tiled", jnp.tile(pe_pad, (bb, 1)))                    # (bb*LP, D)

    # additive key bias: 0 on valid positions, -1e9 on padded positions
    add("kbias", jnp.where(jnp.arange(LP) < L, 0.0, NEG_BIG)[None, :])

    # constant 0/1 lane masks
    lane = jnp.arange(D)
    add("hmask", jnp.stack(
        [((lane >= h * hd) & (lane < (h + 1) * hd)).astype(jnp.float32)
         for h in range(H)], axis=0))                             # (H, D)
    add("cmask_lo", (lane < F).astype(jnp.float32)[None, :])
    add("cmask_hi", (lane >= F).astype(jnp.float32)[None, :])

    # constant selector matrices (sublane broadcast / row extraction via MXU)
    add("bsel", (jnp.arange(N)[:, None] // LP
                 == jnp.arange(bb)[None, :]).astype(jnp.float32))   # (N, bb)
    add("extq", (jnp.arange(bb)[:, None] * QR
                 == jnp.arange(bb * QR)[None, :]).astype(jnp.float32))  # (bb, bb*QR)

    # pack into one (rows, COLS) slab; every entry 8-row aligned, lane offset 0
    COLS = max(arr.shape[1] for _, arr in entries)
    layout = {}
    rows = 0
    for name, arr in entries:
        r, c = arr.shape
        layout[name] = (rows, r, c)
        rows += ((r + 7) // 8) * 8
    slab = jnp.zeros((rows, COLS), jnp.float32)
    for name, arr in entries:
        off, r, c = layout[name]
        slab = slab.at[off:off + r, :c].set(arr)
    return layout, slab, H, LP


# ----------------------------------------------------------------------------
# Pallas kernel
# ----------------------------------------------------------------------------
def make_kernel(layout, bb, LP, F, D, H):
    hd = D // H
    inv_sqrt_hd = 1.0 / math.sqrt(hd)
    sqrt_d = math.sqrt(float(D))      # src_c * sqrt(src_c.size(-1)) = sqrt(d_model)
    f32 = jnp.float32
    N = bb * LP                       # sequence rows per grid step (batch-major)

    def kernel(src2_ref, slab_ref, out_ref):
        # lazy point-of-use reads from the single packed parameter slab
        def P(name):
            off, r, c = layout[name]
            return slab_ref[off:off + r, 0:c]

        def mm(a, b):
            return jnp.dot(a, b, preferred_element_type=f32)

        def ln(x, g, b):
            mu = jnp.mean(x, axis=-1, keepdims=True)
            var = jnp.mean((x - mu) ** 2, axis=-1, keepdims=True)
            return (x - mu) * jax.lax.rsqrt(var + 1e-5) * g + b

        # ---- constants hoisted: read once per grid step ----
        m_lo = P("cmask_lo")                      # (1, D) : 1 on low  F lanes
        m_hi = P("cmask_hi")                      # (1, D) : 1 on high F lanes
        kbias = P("kbias")                        # (1, LP): 0 / -1e9 key mask
        hmask = P("hmask")                        # (H, D)
        hmasks = [hmask[h:h + 1, :] for h in range(H)]

        def attn_heads(q3, k3, v3):
            """q3: (bb, Q, D); k3/v3: (bb, LP, D).  Heads fused into the
            leading axis: one batched matmul pair + ONE softmax chain."""
            qs = jnp.concatenate([q3 * m for m in hmasks], axis=0)
            ks = jnp.concatenate([k3] * H, axis=0)
            vs = jnp.concatenate([v3 * m for m in hmasks], axis=0)
            s = jnp.einsum("gqd,gkd->gqk", qs, ks,
                           preferred_element_type=f32) * inv_sqrt_hd + kbias
            s = s - jnp.max(s, axis=-1, keepdims=True)
            e = jnp.exp(s)
            p = e * pl.reciprocal(jnp.sum(e, axis=-1, keepdims=True), approx=True)
            o = jnp.einsum("gqk,gkd->gqd", p, vs, preferred_element_type=f32)
            acc = o[0:bb]
            for h in range(1, H):
                acc = acc + o[h * bb:(h + 1) * bb]   # head merge (disjoint lanes)
            return acc                               # (bb, Q, D)

        def encoder(xin):
            """xin: (N, D) = cat([src, c]) rows (batch-major); post-norm layer."""
            x = xin * sqrt_d + P("pe_tiled")
            qkv = mm(x, P("enc_wqkv")) + P("enc_bqkv")            # fused QKV (N, 3D)
            q3 = qkv[:, 0:D].reshape(bb, LP, D)
            k3 = qkv[:, D:2 * D].reshape(bb, LP, D)
            v3 = qkv[:, 2 * D:3 * D].reshape(bb, LP, D)
            acc = attn_heads(q3, k3, v3)                          # (bb, LP, D)
            sa = mm(acc.reshape(N, D), P("enc_wo")) + P("enc_bo")
            x = ln(x + sa, P("enc_ln1_g"), P("enc_ln1_b"))
            h1 = jnp.maximum(mm(x, P("enc_ff_w1")) + P("enc_ff_b1"), 0.0)
            ff = mm(h1, P("enc_ff_w2")) + P("enc_ff_b2")
            return ln(x + ff, P("enc_ln2_g"), P("enc_ln2_b"))     # (N, D)

        def decoder(mem, d):
            """mem: (N, D).  tgt == 0 -> decoder collapses to one row/batch;
            x0 / q0 precomputed host-side.  QR identical query rows keep every
            reshape tile-aligned; one row per batch is extracted with a
            constant 0/1 matmul."""
            x0 = P(d + "x0")                                      # (1, D)
            q0 = P(d + "q0")                                      # (1, D)
            kv = mm(mem, P(d + "ca_wkv")) + P(d + "ca_bkv")       # fused K|V (N, 2D)
            k3 = kv[:, 0:D].reshape(bb, LP, D)
            v3 = kv[:, D:2 * D].reshape(bb, LP, D)
            q_rows = jnp.broadcast_to(q0, (QR, D))
            q3 = jnp.broadcast_to(q_rows.reshape(1, QR, D), (bb, QR, D))
            o = attn_heads(q3, k3, v3)                            # (bb, QR, D)
            ob = mm(P("extq"), o.reshape(bb * QR, D))             # (bb, D): row 0 / batch
            ca = mm(ob, P(d + "ca_wo")) + P(d + "ca_bo")
            x = ln(x0 + ca, P(d + "ln2_g"), P(d + "ln2_b"))
            h1 = jnp.maximum(mm(x, P(d + "ff_w1")) + P(d + "ff_b1"), 0.0)
            ff = mm(h1, P(d + "ff_w2")) + P(d + "ff_b2")
            x = ln(x + ff, P(d + "ln3_g"), P(d + "ln3_b"))
            # duplicated fcn weights -> (bb, D) = [x_out | x_out]
            return jax.nn.sigmoid(mm(x, P("fcn_w_dup")) + P("fcn_b_dup"))

        src2 = src2_ref[...].astype(f32)                          # (N, D) = [src | src]

        # --- phase 1: c1 = 0  ->  encoder input = [src | 0] ---
        mem1 = encoder(src2 * m_lo)
        x1d = decoder(mem1, "dec1_")                              # (bb, D) = [x1 | x1]

        # --- phase 2: c2 = (x1 - src)^2 placed in the high F lanes ---
        x1rep = mm(P("bsel"), x1d)                                # broadcast over seq rows
        c2 = ((x1rep - src2) ** 2) * m_hi                         # (N, D)
        mem2 = encoder(src2 * m_lo + c2)
        x2d = decoder(mem2, "dec2_")                              # (bb, D) = [x2 | x2]

        out_ref[...] = (x1d * m_lo + x2d * m_hi).astype(out_ref.dtype)

    return kernel


# ----------------------------------------------------------------------------
# Wrapper
# ----------------------------------------------------------------------------
def tranad_forward(src, slab, layout, n_head, LP, bb=8):
    B, L, F = src.shape
    D = 2 * F
    Bp = ((B + bb - 1) // bb) * bb
    R, C = slab.shape
    kernel = make_kernel(layout, bb, LP, F, D, n_head)

    # pad batch & sequence, duplicate features (lane concat done host-side),
    # flatten to batch-major rows -> (Bp*LP, D)
    srcp = jnp.zeros((Bp, LP, F), src.dtype).at[:B, :L].set(src)
    src2 = jnp.concatenate([srcp, srcp], axis=-1).reshape(Bp * LP, D)

    out = pl.pallas_call(
        kernel,
        out_shape=jax.ShapeDtypeStruct((Bp, D), jnp.float32),     # one row per batch elem
        grid_spec=pltpu.PrefetchScalarGridSpec(
            num_scalar_prefetch=0,
            grid=(Bp // bb,),
            in_specs=[pl.BlockSpec((bb * LP, D), lambda i: (i, 0)),   # bb batches / step
                      pl.BlockSpec((R, C), lambda i: (0, 0))],        # packed params
            out_specs=pl.BlockSpec((bb, D), lambda i: (i, 0))),
        compiler_params=pltpu.CompilerParams(
            # on v7x this axis can be pltpu.CORE_PARALLEL to split batch blocks
            # across the two TensorCores; "parallel" is safe on all generations.
            dimension_semantics=("parallel",)),
    )(src2, slab)

    out = out[:B]
    # decoder collapse (tgt == 0): every sequence position is identical ->
    # broadcast the single row over seq_len host-side (plain XLA, free).
    x1 = jnp.broadcast_to(out[:, None, :F], (B, L, F))
    x2 = jnp.broadcast_to(out[:, None, F:], (B, L, F))
    return x1, x2


# ----------------------------------------------------------------------------
if __name__ == "__main__":
    FEATS = 4
    N_WINDOW = 10          # n_window in the module; used as seq_len
    BATCH = 16
    BB = 8                 # batch elements folded into each grid step

    key = jax.random.PRNGKey(0)
    k_src, k_par = jax.random.split(key)
    src = jax.random.uniform(k_src, (BATCH, N_WINDOW, FEATS), dtype=jnp.float32)

    layout, slab, n_head, LP = build_packed_params(FEATS, N_WINDOW, BB, k_par)

    x1, x2 = tranad_forward(src, slab, layout, n_head, LP, bb=BB)
    jax.block_until_ready((x1, x2))

    assert x1.shape == (BATCH, N_WINDOW, FEATS) and x2.shape == (BATCH, N_WINDOW, FEATS)
    assert bool(jnp.all(jnp.isfinite(x1))) and bool(jnp.all(jnp.isfinite(x2)))
    # sigmoid output range sanity check
    assert bool(jnp.all((x1 >= 0) & (x1 <= 1))) and bool(jnp.all((x2 >= 0) & (x2 <= 1)))
    print("KERNEL_OK")
</pallas_src>

<mosaic_0001>
module attributes {stable_mosaic.version = 11 : i64} {
  func.func @kernel(%arg0: i32, %arg1: memref<128x8xf32, #tpu.memory_space<vmem>>, %arg2: memref<656x64xf32, #tpu.memory_space<vmem>>, %arg3: memref<8x8xf32, #tpu.memory_space<vmem>>) attributes {dimension_semantics = [#tpu.dimension_semantics<parallel>], iteration_bounds = array<i64: 2>, scalar_prefetch = 0 : i64, scratch_operands = 0 : i64, tpu.core_type = #tpu.core_type<tc>, window_params = [{transform_indices = @transform_0, window_bounds = array<i64: 128, 8>}, {pipeline_mode = #tpu.pipeline_mode<synchronous>, transform_indices = @transform_1, window_bounds = array<i64: 656, 64>}, {transform_indices = @transform_2, window_bounds = array<i64: 8, 8>}]} {
    %c504 = arith.constant 504 : index
    %c0 = arith.constant 0 : index
    %0 = vector.load %arg2[%c504, %c0] : memref<656x64xf32, #tpu.memory_space<vmem>>, vector<1x8xf32>
    %c512 = arith.constant 512 : index
    %c0_0 = arith.constant 0 : index
    %1 = vector.load %arg2[%c512, %c0_0] : memref<656x64xf32, #tpu.memory_space<vmem>>, vector<1x8xf32>
    %c488 = arith.constant 488 : index
    %c0_1 = arith.constant 0 : index
    %2 = vector.load %arg2[%c488, %c0_1] : memref<656x64xf32, #tpu.memory_space<vmem>>, vector<1x16xf32>
    %c496 = arith.constant 496 : index
    %c0_2 = arith.constant 0 : index
    %3 = vector.load %arg2[%c496, %c0_2] : memref<656x64xf32, #tpu.memory_space<vmem>>, vector<2x8xf32>
    %4 = vector.extract_strided_slice %3 {offsets = [0, 0], sizes = [1, 8], strides = [1, 1]} : vector<2x8xf32> to vector<1x8xf32>
    %5 = vector.extract_strided_slice %3 {offsets = [1, 0], sizes = [1, 8], strides = [1, 1]} : vector<2x8xf32> to vector<1x8xf32>
    %c0_3 = arith.constant 0 : index
    %c0_4 = arith.constant 0 : index
    %6 = vector.load %arg1[%c0_3, %c0_4] : memref<128x8xf32, #tpu.memory_space<vmem>>, vector<128x8xf32>
    %7 = vector.broadcast %0 : vector<1x8xf32> to vector<128x8xf32>
    %8 = arith.mulf %6, %7 : vector<128x8xf32>
    %cst = arith.constant 2.82842708 : f32
    %9 = vector.broadcast %cst : f32 to vector<128x8xf32>
    %10 = arith.mulf %8, %9 : vector<128x8xf32>
    %c360 = arith.constant 360 : index
    %c0_5 = arith.constant 0 : index
    %11 = vector.load %arg2[%c360, %c0_5] : memref<656x64xf32, #tpu.memory_space<vmem>>, vector<128x8xf32>
    %12 = arith.addf %10, %11 : vector<128x8xf32>
    %c0_6 = arith.constant 0 : index
    %c0_7 = arith.constant 0 : index
    %13 = vector.load %arg2[%c0_6, %c0_7] : memref<656x64xf32, #tpu.memory_space<vmem>>, vector<8x24xf32>
    %cst_8 = arith.constant dense<0.000000e+00> : vector<128x24xf32>
    %14 = tpu.matmul %12, %13, %cst_8 {dimension_numbers = #tpu.dot_dimension_numbers<[1], [0], [0], [1], [0, 0, 1, 1], [], []>} : vector<128x8xf32>, vector<8x24xf32>, vector<128x24xf32> -> vector<128x24xf32>
    %c8 = arith.constant 8 : index
    %c0_9 = arith.constant 0 : index
    %15 = vector.load %arg2[%c8, %c0_9] : memref<656x64xf32, #tpu.memory_space<vmem>>, vector<1x24xf32>
    %16 = vector.broadcast %15 : vector<1x24xf32> to vector<128x24xf32>
    %17 = arith.addf %14, %16 : vector<128x24xf32>
    %18 = vector.extract_strided_slice %17 {offsets = [0, 0], sizes = [128, 8], strides = [1, 1]} : vector<128x24xf32> to vector<128x8xf32>
    %19 = vector.shape_cast %18 : vector<128x8xf32> to vector<8x16x8xf32>
    %20 = vector.extract_strided_slice %17 {offsets = [0, 8], sizes = [128, 8], strides = [1, 1]} : vector<128x24xf32> to vector<128x8xf32>
    %21 = vector.shape_cast %20 : vector<128x8xf32> to vector<8x16x8xf32>
    %22 = vector.extract_strided_slice %17 {offsets = [0, 16], sizes = [128, 8], strides = [1, 1]} : vector<128x24xf32> to vector<128x8xf32>
    %23 = vector.shape_cast %22 : vector<128x8xf32> to vector<8x16x8xf32>
    %24 = vector.shape_cast %4 : vector<1x8xf32> to vector<1x1x8xf32>
    %25 = vector.broadcast %24 : vector<1x1x8xf32> to vector<8x16x8xf32>
    %26 = arith.mulf %19, %25 : vector<8x16x8xf32>
    %27 = vector.shape_cast %5 : vector<1x8xf32> to vector<1x1x8xf32>
    %28 = vector.broadcast %27 : vector<1x1x8xf32> to vector<8x16x8xf32>
    %29 = arith.mulf %19, %28 : vector<8x16x8xf32>
    %30 = tpu.concatenate %26, %29 in 0 : vector<8x16x8xf32>, vector<8x16x8xf32> -> vector<16x16x8xf32>
    %31 = tpu.concatenate %21, %21 in 0 : vector<8x16x8xf32>, vector<8x16x8xf32> -> vector<16x16x8xf32>
    %32 = vector.shape_cast %4 : vector<1x8xf32> to vector<1x1x8xf32>
    %33 = vector.broadcast %32 : vector<1x1x8xf32> to vector<8x16x8xf32>
    %34 = arith.mulf %23, %33 : vector<8x16x8xf32>
    %35 = vector.shape_cast %5 : vector<1x8xf32> to vector<1x1x8xf32>
    %36 = vector.broadcast %35 : vector<1x1x8xf32> to vector<8x16x8xf32>
    %37 = arith.mulf %23, %36 : vector<8x16x8xf32>
    %38 = tpu.concatenate %34, %37 in 0 : vector<8x16x8xf32>, vector<8x16x8xf32> -> vector<16x16x8xf32>
    "tpu.trace_start"() <{level = 10 : i32, message = "gqd,gkd->gqk"}> : () -> ()
    %cst_10 = arith.constant dense<0.000000e+00> : vector<16x16x16xf32>
    %39 = tpu.matmul %30, %31, %cst_10 {dimension_numbers = #tpu.dot_dimension_numbers<[2], [2], [1], [1], [0, 0, 0, 1, 1, 1], [0], [0]>} : vector<16x16x8xf32>, vector<16x16x8xf32>, vector<16x16x16xf32> -> vector<16x16x16xf32>
    "tpu.trace_stop"() : () -> ()
    %cst_11 = arith.constant 5.000000e-01 : f32
    %40 = vector.broadcast %cst_11 : f32 to vector<16x16x16xf32>
    %41 = arith.mulf %39, %40 : vector<16x16x16xf32>
    %42 = vector.shape_cast %2 : vector<1x16xf32> to vector<1x1x16xf32>
    %43 = vector.broadcast %42 : vector<1x1x16xf32> to vector<16x16x16xf32>
    %44 = arith.addf %41, %43 : vector<16x16x16xf32>
    %cst_12 = arith.constant dense<0xFF800000> : vector<16x16xf32>
    %45 = vector.multi_reduction <maximumf>, %44, %cst_12 [2] : vector<16x16x16xf32> to vector<16x16xf32>
    %46 = vector.shape_cast %45 : vector<16x16xf32> to vector<16x16x1xf32>
    %47 = vector.broadcast %46 : vector<16x16x1xf32> to vector<16x16x16xf32>
    %48 = arith.subf %44, %47 : vector<16x16x16xf32>
    %49 = math.exp %48 : vector<16x16x16xf32>
    %cst_13 = arith.constant dense<0.000000e+00> : vector<16x16xf32>
    %50 = vector.multi_reduction <add>, %49, %cst_13 [2] : vector<16x16x16xf32> to vector<16x16xf32>
    %51 = vector.shape_cast %50 : vector<16x16xf32> to vector<16x16x1xf32>
    %52 = tpu.reciprocal %51 {approx = true} : vector<16x16x1xf32> -> vector<16x16x1xf32>
    %53 = vector.broadcast %52 : vector<16x16x1xf32> to vector<16x16x16xf32>
    %54 = arith.mulf %49, %53 : vector<16x16x16xf32>
    "tpu.trace_start"() <{level = 10 : i32, message = "gqk,gkd->gqd"}> : () -> ()
    %cst_14 = arith.constant dense<0.000000e+00> : vector<16x16x8xf32>
    %55 = tpu.matmul %54, %38, %cst_14 {dimension_numbers = #tpu.dot_dimension_numbers<[2], [1], [1], [2], [0, 0, 0, 1, 1, 2], [0], [0]>} : vector<16x16x16xf32>, vector<16x16x8xf32>, vector<16x16x8xf32> -> vector<16x16x8xf32>
    "tpu.trace_stop"() : () -> ()
    %56 = vector.extract_strided_slice %55 {offsets = [0, 0, 0], sizes = [8, 16, 8], strides = [1, 1, 1]} : vector<16x16x8xf32> to vector<8x16x8xf32>
    %57 = vector.extract_strided_slice %55 {offsets = [8, 0, 0], sizes = [8, 16, 8], strides = [1, 1, 1]} : vector<16x16x8xf32> to vector<8x16x8xf32>
    %58 = arith.addf %56, %57 : vector<8x16x8xf32>
    %59 = vector.shape_cast %58 : vector<8x16x8xf32> to vector<128x8xf32>
    %c16 = arith.constant 16 : index
    %c0_15 = arith.constant 0 : index
    %60 = vector.load %arg2[%c16, %c0_15] : memref<656x64xf32, #tpu.memory_space<vmem>>, vector<8x8xf32>
    %cst_16 = arith.constant dense<0.000000e+00> : vector<128x8xf32>
    %61 = tpu.matmul %59, %60, %cst_16 {dimension_numbers = #tpu.dot_dimension_numbers<[1], [0], [0], [1], [0, 0, 1, 1], [], []>} : vector<128x8xf32>, vector<8x8xf32>, vector<128x8xf32> -> vector<128x8xf32>
    %c24 = arith.constant 24 : index
    %c0_17 = arith.constant 0 : index
    %62 = vector.load %arg2[%c24, %c0_17] : memref<656x64xf32, #tpu.memory_space<vmem>>, vector<1x8xf32>
    %63 = vector.broadcast %62 : vector<1x8xf32> to vector<128x8xf32>
    %64 = arith.addf %61, %63 : vector<128x8xf32>
    %65 = arith.addf %12, %64 : vector<128x8xf32>
    %c32 = arith.constant 32 : index
    %c0_18 = arith.constant 0 : index
    %66 = vector.load %arg2[%c32, %c0_18] : memref<656x64xf32, #tpu.memory_space<vmem>>, vector<1x8xf32>
    %c40 = arith.constant 40 : index
    %c0_19 = arith.constant 0 : index
    %67 = vector.load %arg2[%c40, %c0_19] : memref<656x64xf32, #tpu.memory_space<vmem>>, vector<1x8xf32>
    %cst_20 = arith.constant dense<0.000000e+00> : vector<128xf32>
    %68 = vector.multi_reduction <add>, %65, %cst_20 [1] : vector<128x8xf32> to vector<128xf32>
    %69 = vector.shape_cast %68 : vector<128xf32> to vector<128x1xf32>
    %cst_21 = arith.constant 8.000000e+00 : f32
    %70 = vector.broadcast %cst_21 : f32 to vector<128x1xf32>
    %71 = arith.divf %69, %70 : vector<128x1xf32>
    %72 = vector.broadcast %71 : vector<128x1xf32> to vector<128x8xf32>
    %73 = arith.subf %65, %72 : vector<128x8xf32>
    %74 = arith.mulf %73, %73 : vector<128x8xf32>
    %cst_22 = arith.constant dense<0.000000e+00> : vector<128xf32>
    %75 = vector.multi_reduction <add>, %74, %cst_22 [1] : vector<128x8xf32> to vector<128xf32>
    %76 = vector.shape_cast %75 : vector<128xf32> to vector<128x1xf32>
    %cst_23 = arith.constant 8.000000e+00 : f32
    %77 = vector.broadcast %cst_23 : f32 to vector<128x1xf32>
    %78 = arith.divf %76, %77 : vector<128x1xf32>
    %79 = vector.broadcast %71 : vector<128x1xf32> to vector<128x8xf32>
    %80 = arith.subf %65, %79 : vector<128x8xf32>
    %cst_24 = arith.constant 9.99999974E-6 : f32
    %81 = vector.broadcast %cst_24 : f32 to vector<128x1xf32>
    %82 = arith.addf %78, %81 : vector<128x1xf32>
    %83 = math.rsqrt %82 : vector<128x1xf32>
    %84 = vector.broadcast %83 : vector<128x1xf32> to vector<128x8xf32>
    %85 = arith.mulf %80, %84 : vector<128x8xf32>
    %86 = vector.broadcast %66 : vector<1x8xf32> to vector<128x8xf32>
    %87 = arith.mulf %85, %86 : vector<128x8xf32>
    %88 = vector.broadcast %67 : vector<1x8xf32> to vector<128x8xf32>
    %89 = arith.addf %87, %88 : vector<128x8xf32>
    %c48 = arith.constant 48 : index
    %c0_25 = arith.constant 0 : index
    %90 = vector.load %arg2[%c48, %c0_25] : memref<656x64xf32, #tpu.memory_space<vmem>>, vector<8x16xf32>
    %cst_26 = arith.constant dense<0.000000e+00> : vector<128x16xf32>
    %91 = tpu.matmul %89, %90, %cst_26 {dimension_numbers = #tpu.dot_dimension_numbers<[1], [0], [0], [1], [0, 0, 1, 1], [], []>} : vector<128x8xf32>, vector<8x16xf32>, vector<128x16xf32> -> vector<128x16xf32>
    %c56 = arith.constant 56 : index
    %c0_27 = arith.constant 0 : index
    %92 = vector.load %arg2[%c56, %c0_27] : memref<656x64xf32, #tpu.memory_space<vmem>>, vector<1x16xf32>
    %93 = vector.broadcast %92 : vector<1x16xf32> to vector<128x16xf32>
    %94 = arith.addf %91, %93 : vector<128x16xf32>
    %cst_28 = arith.constant 0.000000e+00 : f32
    %95 = vector.broadcast %cst_28 : f32 to vector<128x16xf32>
    %96 = arith.maximumf %94, %95 : vector<128x16xf32>
    %c64 = arith.constant 64 : index
    %c0_29 = arith.constant 0 : index
    %97 = vector.load %arg2[%c64, %c0_29] : memref<656x64xf32, #tpu.memory_space<vmem>>, vector<16x8xf32>
    %cst_30 = arith.constant dense<0.000000e+00> : vector<128x8xf32>
    %98 = tpu.matmul %96, %97, %cst_30 {dimension_numbers = #tpu.dot_dimension_numbers<[1], [0], [0], [1], [0, 0, 1, 1], [], []>} : vector<128x16xf32>, vector<16x8xf32>, vector<128x8xf32> -> vector<128x8xf32>
    %c80 = arith.constant 80 : index
    %c0_31 = arith.constant 0 : index
    %99 = vector.load %arg2[%c80, %c0_31] : memref<656x64xf32, #tpu.memory_space<vmem>>, vector<1x8xf32>
    %100 = vector.broadcast %99 : vector<1x8xf32> to vector<128x8xf32>
    %101 = arith.addf %98, %100 : vector<128x8xf32>
    %102 = arith.addf %89, %101 : vector<128x8xf32>
    %c88 = arith.constant 88 : index
    %c0_32 = arith.constant 0 : index
    %103 = vector.load %arg2[%c88, %c0_32] : memref<656x64xf32, #tpu.memory_space<vmem>>, vector<1x8xf32>
    %c96 = arith.constant 96 : index
    %c0_33 = arith.constant 0 : index
    %104 = vector.load %arg2[%c96, %c0_33] : memref<656x64xf32, #tpu.memory_space<vmem>>, vector<1x8xf32>
    %cst_34 = arith.constant dense<0.000000e+00> : vector<128xf32>
    %105 = vector.multi_reduction <add>, %102, %cst_34 [1] : vector<128x8xf32> to vector<128xf32>
    %106 = vector.shape_cast %105 : vector<128xf32> to vector<128x1xf32>
    %cst_35 = arith.constant 8.000000e+00 : f32
    %107 = vector.broadcast %cst_35 : f32 to vector<128x1xf32>
    %108 = arith.divf %106, %107 : vector<128x1xf32>
    %109 = vector.broadcast %108 : vector<128x1xf32> to vector<128x8xf32>
    %110 = arith.subf %102, %109 : vector<128x8xf32>
    %111 = arith.mulf %110, %110 : vector<128x8xf32>
    %cst_36 = arith.constant dense<0.000000e+00> : vector<128xf32>
    %112 = vector.multi_reduction <add>, %111, %cst_36 [1] : vector<128x8xf32> to vector<128xf32>
    %113 = vector.shape_cast %112 : vector<128xf32> to vector<128x1xf32>
    %cst_37 = arith.constant 8.000000e+00 : f32
    %114 = vector.broadcast %cst_37 : f32 to vector<128x1xf32>
    %115 = arith.divf %113, %114 : vector<128x1xf32>
    %116 = vector.broadcast %108 : vector<128x1xf32> to vector<128x8xf32>
    %117 = arith.subf %102, %116 : vector<128x8xf32>
    %cst_38 = arith.constant 9.99999974E-6 : f32
    %118 = vector.broadcast %cst_38 : f32 to vector<128x1xf32>
    %119 = arith.addf %115, %118 : vector<128x1xf32>
    %120 = math.rsqrt %119 : vector<128x1xf32>
    %121 = vector.broadcast %120 : vector<128x1xf32> to vector<128x8xf32>
    %122 = arith.mulf %117, %121 : vector<128x8xf32>
    %123 = vector.broadcast %103 : vector<1x8xf32> to vector<128x8xf32>
    %124 = arith.mulf %122, %123 : vector<128x8xf32>
    %125 = vector.broadcast %104 : vector<1x8xf32> to vector<128x8xf32>
    %126 = arith.addf %124, %125 : vector<128x8xf32>
    %c104 = arith.constant 104 : index
    %c0_39 = arith.constant 0 : index
    %127 = vector.load %arg2[%c104, %c0_39] : memref<656x64xf32, #tpu.memory_space<vmem>>, vector<1x8xf32>
    %c112 = arith.constant 112 : index
    %c0_40 = arith.constant 0 : index
    %128 = vector.load %arg2[%c112, %c0_40] : memref<656x64xf32, #tpu.memory_space<vmem>>, vector<1x8xf32>
    %c120 = arith.constant 120 : index
    %c0_41 = arith.constant 0 : index
    %129 = vector.load %arg2[%c120, %c0_41] : memref<656x64xf32, #tpu.memory_space<vmem>>, vector<8x16xf32>
    %cst_42 = arith.constant dense<0.000000e+00> : vector<128x16xf32>
    %130 = tpu.matmul %126, %129, %cst_42 {dimension_numbers = #tpu.dot_dimension_numbers<[1], [0], [0], [1], [0, 0, 1, 1], [], []>} : vector<128x8xf32>, vector<8x16xf32>, vector<128x16xf32> -> vector<128x16xf32>
    %c128 = arith.constant 128 : index
    %c0_43 = arith.constant 0 : index
    %131 = vector.load %arg2[%c128, %c0_43] : memref<656x64xf32, #tpu.memory_space<vmem>>, vector<1x16xf32>
    %132 = vector.broadcast %131 : vector<1x16xf32> to vector<128x16xf32>
    %133 = arith.addf %130, %132 : vector<128x16xf32>
    %134 = vector.extract_strided_slice %133 {offsets = [0, 0], sizes = [128, 8], strides = [1, 1]} : vector<128x16xf32> to vector<128x8xf32>
    %135 = vector.shape_cast %134 : vector<128x8xf32> to vector<8x16x8xf32>
    %136 = vector.extract_strided_slice %133 {offsets = [0, 8], sizes = [128, 8], strides = [1, 1]} : vector<128x16xf32> to vector<128x8xf32>
    %137 = vector.shape_cast %136 : vector<128x8xf32> to vector<8x16x8xf32>
    %138 = vector.shape_cast %128 : vector<1x8xf32> to vector<1x8xf32>
    %139 = vector.broadcast %138 : vector<1x8xf32> to vector<8x8xf32>
    %140 = vector.shape_cast %139 : vector<8x8xf32> to vector<1x8x8xf32>
    %141 = vector.shape_cast %140 : vector<1x8x8xf32> to vector<1x8x8xf32>
    %142 = vector.broadcast %141 : vector<1x8x8xf32> to vector<8x8x8xf32>
    %143 = vector.shape_cast %4 : vector<1x8xf32> to vector<1x1x8xf32>
    %144 = vector.broadcast %143 : vector<1x1x8xf32> to vector<8x8x8xf32>
    %145 = arith.mulf %142, %144 : vector<8x8x8xf32>
    %146 = vector.shape_cast %5 : vector<1x8xf32> to vector<1x1x8xf32>
    %147 = vector.broadcast %146 : vector<1x1x8xf32> to vector<8x8x8xf32>
    %148 = arith.mulf %142, %147 : vector<8x8x8xf32>
    %149 = tpu.concatenate %145, %148 in 0 : vector<8x8x8xf32>, vector<8x8x8xf32> -> vector<16x8x8xf32>
    %150 = tpu.concatenate %135, %135 in 0 : vector<8x16x8xf32>, vector<8x16x8xf32> -> vector<16x16x8xf32>
    %151 = vector.shape_cast %4 : vector<1x8xf32> to vector<1x1x8xf32>
    %152 = vector.broadcast %151 : vector<1x1x8xf32> to vector<8x16x8xf32>
    %153 = arith.mulf %137, %152 : vector<8x16x8xf32>
    %154 = vector.shape_cast %5 : vector<1x8xf32> to vector<1x1x8xf32>
    %155 = vector.broadcast %154 : vector<1x1x8xf32> to vector<8x16x8xf32>
    %156 = arith.mulf %137, %155 : vector<8x16x8xf32>
    %157 = tpu.concatenate %153, %156 in 0 : vector<8x16x8xf32>, vector<8x16x8xf32> -> vector<16x16x8xf32>
    "tpu.trace_start"() <{level = 10 : i32, message = "gqd,gkd->gqk"}> : () -> ()
    %cst_44 = arith.constant dense<0.000000e+00> : vector<16x8x16xf32>
    %158 = tpu.matmul %149, %150, %cst_44 {dimension_numbers = #tpu.dot_dimension_numbers<[2], [2], [1], [1], [0, 0, 0, 1, 1, 1], [0], [0]>} : vector<16x8x8xf32>, vector<16x16x8xf32>, vector<16x8x16xf32> -> vector<16x8x16xf32>
    "tpu.trace_stop"() : () -> ()
    %cst_45 = arith.constant 5.000000e-01 : f32
    %159 = vector.broadcast %cst_45 : f32 to vector<16x8x16xf32>
    %160 = arith.mulf %158, %159 : vector<16x8x16xf32>
    %161 = vector.shape_cast %2 : vector<1x16xf32> to vector<1x1x16xf32>
    %162 = vector.broadcast %161 : vector<1x1x16xf32> to vector<16x8x16xf32>
    %163 = arith.addf %160, %162 : vector<16x8x16xf32>
    %cst_46 = arith.constant dense<0xFF800000> : vector<16x8xf32>
    %164 = vector.multi_reduction <maximumf>, %163, %cst_46 [2] : vector<16x8x16xf32> to vector<16x8xf32>
    %165 = vector.shape_cast %164 : vector<16x8xf32> to vector<16x8x1xf32>
    %166 = vector.broadcast %165 : vector<16x8x1xf32> to vector<16x8x16xf32>
    %167 = arith.subf %163, %166 : vector<16x8x16xf32>
    %168 = math.exp %167 : vector<16x8x16xf32>
    %cst_47 = arith.constant dense<0.000000e+00> : vector<16x8xf32>
    %169 = vector.multi_reduction <add>, %168, %cst_47 [2] : vector<16x8x16xf32> to vector<16x8xf32>
    %170 = vector.shape_cast %169 : vector<16x8xf32> to vector<16x8x1xf32>
    %171 = tpu.reciprocal %170 {approx = true} : vector<16x8x1xf32> -> vector<16x8x1xf32>
    %172 = vector.broadcast %171 : vector<16x8x1xf32> to vector<16x8x16xf32>
    %173 = arith.mulf %168, %172 : vector<16x8x16xf32>
    "tpu.trace_start"() <{level = 10 : i32, message = "gqk,gkd->gqd"}> : () -> ()
    %cst_48 = arith.constant dense<0.000000e+00> : vector<16x8x8xf32>
    %174 = tpu.matmul %173, %157, %cst_48 {dimension_numbers = #tpu.dot_dimension_numbers<[2], [1], [1], [2], [0, 0, 0, 1, 1, 2], [0], [0]>} : vector<16x8x16xf32>, vector<16x16x8xf32>, vector<16x8x8xf32> -> vector<16x8x8xf32>
    "tpu.trace_stop"() : () -> ()
    %175 = vector.extract_strided_slice %174 {offsets = [0, 0, 0], sizes = [8, 8, 8], strides = [1, 1, 1]} : vector<16x8x8xf32> to vector<8x8x8xf32>
    %176 = vector.extract_strided_slice %174 {offsets = [8, 0, 0], sizes = [8, 8, 8], strides = [1, 1, 1]} : vector<16x8x8xf32> to vector<8x8x8xf32>
    %177 = arith.addf %175, %176 : vector<8x8x8xf32>
    %c648 = arith.constant 648 : index
    %c0_49 = arith.constant 0 : index
    %178 = vector.load %arg2[%c648, %c0_49] : memref<656x64xf32, #tpu.memory_space<vmem>>, vector<8x64xf32>
    %179 = vector.shape_cast %177 : vector<8x8x8xf32> to vector<64x8xf32>
    %cst_50 = arith.constant dense<0.000000e+00> : vector<8x8xf32>
    %180 = tpu.matmul %178, %179, %cst_50 {dimension_numbers = #tpu.dot_dimension_numbers<[1], [0], [0], [1], [0, 0, 1, 1], [], []>} : vector<8x64xf32>, vector<64x8xf32>, vector<8x8xf32> -> vector<8x8xf32>
    %c136 = arith.constant 136 : index
    %c0_51 = arith.constant 0 : index
    %181 = vector.load %arg2[%c136, %c0_51] : memref<656x64xf32, #tpu.memory_space<vmem>>, vector<8x8xf32>
    %cst_52 = arith.constant dense<0.000000e+00> : vector<8x8xf32>
    %182 = tpu.matmul %180, %181, %cst_52 {dimension_numbers = #tpu.dot_dimension_numbers<[1], [0], [0], [1], [0, 0, 1, 1], [], []>} : vector<8x8xf32>, vector<8x8xf32>, vector<8x8xf32> -> vector<8x8xf32>
    %c144 = arith.constant 144 : index
    %c0_53 = arith.constant 0 : index
    %183 = vector.load %arg2[%c144, %c0_53] : memref<656x64xf32, #tpu.memory_space<vmem>>, vector<1x8xf32>
    %184 = vector.broadcast %183 : vector<1x8xf32> to vector<8x8xf32>
    %185 = arith.addf %182, %184 : vector<8x8xf32>
    %186 = vector.broadcast %127 : vector<1x8xf32> to vector<8x8xf32>
    %187 = arith.addf %186, %185 : vector<8x8xf32>
    %c152 = arith.constant 152 : index
    %c0_54 = arith.constant 0 : index
    %188 = vector.load %arg2[%c152, %c0_54] : memref<656x64xf32, #tpu.memory_space<vmem>>, vector<1x8xf32>
    %c160 = arith.constant 160 : index
    %c0_55 = arith.constant 0 : index
    %189 = vector.load %arg2[%c160, %c0_55] : memref<656x64xf32, #tpu.memory_space<vmem>>, vector<1x8xf32>
    %cst_56 = arith.constant dense<0.000000e+00> : vector<8xf32>
    %190 = vector.multi_reduction <add>, %187, %cst_56 [1] : vector<8x8xf32> to vector<8xf32>
    %191 = vector.shape_cast %190 : vector<8xf32> to vector<8x1xf32>
    %cst_57 = arith.constant 8.000000e+00 : f32
    %192 = vector.broadcast %cst_57 : f32 to vector<8x1xf32>
    %193 = arith.divf %191, %192 : vector<8x1xf32>
    %194 = vector.broadcast %193 : vector<8x1xf32> to vector<8x8xf32>
    %195 = arith.subf %187, %194 : vector<8x8xf32>
    %196 = arith.mulf %195, %195 : vector<8x8xf32>
    %cst_58 = arith.constant dense<0.000000e+00> : vector<8xf32>
    %197 = vector.multi_reduction <add>, %196, %cst_58 [1] : vector<8x8xf32> to vector<8xf32>
    %198 = vector.shape_cast %197 : vector<8xf32> to vector<8x1xf32>
    %cst_59 = arith.constant 8.000000e+00 : f32
    %199 = vector.broadcast %cst_59 : f32 to vector<8x1xf32>
    %200 = arith.divf %198, %199 : vector<8x1xf32>
    %201 = vector.broadcast %193 : vector<8x1xf32> to vector<8x8xf32>
    %202 = arith.subf %187, %201 : vector<8x8xf32>
    %cst_60 = arith.constant 9.99999974E-6 : f32
    %203 = vector.broadcast %cst_60 : f32 to vector<8x1xf32>
    %204 = arith.addf %200, %203 : vector<8x1xf32>
    %205 = math.rsqrt %204 : vector<8x1xf32>
    %206 = vector.broadcast %205 : vector<8x1xf32> to vector<8x8xf32>
    %207 = arith.mulf %202, %206 : vector<8x8xf32>
    %208 = vector.broadcast %188 : vector<1x8xf32> to vector<8x8xf32>
    %209 = arith.mulf %207, %208 : vector<8x8xf32>
    %210 = vector.broadcast %189 : vector<1x8xf32> to vector<8x8xf32>
    %211 = arith.addf %209, %210 : vector<8x8xf32>
    %c168 = arith.constant 168 : index
    %c0_61 = arith.constant 0 : index
    %212 = vector.load %arg2[%c168, %c0_61] : memref<656x64xf32, #tpu.memory_space<vmem>>, vector<8x16xf32>
    %cst_62 = arith.constant dense<0.000000e+00> : vector<8x16xf32>
    %213 = tpu.matmul %211, %212, %cst_62 {dimension_numbers = #tpu.dot_dimension_numbers<[1], [0], [0], [1], [0, 0, 1, 1], [], []>} : vector<8x8xf32>, vector<8x16xf32>, vector<8x16xf32> -> vector<8x16xf32>
    %c176 = arith.constant 176 : index
    %c0_63 = arith.constant 0 : index
    %214 = vector.load %arg2[%c176, %c0_63] : memref<656x64xf32, #tpu.memory_space<vmem>>, vector<1x16xf32>
    %215 = vector.broadcast %214 : vector<1x16xf32> to vector<8x16xf32>
    %216 = arith.addf %213, %215 : vector<8x16xf32>
    %cst_64 = arith.constant 0.000000e+00 : f32
    %217 = vector.broadcast %cst_64 : f32 to vector<8x16xf32>
    %218 = arith.maximumf %216, %217 : vector<8x16xf32>
    %c184 = arith.constant 184 : index
    %c0_65 = arith.constant 0 : index
    %219 = vector.load %arg2[%c184, %c0_65] : memref<656x64xf32, #tpu.memory_space<vmem>>, vector<16x8xf32>
    %cst_66 = arith.constant dense<0.000000e+00> : vector<8x8xf32>
    %220 = tpu.matmul %218, %219, %cst_66 {dimension_numbers = #tpu.dot_dimension_numbers<[1], [0], [0], [1], [0, 0, 1, 1], [], []>} : vector<8x16xf32>, vector<16x8xf32>, vector<8x8xf32> -> vector<8x8xf32>
    %c200 = arith.constant 200 : index
    %c0_67 = arith.constant 0 : index
    %221 = vector.load %arg2[%c200, %c0_67] : memref<656x64xf32, #tpu.memory_space<vmem>>, vector<1x8xf32>
    %222 = vector.broadcast %221 : vector<1x8xf32> to vector<8x8xf32>
    %223 = arith.addf %220, %222 : vector<8x8xf32>
    %224 = arith.addf %211, %223 : vector<8x8xf32>
    %c208 = arith.constant 208 : index
    %c0_68 = arith.constant 0 : index
    %225 = vector.load %arg2[%c208, %c0_68] : memref<656x64xf32, #tpu.memory_space<vmem>>, vector<1x8xf32>
    %c216 = arith.constant 216 : index
    %c0_69 = arith.constant 0 : index
    %226 = vector.load %arg2[%c216, %c0_69] : memref<656x64xf32, #tpu.memory_space<vmem>>, vector<1x8xf32>
    %cst_70 = arith.constant dense<0.000000e+00> : vector<8xf32>
    %227 = vector.multi_reduction <add>, %224, %cst_70 [1] : vector<8x8xf32> to vector<8xf32>
    %228 = vector.shape_cast %227 : vector<8xf32> to vector<8x1xf32>
    %cst_71 = arith.constant 8.000000e+00 : f32
    %229 = vector.broadcast %cst_71 : f32 to vector<8x1xf32>
    %230 = arith.divf %228, %229 : vector<8x1xf32>
    %231 = vector.broadcast %230 : vector<8x1xf32> to vector<8x8xf32>
    %232 = arith.subf %224, %231 : vector<8x8xf32>
    %233 = arith.mulf %232, %232 : vector<8x8xf32>
    %cst_72 = arith.constant dense<0.000000e+00> : vector<8xf32>
    %234 = vector.multi_reduction <add>, %233, %cst_72 [1] : vector<8x8xf32> to vector<8xf32>
    %235 = vector.shape_cast %234 : vector<8xf32> to vector<8x1xf32>
    %cst_73 = arith.constant 8.000000e+00 : f32
    %236 = vector.broadcast %cst_73 : f32 to vector<8x1xf32>
    %237 = arith.divf %235, %236 : vector<8x1xf32>
    %238 = vector.broadcast %230 : vector<8x1xf32> to vector<8x8xf32>
    %239 = arith.subf %224, %238 : vector<8x8xf32>
    %cst_74 = arith.constant 9.99999974E-6 : f32
    %240 = vector.broadcast %cst_74 : f32 to vector<8x1xf32>
    %241 = arith.addf %237, %240 : vector<8x1xf32>
    %242 = math.rsqrt %241 : vector<8x1xf32>
    %243 = vector.broadcast %242 : vector<8x1xf32> to vector<8x8xf32>
    %244 = arith.mulf %239, %243 : vector<8x8xf32>
    %245 = vector.broadcast %225 : vector<1x8xf32> to vector<8x8xf32>
    %246 = arith.mulf %244, %245 : vector<8x8xf32>
    %247 = vector.broadcast %226 : vector<1x8xf32> to vector<8x8xf32>
    %248 = arith.addf %246, %247 : vector<8x8xf32>
    %c344 = arith.constant 344 : index
    %c0_75 = arith.constant 0 : index
    %249 = vector.load %arg2[%c344, %c0_75] : memref<656x64xf32, #tpu.memory_space<vmem>>, vector<8x8xf32>
    %cst_76 = arith.constant dense<0.000000e+00> : vector<8x8xf32>
    %250 = tpu.matmul %248, %249, %cst_76 {dimension_numbers = #tpu.dot_dimension_numbers<[1], [0], [0], [1], [0, 0, 1, 1], [], []>} : vector<8x8xf32>, vector<8x8xf32>, vector<8x8xf32> -> vector<8x8xf32>
    %c352 = arith.constant 352 : index
    %c0_77 = arith.constant 0 : index
    %251 = vector.load %arg2[%c352, %c0_77] : memref<656x64xf32, #tpu.memory_space<vmem>>, vector<1x8xf32>
    %252 = vector.broadcast %251 : vector<1x8xf32> to vector<8x8xf32>
    %253 = arith.addf %250, %252 : vector<8x8xf32>
    %254 = arith.negf %253 : vector<8x8xf32>
    %255 = math.exp %254 : vector<8x8xf32>
    %cst_78 = arith.constant 1.000000e+00 : f32
    %256 = vector.broadcast %cst_78 : f32 to vector<8x8xf32>
    %257 = arith.addf %256, %255 : vector<8x8xf32>
    %258 = arith.divf %256, %257 : vector<8x8xf32>
    %c520 = arith.constant 520 : index
    %c0_79 = arith.constant 0 : index
    %259 = vector.load %arg2[%c520, %c0_79] : memref<656x64xf32, #tpu.memory_space<vmem>>, vector<128x8xf32>
    %cst_80 = arith.constant dense<0.000000e+00> : vector<128x8xf32>
    %260 = tpu.matmul %259, %258, %cst_80 {dimension_numbers = #tpu.dot_dimension_numbers<[1], [0], [0], [1], [0, 0, 1, 1], [], []>} : vector<128x8xf32>, vector<8x8xf32>, vector<128x8xf32> -> vector<128x8xf32>
    %261 = arith.subf %260, %6 : vector<128x8xf32>
    %262 = arith.mulf %261, %261 : vector<128x8xf32>
    %263 = vector.broadcast %1 : vector<1x8xf32> to vector<128x8xf32>
    %264 = arith.mulf %262, %263 : vector<128x8xf32>
    %265 = vector.broadcast %0 : vector<1x8xf32> to vector<128x8xf32>
    %266 = arith.mulf %6, %265 : vector<128x8xf32>
    %267 = arith.addf %266, %264 : vector<128x8xf32>
    %cst_81 = arith.constant 2.82842708 : f32
    %268 = vector.broadcast %cst_81 : f32 to vector<128x8xf32>
    %269 = arith.mulf %267, %268 : vector<128x8xf32>
    %c360_82 = arith.constant 360 : index
    %c0_83 = arith.constant 0 : index
    %270 = vector.load %arg2[%c360_82, %c0_83] : memref<656x64xf32, #tpu.memory_space<vmem>>, vector<128x8xf32>
    %271 = arith.addf %269, %270 : vector<128x8xf32>
    %c0_84 = arith.constant 0 : index
    %c0_85 = arith.constant 0 : index
    %272 = vector.load %arg2[%c0_84, %c0_85] : memref<656x64xf32, #tpu.memory_space<vmem>>, vector<8x24xf32>
    %cst_86 = arith.constant dense<0.000000e+00> : vector<128x24xf32>
    %273 = tpu.matmul %271, %272, %cst_86 {dimension_numbers = #tpu.dot_dimension_numbers<[1], [0], [0], [1], [0, 0, 1, 1], [], []>} : vector<128x8xf32>, vector<8x24xf32>, vector<128x24xf32> -> vector<128x24xf32>
    %c8_87 = arith.constant 8 : index
    %c0_88 = arith.constant 0 : index
    %274 = vector.load %arg2[%c8_87, %c0_88] : memref<656x64xf32, #tpu.memory_space<vmem>>, vector<1x24xf32>
    %275 = vector.broadcast %274 : vector<1x24xf32> to vector<128x24xf32>
    %276 = arith.addf %273, %275 : vector<128x24xf32>
    %277 = vector.extract_strided_slice %276 {offsets = [0, 0], sizes = [128, 8], strides = [1, 1]} : vector<128x24xf32> to vector<128x8xf32>
    %278 = vector.shape_cast %277 : vector<128x8xf32> to vector<8x16x8xf32>
    %279 = vector.extract_strided_slice %276 {offsets = [0, 8], sizes = [128, 8], strides = [1, 1]} : vector<128x24xf32> to vector<128x8xf32>
    %280 = vector.shape_cast %279 : vector<128x8xf32> to vector<8x16x8xf32>
    %281 = vector.extract_strided_slice %276 {offsets = [0, 16], sizes = [128, 8], strides = [1, 1]} : vector<128x24xf32> to vector<128x8xf32>
    %282 = vector.shape_cast %281 : vector<128x8xf32> to vector<8x16x8xf32>
    %283 = vector.shape_cast %4 : vector<1x8xf32> to vector<1x1x8xf32>
    %284 = vector.broadcast %283 : vector<1x1x8xf32> to vector<8x16x8xf32>
    %285 = arith.mulf %278, %284 : vector<8x16x8xf32>
    %286 = vector.shape_cast %5 : vector<1x8xf32> to vector<1x1x8xf32>
    %287 = vector.broadcast %286 : vector<1x1x8xf32> to vector<8x16x8xf32>
    %288 = arith.mulf %278, %287 : vector<8x16x8xf32>
    %289 = tpu.concatenate %285, %288 in 0 : vector<8x16x8xf32>, vector<8x16x8xf32> -> vector<16x16x8xf32>
    %290 = tpu.concatenate %280, %280 in 0 : vector<8x16x8xf32>, vector<8x16x8xf32> -> vector<16x16x8xf32>
    %291 = vector.shape_cast %4 : vector<1x8xf32> to vector<1x1x8xf32>
    %292 = vector.broadcast %291 : vector<1x1x8xf32> to vector<8x16x8xf32>
    %293 = arith.mulf %282, %292 : vector<8x16x8xf32>
    %294 = vector.shape_cast %5 : vector<1x8xf32> to vector<1x1x8xf32>
    %295 = vector.broadcast %294 : vector<1x1x8xf32> to vector<8x16x8xf32>
    %296 = arith.mulf %282, %295 : vector<8x16x8xf32>
    %297 = tpu.concatenate %293, %296 in 0 : vector<8x16x8xf32>, vector<8x16x8xf32> -> vector<16x16x8xf32>
    "tpu.trace_start"() <{level = 10 : i32, message = "gqd,gkd->gqk"}> : () -> ()
    %cst_89 = arith.constant dense<0.000000e+00> : vector<16x16x16xf32>
    %298 = tpu.matmul %289, %290, %cst_89 {dimension_numbers = #tpu.dot_dimension_numbers<[2], [2], [1], [1], [0, 0, 0, 1, 1, 1], [0], [0]>} : vector<16x16x8xf32>, vector<16x16x8xf32>, vector<16x16x16xf32> -> vector<16x16x16xf32>
    "tpu.trace_stop"() : () -> ()
    %cst_90 = arith.constant 5.000000e-01 : f32
    %299 = vector.broadcast %cst_90 : f32 to vector<16x16x16xf32>
    %300 = arith.mulf %298, %299 : vector<16x16x16xf32>
    %301 = vector.shape_cast %2 : vector<1x16xf32> to vector<1x1x16xf32>
    %302 = vector.broadcast %301 : vector<1x1x16xf32> to vector<16x16x16xf32>
    %303 = arith.addf %300, %302 : vector<16x16x16xf32>
    %cst_91 = arith.constant dense<0xFF800000> : vector<16x16xf32>
    %304 = vector.multi_reduction <maximumf>, %303, %cst_91 [2] : vector<16x16x16xf32> to vector<16x16xf32>
    %305 = vector.shape_cast %304 : vector<16x16xf32> to vector<16x16x1xf32>
    %306 = vector.broadcast %305 : vector<16x16x1xf32> to vector<16x16x16xf32>
    %307 = arith.subf %303, %306 : vector<16x16x16xf32>
    %308 = math.exp %307 : vector<16x16x16xf32>
    %cst_92 = arith.constant dense<0.000000e+00> : vector<16x16xf32>
    %309 = vector.multi_reduction <add>, %308, %cst_92 [2] : vector<16x16x16xf32> to vector<16x16xf32>
    %310 = vector.shape_cast %309 : vector<16x16xf32> to vector<16x16x1xf32>
    %311 = tpu.reciprocal %310 {approx = true} : vector<16x16x1xf32> -> vector<16x16x1xf32>
    %312 = vector.broadcast %311 : vector<16x16x1xf32> to vector<16x16x16xf32>
    %313 = arith.mulf %308, %312 : vector<16x16x16xf32>
    "tpu.trace_start"() <{level = 10 : i32, message = "gqk,gkd->gqd"}> : () -> ()
    %cst_93 = arith.constant dense<0.000000e+00> : vector<16x16x8xf32>
    %314 = tpu.matmul %313, %297, %cst_93 {dimension_numbers = #tpu.dot_dimension_numbers<[2], [1], [1], [2], [0, 0, 0, 1, 1, 2], [0], [0]>} : vector<16x16x16xf32>, vector<16x16x8xf32>, vector<16x16x8xf32> -> vector<16x16x8xf32>
    "tpu.trace_stop"() : () -> ()
    %315 = vector.extract_strided_slice %314 {offsets = [0, 0, 0], sizes = [8, 16, 8], strides = [1, 1, 1]} : vector<16x16x8xf32> to vector<8x16x8xf32>
    %316 = vector.extract_strided_slice %314 {offsets = [8, 0, 0], sizes = [8, 16, 8], strides = [1, 1, 1]} : vector<16x16x8xf32> to vector<8x16x8xf32>
    %317 = arith.addf %315, %316 : vector<8x16x8xf32>
    %318 = vector.shape_cast %317 : vector<8x16x8xf32> to vector<128x8xf32>
    %c16_94 = arith.constant 16 : index
    %c0_95 = arith.constant 0 : index
    %319 = vector.load %arg2[%c16_94, %c0_95] : memref<656x64xf32, #tpu.memory_space<vmem>>, vector<8x8xf32>
    %cst_96 = arith.constant dense<0.000000e+00> : vector<128x8xf32>
    %320 = tpu.matmul %318, %319, %cst_96 {dimension_numbers = #tpu.dot_dimension_numbers<[1], [0], [0], [1], [0, 0, 1, 1], [], []>} : vector<128x8xf32>, vector<8x8xf32>, vector<128x8xf32> -> vector<128x8xf32>
    %c24_97 = arith.constant 24 : index
    %c0_98 = arith.constant 0 : index
    %321 = vector.load %arg2[%c24_97, %c0_98] : memref<656x64xf32, #tpu.memory_space<vmem>>, vector<1x8xf32>
    %322 = vector.broadcast %321 : vector<1x8xf32> to vector<128x8xf32>
    %323 = arith.addf %320, %322 : vector<128x8xf32>
    %324 = arith.addf %271, %323 : vector<128x8xf32>
    %c32_99 = arith.constant 32 : index
    %c0_100 = arith.constant 0 : index
    %325 = vector.load %arg2[%c32_99, %c0_100] : memref<656x64xf32, #tpu.memory_space<vmem>>, vector<1x8xf32>
    %c40_101 = arith.constant 40 : index
    %c0_102 = arith.constant 0 : index
    %326 = vector.load %arg2[%c40_101, %c0_102] : memref<656x64xf32, #tpu.memory_space<vmem>>, vector<1x8xf32>
    %cst_103 = arith.constant dense<0.000000e+00> : vector<128xf32>
    %327 = vector.multi_reduction <add>, %324, %cst_103 [1] : vector<128x8xf32> to vector<128xf32>
    %328 = vector.shape_cast %327 : vector<128xf32> to vector<128x1xf32>
    %cst_104 = arith.constant 8.000000e+00 : f32
    %329 = vector.broadcast %cst_104 : f32 to vector<128x1xf32>
    %330 = arith.divf %328, %329 : vector<128x1xf32>
    %331 = vector.broadcast %330 : vector<128x1xf32> to vector<128x8xf32>
    %332 = arith.subf %324, %331 : vector<128x8xf32>
    %333 = arith.mulf %332, %332 : vector<128x8xf32>
    %cst_105 = arith.constant dense<0.000000e+00> : vector<128xf32>
    %334 = vector.multi_reduction <add>, %333, %cst_105 [1] : vector<128x8xf32> to vector<128xf32>
    %335 = vector.shape_cast %334 : vector<128xf32> to vector<128x1xf32>
    %cst_106 = arith.constant 8.000000e+00 : f32
    %336 = vector.broadcast %cst_106 : f32 to vector<128x1xf32>
    %337 = arith.divf %335, %336 : vector<128x1xf32>
    %338 = vector.broadcast %330 : vector<128x1xf32> to vector<128x8xf32>
    %339 = arith.subf %324, %338 : vector<128x8xf32>
    %cst_107 = arith.constant 9.99999974E-6 : f32
    %340 = vector.broadcast %cst_107 : f32 to vector<128x1xf32>
    %341 = arith.addf %337, %340 : vector<128x1xf32>
    %342 = math.rsqrt %341 : vector<128x1xf32>
    %343 = vector.broadcast %342 : vector<128x1xf32> to vector<128x8xf32>
    %344 = arith.mulf %339, %343 : vector<128x8xf32>
    %345 = vector.broadcast %325 : vector<1x8xf32> to vector<128x8xf32>
    %346 = arith.mulf %344, %345 : vector<128x8xf32>
    %347 = vector.broadcast %326 : vector<1x8xf32> to vector<128x8xf32>
    %348 = arith.addf %346, %347 : vector<128x8xf32>
    %c48_108 = arith.constant 48 : index
    %c0_109 = arith.constant 0 : index
    %349 = vector.load %arg2[%c48_108, %c0_109] : memref<656x64xf32, #tpu.memory_space<vmem>>, vector<8x16xf32>
    %cst_110 = arith.constant dense<0.000000e+00> : vector<128x16xf32>
    %350 = tpu.matmul %348, %349, %cst_110 {dimension_numbers = #tpu.dot_dimension_numbers<[1], [0], [0], [1], [0, 0, 1, 1], [], []>} : vector<128x8xf32>, vector<8x16xf32>, vector<128x16xf32> -> vector<128x16xf32>
    %c56_111 = arith.constant 56 : index
    %c0_112 = arith.constant 0 : index
    %351 = vector.load %arg2[%c56_111, %c0_112] : memref<656x64xf32, #tpu.memory_space<vmem>>, vector<1x16xf32>
    %352 = vector.broadcast %351 : vector<1x16xf32> to vector<128x16xf32>
    %353 = arith.addf %350, %352 : vector<128x16xf32>
    %cst_113 = arith.constant 0.000000e+00 : f32
    %354 = vector.broadcast %cst_113 : f32 to vector<128x16xf32>
    %355 = arith.maximumf %353, %354 : vector<128x16xf32>
    %c64_114 = arith.constant 64 : index
    %c0_115 = arith.constant 0 : index
    %356 = vector.load %arg2[%c64_114, %c0_115] : memref<656x64xf32, #tpu.memory_space<vmem>>, vector<16x8xf32>
    %cst_116 = arith.constant dense<0.000000e+00> : vector<128x8xf32>
    %357 = tpu.matmul %355, %356, %cst_116 {dimension_numbers = #tpu.dot_dimension_numbers<[1], [0], [0], [1], [0, 0, 1, 1], [], []>} : vector<128x16xf32>, vector<16x8xf32>, vector<128x8xf32> -> vector<128x8xf32>
    %c80_117 = arith.constant 80 : index
    %c0_118 = arith.constant 0 : index
    %358 = vector.load %arg2[%c80_117, %c0_118] : memref<656x64xf32, #tpu.memory_space<vmem>>, vector<1x8xf32>
    %359 = vector.broadcast %358 : vector<1x8xf32> to vector<128x8xf32>
    %360 = arith.addf %357, %359 : vector<128x8xf32>
    %361 = arith.addf %348, %360 : vector<128x8xf32>
    %c88_119 = arith.constant 88 : index
    %c0_120 = arith.constant 0 : index
    %362 = vector.load %arg2[%c88_119, %c0_120] : memref<656x64xf32, #tpu.memory_space<vmem>>, vector<1x8xf32>
    %c96_121 = arith.constant 96 : index
    %c0_122 = arith.constant 0 : index
    %363 = vector.load %arg2[%c96_121, %c0_122] : memref<656x64xf32, #tpu.memory_space<vmem>>, vector<1x8xf32>
    %cst_123 = arith.constant dense<0.000000e+00> : vector<128xf32>
    %364 = vector.multi_reduction <add>, %361, %cst_123 [1] : vector<128x8xf32> to vector<128xf32>
    %365 = vector.shape_cast %364 : vector<128xf32> to vector<128x1xf32>
    %cst_124 = arith.constant 8.000000e+00 : f32
    %366 = vector.broadcast %cst_124 : f32 to vector<128x1xf32>
    %367 = arith.divf %365, %366 : vector<128x1xf32>
    %368 = vector.broadcast %367 : vector<128x1xf32> to vector<128x8xf32>
    %369 = arith.subf %361, %368 : vector<128x8xf32>
    %370 = arith.mulf %369, %369 : vector<128x8xf32>
    %cst_125 = arith.constant dense<0.000000e+00> : vector<128xf32>
    %371 = vector.multi_reduction <add>, %370, %cst_125 [1] : vector<128x8xf32> to vector<128xf32>
    %372 = vector.shape_cast %371 : vector<128xf32> to vector<128x1xf32>
    %cst_126 = arith.constant 8.000000e+00 : f32
    %373 = vector.broadcast %cst_126 : f32 to vector<128x1xf32>
    %374 = arith.divf %372, %373 : vector<128x1xf32>
    %375 = vector.broadcast %367 : vector<128x1xf32> to vector<128x8xf32>
    %376 = arith.subf %361, %375 : vector<128x8xf32>
    %cst_127 = arith.constant 9.99999974E-6 : f32
    %377 = vector.broadcast %cst_127 : f32 to vector<128x1xf32>
    %378 = arith.addf %374, %377 : vector<128x1xf32>
    %379 = math.rsqrt %378 : vector<128x1xf32>
    %380 = vector.broadcast %379 : vector<128x1xf32> to vector<128x8xf32>
    %381 = arith.mulf %376, %380 : vector<128x8xf32>
    %382 = vector.broadcast %362 : vector<1x8xf32> to vector<128x8xf32>
    %383 = arith.mulf %381, %382 : vector<128x8xf32>
    %384 = vector.broadcast %363 : vector<1x8xf32> to vector<128x8xf32>
    %385 = arith.addf %383, %384 : vector<128x8xf32>
    %c224 = arith.constant 224 : index
    %c0_128 = arith.constant 0 : index
    %386 = vector.load %arg2[%c224, %c0_128] : memref<656x64xf32, #tpu.memory_space<vmem>>, vector<1x8xf32>
    %c232 = arith.constant 232 : index
    %c0_129 = arith.constant 0 : index
    %387 = vector.load %arg2[%c232, %c0_129] : memref<656x64xf32, #tpu.memory_space<vmem>>, vector<1x8xf32>
    %c240 = arith.constant 240 : index
    %c0_130 = arith.constant 0 : index
    %388 = vector.load %arg2[%c240, %c0_130] : memref<656x64xf32, #tpu.memory_space<vmem>>, vector<8x16xf32>
    %cst_131 = arith.constant dense<0.000000e+00> : vector<128x16xf32>
    %389 = tpu.matmul %385, %388, %cst_131 {dimension_numbers = #tpu.dot_dimension_numbers<[1], [0], [0], [1], [0, 0, 1, 1], [], []>} : vector<128x8xf32>, vector<8x16xf32>, vector<128x16xf32> -> vector<128x16xf32>
    %c248 = arith.constant 248 : index
    %c0_132 = arith.constant 0 : index
    %390 = vector.load %arg2[%c248, %c0_132] : memref<656x64xf32, #tpu.memory_space<vmem>>, vector<1x16xf32>
    %391 = vector.broadcast %390 : vector<1x16xf32> to vector<128x16xf32>
    %392 = arith.addf %389, %391 : vector<128x16xf32>
    %393 = vector.extract_strided_slice %392 {offsets = [0, 0], sizes = [128, 8], strides = [1, 1]} : vector<128x16xf32> to vector<128x8xf32>
    %394 = vector.shape_cast %393 : vector<128x8xf32> to vector<8x16x8xf32>
    %395 = vector.extract_strided_slice %392 {offsets = [0, 8], sizes = [128, 8], strides = [1, 1]} : vector<128x16xf32> to vector<128x8xf32>
    %396 = vector.shape_cast %395 : vector<128x8xf32> to vector<8x16x8xf32>
    %397 = vector.shape_cast %387 : vector<1x8xf32> to vector<1x8xf32>
    %398 = vector.broadcast %397 : vector<1x8xf32> to vector<8x8xf32>
    %399 = vector.shape_cast %398 : vector<8x8xf32> to vector<1x8x8xf32>
    %400 = vector.shape_cast %399 : vector<1x8x8xf32> to vector<1x8x8xf32>
    %401 = vector.broadcast %400 : vector<1x8x8xf32> to vector<8x8x8xf32>
    %402 = vector.shape_cast %4 : vector<1x8xf32> to vector<1x1x8xf32>
    %403 = vector.broadcast %402 : vector<1x1x8xf32> to vector<8x8x8xf32>
    %404 = arith.mulf %401, %403 : vector<8x8x8xf32>
    %405 = vector.shape_cast %5 : vector<1x8xf32> to vector<1x1x8xf32>
    %406 = vector.broadcast %405 : vector<1x1x8xf32> to vector<8x8x8xf32>
    %407 = arith.mulf %401, %406 : vector<8x8x8xf32>
    %408 = tpu.concatenate %404, %407 in 0 : vector<8x8x8xf32>, vector<8x8x8xf32> -> vector<16x8x8xf32>
    %409 = tpu.concatenate %394, %394 in 0 : vector<8x16x8xf32>, vector<8x16x8xf32> -> vector<16x16x8xf32>
    %410 = vector.shape_cast %4 : vector<1x8xf32> to vector<1x1x8xf32>
    %411 = vector.broadcast %410 : vector<1x1x8xf32> to vector<8x16x8xf32>
    %412 = arith.mulf %396, %411 : vector<8x16x8xf32>
    %413 = vector.shape_cast %5 : vector<1x8xf32> to vector<1x1x8xf32>
    %414 = vector.broadcast %413 : vector<1x1x8xf32> to vector<8x16x8xf32>
    %415 = arith.mulf %396, %414 : vector<8x16x8xf32>
    %416 = tpu.concatenate %412, %415 in 0 : vector<8x16x8xf32>, vector<8x16x8xf32> -> vector<16x16x8xf32>
    "tpu.trace_start"() <{level = 10 : i32, message = "gqd,gkd->gqk"}> : () -> ()
    %cst_133 = arith.constant dense<0.000000e+00> : vector<16x8x16xf32>
    %417 = tpu.matmul %408, %409, %cst_133 {dimension_numbers = #tpu.dot_dimension_numbers<[2], [2], [1], [1], [0, 0, 0, 1, 1, 1], [0], [0]>} : vector<16x8x8xf32>, vector<16x16x8xf32>, vector<16x8x16xf32> -> vector<16x8x16xf32>
    "tpu.trace_stop"() : () -> ()
    %cst_134 = arith.constant 5.000000e-01 : f32
    %418 = vector.broadcast %cst_134 : f32 to vector<16x8x16xf32>
    %419 = arith.mulf %417, %418 : vector<16x8x16xf32>
    %420 = vector.shape_cast %2 : vector<1x16xf32> to vector<1x1x16xf32>
    %421 = vector.broadcast %420 : vector<1x1x16xf32> to vector<16x8x16xf32>
    %422 = arith.addf %419, %421 : vector<16x8x16xf32>
    %cst_135 = arith.constant dense<0xFF800000> : vector<16x8xf32>
    %423 = vector.multi_reduction <maximumf>, %422, %cst_135 [2] : vector<16x8x16xf32> to vector<16x8xf32>
    %424 = vector.shape_cast %423 : vector<16x8xf32> to vector<16x8x1xf32>
    %425 = vector.broadcast %424 : vector<16x8x1xf32> to vector<16x8x16xf32>
    %426 = arith.subf %422, %425 : vector<16x8x16xf32>
    %427 = math.exp %426 : vector<16x8x16xf32>
    %cst_136 = arith.constant dense<0.000000e+00> : vector<16x8xf32>
    %428 = vector.multi_reduction <add>, %427, %cst_136 [2] : vector<16x8x16xf32> to vector<16x8xf32>
    %429 = vector.shape_cast %428 : vector<16x8xf32> to vector<16x8x1xf32>
    %430 = tpu.reciprocal %429 {approx = true} : vector<16x8x1xf32> -> vector<16x8x1xf32>
    %431 = vector.broadcast %430 : vector<16x8x1xf32> to vector<16x8x16xf32>
    %432 = arith.mulf %427, %431 : vector<16x8x16xf32>
    "tpu.trace_start"() <{level = 10 : i32, message = "gqk,gkd->gqd"}> : () -> ()
    %cst_137 = arith.constant dense<0.000000e+00> : vector<16x8x8xf32>
    %433 = tpu.matmul %432, %416, %cst_137 {dimension_numbers = #tpu.dot_dimension_numbers<[2], [1], [1], [2], [0, 0, 0, 1, 1, 2], [0], [0]>} : vector<16x8x16xf32>, vector<16x16x8xf32>, vector<16x8x8xf32> -> vector<16x8x8xf32>
    "tpu.trace_stop"() : () -> ()
    %434 = vector.extract_strided_slice %433 {offsets = [0, 0, 0], sizes = [8, 8, 8], strides = [1, 1, 1]} : vector<16x8x8xf32> to vector<8x8x8xf32>
    %435 = vector.extract_strided_slice %433 {offsets = [8, 0, 0], sizes = [8, 8, 8], strides = [1, 1, 1]} : vector<16x8x8xf32> to vector<8x8x8xf32>
    %436 = arith.addf %434, %435 : vector<8x8x8xf32>
    %c648_138 = arith.constant 648 : index
    %c0_139 = arith.constant 0 : index
    %437 = vector.load %arg2[%c648_138, %c0_139] : memref<656x64xf32, #tpu.memory_space<vmem>>, vector<8x64xf32>
    %438 = vector.shape_cast %436 : vector<8x8x8xf32> to vector<64x8xf32>
    %cst_140 = arith.constant dense<0.000000e+00> : vector<8x8xf32>
    %439 = tpu.matmul %437, %438, %cst_140 {dimension_numbers = #tpu.dot_dimension_numbers<[1], [0], [0], [1], [0, 0, 1, 1], [], []>} : vector<8x64xf32>, vector<64x8xf32>, vector<8x8xf32> -> vector<8x8xf32>
    %c256 = arith.constant 256 : index
    %c0_141 = arith.constant 0 : index
    %440 = vector.load %arg2[%c256, %c0_141] : memref<656x64xf32, #tpu.memory_space<vmem>>, vector<8x8xf32>
    %cst_142 = arith.constant dense<0.000000e+00> : vector<8x8xf32>
    %441 = tpu.matmul %439, %440, %cst_142 {dimension_numbers = #tpu.dot_dimension_numbers<[1], [0], [0], [1], [0, 0, 1, 1], [], []>} : vector<8x8xf32>, vector<8x8xf32>, vector<8x8xf32> -> vector<8x8xf32>
    %c264 = arith.constant 264 : index
    %c0_143 = arith.constant 0 : index
    %442 = vector.load %arg2[%c264, %c0_143] : memref<656x64xf32, #tpu.memory_space<vmem>>, vector<1x8xf32>
    %443 = vector.broadcast %442 : vector<1x8xf32> to vector<8x8xf32>
    %444 = arith.addf %441, %443 : vector<8x8xf32>
    %445 = vector.broadcast %386 : vector<1x8xf32> to vector<8x8xf32>
    %446 = arith.addf %445, %444 : vector<8x8xf32>
    %c272 = arith.constant 272 : index
    %c0_144 = arith.constant 0 : index
    %447 = vector.load %arg2[%c272, %c0_144] : memref<656x64xf32, #tpu.memory_space<vmem>>, vector<1x8xf32>
    %c280 = arith.constant 280 : index
    %c0_145 = arith.constant 0 : index
    %448 = vector.load %arg2[%c280, %c0_145] : memref<656x64xf32, #tpu.memory_space<vmem>>, vector<1x8xf32>
    %cst_146 = arith.constant dense<0.000000e+00> : vector<8xf32>
    %449 = vector.multi_reduction <add>, %446, %cst_146 [1] : vector<8x8xf32> to vector<8xf32>
    %450 = vector.shape_cast %449 : vector<8xf32> to vector<8x1xf32>
    %cst_147 = arith.constant 8.000000e+00 : f32
    %451 = vector.broadcast %cst_147 : f32 to vector<8x1xf32>
    %452 = arith.divf %450, %451 : vector<8x1xf32>
    %453 = vector.broadcast %452 : vector<8x1xf32> to vector<8x8xf32>
    %454 = arith.subf %446, %453 : vector<8x8xf32>
    %455 = arith.mulf %454, %454 : vector<8x8xf32>
    %cst_148 = arith.constant dense<0.000000e+00> : vector<8xf32>
    %456 = vector.multi_reduction <add>, %455, %cst_148 [1] : vector<8x8xf32> to vector<8xf32>
    %457 = vector.shape_cast %456 : vector<8xf32> to vector<8x1xf32>
    %cst_149 = arith.constant 8.000000e+00 : f32
    %458 = vector.broadcast %cst_149 : f32 to vector<8x1xf32>
    %459 = arith.divf %457, %458 : vector<8x1xf32>
    %460 = vector.broadcast %452 : vector<8x1xf32> to vector<8x8xf32>
    %461 = arith.subf %446, %460 : vector<8x8xf32>
    %cst_150 = arith.constant 9.99999974E-6 : f32
    %462 = vector.broadcast %cst_150 : f32 to vector<8x1xf32>
    %463 = arith.addf %459, %462 : vector<8x1xf32>
    %464 = math.rsqrt %463 : vector<8x1xf32>
    %465 = vector.broadcast %464 : vector<8x1xf32> to vector<8x8xf32>
    %466 = arith.mulf %461, %465 : vector<8x8xf32>
    %467 = vector.broadcast %447 : vector<1x8xf32> to vector<8x8xf32>
    %468 = arith.mulf %466, %467 : vector<8x8xf32>
    %469 = vector.broadcast %448 : vector<1x8xf32> to vector<8x8xf32>
    %470 = arith.addf %468, %469 : vector<8x8xf32>
    %c288 = arith.constant 288 : index
    %c0_151 = arith.constant 0 : index
    %471 = vector.load %arg2[%c288, %c0_151] : memref<656x64xf32, #tpu.memory_space<vmem>>, vector<8x16xf32>
    %cst_152 = arith.constant dense<0.000000e+00> : vector<8x16xf32>
    %472 = tpu.matmul %470, %471, %cst_152 {dimension_numbers = #tpu.dot_dimension_numbers<[1], [0], [0], [1], [0, 0, 1, 1], [], []>} : vector<8x8xf32>, vector<8x16xf32>, vector<8x16xf32> -> vector<8x16xf32>
    %c296 = arith.constant 296 : index
    %c0_153 = arith.constant 0 : index
    %473 = vector.load %arg2[%c296, %c0_153] : memref<656x64xf32, #tpu.memory_space<vmem>>, vector<1x16xf32>
    %474 = vector.broadcast %473 : vector<1x16xf32> to vector<8x16xf32>
    %475 = arith.addf %472, %474 : vector<8x16xf32>
    %cst_154 = arith.constant 0.000000e+00 : f32
    %476 = vector.broadcast %cst_154 : f32 to vector<8x16xf32>
    %477 = arith.maximumf %475, %476 : vector<8x16xf32>
    %c304 = arith.constant 304 : index
    %c0_155 = arith.constant 0 : index
    %478 = vector.load %arg2[%c304, %c0_155] : memref<656x64xf32, #tpu.memory_space<vmem>>, vector<16x8xf32>
    %cst_156 = arith.constant dense<0.000000e+00> : vector<8x8xf32>
    %479 = tpu.matmul %477, %478, %cst_156 {dimension_numbers = #tpu.dot_dimension_numbers<[1], [0], [0], [1], [0, 0, 1, 1], [], []>} : vector<8x16xf32>, vector<16x8xf32>, vector<8x8xf32> -> vector<8x8xf32>
    %c320 = arith.constant 320 : index
    %c0_157 = arith.constant 0 : index
    %480 = vector.load %arg2[%c320, %c0_157] : memref<656x64xf32, #tpu.memory_space<vmem>>, vector<1x8xf32>
    %481 = vector.broadcast %480 : vector<1x8xf32> to vector<8x8xf32>
    %482 = arith.addf %479, %481 : vector<8x8xf32>
    %483 = arith.addf %470, %482 : vector<8x8xf32>
    %c328 = arith.constant 328 : index
    %c0_158 = arith.constant 0 : index
    %484 = vector.load %arg2[%c328, %c0_158] : memref<656x64xf32, #tpu.memory_space<vmem>>, vector<1x8xf32>
    %c336 = arith.constant 336 : index
    %c0_159 = arith.constant 0 : index
    %485 = vector.load %arg2[%c336, %c0_159] : memref<656x64xf32, #tpu.memory_space<vmem>>, vector<1x8xf32>
    %cst_160 = arith.constant dense<0.000000e+00> : vector<8xf32>
    %486 = vector.multi_reduction <add>, %483, %cst_160 [1] : vector<8x8xf32> to vector<8xf32>
    %487 = vector.shape_cast %486 : vector<8xf32> to vector<8x1xf32>
    %cst_161 = arith.constant 8.000000e+00 : f32
    %488 = vector.broadcast %cst_161 : f32 to vector<8x1xf32>
    %489 = arith.divf %487, %488 : vector<8x1xf32>
    %490 = vector.broadcast %489 : vector<8x1xf32> to vector<8x8xf32>
    %491 = arith.subf %483, %490 : vector<8x8xf32>
    %492 = arith.mulf %491, %491 : vector<8x8xf32>
    %cst_162 = arith.constant dense<0.000000e+00> : vector<8xf32>
    %493 = vector.multi_reduction <add>, %492, %cst_162 [1] : vector<8x8xf32> to vector<8xf32>
    %494 = vector.shape_cast %493 : vector<8xf32> to vector<8x1xf32>
    %cst_163 = arith.constant 8.000000e+00 : f32
    %495 = vector.broadcast %cst_163 : f32 to vector<8x1xf32>
    %496 = arith.divf %494, %495 : vector<8x1xf32>
    %497 = vector.broadcast %489 : vector<8x1xf32> to vector<8x8xf32>
    %498 = arith.subf %483, %497 : vector<8x8xf32>
    %cst_164 = arith.constant 9.99999974E-6 : f32
    %499 = vector.broadcast %cst_164 : f32 to vector<8x1xf32>
    %500 = arith.addf %496, %499 : vector<8x1xf32>
    %501 = math.rsqrt %500 : vector<8x1xf32>
    %502 = vector.broadcast %501 : vector<8x1xf32> to vector<8x8xf32>
    %503 = arith.mulf %498, %502 : vector<8x8xf32>
    %504 = vector.broadcast %484 : vector<1x8xf32> to vector<8x8xf32>
    %505 = arith.mulf %503, %504 : vector<8x8xf32>
    %506 = vector.broadcast %485 : vector<1x8xf32> to vector<8x8xf32>
    %507 = arith.addf %505, %506 : vector<8x8xf32>
    %c344_165 = arith.constant 344 : index
    %c0_166 = arith.constant 0 : index
    %508 = vector.load %arg2[%c344_165, %c0_166] : memref<656x64xf32, #tpu.memory_space<vmem>>, vector<8x8xf32>
    %cst_167 = arith.constant dense<0.000000e+00> : vector<8x8xf32>
    %509 = tpu.matmul %507, %508, %cst_167 {dimension_numbers = #tpu.dot_dimension_numbers<[1], [0], [0], [1], [0, 0, 1, 1], [], []>} : vector<8x8xf32>, vector<8x8xf32>, vector<8x8xf32> -> vector<8x8xf32>
    %c352_168 = arith.constant 352 : index
    %c0_169 = arith.constant 0 : index
    %510 = vector.load %arg2[%c352_168, %c0_169] : memref<656x64xf32, #tpu.memory_space<vmem>>, vector<1x8xf32>
    %511 = vector.broadcast %510 : vector<1x8xf32> to vector<8x8xf32>
    %512 = arith.addf %509, %511 : vector<8x8xf32>
    %513 = arith.negf %512 : vector<8x8xf32>
    %514 = math.exp %513 : vector<8x8xf32>
    %cst_170 = arith.constant 1.000000e+00 : f32
    %515 = vector.broadcast %cst_170 : f32 to vector<8x8xf32>
    %516 = arith.addf %515, %514 : vector<8x8xf32>
    %517 = arith.divf %515, %516 : vector<8x8xf32>
    %518 = vector.broadcast %0 : vector<1x8xf32> to vector<8x8xf32>
    %519 = arith.mulf %258, %518 : vector<8x8xf32>
    %520 = vector.broadcast %1 : vector<1x8xf32> to vector<8x8xf32>
    %521 = arith.mulf %517, %520 : vector<8x8xf32>
    %522 = arith.addf %519, %521 : vector<8x8xf32>
    %c0_171 = arith.constant 0 : index
    %c0_172 = arith.constant 0 : index
    %523 = vector.load %arg3[%c0_171, %c0_172] : memref<8x8xf32, #tpu.memory_space<vmem>>, vector<8x8xf32>
    tpu.vector_store %arg3[%c0_171, %c0_172], %522 {strides = array<i32>} : memref<8x8xf32, #tpu.memory_space<vmem>>, vector<8x8xf32>,
    return
  }
  func.func @transform_0(%arg0: i32) -> (i32, i32) {
    %c0_i32 = arith.constant 0 : i32
    %c0_i32_0 = arith.constant 0 : i32
    return %arg0, %c0_i32 : i32, i32
  }
  func.func @transform_1(%arg0: i32) -> (i32, i32) {
    %c0_i32 = arith.constant 0 : i32
    %c0_i32_0 = arith.constant 0 : i32
    %c0_i32_1 = arith.constant 0 : i32
    return %c0_i32, %c0_i32_0 : i32, i32
  }
  func.func @transform_2(%arg0: i32) -> (i32, i32) {
    %c0_i32 = arith.constant 0 : i32
    %c0_i32_0 = arith.constant 0 : i32
    return %arg0, %c0_i32 : i32, i32
  }
}

</mosaic_0001>

<bundles_post_ra>
// kernel: tpu_custom_call.1
= control target key start
LH: loop header
LB: loop body
LE: loop exit
PB: predicated region body
PF: predicated region fallthrough
CT: control target
= control target key end

     0   :  { %s19776_s9 = smov 0   ;;  %s24823_s0 = inlined_call_operand.vmem [shape: f32[256,8], index: 0, kind: input, shape index: {}]   ;;  %s24824_s1 = inlined_call_operand.vmem [shape: f32[656,64], index: 1, kind: input, shape index: {}]   ;;  %s24825_s2 = inlined_call_operand.vmem [shape: f32[16,8], index: 2, kind: output, shape index: {}]  }
   0x1 LB: > { %s19782_s10 = sadd.s32 4294967295, %s19753_s9   ;;  %p16688_p0 = scmp.ge.s32.totalorder %s19753_s9, 1  ;;  %s19753_s9 = sphi %s19776_s9, %s12_s9  }
   0x2   : > { %p113_p1 = scmp.lt.s32.totalorder %s19753_s9, 3 }
   0x4   : > { %p114_p2 = pnand %p16688_p0, %p113_p1 }
   0x6   : > { %117 = sbr.rel (%p114_p2) target bundleno = 10141 (0x279d), region = 28 }
   0xb   : > { %v232_v0 = vld [vmem:[%s24824_s1] sm:$0xff]  ;;  %s16689_s13 = sshll.u32 %s19782_s10, 4  ;;  %v19793_v1 = vld [vmem:[%s24824_s1 + $0x1f8] ss:$0 sm:$0xff]  ;;  %v200_v3 = vld [vmem:[%s24824_s1 + $0x168] sm:$0xff]  ;;  %vm238_vm0 = vcmask 64512  }
   0xc   : > { %17916 = vmatprep.subr.mxu0 %v232_v0  ;;  %p135_p3 = scmp.lt.s32.totalorder %s16689_s13, 31  ;;  %v201_v12 = vld [vmem:[%s24824_s1 + $0x170] sm:$0xff]  ;;  %v202_v13 = vld [vmem:[%s24824_s1 + $0x178] sm:$0xff]  ;;  %v203_v26 = vld [vmem:[%s24824_s1 + $0x180] sm:$0xff]  ;;  %s19755_s3 = smov 120   ;;  %vm1956_vm1 = vcmask 130048  }
   0xd   : > { %17917 = vmatpush3.msra.mxu0 %v232_v0  ;;  %v204_v29 = vld [vmem:[%s24824_s1 + $0x188] sm:$0xff]  ;;  %v205_v35 = vld [vmem:[%s24824_s1 + $0x190] sm:$0xff]  ;;  %v206_v39 = vld [vmem:[%s24824_s1 + $0x198] sm:$0xff]  ;;  %s19756_s4 = smov 16   ;;  %s19757_s5 = smov 112   ;;  %vm19760_vm2 = vmmov 0  }
   0xe   : > { %s25052_s13 = smov (!%p135_p3, %s16689_s13), 31  ;;  %v207_v45 = vld [vmem:[%s24824_s1 + $0x1a0] sm:$0xff]  ;;  %v208_v49 = vld [vmem:[%s24824_s1 + $0x1a8] sm:$0xff]  ;;  %v209_v55 = vld [vmem:[%s24824_s1 + $0x1b0] sm:$0xff]  ;;  %vm7828_vm3 = vcmask 523264   ;;  %p140_p4 = scmp.lt.s32.totalorder %s19782_s10, 1 }
   0xf   : > { %s16690_s14 = sshll.u32 %s25052_s13, 3  ;;  %v210_v59 = vld [vmem:[%s24824_s1 + $0x1b8] sm:$0xff] }
  0x10   : > { %s19798_s19 = scalar_lea.vmem %s24823_s0, %s16690_s14  ;;  %s25054_s10 = smov (!%p140_p4, %s19782_s10), 1 }
  0x11   : > { %v148_v2 = vld [vmem:[%s19798_s19] sm:$0xff]  ;;  %v149_v4 = vld [vmem:[%s19798_s19 + $0x8] sm:$0xff]  ;;  %v150_v5 = vld [vmem:[%s19798_s19 + $0x10] sm:$0xff]  ;;  %s16691_s11 = sshll.u32 %s25054_s10, 3 }
  0x12   : > { %v19807_v6 = vmul.f32 %v19793_v1, %v148_v2  ;;  %v19810_v7 = vmul.f32 %v19793_v1, %v149_v4  ;;  %v19813_v8 = vmul.f32 %v19793_v1, %v150_v5  ;;  %v151_v9 = vld [vmem:[%s19798_s19 + $0x18] sm:$0xff]  ;;  %v152_v10 = vld [vmem:[%s19798_s19 + $0x20] sm:$0xff]  ;;  %v153_v11 = vld [vmem:[%s19798_s19 + $0x28] sm:$0xff]  ;;  %s143_s17 = scalar_lea.vmem %s24825_s2, %s16691_s11 }
  0x13   : > { %v19825_v14 = vmul.f32 %v19793_v1, %v151_v9  ;;  %v19828_v15 = vmul.f32 %v19793_v1, %v152_v10  ;;  %v154_v16 = vld [vmem:[%s19798_s19 + $0x30] sm:$0xff]  ;;  %v19836_v21 = vmul.f32 %v19793_v1, %v153_v11  ;;  %v155_v28 = vld [vmem:[%s19798_s19 + $0x38] sm:$0xff]  ;;  %v156_v30 = vld [vmem:[%s19798_s19 + $0x40] sm:$0xff] }
  0x14   : > { %24906 = vst [vmem:[#allocation2_spill] sm:$0xff] %v19807_v6  ;;  %24907 = vst [vmem:[#allocation3_spill] sm:$0xff] %v19810_v7  ;;  %v184_v17 = vmul.f32 2.828427, %v19807_v6  ;;  %v185_v18 = vmul.f32 2.828427, %v19810_v7  ;;  %v19839_v22 = vmul.f32 %v19793_v1, %v154_v16  ;;  %v19864_v33 = vmul.f32 %v19793_v1, %v155_v28 }
  0x15   : > { %24908 = vst [vmem:[#allocation4_spill] sm:$0xff] %v19813_v8  ;;  %24909 = vst [vmem:[#allocation5_spill] sm:$0xff] %v19825_v14  ;;  %v186_v19 = vmul.f32 2.828427, %v19813_v8  ;;  %v187_v20 = vmul.f32 2.828427, %v19825_v14  ;;  %v19875_v37 = vmul.f32 %v19793_v1, %v156_v30  ;;  %v432_v28 = vlaneseq }
  0x16   : > { %24910 = vst [vmem:[#allocation6_spill] sm:$0xff] %v19828_v15  ;;  %24911 = vst [vmem:[#allocation7_spill] sm:$0xff] %v19836_v21  ;;  %v19841_v23 = vadd.f32 %v200_v3, %v184_v17  ;;  %v19843_v24 = vadd.f32 %v201_v12, %v185_v18  ;;  %v188_v27 = vmul.f32 2.828427, %v19828_v15  ;;  %v189_v32 = vmul.f32 2.828427, %v19836_v21 }
  0x17   : > { %24912 = vst [vmem:[#allocation8_spill] sm:$0xff] %v19839_v22  ;;  %v19845_v25 = vadd.f32 %v202_v13, %v186_v19  ;;  %v19860_v31 = vadd.f32 %v203_v26, %v187_v20  ;;  %24917 = vst [vmem:[#allocation13_spill] sm:$0xff] %v19864_v33  ;;  %v190_v36 = vmul.f32 2.828427, %v19839_v22  ;;  %v157_v38 = vld [vmem:[%s19798_s19 + $0x48] sm:$0xff]  ;;  %v158_v40 = vld [vmem:[%s19798_s19 + $0x50] sm:$0xff] }
  0x18   : > { %24913 = vst [vmem:[#allocation9_spill] sm:$0xff] %v19841_v23  ;;  %24914 = vst [vmem:[#allocation10_spill] sm:$0xff] %v19843_v24  ;;  %17918 = vmatprep.mubr.msk.f32.mxu0 %vm238_vm0, %v19841_v23  ;;  %v19868_v34 = vadd.f32 %v204_v29, %v188_v27  ;;  %v19884_v41 = vadd.f32 %v205_v35, %v189_v32  ;;  %v191_v42 = vmul.f32 2.828427, %v19864_v33  ;;  %v192_v46 = vmul.f32 2.828427, %v19875_v37 }
  0x19   : > { %24915 = vst [vmem:[#allocation11_spill] sm:$0xff] %v19845_v25  ;;  %17919 = vmatmul.mubr.msk.f32.vlgmr.msra.gmra.mxu0 %vm238_vm0, %v19843_v24  ;;  %24916 = vst [vmem:[#allocation12_spill] sm:$0xff] %v19860_v31  ;;  %v19888_v43 = vmul.f32 %v19793_v1, %v157_v38  ;;  %v19892_v44 = vadd.f32 %v206_v39, %v190_v36  ;;  %v19899_v47 = vmul.f32 %v19793_v1, %v158_v40  ;;  %v159_v48 = vld [vmem:[%s19798_s19 + $0x58] sm:$0xff]  ;;  %v160_v50 = vld [vmem:[%s19798_s19 + $0x60] sm:$0xff] }
  0x1a   : > { %17921 = vmatprep.mubr.msk.f32.mxu0 %vm238_vm0, %v19845_v25  ;;  %24918 = vst [vmem:[#allocation14_spill] sm:$0xff] %v19868_v34  ;;  %24919 = vst [vmem:[#allocation15_spill] sm:$0xff] %v19875_v37  ;;  %v19908_v51 = vadd.f32 %v207_v45, %v191_v42  ;;  %v19912_v53 = vmul.f32 %v19793_v1, %v159_v48  ;;  %v19916_v54 = vadd.f32 %v208_v49, %v192_v46  ;;  %v161_v58 = vld [vmem:[%s19798_s19 + $0x68] sm:$0xff]  ;;  %v162_v60 = vld [vmem:[%s19798_s19 + $0x70] sm:$0xff] }
  0x1b   : > { %24920 = vst [vmem:[#allocation16_spill] sm:$0xff] %v19884_v41  ;;  %24921 = vst [vmem:[#allocation17_spill] sm:$0xff] %v19888_v43  ;;  %v193_v52 = vmul.f32 2.828427, %v19888_v43  ;;  %v194_v56 = vmul.f32 2.828427, %v19899_v47  ;;  %v19923_v57 = vmul.f32 %v19793_v1, %v160_v50  ;;  %v19936_v63 = vmul.f32 %v19793_v1, %v161_v58 }
  0x1c   : > { %24922 = vst [vmem:[#allocation18_spill] sm:$0xff] %v19892_v44  ;;  %24923 = vst [vmem:[#allocation19_spill] sm:$0xff] %v19899_v47  ;;  %v195_v62 = vmul.f32 2.828427, %v19912_v53  ;;  %v211_v2 = vld [vmem:[%s24824_s1 + $0x1c0] sm:$0xff]  ;;  %v19947_v4 = vmul.f32 %v19793_v1, %v162_v60  ;;  %v163_v5 = vld [vmem:[%s19798_s19 + $0x78] sm:$0xff] }
  0x1d   : > { %17922 = vmatmul.mubr.msk.f32.gmra.mxu0 %vm238_vm0, %v19860_v31  ;;  %24924 = vst [vmem:[#allocation20_spill] sm:$0xff] %v19908_v51  ;;  %24925 = vst [vmem:[#allocation21_spill] sm:$0xff] %v19912_v53  ;;  %v19932_v61 = vadd.f32 %v209_v55, %v193_v52  ;;  %v19940_v0 = vadd.f32 %v210_v59, %v194_v56  ;;  %v196_v3 = vmul.f32 2.828427, %v19923_v57  ;;  %v212_v9 = vld [vmem:[%s24824_s1 + $0x1c8] sm:$0xff]  ;;  %v213_v16 = vld [vmem:[%s24824_s1 + $0x1d0] sm:$0xff] }
  0x1e   : > { %17924 = vmatprep.mubr.msk.f32.mxu0 %vm238_vm0, %v19868_v34  ;;  %24926 = vst [vmem:[#allocation22_spill] sm:$0xff] %v19916_v54  ;;  %24927 = vst [vmem:[#allocation23_spill] sm:$0xff] %v19923_v57  ;;  %v19955_v10 = vadd.f32 %v211_v2, %v195_v62  ;;  %v197_v11 = vmul.f32 2.828427, %v19936_v63  ;;  %v19959_v12 = vmul.f32 %v19793_v1, %v163_v5  ;;  %v198_v17 = vmul.f32 2.828427, %v19947_v4 }
  0x1f   : > { %24928 = vst [vmem:[#allocation24_spill] sm:$0xff] %v19932_v61  ;;  %24929 = vst [vmem:[#allocation25_spill] sm:$0xff] %v19936_v63  ;;  %v19963_v13 = vadd.f32 %v212_v9, %v196_v3  ;;  %v214_v18 = vld [vmem:[%s24824_s1 + $0x1d8] sm:$0xff]  ;;  %v215_v26 = vld [vmem:[%s24824_s1 + $0x1e0] sm:$0xff]  ;;  %v433_v29 = vshrl.u32 %v432_v28, 7 }
  0x20   : > { %24930 = vst [vmem:[#allocation26_spill] sm:$0xff] %v19940_v0  ;;  %24931 = vst [vmem:[#allocation27_spill] sm:$0xff] %v19947_v4  ;;  %v19974_v1 = vadd.f32 %v213_v16, %v197_v11  ;;  %v199_v19 = vmul.f32 2.828427, %v19959_v12  ;;  %v19979_v20 = vadd.f32 %v214_v18, %v198_v17  ;;  %v16693_v30 = vld [vmem:[%s24824_s1 + $0x8] ss:$0 sm:$0xff] }
  0x21   : > { %17925 = vmatmul.mubr.msk.f32.gmra.mxu0 %vm238_vm0, %v19884_v41  ;;  %24932 = vst [vmem:[#allocation28_spill] sm:$0xff] %v19955_v10  ;;  %24933 = vst [vmem:[#allocation29_spill] sm:$0xff] %v19959_v12  ;;  %v434_v32 = vsub.s32 0, %v433_v29  ;;  %v147_v36 = vld [vmem:[%s24824_s1 + $0x1f0] sm:$0x3] }
  0x22   : > { %17927 = vmatprep.mubr.msk.f32.mxu0 %vm238_vm0, %v19892_v44  ;;  %24934 = vst [vmem:[#allocation30_spill] sm:$0xff] %v19963_v13  ;;  %24935 = vst [vmem:[#allocation31_spill] sm:$0xff] %v19974_v1  ;;  %v19986_v27 = vadd.f32 %v215_v26, %v199_v19 }
  0x23   : > { %24936 = vst [vmem:[#allocation32_spill] sm:$0xff] %v19979_v20  ;;  %v20004_v42 = vrot.slane %v147_v36, %v434_v32 }
  0x24   : > { %24937 = vst [vmem:[#allocation33_spill] sm:$0xff] %v19986_v27 }
  0x25   : > { %17928 = vmatmul.mubr.msk.f32.gmra.mxu0 %vm238_vm0, %v19908_v51  ;;  %24938 = vst [vmem:[#allocation34_spill] sm:$0xff] %v20004_v42 }
  0x26   : > { %17930 = vmatprep.mubr.msk.f32.mxu0 %vm238_vm0, %v19916_v54 }
  0x29   : > { %17931 = vmatmul.mubr.msk.f32.gmra.mxu0 %vm238_vm0, %v19932_v61 }
  0x2a   : > { %17933 = vmatprep.mubr.msk.f32.mxu0 %vm238_vm0, %v19940_v0 }
  0x2d   : > { %17934 = vmatmul.mubr.msk.f32.gmra.mxu0 %vm238_vm0, %v19955_v10 }
  0x2e   : > { %17936 = vmatprep.mubr.msk.f32.mxu0 %vm238_vm0, %v19963_v13 }
  0x31   : > { %17937 = vmatmul.mubr.msk.f32.gmra.mxu0 %vm238_vm0, %v19974_v1 }
  0x32   : > { %17939 = vmatprep.mubr.msk.f32.mxu0 %vm238_vm0, %v19979_v20 }
  0x35   : > { %17940 = vmatmul.mubr.msk.f32.gmra.mxu0 %vm238_vm0, %v19986_v27 }
  0xd9   : > { %v17920_v35 = vpop.f32.mrf.mxu0 }
  0xda   : > { %v19998_v38 = vadd.f32 %v17920_v35, %v16693_v30 }
  0xdb   : > { %v353_v39 = vpop.f32.mrf.mxu0 }
  0xdc   : > { %v20000_v40 = vadd.f32 %v16693_v30, %v353_v39  ;;  %516 = vrot.lane.b32.xlu0 %v19998_v38, %s19755_s3 }
  0xdd   : > { %v17923_v45 = vpop.f32.mrf.mxu0 }
  0xde   : > { %v20006_v46 = vadd.f32 %v17923_v45, %v16693_v30  ;;  %v436_v48 = vmul.f32 %v20004_v42, %v20000_v40 }
  0xdf   : > { %v363_v49 = vpop.f32.mrf.mxu0 }
  0xe0   : > { %v20010_v50 = vadd.f32 %v16693_v30, %v363_v49  ;;  %607 = vrot.lane.b32.xlu1 %v20006_v46, %s19755_s3  ;;  %514 = vrot.lane.b32.xlu0 %v20000_v40, %s19755_s3  ;;  %v454_v49 = vsub.s32 1, %v433_v29 }
  0xe1   : > { %17946 = vmatprep.mubr.msk.f32.mxu1 %vm238_vm0, %v436_v48  ;;  %v17926_v52 = vpop.f32.mrf.mxu0 }
  0xe2   : > { %v20017_v55 = vadd.f32 %v17926_v52, %v16693_v30 }
  0xe3   : > { %v373_v56 = vpop.f32.mrf.mxu0 }
  0xe4   : > { %v20019_v58 = vadd.f32 %v16693_v30, %v373_v56  ;;  %605 = vrot.lane.b32.xlu1 %v20010_v50, %s19755_s3  ;;  %698 = vrot.lane.b32.xlu0 %v20017_v55, %s19755_s3 }
  0xe5   : > { %v17929_v59 = vpop.f32.mrf.mxu0 }
  0xe6   : > { %v20025_v60 = vadd.f32 %v17929_v59, %v16693_v30  ;;  %v20068_v59 = vrot.slane %v147_v36, %v454_v49  ;;  %v440_v49 = vmul.f32 %v20004_v42, %v20019_v58 }
  0xe7   : > { %v383_v62 = vpop.f32.mrf.mxu0 }
  0xe8   : > { %v20027_v2 = vadd.f32 %v16693_v30, %v383_v62  ;;  %696 = vrot.lane.b32.xlu1 %v20019_v58, %s19755_s3  ;;  %789 = vrot.lane.b32.xlu0 %v20025_v60, %s19755_s3  ;;  %24939 = vst [vmem:[#allocation35_spill] sm:$0xff] %v20068_v59  ;;  %v437_v62 = vmul.f32 %v20004_v42, %v19998_v38 }
  0xe9   : > { %v17932_v3 = vpop.f32.mrf.mxu0  ;;  %v456_v47 = vmul.f32 %v20068_v59, %v20000_v40 }
  0xea   : > { %v20033_v5 = vadd.f32 %v17932_v3, %v16693_v30  ;;  %v442_v12 = vmul.f32 %v20004_v42, %v20027_v2 }
  0xeb   : > { %v393_v9 = vpop.f32.mrf.mxu0 }
  0xec   : > { %v20035_v11 = vadd.f32 %v16693_v30, %v393_v9  ;;  %787 = vrot.lane.b32.xlu1 %v20027_v2, %s19755_s3  ;;  %880 = vrot.lane.b32.xlu0 %v20033_v5, %s19755_s3 }
  0xed   : > { %v17935_v16 = vpop.f32.mrf.mxu0 }
  0xee   : > { %v20041_v17 = vadd.f32 %v17935_v16, %v16693_v30  ;;  %v444_v18 = vmul.f32 %v20004_v42, %v20035_v11  ;;  %v438_v16 = vmul.f32 %v20004_v42, %v20010_v50 }
  0xef   : > { %v403_v19 = vpop.f32.mrf.mxu0 }
  0xf0   : > { %v20045_v26 = vadd.f32 %v16693_v30, %v403_v19  ;;  %878 = vrot.lane.b32.xlu1 %v20035_v11, %s19755_s3  ;;  %971 = vrot.lane.b32.xlu0 %v20041_v17, %s19755_s3 }
  0xf1   : > { %v17938_v28 = vpop.f32.mrf.mxu0  ;;  %17974 = vmatprep.mubr.msk.f32.mxu0 %vm238_vm0, %v444_v18 }
  0xf2   : > { %v20052_v32 = vadd.f32 %v17938_v28, %v16693_v30  ;;  %v439_v28 = vmul.f32 %v20004_v42, %v20006_v46  ;;  %v446_v63 = vmul.f32 %v20004_v42, %v20045_v26 }
  0xf3   : > { %v413_v35 = vpop.f32.mrf.mxu0 }
  0xf4   : > { %v20054_v39 = vadd.f32 %v16693_v30, %v413_v35  ;;  %969 = vrot.lane.b32.xlu1 %v20045_v26, %s19755_s3  ;;  %1062 = vrot.lane.b32.xlu0 %v20052_v32, %s19755_s3 }
  0xf5   : > { %v17941_v45 = vpop.f32.mrf.mxu0 }
  0xf6   : > { %v20060_v48 = vadd.f32 %v17941_v45, %v16693_v30  ;;  %v448_v57 = vmul.f32 %v20004_v42, %v20054_v39 }
  0xf7   : > { %v423_v52 = vpop.f32.mrf.mxu0 }
  0xf8   : > { %1060 = vrot.lane.b32.xlu1 %v20054_v39, %s19755_s3  ;;  %1153 = vrot.lane.b32.xlu0 %v20060_v48, %s19755_s3  ;;  %v20066_v56 = vadd.f32 %v16693_v30, %v423_v52 }
  0xfc   : > { %1151 = vrot.lane.b32.xlu1 %v20066_v56, %s19755_s3  ;;  %493 = vrot.lane.b32.xlu0 %v20068_v59, %s19756_s4 }
 0x100   : > { %473 = vrot.lane.b32.xlu1 %v20004_v42, %s19756_s4  ;;  %s19758_s4 = smov 8  }
 0x14e   : > { %v20074_v29 = vpop.permute.xlu0 %516 }
 0x14f   : > { %17942 = vmatprep.subr.msk.mxu1 %vm238_vm0, %v20074_v29 }
 0x150   : > { %17943 = vmatpush3.xpose.msk.msra.mxu1 %vm238_vm0, %v20074_v29 }
 0x152   : > { %v20080_v30 = vpop.permute.xlu1 %607  ;;  %v20082_v36 = vpop.permute.xlu0 %514 }
 0x153   : > { %17944 = vmatprep.subr.msk.mxu1 %vm238_vm0, %v20082_v36 }
 0x154   : > { %17945 = vmatpush3.xpose.msk.msra.mxu1 %vm238_vm0, %v20082_v36 }
 0x155   : > { %17949 = vmatprep.subr.msk.mxu1 %vm238_vm0, %v20080_v30 }
 0x156   : > { %v20092_v3 = vpop.permute.xlu1 %605  ;;  %v20094_v9 = vpop.permute.xlu0 %698 }
 0x157   : > { %17947 = vmatmul.mubr.msk.f32.vlgmr.msra.gmra.mxu1 %vm238_vm0, %v437_v62 }
 0x158   : > { %17950 = vmatpush3.xpose.msk.msra.mxu1 %vm238_vm0, %v20080_v30  ;;  %17953 = vmatprep.mubr.msk.f32.mxu1 %vm238_vm0, %v438_v16  ;;  %v441_v16 = vmul.f32 %v20004_v42, %v20017_v55 }
 0x159   : > { %17951 = vmatprep.subr.msk.mxu1 %vm238_vm0, %v20092_v3 }
 0x15a   : > { %v20104_v18 = vpop.permute.xlu1 %696  ;;  %v20106_v19 = vpop.permute.xlu0 %789 }
 0x15c   : > { %17952 = vmatpush3.xpose.msk.msra.mxu1 %vm238_vm0, %v20092_v3 }
 0x15d   : > { %17956 = vmatprep.subr.msk.mxu1 %vm238_vm0, %v20094_v9 }
 0x15e   : > { %v20114_v35 = vpop.permute.xlu1 %787  ;;  %v20116_v45 = vpop.permute.xlu0 %880 }
 0x15f   : > { %17954 = vmatmul.mubr.msk.f32.vlgmr.msra.gmra.mxu1 %vm238_vm0, %v439_v28  ;;  %17970 = vmatprep.subr.msk.mxu0 %vm238_vm0, %v20116_v45  ;;  %v445_v28 = vmul.f32 %v20004_v42, %v20033_v5 }
 0x160   : > { %17957 = vmatpush3.xpose.msk.msra.mxu1 %vm238_vm0, %v20094_v9  ;;  %17960 = vmatprep.mubr.msk.f32.mxu1 %vm238_vm0, %v440_v49 }
 0x161   : > { %17971 = vmatpush3.xpose.msk.msra.mxu0 %vm238_vm0, %v20116_v45  ;;  %17958 = vmatprep.subr.msk.mxu1 %vm238_vm0, %v20104_v18 }
 0x162   : > { %v20130_v52 = vpop.permute.xlu1 %878  ;;  %v20132_v62 = vpop.permute.xlu0 %971 }
 0x163   : > { %17972 = vmatprep.subr.msk.mxu0 %vm238_vm0, %v20130_v52 }
 0x164   : > { %17959 = vmatpush3.xpose.msk.msra.mxu1 %vm238_vm0, %v20104_v18 }
 0x165   : > { %17973 = vmatpush3.xpose.msk.msra.mxu0 %vm238_vm0, %v20130_v52  ;;  %17963 = vmatprep.subr.msk.mxu1 %vm238_vm0, %v20106_v19 }
 0x166   : > { %v20146_v49 = vpop.permute.xlu1 %969  ;;  %v20148_v4 = vpop.permute.xlu0 %1062 }
 0x167   : > { %17961 = vmatmul.mubr.msk.f32.vlgmr.msra.gmra.mxu1 %vm238_vm0, %v441_v16  ;;  %17984 = vmatprep.subr.msk.mxu0 %vm238_vm0, %v20148_v4 }
 0x168   : > { %17975 = vmatmul.mubr.msk.f32.vlgmr.msra.gmra.mxu0 %vm238_vm0, %v445_v28  ;;  %17964 = vmatpush3.xpose.msk.msra.mxu1 %vm238_vm0, %v20106_v19  ;;  %v449_v28 = vmul.f32 %v20004_v42, %v20052_v32 }
 0x169   : > { %17967 = vmatprep.mubr.msk.f32.mxu1 %vm238_vm0, %v442_v12  ;;  %17985 = vmatpush3.xpose.msk.msra.mxu0 %vm238_vm0, %v20148_v4 }
 0x16a   : > { %17988 = vmatprep.mubr.msk.f32.mxu0 %vm238_vm0, %v448_v57  ;;  %17965 = vmatprep.subr.msk.mxu1 %vm238_vm0, %v20114_v35  ;;  %v20166_v16 = vpop.permute.xlu1 %1060  ;;  %v443_v57 = vmul.f32 %v20004_v42, %v20025_v60 }
 0x16b   : > { %17986 = vmatprep.subr.msk.mxu0 %vm238_vm0, %v20166_v16 }
 0x16c   : > { %17966 = vmatpush3.xpose.msk.msra.mxu1 %vm238_vm0, %v20114_v35 }
 0x16d   : > { %17987 = vmatpush3.xpose.msk.msra.mxu0 %vm238_vm0, %v20166_v16  ;;  %17977 = vmatprep.subr.msk.mxu1 %vm238_vm0, %v20132_v62 }
 0x16e   : > { %17998 = vmatprep.subr.msk.mxu0 %vm238_vm0, %v20074_v29  ;;  %v20180_v12 = vpop.permute.xlu1 %1151 }
 0x16f   : > { %17968 = vmatmul.mubr.msk.f32.vlgmr.msra.gmra.mxu1 %vm238_vm0, %v443_v57 }
 0x170   : > { %17989 = vmatmul.mubr.msk.f32.vlgmr.msra.gmra.mxu0 %vm238_vm0, %v449_v28  ;;  %17978 = vmatpush3.xpose.msk.msra.mxu1 %vm238_vm0, %v20132_v62 }
 0x171   : > { %17981 = vmatprep.mubr.msk.f32.mxu1 %vm238_vm0, %v446_v63  ;;  %17999 = vmatpush3.xpose.msk.msra.mxu0 %vm238_vm0, %v20074_v29  ;;  %v20213_v63 = vpop.permute.xlu0 %1153  ;;  %v457_v29 = vmul.f32 %v20068_v59, %v19998_v38 }
 0x172   : > { %18002 = vmatprep.mubr.msk.f32.mxu0 %vm238_vm0, %v456_v47  ;;  %17979 = vmatprep.subr.msk.mxu1 %vm238_vm0, %v20146_v49  ;;  %v20198_v57 = vpop.permute.xlu1 %473  ;;  %v447_v47 = vmul.f32 %v20004_v42, %v20041_v17 }
 0x173   : > { %24940 = vst [vmem:[#allocation36_spill] sm:$0xff] %v20198_v57  ;;  %18000 = vmatprep.subr.msk.mxu0 %vm238_vm0, %v20082_v36  ;;  %v477_v28 = vmul.f32 %v20198_v57, %v19998_v38  ;;  %v476_v53 = vmul.f32 %v20198_v57, %v20000_v40 }
 0x174   : > { %17980 = vmatpush3.xpose.msk.msra.mxu1 %vm238_vm0, %v20146_v49 }
 0x175   : > { %18001 = vmatpush3.xpose.msk.msra.mxu0 %vm238_vm0, %v20082_v36  ;;  %2313 = vrot.lane.b32.xlu1 %v477_v28, %s19757_s5  ;;  %v450_v36 = vmul.f32 %v20004_v42, %v20066_v56  ;;  %v460_v28 = vmul.f32 %v20068_v59, %v20019_v58 }
 0x176   : > { %18012 = vmatprep.subr.msk.mxu0 %vm238_vm0, %v20094_v9  ;;  %2311 = vrot.lane.b32.xlu0 %v476_v53, %s19757_s5  ;;  %v479_v53 = vmul.f32 %v20198_v57, %v20006_v46 }
 0x177   : > { %17982 = vmatmul.mubr.msk.f32.vlgmr.msra.gmra.mxu1 %vm238_vm0, %v447_v47  ;;  %17991 = vmatprep.subr.msk.mxu1 %vm238_vm0, %v20213_v63  ;;  %v481_v47 = vmul.f32 %v20198_v57, %v20017_v55 }
 0x178   : > { %18003 = vmatmul.mubr.msk.f32.vlgmr.msra.gmra.mxu0 %vm238_vm0, %v457_v29  ;;  %17992 = vmatpush3.xpose.msk.msra.mxu1 %vm238_vm0, %v20213_v63  ;;  %v478_v29 = vmul.f32 %v20198_v57, %v20010_v50 }
 0x179   : > { %17995 = vmatprep.mubr.msk.f32.mxu1 %vm238_vm0, %v450_v36  ;;  %18013 = vmatpush3.xpose.msk.msra.mxu0 %vm238_vm0, %v20094_v9  ;;  %v483_v9 = vmul.f32 %v20198_v57, %v20025_v60  ;;  %v451_v36 = vmul.f32 %v20004_v42, %v20060_v48 }
 0x17a   : > { %18016 = vmatprep.mubr.msk.f32.mxu0 %vm238_vm0, %v460_v28  ;;  %2402 = vrot.lane.b32.xlu1 %v479_v53, %s19757_s5  ;;  %v461_v28 = vmul.f32 %v20068_v59, %v20017_v55  ;;  %v464_v53 = vmul.f32 %v20068_v59, %v20035_v11 }
 0x17b   : > { %2491 = vrot.lane.b32.xlu0 %v481_v47, %s19757_s5  ;;  %18014 = vmatprep.subr.msk.mxu0 %vm238_vm0, %v20104_v18  ;;  %v480_v47 = vmul.f32 %v20198_v57, %v20019_v58 }
 0x17c   : > { %17993 = vmatprep.subr.msk.mxu1 %vm238_vm0, %v20180_v12 }
 0x17d   : > { %17994 = vmatpush3.xpose.msk.msra.mxu1 %vm238_vm0, %v20180_v12  ;;  %18015 = vmatpush3.xpose.msk.msra.mxu0 %vm238_vm0, %v20104_v18  ;;  %v458_v18 = vmul.f32 %v20068_v59, %v20010_v50 }
 0x17e   : > { %2400 = vrot.lane.b32.xlu1 %v478_v29, %s19757_s5  ;;  %18005 = vmatprep.subr.msk.mxu1 %vm238_vm0, %v20080_v30  ;;  %v482_v29 = vmul.f32 %v20198_v57, %v20027_v2 }
 0x17f   : > { %2580 = vrot.lane.b32.xlu0 %v483_v9, %s19757_s5  ;;  %18026 = vmatprep.subr.msk.mxu0 %vm238_vm0, %v20116_v45  ;;  %v459_v9 = vmul.f32 %v20068_v59, %v20006_v46 }
 0x180   : > { %17996 = vmatmul.mubr.msk.f32.vlgmr.msra.gmra.mxu1 %vm238_vm0, %v451_v36  ;;  %18017 = vmatmul.mubr.msk.f32.vlgmr.msra.gmra.mxu0 %vm238_vm0, %v461_v28  ;;  %v468_v36 = vmul.f32 %v20068_v59, %v20054_v39  ;;  %v484_v28 = vmul.f32 %v20198_v57, %v20035_v11 }
 0x181   : > { %18006 = vmatpush3.xpose.msk.msra.mxu1 %vm238_vm0, %v20080_v30  ;;  %18009 = vmatprep.mubr.msk.f32.mxu1 %vm238_vm0, %v458_v18  ;;  %v485_v30 = vmul.f32 %v20198_v57, %v20033_v5  ;;  %v486_v18 = vmul.f32 %v20198_v57, %v20045_v26 }
 0x182   : > { %18027 = vmatpush3.xpose.msk.msra.mxu0 %vm238_vm0, %v20116_v45  ;;  %18030 = vmatprep.mubr.msk.f32.mxu0 %vm238_vm0, %v464_v53  ;;  %v487_v45 = vmul.f32 %v20198_v57, %v20041_v17  ;;  %v20317_v53 = vpop.permute.xlu0 %493 }
 0x183   : > { %2489 = vrot.lane.b32.xlu1 %v480_v47, %s19757_s5  ;;  %2578 = vrot.lane.b32.xlu0 %v482_v29, %s19757_s5  ;;  %v463_v47 = vmul.f32 %v20068_v59, %v20025_v60  ;;  %v501_v29 = vmul.f32 %v20317_v53, %v20017_v55  ;;  %v467_v55 = vmul.f32 %v20068_v59, %v20041_v17 }
 0x184   : > { %18007 = vmatprep.subr.msk.mxu1 %vm238_vm0, %v20092_v3  ;;  %18028 = vmatprep.subr.msk.mxu0 %vm238_vm0, %v20130_v52  ;;  %v508_v20 = vmul.f32 %v20317_v53, %v20054_v39 }
 0x185   : > { %18008 = vmatpush3.xpose.msk.msra.mxu1 %vm238_vm0, %v20092_v3  ;;  %v465_v3 = vmul.f32 %v20068_v59, %v20033_v5 }
 0x186   : > { %18029 = vmatpush3.xpose.msk.msra.mxu0 %vm238_vm0, %v20130_v52  ;;  %18019 = vmatprep.subr.msk.mxu1 %vm238_vm0, %v20106_v19  ;;  %v462_v52 = vmul.f32 %v20068_v59, %v20027_v2 }
 0x187   : > { %2669 = vrot.lane.b32.xlu1 %v485_v30, %s19757_s5  ;;  %2758 = vrot.lane.b32.xlu0 %v487_v45, %s19757_s5  ;;  %v503_v30 = vmul.f32 %v20317_v53, %v20025_v60  ;;  %v470_v45 = vmul.f32 %v20068_v59, %v20066_v56  ;;  %v505_v60 = vmul.f32 %v20317_v53, %v20033_v5 }
 0x188   : > { %18040 = vmatprep.subr.msk.mxu0 %vm238_vm0, %v20148_v4  ;;  %18010 = vmatmul.mubr.msk.f32.vlgmr.msra.gmra.mxu1 %vm238_vm0, %v459_v9  ;;  %v500_v5 = vmul.f32 %v20317_v53, %v20019_v58  ;;  %v504_v58 = vmul.f32 %v20317_v53, %v20035_v11  ;;  %v506_v9 = vmul.f32 %v20317_v53, %v20045_v26 }
 0x189   : > { %18031 = vmatmul.mubr.msk.f32.vlgmr.msra.gmra.mxu0 %vm238_vm0, %v465_v3  ;;  %18020 = vmatpush3.xpose.msk.msra.mxu1 %vm238_vm0, %v20106_v19  ;;  %v499_v19 = vmul.f32 %v20317_v53, %v20006_v46  ;;  %v488_v46 = vmul.f32 %v20198_v57, %v20054_v39 }
 0x18a   : > { %18023 = vmatprep.mubr.msk.f32.mxu1 %vm238_vm0, %v462_v52  ;;  %18041 = vmatpush3.xpose.msk.msra.mxu0 %vm238_vm0, %v20148_v4  ;;  %v489_v4 = vmul.f32 %v20198_v57, %v20052_v32 }
 0x18b   : > { %18044 = vmatprep.mubr.msk.f32.mxu0 %vm238_vm0, %v468_v36  ;;  %2667 = vrot.lane.b32.xlu1 %v484_v28, %s19757_s5 }
 0x18c   : > { %2756 = vrot.lane.b32.xlu0 %v486_v18, %s19757_s5  ;;  %18021 = vmatprep.subr.msk.mxu1 %vm238_vm0, %v20114_v35 }
 0x18d   : > { %18042 = vmatprep.subr.msk.mxu0 %vm238_vm0, %v20166_v16  ;;  %18022 = vmatpush3.xpose.msk.msra.mxu1 %vm238_vm0, %v20114_v35  ;;  %v469_v35 = vmul.f32 %v20068_v59, %v20052_v32 }
 0x18e   : > { %18043 = vmatpush3.xpose.msk.msra.mxu0 %vm238_vm0, %v20166_v16  ;;  %18033 = vmatprep.subr.msk.mxu1 %vm238_vm0, %v20132_v62  ;;  %v466_v16 = vmul.f32 %v20068_v59, %v20045_v26 }
 0x18f   : > { %2847 = vrot.lane.b32.xlu1 %v489_v4, %s19757_s5  ;;  %v20423_v4 = vld [vmem:[%s24824_s1 + $0x1e8] ss:$0 sm:$0xff] }
 0x190   : > { %3114 = vrot.lane.b32.xlu0 %v499_v19, %s19757_s5  ;;  %18024 = vmatmul.mubr.msk.f32.vlgmr.msra.gmra.mxu1 %vm238_vm0, %v463_v47 }
 0x191   : > { %18045 = vmatmul.mubr.msk.f32.vlgmr.msra.gmra.mxu0 %vm238_vm0, %v469_v35  ;;  %18034 = vmatpush3.xpose.msk.msra.mxu1 %vm238_vm0, %v20132_v62  ;;  %v497_v62 = vmul.f32 %v20317_v53, %v19998_v38  ;;  %v496_v38 = vmul.f32 %v20317_v53, %v20000_v40  ;;  %v471_v40 = vmul.f32 %v20068_v59, %v20060_v48 }
 0x192   : > { %18037 = vmatprep.mubr.msk.f32.mxu1 %vm238_vm0, %v466_v16  ;;  %18035 = vmatprep.subr.msk.mxu1 %vm238_vm0, %v20146_v49 }
 0x193   : > { %2845 = vrot.lane.b32.xlu1 %v488_v46, %s19757_s5 }
 0x194   : > { %3203 = vrot.lane.b32.xlu0 %v501_v29, %s19757_s5 }
 0x195   : > { %18036 = vmatpush3.xpose.msk.msra.mxu1 %vm238_vm0, %v20146_v49  ;;  %v498_v49 = vmul.f32 %v20317_v53, %v20010_v50  ;;  %v502_v50 = vmul.f32 %v20317_v53, %v20027_v2 }
 0x196   : > { %18047 = vmatprep.subr.msk.mxu1 %vm238_vm0, %v20213_v63 }
 0x197   : > { %3025 = vrot.lane.b32.xlu1 %v497_v62, %s19757_s5 }
 0x198   : > { %3292 = vrot.lane.b32.xlu0 %v503_v30, %s19757_s5  ;;  %18038 = vmatmul.mubr.msk.f32.vlgmr.msra.gmra.mxu1 %vm238_vm0, %v467_v55 }
 0x199   : > { %18048 = vmatpush3.xpose.msk.msra.mxu1 %vm238_vm0, %v20213_v63  ;;  %18051 = vmatprep.mubr.msk.f32.mxu1 %vm238_vm0, %v470_v45  ;;  %v507_v63 = vmul.f32 %v20317_v53, %v20041_v17  ;;  %v490_v17 = vmul.f32 %v20198_v57, %v20066_v56 }
 0x19a   : > { %18049 = vmatprep.subr.msk.mxu1 %vm238_vm0, %v20180_v12 }
 0x19b   : > { %3023 = vrot.lane.b32.xlu1 %v496_v38, %s19757_s5 }
 0x19c   : > { %3381 = vrot.lane.b32.xlu0 %v505_v60, %s19757_s5 }
 0x19d   : > { %18050 = vmatpush3.xpose.msk.msra.mxu1 %vm238_vm0, %v20180_v12  ;;  %v491_v12 = vmul.f32 %v20198_v57, %v20060_v48 }
 0x19f   : > { %3112 = vrot.lane.b32.xlu1 %v498_v49, %s19757_s5 }
 0x1a0   : > { %3470 = vrot.lane.b32.xlu0 %v507_v63, %s19757_s5  ;;  %18052 = vmatmul.mubr.msk.f32.vlgmr.msra.gmra.mxu1 %vm238_vm0, %v471_v40 }
 0x1a3   : > { %3201 = vrot.lane.b32.xlu1 %v500_v5, %s19757_s5 }
 0x1a4   : > { %2936 = vrot.lane.b32.xlu0 %v491_v12, %s19757_s5 }
 0x1a7   : > { %3290 = vrot.lane.b32.xlu1 %v502_v50, %s19757_s5 }
 0x1a8   : > { %2934 = vrot.lane.b32.xlu0 %v490_v17, %s19757_s5 }
 0x1ab   : > { %3379 = vrot.lane.b32.xlu1 %v504_v58, %s19757_s5 }
 0x1af   : > { %3468 = vrot.lane.b32.xlu1 %v506_v9, %s19757_s5 }
 0x1e7   : > { %v2314_v3 = vpop.permute.xlu1 %2313 }
 0x1e8   : > { %v2312_v52 = vpop.permute.xlu0 %2311  ;;  %18054 = vmatprep.subr.mxu0 %v2314_v3 }
 0x1e9   : > { %18055 = vmatpush3.msra.mxu0 %v2314_v3 }
 0x1ea   : > { %18056 = vmatprep.subr.mxu0 %v2312_v52 }
 0x1eb   : > { %18057 = vmatpush3.msra.mxu0 %v2312_v52 }
 0x1ec   : > { %v20412_v2 = vpop.permute.xlu1 %2402 }
 0x1ed   : > { %v2492_v36 = vpop.permute.xlu0 %2491  ;;  %18061 = vmatprep.subr.mxu0 %v20412_v2 }
 0x1ee   : > { %18068 = vmatprep.subr.mxu1 %v2492_v36 }
 0x1ef   : > { %18069 = vmatpush3.msra.mxu1 %v2492_v36 }
 0x1f0   : > { %v20415_v11 = vpop.permute.xlu1 %2400 }
 0x1f5   : > { %v2490_v28 = vpop.permute.xlu1 %2489 }
 0x1f6   : > { %18070 = vmatprep.subr.mxu1 %v2490_v28 }
 0x1f7   : > { %18071 = vmatpush3.msra.mxu1 %v2490_v28 }
 0x1f9   : > { %v20417_v26 = vpop.permute.xlu1 %2669 }
 0x1fa   : > { %18082 = vmatprep.subr.mxu1 %v20417_v26 }
 0x1fd   : > { %v20587_v27 = vpop.permute.xlu1 %2667 }
 0x217   : > { %v17948_v18 = vpop.f32.mrf.mxu1 }
 0x218   : > { %v1889_v19 = vmul.f32 0.5, %v17948_v18 }
 0x219   : > { %v594_v47 = vpop.f32.mrf.mxu1 }
 0x21a   : > { %v1888_v35 = vmul.f32 0.5, %v594_v47  ;;  %v20426_v16 = vadd.f32 %v20423_v4, %v1889_v19 }
 0x21c   : > { %v1960_v46 = vsel %vm1956_vm1, %v20426_v16, -inf  ;;  %v20431_v29 = vadd.f32 %v20423_v4, %v1888_v35 }
 0x21d   : > { %1961 = vmax.xlane.f32.xlu1 %v1960_v46 }
 0x21e   : > { %v1957_v62 = vsel %vm1956_vm1, %v20431_v29, -inf }
 0x21f   : > { %1958 = vmax.xlane.f32.xlu0 %v1957_v62  ;;  %v17955_v30 = vpop.f32.mrf.mxu1 }
 0x220   : > { %v1891_v55 = vmul.f32 0.5, %v17955_v30 }
 0x221   : > { %v685_v45 = vpop.f32.mrf.mxu1 }
 0x222   : > { %v1890_v38 = vmul.f32 0.5, %v685_v45  ;;  %v20436_v60 = vadd.f32 %v20423_v4, %v1891_v55 }
 0x224   : > { %v1966_v49 = vsel %vm1956_vm1, %v20436_v60, -inf  ;;  %v20441_v63 = vadd.f32 %v20423_v4, %v1890_v38 }
 0x225   : > { %1967 = vmax.xlane.f32.xlu1 %v1966_v49 }
 0x226   : > { %v1963_v40 = vsel %vm1956_vm1, %v20441_v63, -inf }
 0x227   : > { %1964 = vmax.xlane.f32.xlu0 %v1963_v40  ;;  %v17962_v5 = vpop.f32.mrf.mxu1 }
 0x228   : > { %v17976_v12 = vpop.f32.mrf.mxu0  ;;  %v1893_v50 = vmul.f32 0.5, %v17962_v5 }
 0x229   : > { %v1897_v17 = vmul.f32 0.5, %v17976_v12  ;;  %v776_v58 = vpop.f32.mrf.mxu1 }
 0x22a   : > { %v20446_v9 = vadd.f32 %v20423_v4, %v1893_v50  ;;  %v1892_v3 = vmul.f32 0.5, %v776_v58  ;;  %v958_v28 = vpop.f32.mrf.mxu0 }
 0x22b   : > { %v20451_v36 = vadd.f32 %v20423_v4, %v1897_v17  ;;  %v1896_v19 = vmul.f32 0.5, %v958_v28 }
 0x22c   : > { %v1972_v52 = vsel %vm1956_vm1, %v20446_v9, -inf  ;;  %v20456_v62 = vadd.f32 %v20423_v4, %v1892_v3 }
 0x22d   : > { %1973 = vmax.xlane.f32.xlu0 %v1972_v52  ;;  %v1984_v46 = vsel %vm1956_vm1, %v20451_v36, -inf  ;;  %v20466_v5 = vadd.f32 %v20423_v4, %v1896_v19 }
 0x22e   : > { %v1969_v49 = vsel %vm1956_vm1, %v20456_v62, -inf }
 0x22f   : > { %v17969_v18 = vpop.f32.mrf.mxu1  ;;  %v1981_v28 = vsel %vm1956_vm1, %v20466_v5, -inf }
 0x230   : > { %v1895_v47 = vmul.f32 0.5, %v17969_v18  ;;  %v17990_v35 = vpop.f32.mrf.mxu0 }
 0x231   : > { %1985 = vmax.xlane.f32.xlu0 %v1984_v46  ;;  %v867_v30 = vpop.f32.mrf.mxu1  ;;  %v1901_v38 = vmul.f32 0.5, %v17990_v35 }
 0x232   : > { %v1894_v55 = vmul.f32 0.5, %v867_v30  ;;  %v20459_v45 = vadd.f32 %v20423_v4, %v1895_v47  ;;  %v1140_v50 = vpop.f32.mrf.mxu0 }
 0x233   : > { %v20472_v58 = vadd.f32 %v20423_v4, %v1901_v38  ;;  %v1900_v3 = vmul.f32 0.5, %v1140_v50 }
 0x234   : > { %v1978_v40 = vsel %vm1956_vm1, %v20459_v45, -inf  ;;  %v20469_v12 = vadd.f32 %v20423_v4, %v1894_v55 }
 0x235   : > { %1970 = vmax.xlane.f32.xlu0 %v1969_v49  ;;  %1979 = vmax.xlane.f32.xlu1 %v1978_v40  ;;  %v1996_v30 = vsel %vm1956_vm1, %v20472_v58, -inf  ;;  %v20486_v49 = vadd.f32 %v20423_v4, %v1900_v3 }
 0x236   : > { %v1975_v18 = vsel %vm1956_vm1, %v20469_v12, -inf }
 0x237   : > { %v17983_v17 = vpop.f32.mrf.mxu1 }
 0x238   : > { %v1899_v52 = vmul.f32 0.5, %v17983_v17  ;;  %v18004_v19 = vpop.f32.mrf.mxu0 }
 0x239   : > { %1982 = vmax.xlane.f32.xlu0 %v1981_v28  ;;  %1976 = vmax.xlane.f32.xlu1 %v1975_v18  ;;  %v1049_v47 = vpop.f32.mrf.mxu1  ;;  %v1905_v55 = vmul.f32 0.5, %v18004_v19  ;;  %v1993_v18 = vsel %vm1956_vm1, %v20486_v49, -inf }
 0x23a   : > { %v1898_v35 = vmul.f32 0.5, %v1049_v47  ;;  %v20479_v46 = vadd.f32 %v20423_v4, %v1899_v52  ;;  %v1312_v50 = vpop.f32.mrf.mxu0 }
 0x23b   : > { %v1904_v17 = vmul.f32 0.5, %v1312_v50  ;;  %v20496_v47 = vadd.f32 %v20423_v4, %v1905_v55 }
 0x23c   : > { %v1990_v38 = vsel %vm1956_vm1, %v20479_v46, -inf  ;;  %v20489_v40 = vadd.f32 %v20423_v4, %v1898_v35 }
 0x23d   : > { %1997 = vmax.xlane.f32.xlu0 %v1996_v30  ;;  %1991 = vmax.xlane.f32.xlu1 %v1990_v38  ;;  %v2008_v50 = vsel %vm1956_vm1, %v20496_v47, -inf  ;;  %v20504_v43 = vadd.f32 %v20423_v4, %v1904_v17 }
 0x23e   : > { %v1987_v19 = vsel %vm1956_vm1, %v20489_v40, -inf }
 0x240   : > { %v17997_v28 = vpop.f32.mrf.mxu1  ;;  %v18018_v52 = vpop.f32.mrf.mxu0 }
 0x241   : > { %v1903_v3 = vmul.f32 0.5, %v17997_v28  ;;  %1994 = vmax.xlane.f32.xlu0 %v1993_v18  ;;  %1988 = vmax.xlane.f32.xlu1 %v1987_v19  ;;  %v1909_v38 = vmul.f32 0.5, %v18018_v52  ;;  %v2005_v18 = vsel %vm1956_vm1, %v20504_v43, -inf }
 0x242   : > { %v1474_v35 = vpop.f32.mrf.mxu0  ;;  %v1231_v57 = vpop.f32.mrf.mxu1 }
 0x243   : > { %v1902_v37 = vmul.f32 0.5, %v1231_v57  ;;  %v20499_v30 = vadd.f32 %v20423_v4, %v1903_v3  ;;  %v1908_v22 = vmul.f32 0.5, %v1474_v35  ;;  %v20514_v52 = vadd.f32 %v20423_v4, %v1909_v38 }
 0x245   : > { %2009 = vmax.xlane.f32.xlu0 %v2008_v50  ;;  %v2002_v55 = vsel %vm1956_vm1, %v20499_v30, -inf  ;;  %v20509_v28 = vadd.f32 %v20423_v4, %v1902_v37  ;;  %v20519_v35 = vadd.f32 %v20423_v4, %v1908_v22  ;;  %v2020_v15 = vsel %vm1956_vm1, %v20514_v52, -inf }
 0x246   : > { %2003 = vmax.xlane.f32.xlu1 %v2002_v55 }
 0x247   : > { %v1999_v17 = vsel %vm1956_vm1, %v20509_v28, -inf }
 0x248   : > { %v18011_v57 = vpop.f32.mrf.mxu1 }
 0x249   : > { %v1907_v19 = vmul.f32 0.5, %v18011_v57  ;;  %v18032_v3 = vpop.f32.mrf.mxu0  ;;  %2006 = vmax.xlane.f32.xlu0 %v2005_v18  ;;  %v2017_v18 = vsel %vm1956_vm1, %v20519_v35, -inf }
 0x24a   : > { %2000 = vmax.xlane.f32.xlu1 %v1999_v17  ;;  %v1393_v37 = vpop.f32.mrf.mxu1  ;;  %v1913_v33 = vmul.f32 0.5, %v18032_v3 }
 0x24b   : > { %v1636_v50 = vpop.f32.mrf.mxu0  ;;  %v1906_v55 = vmul.f32 0.5, %v1393_v37  ;;  %v20524_v38 = vadd.f32 %v20423_v4, %v1907_v19 }
 0x24c   : > { %v1912_v57 = vmul.f32 0.5, %v1636_v50  ;;  %v20534_v3 = vadd.f32 %v20423_v4, %v1913_v33 }
 0x24d   : > { %2021 = vmax.xlane.f32.xlu0 %v2020_v15  ;;  %v20529_v21 = vadd.f32 %v20423_v4, %v1906_v55  ;;  %v2014_v17 = vsel %vm1956_vm1, %v20524_v38, -inf }
 0x24e   : > { %2018 = vmax.xlane.f32.xlu1 %v2017_v18  ;;  %v20539_v19 = vadd.f32 %v20423_v4, %v1912_v57  ;;  %v2032_v6 = vsel %vm1956_vm1, %v20534_v3, -inf }
 0x24f   : > { %v2011_v15 = vsel %vm1956_vm1, %v20529_v21, -inf }
 0x250   : > { %v18025_v22 = vpop.f32.mrf.mxu1 }
 0x251   : > { %v1911_v37 = vmul.f32 0.5, %v18025_v22  ;;  %v18046_v8 = vpop.f32.mrf.mxu0  ;;  %2015 = vmax.xlane.f32.xlu0 %v2014_v17  ;;  %v2029_v17 = vsel %vm1956_vm1, %v20539_v19, -inf }
 0x252   : > { %2012 = vmax.xlane.f32.xlu1 %v2011_v15  ;;  %v1555_v50 = vpop.f32.mrf.mxu1  ;;  %v1917_v14 = vmul.f32 0.5, %v18046_v8 }
 0x253   : > { %v1798_v55 = vpop.f32.mrf.mxu0  ;;  %v1910_v18 = vmul.f32 0.5, %v1555_v50  ;;  %v20544_v33 = vadd.f32 %v20423_v4, %v1911_v37 }
 0x254   : > { %v1916_v22 = vmul.f32 0.5, %v1798_v55  ;;  %v20554_v8 = vadd.f32 %v20423_v4, %v1917_v14 }
 0x255   : > { %2033 = vmax.xlane.f32.xlu0 %v2032_v6  ;;  %v20549_v7 = vadd.f32 %v20423_v4, %v1910_v18  ;;  %v2026_v15 = vsel %vm1956_vm1, %v20544_v33, -inf }
 0x256   : > { %2030 = vmax.xlane.f32.xlu1 %v2029_v17  ;;  %v20559_v6 = vadd.f32 %v20423_v4, %v1916_v22  ;;  %v2044_v17 = vsel %vm1956_vm1, %v20554_v8, -inf }
 0x257   : > { %v2023_v37 = vsel %vm1956_vm1, %v20549_v7, -inf }
 0x258   : > { %v18039_v57 = vpop.f32.mrf.mxu1  ;;  %v2041_v14 = vsel %vm1956_vm1, %v20559_v6, -inf }
 0x259   : > { %v1915_v50 = vmul.f32 0.5, %v18039_v57  ;;  %2027 = vmax.xlane.f32.xlu0 %v2026_v15 }
 0x25a   : > { %2024 = vmax.xlane.f32.xlu1 %v2023_v37  ;;  %v1717_v55 = vpop.f32.mrf.mxu1 }
 0x25b   : > { %v1914_v18 = vmul.f32 0.5, %v1717_v55  ;;  %v20564_v42 = vadd.f32 %v20423_v4, %v1915_v50 }
 0x25d   : > { %2045 = vmax.xlane.f32.xlu0 %v2044_v17  ;;  %v20569_v57 = vadd.f32 %v20423_v4, %v1914_v18  ;;  %v2038_v22 = vsel %vm1956_vm1, %v20564_v42, -inf }
 0x25e   : > { %2042 = vmax.xlane.f32.xlu1 %v2041_v14 }
 0x25f   : > { %v2035_v55 = vsel %vm1956_vm1, %v20569_v57, -inf }
 0x260   : > { %v18053_v15 = vpop.f32.mrf.mxu1 }
 0x261   : > { %v1919_v37 = vmul.f32 0.5, %v18053_v15  ;;  %2039 = vmax.xlane.f32.xlu0 %v2038_v22  ;;  %v20585_v22 = vpop.permute.xlu0 %2580 }
 0x262   : > { %2036 = vmax.xlane.f32.xlu1 %v2035_v55  ;;  %v1879_v50 = vpop.f32.mrf.mxu1 }
 0x263   : > { %v1918_v59 = vmul.f32 0.5, %v1879_v50  ;;  %v20576_v17 = vadd.f32 %v20423_v4, %v1919_v37  ;;  %v20591_v50 = vpop.permute.xlu1 %2847 }
 0x265   : > { %v2050_v18 = vsel %vm1956_vm1, %v20576_v17, -inf  ;;  %v20581_v14 = vadd.f32 %v20423_v4, %v1918_v59  ;;  %v20589_v55 = vpop.permute.xlu0 %2578 }
 0x266   : > { %2051 = vmax.xlane.f32.xlu0 %v2050_v18  ;;  %v509_v18 = vmul.f32 %v20317_v53, %v20052_v32 }
 0x267   : > { %v2047_v15 = vsel %vm1956_vm1, %v20581_v14, -inf  ;;  %v20597_v59 = vpop.permute.xlu1 %2845 }
 0x268   : > { %2048 = vmax.xlane.f32.xlu1 %v2047_v15 }
 0x269   : > { %v20593_v37 = vpop.permute.xlu0 %2758 }
 0x26b   : > { %v20605_v15 = vpop.permute.xlu1 %3025 }
 0x26d   : > { %v20600_v4 = vpop.permute.xlu0 %2756 }
 0x26f   : > { %v20609_v13 = vpop.permute.xlu1 %3023 }
 0x271   : > { %v20607_v1 = vpop.permute.xlu0 %3114 }
 0x273   : > { %v20613_v39 = vpop.permute.xlu1 %3112 }
 0x274   : > { %24941 = vst [vmem:[#allocation37_spill] sm:$0xff] %v20613_v39 }
 0x275   : > { %v20611_v10 = vpop.permute.xlu0 %3203 }
 0x279   : > { %3557 = vrot.lane.b32.xlu1 %v508_v20, %s19757_s5  ;;  %v20615_v0 = vpop.permute.xlu0 %3292  ;;  %v20617_v20 = vpop.permute.xlu1 %3201 }
 0x27a   : > { %24942 = vst [vmem:[#allocation38_spill] sm:$0xff] %v20615_v0  ;;  %24943 = vst [vmem:[#allocation39_spill] sm:$0xff] %v20617_v20 }
 0x27c   : > { %3559 = vrot.lane.b32.xlu0 %v509_v18, %s19757_s5 }
 0x27d   : > { %v20619_v61 = vpop.permute.xlu0 %3381  ;;  %v20621_v54 = vpop.permute.xlu1 %3290 }
 0x27e   : > { %24944 = vst [vmem:[#allocation40_spill] sm:$0xff] %v20619_v61  ;;  %24945 = vst [vmem:[#allocation41_spill] sm:$0xff] %v20621_v54 }
 0x281   : > { %v20623_v32 = vpop.permute.xlu0 %3470  ;;  %v20625_v18 = vpop.permute.xlu1 %3379 }
 0x282   : > { %24946 = vst [vmem:[#allocation42_spill] sm:$0xff] %v20623_v32  ;;  %24947 = vst [vmem:[#allocation43_spill] sm:$0xff] %v20625_v18 }
 0x285   : > { %v20627_v51 = vpop.permute.xlu0 %2936  ;;  %v20629_v44 = vpop.permute.xlu1 %3468 }
 0x286   : > { %24948 = vst [vmem:[#allocation44_spill] sm:$0xff] %v20629_v44 }
 0x289   : > { %v20631_v41 = vpop.permute.xlu0 %2934 }
 0x2a6   : > { %v1962_v34 = vpop.xlane.xlu1 %1961 }
 0x2a7   : > { %v2054_v31 = vsub.f32 %v20426_v16, %v1962_v34 }
 0x2a8   : > { %v1959_v25 = vpop.xlane.xlu0 %1958 }
 0x2a9   : > { %v2087_v23 = vmul.f32 1.442695, %v2054_v31  ;;  %v2053_v24 = vsub.f32 %v20431_v29, %v1959_v25 }
 0x2ab   : > { %19198 = vpow2.f32 %v2087_v23  ;;  %v2085_v61 = vmul.f32 1.442695, %v2053_v24 }
 0x2ad   : > { %19200 = vpow2.f32 %v2085_v61 }
 0x2ae   : > { %v1968_v54 = vpop.xlane.xlu1 %1967 }
 0x2af   : > { %v2056_v32 = vsub.f32 %v20436_v60, %v1968_v54 }
 0x2b0   : > { %v1965_v18 = vpop.xlane.xlu0 %1964 }
 0x2b1   : > { %v2091_v0 = vmul.f32 1.442695, %v2056_v32  ;;  %v2055_v39 = vsub.f32 %v20441_v63, %v1965_v18 }
 0x2b3   : > { %19202 = vpow2.f32 %v2091_v0  ;;  %v2089_v44 = vmul.f32 1.442695, %v2055_v39 }
 0x2b5   : > { %19204 = vpow2.f32 %v2089_v44 }
 0x2b6   : > { %v1974_v20 = vpop.xlane.xlu0 %1973 }
 0x2b7   : > { %v2058_v34 = vsub.f32 %v20446_v9, %v1974_v20 }
 0x2b8   : > { %v20638_v16 = vpop.eup %19198 }
 0x2b9   : > { %v2095_v31 = vmul.f32 1.442695, %v2058_v34  ;;  %v2152_v23 = vsel %vm1956_vm1, %v20638_v16, 0.0 }
 0x2ba   : > { %v20642_v24 = vpop.eup %19200  ;;  %v1986_v25 = vpop.xlane.xlu0 %1985  ;;  %2153 = vadd.xlane.f32.xlu0 %v2152_v23 }
 0x2bb   : > { %19206 = vpow2.f32 %v2095_v31  ;;  %v2062_v54 = vsub.f32 %v20451_v36, %v1986_v25  ;;  %v2149_v61 = vsel %vm1956_vm1, %v20642_v24, 0.0 }
 0x2bc   : > { %2150 = vadd.xlane.f32.xlu1 %v2149_v61 }
 0x2bd   : > { %v2103_v44 = vmul.f32 1.442695, %v2062_v54 }
 0x2be   : > { %v1971_v0 = vpop.xlane.xlu0 %1970  ;;  %v1980_v29 = vpop.xlane.xlu1 %1979 }
 0x2bf   : > { %19208 = vpow2.f32 %v2103_v44  ;;  %v2057_v60 = vsub.f32 %v20456_v62, %v1971_v0  ;;  %v2060_v63 = vsub.f32 %v20459_v45, %v1980_v29 }
 0x2c0   : > { %v20649_v9 = vpop.eup %19202 }
 0x2c1   : > { %v2093_v39 = vmul.f32 1.442695, %v2057_v60  ;;  %v2099_v20 = vmul.f32 1.442695, %v2060_v63  ;;  %v2158_v32 = vsel %vm1956_vm1, %v20649_v9, 0.0 }
 0x2c2   : > { %v20653_v36 = vpop.eup %19204  ;;  %v1983_v18 = vpop.xlane.xlu0 %1982  ;;  %2159 = vadd.xlane.f32.xlu1 %v2158_v32 }
 0x2c3   : > { %v1977_v34 = vpop.xlane.xlu1 %1976  ;;  %19210 = vpow2.f32 %v2093_v39  ;;  %v2061_v31 = vsub.f32 %v20466_v5, %v1983_v18  ;;  %v2155_v25 = vsel %vm1956_vm1, %v20653_v36, 0.0 }
 0x2c4   : > { %v2059_v23 = vsub.f32 %v20469_v12, %v1977_v34  ;;  %19212 = vpow2.f32 %v2099_v20 }
 0x2c5   : > { %v2101_v62 = vmul.f32 1.442695, %v2061_v31 }
 0x2c6   : > { %v2097_v45 = vmul.f32 1.442695, %v2059_v23  ;;  %v1998_v54 = vpop.xlane.xlu0 %1997  ;;  %2156 = vadd.xlane.f32.xlu1 %v2155_v25 }
 0x2c7   : > { %v1992_v61 = vpop.xlane.xlu1 %1991  ;;  %19214 = vpow2.f32 %v2101_v62  ;;  %v2066_v44 = vsub.f32 %v20472_v58, %v1998_v54 }
 0x2c8   : > { %v2064_v0 = vsub.f32 %v20479_v46, %v1992_v61  ;;  %v20661_v29 = vpop.eup %19206  ;;  %19216 = vpow2.f32 %v2097_v45 }
 0x2c9   : > { %v2111_v5 = vmul.f32 1.442695, %v2066_v44  ;;  %v2164_v12 = vsel %vm1956_vm1, %v20661_v29, 0.0 }
 0x2ca   : > { %v2107_v60 = vmul.f32 1.442695, %v2064_v0  ;;  %v1995_v63 = vpop.xlane.xlu0 %1994  ;;  %2165 = vadd.xlane.f32.xlu0 %v2164_v12 }
 0x2cb   : > { %v1989_v39 = vpop.xlane.xlu1 %1988  ;;  %19218 = vpow2.f32 %v2111_v5  ;;  %v2065_v20 = vsub.f32 %v20486_v49, %v1995_v63 }
 0x2cc   : > { %v2063_v32 = vsub.f32 %v20489_v40, %v1989_v39  ;;  %v20667_v18 = vpop.eup %19208  ;;  %19220 = vpow2.f32 %v2107_v60 }
 0x2cd   : > { %v2109_v58 = vmul.f32 1.442695, %v2065_v20  ;;  %v2176_v34 = vsel %vm1956_vm1, %v20667_v18, 0.0 }
 0x2ce   : > { %v2105_v46 = vmul.f32 1.442695, %v2063_v32  ;;  %v2010_v31 = vpop.xlane.xlu0 %2009  ;;  %2177 = vadd.xlane.f32.xlu0 %v2176_v34 }
 0x2cf   : > { %19222 = vpow2.f32 %v2109_v58  ;;  %v2070_v23 = vsub.f32 %v20496_v47, %v2010_v31  ;;  %v2004_v62 = vpop.xlane.xlu1 %2003 }
 0x2d0   : > { %v20672_v45 = vpop.eup %19210  ;;  %19224 = vpow2.f32 %v2105_v46  ;;  %v2068_v49 = vsub.f32 %v20499_v30, %v2004_v62 }
 0x2d1   : > { %v20675_v40 = vpop.eup %19212  ;;  %v2119_v25 = vmul.f32 1.442695, %v2070_v23  ;;  %v2161_v54 = vsel %vm1956_vm1, %v20672_v45, 0.0 }
 0x2d2   : > { %v2115_v61 = vmul.f32 1.442695, %v2068_v49  ;;  %v2007_v44 = vpop.xlane.xlu0 %2006  ;;  %2162 = vadd.xlane.f32.xlu0 %v2161_v54  ;;  %v2170_v0 = vsel %vm1956_vm1, %v20675_v40, 0.0 }
 0x2d3   : > { %19226 = vpow2.f32 %v2119_v25  ;;  %v2069_v47 = vsub.f32 %v20504_v43, %v2007_v44  ;;  %v2001_v5 = vpop.xlane.xlu1 %2000  ;;  %2171 = vadd.xlane.f32.xlu1 %v2170_v0 }
 0x2d4   : > { %v20682_v60 = vpop.eup %19214  ;;  %19228 = vpow2.f32 %v2115_v61  ;;  %v2067_v30 = vsub.f32 %v20509_v28, %v2001_v5 }
 0x2d5   : > { %v20685_v12 = vpop.eup %19216  ;;  %v2117_v63 = vmul.f32 1.442695, %v2069_v47  ;;  %v2173_v39 = vsel %vm1956_vm1, %v20682_v60, 0.0 }
 0x2d6   : > { %v2113_v20 = vmul.f32 1.442695, %v2067_v30  ;;  %v2022_v32 = vpop.xlane.xlu0 %2021  ;;  %2174 = vadd.xlane.f32.xlu0 %v2173_v39  ;;  %v2167_v58 = vsel %vm1956_vm1, %v20685_v12, 0.0 }
 0x2d7   : > { %19230 = vpow2.f32 %v2117_v63  ;;  %v2074_v43 = vsub.f32 %v20514_v52, %v2022_v32  ;;  %v2019_v46 = vpop.xlane.xlu1 %2018  ;;  %2168 = vadd.xlane.f32.xlu1 %v2167_v58 }
 0x2d8   : > { %v20692_v34 = vpop.eup %19218  ;;  %19232 = vpow2.f32 %v2113_v20  ;;  %v2073_v28 = vsub.f32 %v20519_v35, %v2019_v46 }
 0x2d9   : > { %v20695_v31 = vpop.eup %19220  ;;  %v2127_v23 = vmul.f32 1.442695, %v2074_v43  ;;  %v2188_v62 = vsel %vm1956_vm1, %v20692_v34, 0.0 }
 0x2da   : > { %v2125_v49 = vmul.f32 1.442695, %v2073_v28  ;;  %v2016_v25 = vpop.xlane.xlu0 %2015  ;;  %2189 = vadd.xlane.f32.xlu0 %v2188_v62  ;;  %v2182_v54 = vsel %vm1956_vm1, %v20695_v31, 0.0 }
 0x2db   : > { %19234 = vpow2.f32 %v2127_v23  ;;  %v2072_v52 = vsub.f32 %v20524_v38, %v2016_v25  ;;  %v2013_v61 = vpop.xlane.xlu1 %2012  ;;  %2183 = vadd.xlane.f32.xlu1 %v2182_v54 }
 0x2dc   : > { %v20702_v44 = vpop.eup %19222  ;;  %19236 = vpow2.f32 %v2125_v49  ;;  %v2071_v47 = vsub.f32 %v20529_v21, %v2013_v61 }
 0x2dd   : > { %v20704_v35 = vpop.eup %19224  ;;  %v2123_v0 = vmul.f32 1.442695, %v2072_v52  ;;  %v2185_v5 = vsel %vm1956_vm1, %v20702_v44, 0.0 }
 0x2de   : > { %v2034_v30 = vpop.xlane.xlu0 %2033  ;;  %2186 = vadd.xlane.f32.xlu0 %v2185_v5  ;;  %v2179_v63 = vsel %vm1956_vm1, %v20704_v35, 0.0  ;;  %v2121_v21 = vmul.f32 1.442695, %v2071_v47 }
 0x2df   : > { %19238 = vpow2.f32 %v2123_v0  ;;  %v2078_v38 = vsub.f32 %v20534_v3, %v2034_v30  ;;  %v2031_v39 = vpop.xlane.xlu1 %2030  ;;  %2180 = vadd.xlane.f32.xlu1 %v2179_v63 }
 0x2e0   : > { %v20712_v20 = vpop.eup %19226  ;;  %v2077_v32 = vsub.f32 %v20539_v19, %v2031_v39 }
 0x2e1   : > { %v20715_v58 = vpop.eup %19228  ;;  %v2135_v43 = vmul.f32 1.442695, %v2078_v38  ;;  %v2200_v46 = vsel %vm1956_vm1, %v20712_v20, 0.0 }
 0x2e2   : > { %v2133_v28 = vmul.f32 1.442695, %v2077_v32  ;;  %v2028_v23 = vpop.xlane.xlu0 %2027  ;;  %2201 = vadd.xlane.f32.xlu0 %v2200_v46  ;;  %v2194_v62 = vsel %vm1956_vm1, %v20715_v58, 0.0 }
 0x2e3   : > { %19240 = vpow2.f32 %v2135_v43  ;;  %v2076_v3 = vsub.f32 %v20544_v33, %v2028_v23  ;;  %v2025_v49 = vpop.xlane.xlu1 %2024  ;;  %2195 = vadd.xlane.f32.xlu1 %v2194_v62 }
 0x2e4   : > { %v20722_v25 = vpop.eup %19230  ;;  %19242 = vpow2.f32 %v2133_v28  ;;  %v2075_v52 = vsub.f32 %v20549_v7, %v2025_v49 }
 0x2e5   : > { %v20724_v19 = vpop.eup %19232  ;;  %19244 = vpow2.f32 %v2121_v21  ;;  %v2131_v54 = vmul.f32 1.442695, %v2076_v3  ;;  %v2197_v61 = vsel %vm1956_vm1, %v20722_v25, 0.0 }
 0x2e6   : > { %v2046_v0 = vpop.xlane.xlu0 %2045  ;;  %2198 = vadd.xlane.f32.xlu0 %v2197_v61  ;;  %v2191_v47 = vsel %vm1956_vm1, %v20724_v19, 0.0  ;;  %v2129_v7 = vmul.f32 1.442695, %v2075_v52 }
 0x2e7   : > { %19246 = vpow2.f32 %v2131_v54  ;;  %v2082_v33 = vsub.f32 %v20554_v8, %v2046_v0  ;;  %v2043_v5 = vpop.xlane.xlu1 %2042  ;;  %2192 = vadd.xlane.f32.xlu1 %v2191_v47 }
 0x2e8   : > { %v20732_v30 = vpop.eup %19234  ;;  %v2081_v63 = vsub.f32 %v20559_v6, %v2043_v5 }
 0x2e9   : > { %v20735_v38 = vpop.eup %19236  ;;  %v2143_v39 = vmul.f32 1.442695, %v2082_v33  ;;  %v2212_v32 = vsel %vm1956_vm1, %v20732_v30, 0.0 }
 0x2ea   : > { %v2141_v21 = vmul.f32 1.442695, %v2081_v63  ;;  %v2040_v43 = vpop.xlane.xlu0 %2039  ;;  %2213 = vadd.xlane.f32.xlu0 %v2212_v32  ;;  %v2209_v46 = vsel %vm1956_vm1, %v20735_v38, 0.0 }
 0x2eb   : > { %19248 = vpow2.f32 %v2143_v39  ;;  %v2080_v8 = vsub.f32 %v20564_v42, %v2040_v43  ;;  %v2037_v28 = vpop.xlane.xlu1 %2036  ;;  %2210 = vadd.xlane.f32.xlu1 %v2209_v46 }
 0x2ec   : > { %v20742_v23 = vpop.eup %19238  ;;  %19250 = vpow2.f32 %v2141_v21  ;;  %v2079_v6 = vsub.f32 %v20569_v57, %v2037_v28 }
 0x2ed   : > { %19252 = vpow2.f32 %v2129_v7  ;;  %v2139_v62 = vmul.f32 1.442695, %v2080_v8  ;;  %v2206_v3 = vsel %vm1956_vm1, %v20742_v23, 0.0 }
 0x2ee   : > { %v2137_v49 = vmul.f32 1.442695, %v2079_v6  ;;  %2207 = vadd.xlane.f32.xlu0 %v2206_v3 }
 0x2ef   : > { %v2052_v54 = vpop.xlane.xlu0 %2051 }
 0x2f0   : > { %v20747_v52 = vpop.eup %19240  ;;  %19254 = vpow2.f32 %v2137_v49  ;;  %v2084_v42 = vsub.f32 %v20576_v17, %v2052_v54 }
 0x2f1   : > { %v20750_v61 = vpop.eup %19242  ;;  %19256 = vpow2.f32 %v2139_v62  ;;  %v2049_v0 = vpop.xlane.xlu1 %2048  ;;  %v2224_v57 = vsel %vm1956_vm1, %v20747_v52, 0.0 }
 0x2f2   : > { %v20754_v47 = vpop.eup %19244  ;;  %v2147_v33 = vmul.f32 1.442695, %v2084_v42  ;;  %v2083_v5 = vsub.f32 %v20581_v14, %v2049_v0  ;;  %v2221_v63 = vsel %vm1956_vm1, %v20750_v61, 0.0  ;;  %2225 = vadd.xlane.f32.xlu1 %v2224_v57 }
 0x2f3   : > { %2222 = vadd.xlane.f32.xlu0 %v2221_v63  ;;  %v2203_v32 = vsel %vm1956_vm1, %v20754_v47, 0.0  ;;  %v20799_v63 = vpop.permute.xlu0 %3559 }
 0x2f4   : > { %v20759_v7 = vpop.eup %19246  ;;  %v2145_v17 = vmul.f32 1.442695, %v2083_v5  ;;  %19258 = vpow2.f32 %v2147_v33  ;;  %v510_v33 = vmul.f32 %v20317_v53, %v20066_v56  ;;  %v511_v5 = vmul.f32 %v20317_v53, %v20060_v48 }
 0x2f5   : > { %v2218_v39 = vsel %vm1956_vm1, %v20759_v7, 0.0 }
 0x2f6   : > { %19260 = vpow2.f32 %v2145_v17  ;;  %2204 = vadd.xlane.f32.xlu1 %v2203_v32  ;;  %v20801_v17 = vpop.permute.xlu1 %3557 }
 0x2f7   : > { %2219 = vadd.xlane.f32.xlu0 %v2218_v39 }
 0x2f8   : > { %v20765_v21 = vpop.eup %19248 }
 0x2f9   : > { %v20767_v14 = vpop.eup %19250  ;;  %v2236_v43 = vsel %vm1956_vm1, %v20765_v21, 0.0 }
 0x2fa   : > { %v20771_v46 = vpop.eup %19252  ;;  %v2233_v8 = vsel %vm1956_vm1, %v20767_v14, 0.0  ;;  %2237 = vadd.xlane.f32.xlu1 %v2236_v43 }
 0x2fb   : > { %2234 = vadd.xlane.f32.xlu0 %v2233_v8  ;;  %v2215_v6 = vsel %vm1956_vm1, %v20771_v46, 0.0 }
 0x2fd   : > { %v20775_v28 = vpop.eup %19254 }
 0x2fe   : > { %v20779_v62 = vpop.eup %19256  ;;  %v2227_v3 = vsel %vm1956_vm1, %v20775_v28, 0.0  ;;  %2216 = vadd.xlane.f32.xlu1 %v2215_v6 }
 0x2ff   : > { %2228 = vadd.xlane.f32.xlu0 %v2227_v3  ;;  %v2230_v49 = vsel %vm1956_vm1, %v20779_v62, 0.0 }
 0x301   : > { %v20785_v54 = vpop.eup %19258 }
 0x302   : > { %2231 = vadd.xlane.f32.xlu1 %v2230_v49  ;;  %v2242_v57 = vsel %vm1956_vm1, %v20785_v54, 0.0 }
 0x303   : > { %v20787_v42 = vpop.eup %19260 }
 0x304   : > { %v2239_v0 = vsel %vm1956_vm1, %v20787_v42, 0.0 }
 0x305   : > { %2240 = vadd.xlane.f32.xlu0 %v2239_v0 }
 0x306   : > { %2243 = vadd.xlane.f32.xlu1 %v2242_v57 }
 0x317   : > { %3646 = vrot.lane.b32.xlu1 %v510_v33, %s19757_s5 }
 0x31b   : > { %3648 = vrot.lane.b32.xlu0 %v511_v5, %s19757_s5 }
 0x343   : > { %v2154_v39 = vpop.xlane.xlu0 %2153 }
 0x344   : > { %19262 = vrcp.f32 %v2154_v39 }
 0x345   : > { %v2151_v32 = vpop.xlane.xlu1 %2150 }
 0x346   : > { %19264 = vrcp.f32 %v2151_v32 }
 0x34b   : > { %v2160_v43 = vpop.xlane.xlu1 %2159 }
 0x34c   : > { %19266 = vrcp.f32 %v2160_v43 }
 0x34f   : > { %v2157_v8 = vpop.xlane.xlu1 %2156 }
 0x350   : > { %19268 = vrcp.f32 %v2157_v8 }
 0x351   : > { %v19263_v56 = vpop.eup %19262 }
 0x352   : > { %v2278_v48 = vmul.f32 %v19263_v56, %v20638_v16 }
 0x353   : > { %v19265_v6 = vpop.eup %19264  ;;  %v2166_v3 = vpop.xlane.xlu0 %2165 }
 0x354   : > { %v2277_v49 = vmul.f32 %v19265_v6, %v20642_v24  ;;  %19270 = vrcp.f32 %v2166_v3 }
 0x356   : > { %18058 = vmatprep.mubr.msk.f32.mxu0 %vm1956_vm1, %v2277_v49 }
 0x357   : > { %v2178_v0 = vpop.xlane.xlu0 %2177  ;;  %18059 = vmatmul.mubr.msk.f32.vlgmr.msra.gmra.mxu0 %vm1956_vm1, %v2278_v48 }
 0x358   : > { %18062 = vmatpush3.msra.mxu0 %v20412_v2 }
 0x359   : > { %18063 = vmatprep.subr.mxu0 %v20415_v11  ;;  %v19267_v33 = vpop.eup %19266 }
 0x35a   : > { %18064 = vmatpush3.msra.mxu0 %v20415_v11  ;;  %v2280_v32 = vmul.f32 %v19267_v33, %v20649_v9 }
 0x35b   : > { %18075 = vmatprep.subr.mxu0 %v20585_v22  ;;  %v2163_v57 = vpop.xlane.xlu0 %2162 }
 0x35c   : > { %19272 = vrcp.f32 %v2163_v57  ;;  %v2172_v24 = vpop.xlane.xlu1 %2171 }
 0x35d   : > { %v19269_v5 = vpop.eup %19268  ;;  %19274 = vrcp.f32 %v2178_v0 }
 0x35e   : > { %v2279_v16 = vmul.f32 %v19269_v5, %v20653_v36  ;;  %19276 = vrcp.f32 %v2172_v24 }
 0x35f   : > { %v2175_v39 = vpop.xlane.xlu0 %2174 }
 0x360   : > { %19278 = vrcp.f32 %v2175_v39  ;;  %v2169_v2 = vpop.xlane.xlu1 %2168  ;;  %18065 = vmatprep.mubr.msk.f32.mxu0 %vm1956_vm1, %v2279_v16 }
 0x361   : > { %19280 = vrcp.f32 %v2169_v2  ;;  %18066 = vmatmul.mubr.msk.f32.vlgmr.msra.gmra.mxu0 %vm1956_vm1, %v2280_v32  ;;  %v19271_v36 = vpop.eup %19270 }
 0x362   : > { %18076 = vmatpush3.msra.mxu0 %v20585_v22  ;;  %v2282_v49 = vmul.f32 %v19271_v36, %v20661_v29 }
 0x363   : > { %18077 = vmatprep.subr.mxu0 %v20589_v55  ;;  %v2190_v11 = vpop.xlane.xlu0 %2189 }
 0x364   : > { %18078 = vmatpush3.msra.mxu0 %v20589_v55  ;;  %v2184_v43 = vpop.xlane.xlu1 %2183  ;;  %19282 = vrcp.f32 %v2190_v11 }
 0x365   : > { %18089 = vmatprep.subr.mxu0 %v20593_v37  ;;  %19284 = vrcp.f32 %v2184_v43 }
 0x367   : > { %v2187_v9 = vpop.xlane.xlu0 %2186 }
 0x368   : > { %19286 = vrcp.f32 %v2187_v9  ;;  %v2181_v8 = vpop.xlane.xlu1 %2180 }
 0x369   : > { %v19273_v56 = vpop.eup %19272  ;;  %19288 = vrcp.f32 %v2181_v8 }
 0x36a   : > { %v2281_v6 = vmul.f32 %v19273_v56, %v20672_v45  ;;  %v19275_v3 = vpop.eup %19274 }
 0x36b   : > { %v2202_v22 = vpop.xlane.xlu0 %2201  ;;  %v19277_v48 = vpop.eup %19276  ;;  %v2286_v16 = vmul.f32 %v19275_v3, %v20667_v18  ;;  %v24953_v3 = vld [vmem:[#allocation43_spill] sm:$0xff] }
 0x36c   : > { %v2196_v0 = vpop.xlane.xlu1 %2195  ;;  %18072 = vmatprep.mubr.msk.f32.mxu1 %vm1956_vm1, %v2281_v6  ;;  %19290 = vrcp.f32 %v2202_v22  ;;  %v2284_v5 = vmul.f32 %v19277_v48, %v20675_v40 }
 0x36d   : > { %v19279_v55 = vpop.eup %19278  ;;  %18073 = vmatmul.mubr.msk.f32.vlgmr.msra.gmra.mxu1 %vm1956_vm1, %v2282_v49  ;;  %19292 = vrcp.f32 %v2196_v0 }
 0x36e   : > { %v19281_v57 = vpop.eup %19280  ;;  %18083 = vmatpush3.msra.mxu1 %v20417_v26  ;;  %v2285_v33 = vmul.f32 %v19279_v55, %v20682_v60 }
 0x36f   : > { %18084 = vmatprep.subr.mxu1 %v20587_v27  ;;  %v2199_v45 = vpop.xlane.xlu0 %2198  ;;  %v2283_v24 = vmul.f32 %v19281_v57, %v20685_v12 }
 0x370   : > { %18085 = vmatpush3.msra.mxu1 %v20587_v27  ;;  %19294 = vrcp.f32 %v2199_v45  ;;  %v2193_v29 = vpop.xlane.xlu1 %2192  ;;  %18086 = vmatprep.mubr.msk.f32.mxu1 %vm1956_vm1, %v2285_v33 }
 0x371   : > { %19296 = vrcp.f32 %v2193_v29  ;;  %18079 = vmatprep.mubr.msk.f32.mxu0 %vm1956_vm1, %v2283_v24  ;;  %18096 = vmatprep.subr.mxu1 %v20591_v50  ;;  %v19283_v26 = vpop.eup %19282 }
 0x372   : > { %18080 = vmatmul.mubr.msk.f32.vlgmr.msra.gmra.mxu0 %vm1956_vm1, %v2284_v5  ;;  %18087 = vmatmul.mubr.msk.f32.vlgmr.msra.gmra.mxu1 %vm1956_vm1, %v2286_v16  ;;  %v19285_v60 = vpop.eup %19284  ;;  %v2290_v32 = vmul.f32 %v19283_v26, %v20692_v34  ;;  %v24954_v5 = vld [vmem:[#allocation41_spill] sm:$0xff]  ;;  %v24955_v26 = vld [vmem:[#allocation42_spill] sm:$0xff] }
 0x373   : > { %18090 = vmatpush3.msra.mxu0 %v20593_v37  ;;  %18097 = vmatpush3.msra.mxu1 %v20591_v50  ;;  %v2214_v27 = vpop.xlane.xlu0 %2213  ;;  %v2288_v2 = vmul.f32 %v19285_v60, %v20695_v31 }
 0x374   : > { %18091 = vmatprep.subr.mxu0 %v20600_v4  ;;  %18098 = vmatprep.subr.mxu1 %v20597_v59  ;;  %19298 = vrcp.f32 %v2214_v27  ;;  %v2211_v18 = vpop.xlane.xlu1 %2210 }
 0x375   : > { %v19287_v40 = vpop.eup %19286  ;;  %18099 = vmatpush3.msra.mxu1 %v20597_v59  ;;  %18092 = vmatpush3.msra.mxu0 %v20600_v4  ;;  %19300 = vrcp.f32 %v2211_v18 }
 0x376   : > { %v19289_v12 = vpop.eup %19288  ;;  %18103 = vmatprep.subr.mxu0 %v20627_v51  ;;  %18110 = vmatprep.subr.mxu1 %v20605_v15  ;;  %v2289_v50 = vmul.f32 %v19287_v40, %v20702_v44  ;;  %v24956_v40 = vld [vmem:[#allocation44_spill] sm:$0xff] }
 0x377   : > { %v2208_v37 = vpop.xlane.xlu0 %2207  ;;  %v2287_v39 = vmul.f32 %v19289_v12, %v20704_v35 }
 0x378   : > { %18100 = vmatprep.mubr.msk.f32.mxu1 %vm1956_vm1, %v2289_v50 }
 0x379   : > { %18093 = vmatprep.mubr.msk.f32.mxu0 %vm1956_vm1, %v2287_v39  ;;  %18101 = vmatmul.mubr.msk.f32.vlgmr.msra.gmra.mxu1 %vm1956_vm1, %v2290_v32  ;;  %v19291_v59 = vpop.eup %19290 }
 0x37a   : > { %18094 = vmatmul.mubr.msk.f32.vlgmr.msra.gmra.mxu0 %vm1956_vm1, %v2288_v2  ;;  %18111 = vmatpush3.msra.mxu1 %v20605_v15  ;;  %v19293_v44 = vpop.eup %19292  ;;  %v2294_v43 = vmul.f32 %v19291_v59, %v20712_v20 }
 0x37b   : > { %18104 = vmatpush3.msra.mxu0 %v20627_v51  ;;  %18112 = vmatprep.subr.mxu1 %v20609_v13  ;;  %v2226_v4 = vpop.xlane.xlu1 %2225  ;;  %v2292_v9 = vmul.f32 %v19293_v44, %v20715_v58  ;;  %v24950_v58 = vld [vmem:[#allocation37_spill] sm:$0xff] }
 0x37c   : > { %18105 = vmatprep.subr.mxu0 %v20631_v41  ;;  %18113 = vmatpush3.msra.mxu1 %v20609_v13  ;;  %v2223_v34 = vpop.xlane.xlu0 %2222  ;;  %19302 = vrcp.f32 %v2226_v4 }
 0x37d   : > { %v19295_v31 = vpop.eup %19294  ;;  %19304 = vrcp.f32 %v2223_v34  ;;  %18106 = vmatpush3.msra.mxu0 %v20631_v41  ;;  %18124 = vmatprep.subr.mxu1 %v20611_v10 }
 0x37e   : > { %v19297_v15 = vpop.eup %19296  ;;  %18117 = vmatprep.subr.mxu0 %v20607_v1  ;;  %v2293_v51 = vmul.f32 %v19295_v31, %v20722_v25  ;;  %19306 = vrcp.f32 %v2208_v37  ;;  %v24949_v25 = vld [vmem:[#allocation39_spill] sm:$0xff] }
 0x37f   : > { %v2205_v35 = vpop.xlane.xlu1 %2204  ;;  %v2291_v11 = vmul.f32 %v19297_v15, %v20724_v19 }
 0x380   : > { %v2220_v13 = vpop.xlane.xlu0 %2219  ;;  %19308 = vrcp.f32 %v2205_v35  ;;  %18114 = vmatprep.mubr.msk.f32.mxu1 %vm1956_vm1, %v2293_v51 }
 0x381   : > { %v19299_v41 = vpop.eup %19298  ;;  %18107 = vmatprep.mubr.msk.f32.mxu0 %vm1956_vm1, %v2291_v11  ;;  %18115 = vmatmul.mubr.msk.f32.vlgmr.msra.gmra.mxu1 %vm1956_vm1, %v2294_v43 }
 0x382   : > { %v19301_v36 = vpop.eup %19300  ;;  %18108 = vmatmul.mubr.msk.f32.vlgmr.msra.gmra.mxu0 %vm1956_vm1, %v2292_v9  ;;  %18125 = vmatpush3.msra.mxu1 %v20611_v10  ;;  %v2298_v8 = vmul.f32 %v19299_v41, %v20732_v30  ;;  %v24951_v10 = vld [vmem:[#allocation38_spill] sm:$0xff] }
 0x383   : > { %18118 = vmatpush3.msra.mxu0 %v20607_v1  ;;  %18126 = vmatprep.subr.mxu1 %v24949_v25  ;;  %v2238_v20 = vpop.xlane.xlu1 %2237  ;;  %v2297_v19 = vmul.f32 %v19301_v36, %v20735_v38  ;;  %v24952_v1 = vld [vmem:[#allocation40_spill] sm:$0xff] }
 0x384   : > { %18119 = vmatprep.subr.mxu0 %v24950_v58  ;;  %18127 = vmatpush3.msra.mxu1 %v24949_v25  ;;  %v2235_v56 = vpop.xlane.xlu0 %2234  ;;  %19310 = vrcp.f32 %v2238_v20 }
 0x385   : > { %19312 = vrcp.f32 %v2235_v56  ;;  %18120 = vmatpush3.msra.mxu0 %v24950_v58  ;;  %18128 = vmatprep.mubr.msk.f32.mxu1 %vm1956_vm1, %v2297_v19 }
 0x386   : > { %18131 = vmatprep.subr.mxu0 %v24951_v10  ;;  %18138 = vmatprep.subr.mxu1 %v24952_v1  ;;  %19314 = vrcp.f32 %v2220_v13 }
 0x387   : > { %18129 = vmatmul.mubr.msk.f32.vlgmr.msra.gmra.mxu1 %vm1956_vm1, %v2298_v8  ;;  %v2217_v38 = vpop.xlane.xlu1 %2216 }
 0x388   : > { %18139 = vmatpush3.msra.mxu1 %v24952_v1  ;;  %v2229_v30 = vpop.xlane.xlu0 %2228  ;;  %19316 = vrcp.f32 %v2217_v38 }
 0x389   : > { %v19303_v6 = vpop.eup %19302  ;;  %18140 = vmatprep.subr.mxu1 %v24953_v3  ;;  %19318 = vrcp.f32 %v2229_v30 }
 0x38a   : > { %v19305_v22 = vpop.eup %19304  ;;  %18141 = vmatpush3.msra.mxu1 %v24953_v3  ;;  %v2302_v49 = vmul.f32 %v19303_v6, %v20747_v52 }
 0x38b   : > { %18152 = vmatprep.subr.mxu1 %v20799_v63  ;;  %v2232_v48 = vpop.xlane.xlu1 %2231  ;;  %v2301_v0 = vmul.f32 %v19305_v22, %v20750_v61  ;;  %v19307_v55 = vpop.eup %19306 }
 0x38c   : > { %19320 = vrcp.f32 %v2232_v48  ;;  %v2296_v52 = vmul.f32 %v19307_v55, %v20742_v23 }
 0x38d   : > { %v19309_v57 = vpop.eup %19308  ;;  %18142 = vmatprep.mubr.msk.f32.mxu1 %vm1956_vm1, %v2301_v0 }
 0x38e   : > { %v2241_v33 = vpop.xlane.xlu0 %2240  ;;  %18143 = vmatmul.mubr.msk.f32.vlgmr.msra.gmra.mxu1 %vm1956_vm1, %v2302_v49  ;;  %v2295_v45 = vmul.f32 %v19309_v57, %v20754_v47 }
 0x38f   : > { %19322 = vrcp.f32 %v2241_v33  ;;  %18153 = vmatpush3.msra.mxu1 %v20799_v63  ;;  %v2244_v24 = vpop.xlane.xlu1 %2243 }
 0x390   : > { %18154 = vmatprep.subr.mxu1 %v20801_v17  ;;  %19324 = vrcp.f32 %v2244_v24  ;;  %18121 = vmatprep.mubr.msk.f32.mxu0 %vm1956_vm1, %v2295_v45 }
 0x391   : > { %v19311_v61 = vpop.eup %19310  ;;  %18155 = vmatpush3.msra.mxu1 %v20801_v17  ;;  %18122 = vmatmul.mubr.msk.f32.vlgmr.msra.gmra.mxu0 %vm1956_vm1, %v2296_v52 }
 0x392   : > { %v19313_v29 = vpop.eup %19312  ;;  %18132 = vmatpush3.msra.mxu0 %v24951_v10  ;;  %v2306_v47 = vmul.f32 %v19311_v61, %v20765_v21  ;;  %v3649_v50 = vpop.permute.xlu0 %3648 }
 0x393   : > { %18133 = vmatprep.subr.mxu0 %v24954_v5  ;;  %v2305_v63 = vmul.f32 %v19313_v29, %v20767_v14  ;;  %v19315_v23 = vpop.eup %19314 }
 0x394   : > { %18134 = vmatpush3.msra.mxu0 %v24954_v5  ;;  %v2300_v60 = vmul.f32 %v19315_v23, %v20759_v7 }
 0x395   : > { %v19317_v16 = vpop.eup %19316  ;;  %18145 = vmatprep.subr.mxu0 %v24955_v26  ;;  %18156 = vmatprep.mubr.msk.f32.mxu1 %vm1956_vm1, %v2305_v63 }
 0x396   : > { %v19319_v17 = vpop.eup %19318  ;;  %18157 = vmatmul.mubr.msk.f32.vlgmr.msra.gmra.mxu1 %vm1956_vm1, %v2306_v47  ;;  %v2299_v27 = vmul.f32 %v19317_v16, %v20771_v46 }
 0x397   : > { %v2303_v21 = vmul.f32 %v19319_v17, %v20775_v28  ;;  %v3647_v28 = vpop.permute.xlu1 %3646 }
 0x398   : > { %18135 = vmatprep.mubr.msk.f32.mxu0 %vm1956_vm1, %v2299_v27 }
 0x399   : > { %v19321_v14 = vpop.eup %19320  ;;  %18136 = vmatmul.mubr.msk.f32.vlgmr.msra.gmra.mxu0 %vm1956_vm1, %v2300_v60 }
 0x39a   : > { %18146 = vmatpush3.msra.mxu0 %v24955_v26  ;;  %18149 = vmatprep.mubr.msk.f32.mxu0 %vm1956_vm1, %v2303_v21  ;;  %v2304_v18 = vmul.f32 %v19321_v14, %v20779_v62  ;;  %v3749_v62 = vld [vmem:[%s24824_s1 + $0x10] sm:$0xff]  ;;  %v20939_v26 = vld [vmem:[%s24824_s1 + $0x18] ss:$0 sm:$0xff]  ;;  %v24957_v21 = vld [vmem:[#allocation10_spill] sm:$0xff] }
 0x39b   : > { %18147 = vmatprep.subr.mxu0 %v24956_v40  ;;  %18166 = vmatprep.subr.mxu1 %v3749_v62 }
 0x39c   : > { %v19323_v12 = vpop.eup %19322  ;;  %18148 = vmatpush3.msra.mxu0 %v24956_v40  ;;  %18167 = vmatpush3.msra.mxu1 %v3749_v62 }
 0x39d   : > { %v19325_v7 = vpop.eup %19324  ;;  %18159 = vmatprep.subr.mxu0 %v3649_v50  ;;  %18150 = vmatmul.mubr.msk.f32.vlgmr.msra.gmra.mxu0 %vm1956_vm1, %v2304_v18  ;;  %v2307_v46 = vmul.f32 %v19323_v12, %v20787_v42  ;;  %v24958_v12 = vld [vmem:[#allocation9_spill] sm:$0xff] }
 0x39e   : > { %18160 = vmatpush3.msra.mxu0 %v3649_v50  ;;  %v2308_v37 = vmul.f32 %v19325_v7, %v20785_v54 }
 0x39f   : > { %18161 = vmatprep.subr.mxu0 %v3647_v28  ;;  %18163 = vmatprep.mubr.msk.f32.mxu0 %vm1956_vm1, %v2307_v46 }
 0x3a0   : > { %18162 = vmatpush3.msra.mxu0 %v3647_v28 }
 0x3a1   : > { %18164 = vmatmul.mubr.msk.f32.vlgmr.msra.gmra.mxu0 %vm1956_vm1, %v2308_v37 }
 0x417   : > { %v18060_v2 = vpop.f32.mrf.mxu0 }
 0x419   : > { %v2389_v59 = vpop.f32.mrf.mxu0 }
 0x421   : > { %v18067_v4 = vpop.f32.mrf.mxu0 }
 0x423   : > { %v2478_v34 = vpop.f32.mrf.mxu0 }
 0x42d   : > { %v18074_v39 = vpop.f32.mrf.mxu1 }
 0x42f   : > { %v2567_v32 = vpop.f32.mrf.mxu1 }
 0x432   : > { %v18088_v42 = vpop.f32.mrf.mxu1  ;;  %v18081_v31 = vpop.f32.mrf.mxu0 }
 0x434   : > { %v2745_v44 = vpop.f32.mrf.mxu1  ;;  %v2656_v35 = vpop.f32.mrf.mxu0 }
 0x439   : > { %v18102_v54 = vpop.f32.mrf.mxu1 }
 0x43a   : > { %v18095_v13 = vpop.f32.mrf.mxu0 }
 0x43b   : > { %v2923_v15 = vpop.f32.mrf.mxu1 }
 0x43c   : > { %v2834_v41 = vpop.f32.mrf.mxu0 }
 0x441   : > { %v18116_v51 = vpop.f32.mrf.mxu1 }
 0x442   : > { %v3734_v9 = vadd.f32 %v18116_v51, %v18060_v2  ;;  %v18109_v36 = vpop.f32.mrf.mxu0 }
 0x443   : > { %v3101_v11 = vpop.f32.mrf.mxu1 }
 0x444   : > { %v3733_v43 = vadd.f32 %v3101_v11, %v2389_v59  ;;  %v3012_v25 = vpop.f32.mrf.mxu0 }
 0x446   : > { %18168 = vmatprep.mubr.msk.f32.mxu1 %vm238_vm0, %v3733_v43 }
 0x447   : > { %18169 = vmatmul.mubr.msk.f32.vlgmr.msra.gmra.mxu1 %vm238_vm0, %v3734_v9  ;;  %v18130_v20 = vpop.f32.mrf.mxu1 }
 0x448   : > { %v3738_v30 = vadd.f32 %v18130_v20, %v18074_v39  ;;  %v24963_v20 = vld [vmem:[#allocation18_spill] sm:$0xff] }
 0x449   : > { %v3279_v8 = vpop.f32.mrf.mxu1 }
 0x44a   : > { %v3737_v1 = vadd.f32 %v3279_v8, %v2567_v32  ;;  %v24959_v32 = vld [vmem:[#allocation11_spill] sm:$0xff] }
 0x44e   : > { %v18144_v38 = vpop.f32.mrf.mxu1 }
 0x44f   : > { %v3742_v45 = vadd.f32 %v18144_v38, %v18088_v42 }
 0x450   : > { %v3457_v3 = vpop.f32.mrf.mxu1 }
 0x451   : > { %v18123_v19 = vpop.f32.mrf.mxu0  ;;  %v3741_v55 = vadd.f32 %v3457_v3, %v2745_v44  ;;  %v24965_v3 = vld [vmem:[#allocation22_spill] sm:$0xff] }
 0x452   : > { %v3736_v10 = vadd.f32 %v18123_v19, %v18067_v4  ;;  %v24960_v4 = vld [vmem:[#allocation12_spill] sm:$0xff] }
 0x453   : > { %v3190_v58 = vpop.f32.mrf.mxu0 }
 0x454   : > { %v3735_v56 = vadd.f32 %v3190_v58, %v2478_v34 }
 0x456   : > { %18171 = vmatprep.mubr.msk.f32.mxu1 %vm238_vm0, %v3735_v56  ;;  %v18158_v57 = vpop.f32.mrf.mxu1  ;;  %v24964_v56 = vld [vmem:[#allocation20_spill] sm:$0xff] }
 0x457   : > { %18172 = vmatmul.mubr.msk.f32.gmra.mxu1 %vm238_vm0, %v3736_v10  ;;  %v3746_v63 = vadd.f32 %v18158_v57, %v18102_v54 }
 0x458   : > { %18174 = vmatprep.mubr.msk.f32.mxu1 %vm238_vm0, %v3737_v1  ;;  %v3635_v52 = vpop.f32.mrf.mxu1 }
 0x459   : > { %v18137_v6 = vpop.f32.mrf.mxu0  ;;  %v3745_v47 = vadd.f32 %v3635_v52, %v2923_v15  ;;  %v24961_v15 = vld [vmem:[#allocation14_spill] sm:$0xff] }
 0x45a   : > { %v3740_v48 = vadd.f32 %v18137_v6, %v18081_v31  ;;  %v24967_v52 = vld [vmem:[#allocation26_spill] sm:$0xff] }
 0x45b   : > { %v3368_v22 = vpop.f32.mrf.mxu0  ;;  %18175 = vmatmul.mubr.msk.f32.gmra.mxu1 %vm238_vm0, %v3738_v30 }
 0x45c   : > { %v3739_v49 = vadd.f32 %v3368_v22, %v2656_v35  ;;  %v24962_v35 = vld [vmem:[#allocation16_spill] sm:$0xff] }
 0x45d   : > { %v18151_v0 = vpop.f32.mrf.mxu0 }
 0x45e   : > { %18177 = vmatprep.mubr.msk.f32.mxu1 %vm238_vm0, %v3739_v49  ;;  %v3744_v29 = vadd.f32 %v18151_v0, %v18095_v13  ;;  %v24966_v0 = vld [vmem:[#allocation24_spill] sm:$0xff] }
 0x45f   : > { %v3546_v33 = vpop.f32.mrf.mxu0  ;;  %18178 = vmatmul.mubr.msk.f32.gmra.mxu1 %vm238_vm0, %v3740_v48 }
 0x460   : > { %18180 = vmatprep.mubr.msk.f32.mxu1 %vm238_vm0, %v3741_v55  ;;  %v3743_v24 = vadd.f32 %v3546_v33, %v2834_v41 }
 0x461   : > { %v18165_v61 = vpop.f32.mrf.mxu0 }
 0x462   : > { %v3748_v16 = vadd.f32 %v18165_v61, %v18109_v36 }
 0x463   : > { %18181 = vmatmul.mubr.msk.f32.gmra.mxu1 %vm238_vm0, %v3742_v45  ;;  %v3724_v5 = vpop.f32.mrf.mxu0 }
 0x464   : > { %18183 = vmatprep.mubr.msk.f32.mxu1 %vm238_vm0, %v3743_v24  ;;  %v3747_v23 = vadd.f32 %v3724_v5, %v3012_v25 }
 0x467   : > { %18184 = vmatmul.mubr.msk.f32.gmra.mxu1 %vm238_vm0, %v3744_v29  ;;  %v24968_v29 = vld [vmem:[#allocation28_spill] sm:$0xff] }
 0x468   : > { %18186 = vmatprep.mubr.msk.f32.mxu1 %vm238_vm0, %v3745_v47 }
 0x46b   : > { %18187 = vmatmul.mubr.msk.f32.gmra.mxu1 %vm238_vm0, %v3746_v63 }
 0x46c   : > { %18189 = vmatprep.mubr.msk.f32.mxu1 %vm238_vm0, %v3747_v23 }
 0x46f   : > { %18190 = vmatmul.mubr.msk.f32.gmra.mxu1 %vm238_vm0, %v3748_v16 }
 0x507   : > { %v18170_v17 = vpop.f32.mrf.mxu1 }
 0x508   : > { %v3875_v27 = vadd.f32 %v18170_v17, %v20939_v26 }
 0x509   : > { %v3869_v60 = vpop.f32.mrf.mxu1 }
 0x50a   : > { %v20943_v14 = vadd.f32 %v3875_v27, %v24957_v21  ;;  %v3870_v18 = vadd.f32 %v20939_v26, %v3869_v60  ;;  %v24969_v60 = vld [vmem:[#allocation30_spill] sm:$0xff] }
 0x50c   : > { %v3969_v40 = vsel %vm238_vm0, %v20943_v14, 0.0  ;;  %v20949_v50 = vadd.f32 %v3870_v18, %v24958_v12  ;;  %v24970_v12 = vld [vmem:[#allocation31_spill] sm:$0xff] }
 0x50d   : > { %3970 = vadd.xlane.f32.xlu1 %v3969_v40 }
 0x50e   : > { %v3966_v7 = vsel %vm238_vm0, %v20949_v50, 0.0 }
 0x50f   : > { %3967 = vadd.xlane.f32.xlu0 %v3966_v7 }
 0x517   : > { %v18173_v46 = vpop.f32.mrf.mxu1 }
 0x518   : > { %v3885_v37 = vadd.f32 %v18173_v46, %v20939_v26 }
 0x519   : > { %v3879_v28 = vpop.f32.mrf.mxu1 }
 0x51a   : > { %v3880_v62 = vadd.f32 %v20939_v26, %v3879_v28  ;;  %v20960_v44 = vadd.f32 %v3885_v37, %v24960_v4 }
 0x51b   : > { %v18176_v39 = vpop.f32.mrf.mxu1 }
 0x51c   : > { %v20956_v2 = vadd.f32 %v3880_v62, %v24959_v32  ;;  %v3895_v42 = vadd.f32 %v18176_v39, %v20939_v26  ;;  %v3975_v36 = vsel %vm238_vm0, %v20960_v44, 0.0  ;;  %v24971_v62 = vld [vmem:[#allocation32_spill] sm:$0xff]  ;;  %v24972_v32 = vld [vmem:[#allocation33_spill] sm:$0xff] }
 0x51d   : > { %v3889_v59 = vpop.f32.mrf.mxu1 }
 0x51e   : > { %v3890_v54 = vadd.f32 %v20939_v26, %v3889_v59  ;;  %v3972_v34 = vsel %vm238_vm0, %v20956_v2, 0.0  ;;  %v20969_v11 = vadd.f32 %v3895_v42, %v24962_v35 }
 0x51f   : > { %3973 = vadd.xlane.f32.xlu0 %v3972_v34  ;;  %v18179_v31 = vpop.f32.mrf.mxu1 }
 0x520   : > { %v20966_v51 = vadd.f32 %v3890_v54, %v24961_v15  ;;  %v3905_v13 = vadd.f32 %v18179_v31, %v20939_v26  ;;  %v3981_v58 = vsel %vm238_vm0, %v20969_v11, 0.0 }
 0x521   : > { %v3899_v43 = vpop.f32.mrf.mxu1 }
 0x522   : > { %v3900_v9 = vadd.f32 %v20939_v26, %v3899_v43  ;;  %v3978_v41 = vsel %vm238_vm0, %v20966_v51, 0.0  ;;  %v20983_v10 = vadd.f32 %v3905_v13, %v24964_v56 }
 0x523   : > { %3979 = vadd.xlane.f32.xlu1 %v3978_v41  ;;  %3976 = vadd.xlane.f32.xlu0 %v3975_v36  ;;  %v18182_v25 = vpop.f32.mrf.mxu1 }
 0x524   : > { %v20978_v19 = vadd.f32 %v3900_v9, %v24963_v20  ;;  %v3915_v1 = vadd.f32 %v18182_v25, %v20939_v26  ;;  %v3987_v33 = vsel %vm238_vm0, %v20983_v10, 0.0 }
 0x525   : > { %v3909_v8 = vpop.f32.mrf.mxu1 }
 0x526   : > { %v3910_v38 = vadd.f32 %v20939_v26, %v3909_v8  ;;  %v3984_v30 = vsel %vm238_vm0, %v20978_v19, 0.0  ;;  %v20994_v55 = vadd.f32 %v3915_v1, %v24966_v0 }
 0x527   : > { %3982 = vadd.xlane.f32.xlu0 %v3981_v58  ;;  %3985 = vadd.xlane.f32.xlu1 %v3984_v30  ;;  %v18185_v6 = vpop.f32.mrf.mxu1 }
 0x528   : > { %v20990_v22 = vadd.f32 %v3910_v38, %v24965_v3  ;;  %v3925_v49 = vadd.f32 %v18185_v6, %v20939_v26  ;;  %v3993_v16 = vsel %vm238_vm0, %v20994_v55, 0.0 }
 0x529   : > { %v3919_v48 = vpop.f32.mrf.mxu1 }
 0x52a   : > { %v3920_v57 = vadd.f32 %v20939_v26, %v3919_v48  ;;  %v3990_v45 = vsel %vm238_vm0, %v20990_v22, 0.0  ;;  %v21005_v47 = vadd.f32 %v3925_v49, %v24968_v29 }
 0x52b   : > { %3988 = vadd.xlane.f32.xlu0 %v3987_v33  ;;  %3991 = vadd.xlane.f32.xlu1 %v3990_v45  ;;  %v18188_v24 = vpop.f32.mrf.mxu1 }
 0x52c   : > { %v21002_v61 = vadd.f32 %v3920_v57, %v24967_v52  ;;  %v3935_v63 = vadd.f32 %v18188_v24, %v20939_v26  ;;  %v3999_v40 = vsel %vm238_vm0, %v21005_v47, 0.0 }
 0x52d   : > { %v3929_v5 = vpop.f32.mrf.mxu1 }
 0x52e   : > { %v3930_v23 = vadd.f32 %v20939_v26, %v3929_v5  ;;  %v3996_v17 = vsel %vm238_vm0, %v21002_v61, 0.0  ;;  %v21019_v7 = vadd.f32 %v3935_v63, %v24970_v12 }
 0x52f   : > { %3994 = vadd.xlane.f32.xlu0 %v3993_v16  ;;  %3997 = vadd.xlane.f32.xlu1 %v3996_v17  ;;  %v18191_v27 = vpop.f32.mrf.mxu1 }
 0x530   : > { %v21014_v21 = vadd.f32 %v3930_v23, %v24969_v60  ;;  %v3945_v46 = vadd.f32 %v18191_v27, %v20939_v26  ;;  %v4005_v59 = vsel %vm238_vm0, %v21019_v7, 0.0 }
 0x531   : > { %v3939_v18 = vpop.f32.mrf.mxu1 }
 0x532   : > { %v3940_v28 = vadd.f32 %v20939_v26, %v3939_v18  ;;  %v4002_v37 = vsel %vm238_vm0, %v21014_v21, 0.0  ;;  %v21029_v42 = vadd.f32 %v3945_v46, %v24972_v32 }
 0x533   : > { %4000 = vadd.xlane.f32.xlu0 %v3999_v40  ;;  %4003 = vadd.xlane.f32.xlu1 %v4002_v37 }
 0x534   : > { %v21026_v39 = vadd.f32 %v3940_v28, %v24971_v62  ;;  %v4011_v26 = vsel %vm238_vm0, %v21029_v42, 0.0 }
 0x536   : > { %v4008_v4 = vsel %vm238_vm0, %v21026_v39, 0.0 }
 0x537   : > { %4006 = vadd.xlane.f32.xlu0 %v4005_v59  ;;  %4009 = vadd.xlane.f32.xlu1 %v4008_v4 }
 0x53b   : > { %4012 = vadd.xlane.f32.xlu0 %v4011_v26 }
 0x596   : > { %v3971_v54 = vpop.xlane.xlu1 %3970 }
 0x597   : > { %v4016_v34 = vmul.f32 0.125, %v3971_v54 }
 0x598   : > { %v3968_v31 = vpop.xlane.xlu0 %3967 }
 0x599   : > { %v21038_v15 = vsub.f32 %v20943_v14, %v4016_v34  ;;  %v4015_v35 = vmul.f32 0.125, %v3968_v31 }
 0x59b   : > { %v21041_v43 = vsub.f32 %v20949_v50, %v4015_v35  ;;  %v4048_v13 = vmul.f32 %v21038_v15, %v21038_v15 }
 0x59d   : > { %v4066_v9 = vsel %vm238_vm0, %v4048_v13, 0.0  ;;  %v4047_v41 = vmul.f32 %v21041_v43, %v21041_v43 }
 0x59e   : > { %4067 = vadd.xlane.f32.xlu0 %v4066_v9 }
 0x59f   : > { %v4063_v36 = vsel %vm238_vm0, %v4047_v41, 0.0 }
 0x5a0   : > { %4064 = vadd.xlane.f32.xlu1 %v4063_v36 }
 0x5a8   : > { %v3974_v25 = vpop.xlane.xlu0 %3973 }
 0x5a9   : > { %v4017_v20 = vmul.f32 0.125, %v3974_v25 }
 0x5ab   : > { %v21050_v14 = vsub.f32 %v20956_v2, %v4017_v20 }
 0x5ac   : > { %v3977_v8 = vpop.xlane.xlu0 %3976  ;;  %v3980_v50 = vpop.xlane.xlu1 %3979 }
 0x5ad   : > { %v4018_v58 = vmul.f32 0.125, %v3977_v8  ;;  %v4019_v56 = vmul.f32 0.125, %v3980_v50  ;;  %v4049_v1 = vmul.f32 %v21050_v14, %v21050_v14  ;;  %v4215_v50 = vld [vmem:[%s24824_s1 + $0x30] sm:$0xff] }
 0x5ae   : > { %18192 = vmatprep.subr.mxu0 %v4215_v50 }
 0x5af   : > { %v21055_v38 = vsub.f32 %v20960_v44, %v4018_v58  ;;  %v21058_v30 = vsub.f32 %v20966_v51, %v4019_v56  ;;  %v4069_v6 = vsel %vm238_vm0, %v4049_v1, 0.0  ;;  %18193 = vmatpush3.msra.mxu0 %v4215_v50 }
 0x5b0   : > { %v3983_v3 = vpop.xlane.xlu0 %3982  ;;  %4070 = vadd.xlane.f32.xlu1 %v4069_v6  ;;  %v3986_v49 = vpop.xlane.xlu1 %3985 }
 0x5b1   : > { %v4020_v2 = vmul.f32 0.125, %v3983_v3  ;;  %v4021_v48 = vmul.f32 0.125, %v3986_v49  ;;  %v4050_v0 = vmul.f32 %v21055_v38, %v21055_v38  ;;  %v4051_v57 = vmul.f32 %v21058_v30, %v21058_v30 }
 0x5b3   : > { %v21066_v33 = vsub.f32 %v20969_v11, %v4020_v2  ;;  %v21069_v44 = vsub.f32 %v20978_v19, %v4021_v48  ;;  %v4072_v51 = vsel %vm238_vm0, %v4050_v0, 0.0  ;;  %v4075_v45 = vsel %vm238_vm0, %v4051_v57, 0.0 }
 0x5b4   : > { %v3989_v24 = vpop.xlane.xlu0 %3988  ;;  %4073 = vadd.xlane.f32.xlu0 %v4072_v51  ;;  %4076 = vadd.xlane.f32.xlu1 %v4075_v45  ;;  %v3992_v52 = vpop.xlane.xlu1 %3991 }
 0x5b5   : > { %v4022_v29 = vmul.f32 0.125, %v3989_v24  ;;  %v4023_v5 = vmul.f32 0.125, %v3992_v52  ;;  %v4052_v63 = vmul.f32 %v21066_v33, %v21066_v33  ;;  %v4053_v11 = vmul.f32 %v21069_v44, %v21069_v44 }
 0x5b7   : > { %v21078_v23 = vsub.f32 %v20983_v10, %v4022_v29  ;;  %v21081_v19 = vsub.f32 %v20990_v22, %v4023_v5  ;;  %v4078_v16 = vsel %vm238_vm0, %v4052_v63, 0.0  ;;  %v4081_v17 = vsel %vm238_vm0, %v4053_v11, 0.0  ;;  %v21139_v5 = vld [vmem:[%s24824_s1 + $0x20] ss:$0 sm:$0xff] }
 0x5b8   : > { %v3995_v27 = vpop.xlane.xlu0 %3994  ;;  %4079 = vadd.xlane.f32.xlu0 %v4078_v16  ;;  %4082 = vadd.xlane.f32.xlu1 %v4081_v17  ;;  %v3998_v60 = vpop.xlane.xlu1 %3997 }
 0x5b9   : > { %v4024_v18 = vmul.f32 0.125, %v3995_v27  ;;  %v4025_v40 = vmul.f32 0.125, %v3998_v60  ;;  %v4054_v12 = vmul.f32 %v21078_v23, %v21078_v23  ;;  %v4055_v10 = vmul.f32 %v21081_v19, %v21081_v19 }
 0x5bb   : > { %v21090_v46 = vsub.f32 %v20994_v55, %v4024_v18  ;;  %v21093_v22 = vsub.f32 %v21002_v61, %v4025_v40  ;;  %v4084_v28 = vsel %vm238_vm0, %v4054_v12, 0.0  ;;  %v4087_v37 = vsel %vm238_vm0, %v4055_v10, 0.0  ;;  %v21147_v10 = vld [vmem:[%s24824_s1 + $0x28] ss:$0 sm:$0xff] }
 0x5bc   : > { %v4001_v62 = vpop.xlane.xlu0 %4000  ;;  %4085 = vadd.xlane.f32.xlu0 %v4084_v28  ;;  %4088 = vadd.xlane.f32.xlu1 %v4087_v37  ;;  %v4004_v32 = vpop.xlane.xlu1 %4003 }
 0x5bd   : > { %v4026_v59 = vmul.f32 0.125, %v4001_v62  ;;  %v4027_v4 = vmul.f32 0.125, %v4004_v32  ;;  %v4056_v26 = vmul.f32 %v21090_v46, %v21090_v46  ;;  %v4057_v55 = vmul.f32 %v21093_v22, %v21093_v22 }
 0x5bf   : > { %v21102_v54 = vsub.f32 %v21005_v47, %v4026_v59  ;;  %v21105_v61 = vsub.f32 %v21014_v21, %v4027_v4  ;;  %v4090_v34 = vsel %vm238_vm0, %v4056_v26, 0.0  ;;  %v4093_v31 = vsel %vm238_vm0, %v4057_v55, 0.0 }
 0x5c0   : > { %v4007_v35 = vpop.xlane.xlu0 %4006  ;;  %4091 = vadd.xlane.f32.xlu0 %v4090_v34  ;;  %4094 = vadd.xlane.f32.xlu1 %v4093_v31  ;;  %v4010_v13 = vpop.xlane.xlu1 %4009 }
 0x5c1   : > { %v4028_v9 = vmul.f32 0.125, %v4007_v35  ;;  %v4029_v41 = vmul.f32 0.125, %v4010_v13  ;;  %v4058_v36 = vmul.f32 %v21102_v54, %v21102_v54  ;;  %v4059_v47 = vmul.f32 %v21105_v61, %v21105_v61 }
 0x5c3   : > { %v21114_v25 = vsub.f32 %v21019_v7, %v4028_v9  ;;  %v21117_v21 = vsub.f32 %v21026_v39, %v4029_v41  ;;  %v4096_v20 = vsel %vm238_vm0, %v4058_v36, 0.0  ;;  %v4099_v8 = vsel %vm238_vm0, %v4059_v47, 0.0 }
 0x5c4   : > { %v4013_v58 = vpop.xlane.xlu0 %4012  ;;  %4097 = vadd.xlane.f32.xlu0 %v4096_v20  ;;  %4100 = vadd.xlane.f32.xlu1 %v4099_v8 }
 0x5c5   : > { %v4030_v56 = vmul.f32 0.125, %v4013_v58  ;;  %v4060_v1 = vmul.f32 %v21114_v25, %v21114_v25  ;;  %v4061_v7 = vmul.f32 %v21117_v21, %v21117_v21 }
 0x5c7   : > { %v21129_v39 = vsub.f32 %v21029_v42, %v4030_v56  ;;  %v4102_v6 = vsel %vm238_vm0, %v4060_v1, 0.0  ;;  %v4105_v3 = vsel %vm238_vm0, %v4061_v7, 0.0 }
 0x5c8   : > { %4103 = vadd.xlane.f32.xlu0 %v4102_v6  ;;  %4106 = vadd.xlane.f32.xlu1 %v4105_v3 }
 0x5c9   : > { %v4062_v49 = vmul.f32 %v21129_v39, %v21129_v39 }
 0x5cb   : > { %v4108_v2 = vsel %vm238_vm0, %v4062_v49, 0.0 }
 0x5cc   : > { %4109 = vadd.xlane.f32.xlu0 %v4108_v2 }
 0x627   : > { %v4068_v48 = vpop.xlane.xlu0 %4067 }
 0x628   : > { %v4112_v0 = vmul.f32 0.125, %v4068_v48 }
 0x629   : > { %v4065_v57 = vpop.xlane.xlu1 %4064 }
 0x62a   : > { %v4128_v51 = vadd.f32 1e-05, %v4112_v0  ;;  %v4111_v45 = vmul.f32 0.125, %v4065_v57 }
 0x62c   : > { %19326 = vrsqrt.f32 %v4128_v51  ;;  %v4127_v42 = vadd.f32 1e-05, %v4111_v45 }
 0x62e   : > { %19328 = vrsqrt.f32 %v4127_v42 }
 0x639   : > { %v19327_v24 = vpop.eup %19326  ;;  %v4071_v52 = vpop.xlane.xlu1 %4070 }
 0x63a   : > { %v4113_v29 = vmul.f32 0.125, %v4071_v52  ;;  %v4160_v63 = vmul.f32 %v19327_v24, %v21038_v15 }
 0x63b   : > { %v19329_v11 = vpop.eup %19328 }
 0x63c   : > { %v4129_v16 = vadd.f32 1e-05, %v4113_v29  ;;  %v4159_v17 = vmul.f32 %v19329_v11, %v21041_v43  ;;  %v4180_v18 = vmul.f32 %v21139_v5, %v4160_v63 }
 0x63d   : > { %v4074_v27 = vpop.xlane.xlu0 %4073  ;;  %v4077_v60 = vpop.xlane.xlu1 %4076 }
 0x63e   : > { %19330 = vrsqrt.f32 %v4129_v16  ;;  %v4114_v40 = vmul.f32 0.125, %v4074_v27  ;;  %v4115_v12 = vmul.f32 0.125, %v4077_v60  ;;  %v4179_v28 = vmul.f32 %v21139_v5, %v4159_v17 }
 0x63f   : > { %v21154_v59 = vadd.f32 %v21147_v10, %v4180_v18 }
 0x640   : > { %v4130_v37 = vadd.f32 1e-05, %v4114_v40  ;;  %v4131_v15 = vadd.f32 1e-05, %v4115_v12  ;;  %v21151_v62 = vadd.f32 %v21147_v10, %v4179_v28 }
 0x641   : > { %v4080_v43 = vpop.xlane.xlu0 %4079  ;;  %v4083_v32 = vpop.xlane.xlu1 %4082 }
 0x642   : > { %19332 = vrsqrt.f32 %v4130_v37  ;;  %v4116_v4 = vmul.f32 0.125, %v4080_v43  ;;  %v4117_v26 = vmul.f32 0.125, %v4083_v32  ;;  %18194 = vmatprep.mubr.msk.f32.mxu0 %vm238_vm0, %v21151_v62 }
 0x643   : > { %19334 = vrsqrt.f32 %v4131_v15  ;;  %18195 = vmatmul.mubr.msk.f32.vlgmr.msra.gmra.mxu0 %vm238_vm0, %v21154_v59 }
 0x644   : > { %v4132_v55 = vadd.f32 1e-05, %v4116_v4  ;;  %v4133_v34 = vadd.f32 1e-05, %v4117_v26 }
 0x645   : > { %v4086_v31 = vpop.xlane.xlu0 %4085  ;;  %v4089_v35 = vpop.xlane.xlu1 %4088 }
 0x646   : > { %19336 = vrsqrt.f32 %v4132_v55  ;;  %v4118_v13 = vmul.f32 0.125, %v4086_v31  ;;  %v4119_v9 = vmul.f32 0.125, %v4089_v35 }
 0x647   : > { %19338 = vrsqrt.f32 %v4133_v34 }
 0x648   : > { %v4134_v41 = vadd.f32 1e-05, %v4118_v13  ;;  %v4135_v36 = vadd.f32 1e-05, %v4119_v9 }
 0x649   : > { %v4092_v47 = vpop.xlane.xlu0 %4091  ;;  %v4095_v20 = vpop.xlane.xlu1 %4094 }
 0x64a   : > { %19340 = vrsqrt.f32 %v4134_v41  ;;  %v4120_v8 = vmul.f32 0.125, %v4092_v47  ;;  %v4121_v50 = vmul.f32 0.125, %v4095_v20 }
 0x64b   : > { %v19331_v58 = vpop.eup %19330  ;;  %19342 = vrsqrt.f32 %v4135_v36 }
 0x64c   : > { %v4136_v56 = vadd.f32 1e-05, %v4120_v8  ;;  %v4137_v1 = vadd.f32 1e-05, %v4121_v50  ;;  %v4161_v7 = vmul.f32 %v19331_v58, %v21050_v14 }
 0x64d   : > { %v4098_v6 = vpop.xlane.xlu0 %4097  ;;  %v4101_v3 = vpop.xlane.xlu1 %4100 }
 0x64e   : > { %19344 = vrsqrt.f32 %v4136_v56  ;;  %v4122_v49 = vmul.f32 0.125, %v4098_v6  ;;  %v4123_v2 = vmul.f32 0.125, %v4101_v3  ;;  %v4181_v48 = vmul.f32 %v21139_v5, %v4161_v7 }
 0x64f   : > { %v19333_v0 = vpop.eup %19332  ;;  %19346 = vrsqrt.f32 %v4137_v1 }
 0x650   : > { %v19335_v57 = vpop.eup %19334  ;;  %v4138_v51 = vadd.f32 1e-05, %v4122_v49  ;;  %v4139_v45 = vadd.f32 1e-05, %v4123_v2  ;;  %v21163_v42 = vadd.f32 %v21147_v10, %v4181_v48  ;;  %v4162_v24 = vmul.f32 %v19333_v0, %v21055_v38 }
 0x651   : > { %v4104_v52 = vpop.xlane.xlu0 %4103  ;;  %v4107_v29 = vpop.xlane.xlu1 %4106  ;;  %v4163_v14 = vmul.f32 %v19335_v57, %v21058_v30 }
 0x652   : > { %19348 = vrsqrt.f32 %v4138_v51  ;;  %v4124_v63 = vmul.f32 0.125, %v4104_v52  ;;  %v4125_v11 = vmul.f32 0.125, %v4107_v29  ;;  %18197 = vmatprep.mubr.msk.f32.mxu0 %vm238_vm0, %v21163_v42  ;;  %v4182_v16 = vmul.f32 %v21139_v5, %v4162_v24  ;;  %v4430_v29 = vld [vmem:[%s24824_s1 + $0x40] sm:$0xff] }
 0x653   : > { %v19337_v17 = vpop.eup %19336  ;;  %19350 = vrsqrt.f32 %v4139_v45  ;;  %v4183_v27 = vmul.f32 %v21139_v5, %v4163_v14 }
 0x654   : > { %v19339_v60 = vpop.eup %19338  ;;  %v4140_v18 = vadd.f32 1e-05, %v4124_v63  ;;  %v4141_v40 = vadd.f32 1e-05, %v4125_v11  ;;  %v21172_v38 = vadd.f32 %v21147_v10, %v4182_v16  ;;  %v4164_v30 = vmul.f32 %v19337_v17, %v21066_v33 }
 0x655   : > { %v4110_v12 = vpop.xlane.xlu0 %4109  ;;  %v21176_v28 = vadd.f32 %v21147_v10, %v4183_v27  ;;  %v4165_v37 = vmul.f32 %v19339_v60, %v21069_v44 }
 0x656   : > { %19352 = vrsqrt.f32 %v4140_v18  ;;  %v4126_v15 = vmul.f32 0.125, %v4110_v12  ;;  %18198 = vmatmul.mubr.msk.f32.gmra.mxu0 %vm238_vm0, %v21172_v38  ;;  %v4184_v43 = vmul.f32 %v21139_v5, %v4164_v30 }
 0x657   : > { %v19341_v32 = vpop.eup %19340  ;;  %19354 = vrsqrt.f32 %v4141_v40  ;;  %18200 = vmatprep.mubr.msk.f32.mxu0 %vm238_vm0, %v21176_v28  ;;  %v4185_v33 = vmul.f32 %v21139_v5, %v4165_v37 }
 0x658   : > { %v19343_v4 = vpop.eup %19342  ;;  %v4142_v26 = vadd.f32 1e-05, %v4126_v15  ;;  %v21186_v55 = vadd.f32 %v21147_v10, %v4184_v43  ;;  %v4166_v44 = vmul.f32 %v19341_v32, %v21078_v23 }
 0x659   : > { %v21190_v34 = vadd.f32 %v21147_v10, %v4185_v33  ;;  %v4167_v31 = vmul.f32 %v19343_v4, %v21081_v19 }
 0x65a   : > { %19356 = vrsqrt.f32 %v4142_v26  ;;  %18201 = vmatmul.mubr.msk.f32.gmra.mxu0 %vm238_vm0, %v21186_v55  ;;  %v4186_v35 = vmul.f32 %v21139_v5, %v4166_v44 }
 0x65b   : > { %v19345_v13 = vpop.eup %19344  ;;  %18203 = vmatprep.mubr.msk.f32.mxu0 %vm238_vm0, %v21190_v34  ;;  %v4187_v9 = vmul.f32 %v21139_v5, %v4167_v31 }
 0x65c   : > { %v19347_v41 = vpop.eup %19346  ;;  %v21200_v23 = vadd.f32 %v21147_v10, %v4186_v35  ;;  %v4168_v36 = vmul.f32 %v19345_v13, %v21090_v46 }
 0x65d   : > { %v21204_v19 = vadd.f32 %v21147_v10, %v4187_v9  ;;  %v4169_v47 = vmul.f32 %v19347_v41, %v21093_v22 }
 0x65e   : > { %18204 = vmatmul.mubr.msk.f32.gmra.mxu0 %vm238_vm0, %v21200_v23  ;;  %v4188_v20 = vmul.f32 %v21139_v5, %v4168_v36 }
 0x65f   : > { %v19349_v8 = vpop.eup %19348  ;;  %18206 = vmatprep.mubr.msk.f32.mxu0 %vm238_vm0, %v21204_v19  ;;  %v4189_v50 = vmul.f32 %v21139_v5, %v4169_v47 }
 0x660   : > { %v19351_v58 = vpop.eup %19350  ;;  %v21214_v56 = vadd.f32 %v21147_v10, %v4188_v20  ;;  %v4170_v46 = vmul.f32 %v19349_v8, %v21102_v54 }
 0x661   : > { %v21218_v1 = vadd.f32 %v21147_v10, %v4189_v50  ;;  %v4171_v22 = vmul.f32 %v19351_v58, %v21105_v61 }
 0x662   : > { %18207 = vmatmul.mubr.msk.f32.gmra.mxu0 %vm238_vm0, %v21214_v56  ;;  %v4190_v7 = vmul.f32 %v21139_v5, %v4170_v46 }
 0x663   : > { %v19353_v6 = vpop.eup %19352  ;;  %18209 = vmatprep.mubr.msk.f32.mxu0 %vm238_vm0, %v21218_v1  ;;  %v4191_v3 = vmul.f32 %v21139_v5, %v4171_v22 }
 0x664   : > { %v19355_v49 = vpop.eup %19354  ;;  %v21228_v2 = vadd.f32 %v21147_v10, %v4190_v7  ;;  %v4172_v54 = vmul.f32 %v19353_v6, %v21114_v25 }
 0x665   : > { %v21232_v48 = vadd.f32 %v21147_v10, %v4191_v3  ;;  %v4173_v61 = vmul.f32 %v19355_v49, %v21117_v21 }
 0x666   : > { %18210 = vmatmul.mubr.msk.f32.gmra.mxu0 %vm238_vm0, %v21228_v2  ;;  %v4192_v0 = vmul.f32 %v21139_v5, %v4172_v54 }
 0x667   : > { %v19357_v57 = vpop.eup %19356  ;;  %18212 = vmatprep.mubr.msk.f32.mxu0 %vm238_vm0, %v21232_v48  ;;  %v4193_v51 = vmul.f32 %v21139_v5, %v4173_v61 }
 0x668   : > { %v21242_v45 = vadd.f32 %v21147_v10, %v4192_v0  ;;  %v4174_v25 = vmul.f32 %v19357_v57, %v21129_v39  ;;  %v4431_v39 = vld [vmem:[%s24824_s1 + $0x48] sm:$0xff] }
 0x669   : > { %v21246_v24 = vadd.f32 %v21147_v10, %v4193_v51  ;;  %18218 = vmatprep.subr.mxu1 %v4431_v39 }
 0x66a   : > { %18213 = vmatmul.mubr.msk.f32.gmra.mxu0 %vm238_vm0, %v21242_v45  ;;  %v4194_v21 = vmul.f32 %v21139_v5, %v4174_v25  ;;  %18219 = vmatpush3.msra.mxu1 %v4431_v39  ;;  %v16826_v5 = vld [vmem:[%s24824_s1 + $0x38] ss:$0 sm:$0xff] }
 0x66b   : > { %18215 = vmatprep.mubr.msk.f32.mxu0 %vm238_vm0, %v21246_v24  ;;  %18220 = vmatprep.subr.mxu1 %v4430_v29 }
 0x66c   : > { %v21254_v52 = vadd.f32 %v21147_v10, %v4194_v21  ;;  %18221 = vmatpush3.msra.mxu1 %v4430_v29 }
 0x66e   : > { %18216 = vmatmul.mubr.msk.f32.gmra.mxu0 %vm238_vm0, %v21254_v52 }
 0x703   : > { %v18196_v10 = vpop.f32.mrf.mxu0 }
 0x704   : > { %v4341_v14 = vadd.f32 %v18196_v10, %v16826_v5 }
 0x705   : > { %v4335_v63 = vpop.f32.mrf.mxu0 }
 0x706   : > { %v4336_v11 = vadd.f32 %v16826_v5, %v4335_v63  ;;  %v4415_v17 = vmax.f32 %v4341_v14, 0.0  ;;  %v21286_v63 = vld [vmem:[%s24824_s1 + $0x50] ss:$0 sm:$0xff] }
 0x708   : > { %v4414_v16 = vmax.f32 %v4336_v11, 0.0 }
 0x70a   : > { %18222 = vmatprep.mubr.msk.f32.mxu1 %vm1956_vm1, %v4414_v16 }
 0x70b   : > { %18223 = vmatmul.mubr.msk.f32.vlgmr.msra.gmra.mxu1 %vm1956_vm1, %v4415_v17 }
 0x716   : > { %v18199_v27 = vpop.f32.mrf.mxu0 }
 0x717   : > { %v4351_v60 = vadd.f32 %v18199_v27, %v16826_v5 }
 0x718   : > { %v4345_v18 = vpop.f32.mrf.mxu0 }
 0x719   : > { %v4346_v40 = vadd.f32 %v16826_v5, %v4345_v18  ;;  %v4417_v37 = vmax.f32 %v4351_v60, 0.0 }
 0x71a   : > { %v18202_v30 = vpop.f32.mrf.mxu0 }
 0x71b   : > { %v4416_v12 = vmax.f32 %v4346_v40, 0.0  ;;  %v4361_v15 = vadd.f32 %v18202_v30, %v16826_v5 }
 0x71c   : > { %v4355_v43 = vpop.f32.mrf.mxu0 }
 0x71d   : > { %v4356_v32 = vadd.f32 %v16826_v5, %v4355_v43  ;;  %18225 = vmatprep.mubr.msk.f32.mxu1 %vm1956_vm1, %v4416_v12  ;;  %v4419_v26 = vmax.f32 %v4361_v15, 0.0 }
 0x71e   : > { %v18205_v33 = vpop.f32.mrf.mxu0  ;;  %18226 = vmatmul.mubr.msk.f32.gmra.mxu1 %vm1956_vm1, %v4417_v37 }
 0x71f   : > { %v4418_v4 = vmax.f32 %v4356_v32, 0.0  ;;  %v4371_v44 = vadd.f32 %v18205_v33, %v16826_v5 }
 0x720   : > { %v4365_v31 = vpop.f32.mrf.mxu0 }
 0x721   : > { %v4366_v35 = vadd.f32 %v16826_v5, %v4365_v31  ;;  %18228 = vmatprep.mubr.msk.f32.mxu1 %vm1956_vm1, %v4418_v4  ;;  %v4421_v41 = vmax.f32 %v4371_v44, 0.0 }
 0x722   : > { %v18208_v13 = vpop.f32.mrf.mxu0  ;;  %18229 = vmatmul.mubr.msk.f32.gmra.mxu1 %vm1956_vm1, %v4419_v26 }
 0x723   : > { %v4420_v9 = vmax.f32 %v4366_v35, 0.0  ;;  %v4381_v36 = vadd.f32 %v18208_v13, %v16826_v5 }
 0x724   : > { %v4375_v47 = vpop.f32.mrf.mxu0 }
 0x725   : > { %v4376_v20 = vadd.f32 %v16826_v5, %v4375_v47  ;;  %18231 = vmatprep.mubr.msk.f32.mxu1 %vm1956_vm1, %v4420_v9  ;;  %v4423_v58 = vmax.f32 %v4381_v36, 0.0 }
 0x726   : > { %v18211_v8 = vpop.f32.mrf.mxu0  ;;  %18232 = vmatmul.mubr.msk.f32.gmra.mxu1 %vm1956_vm1, %v4421_v41 }
 0x727   : > { %v4422_v50 = vmax.f32 %v4376_v20, 0.0  ;;  %v4391_v46 = vadd.f32 %v18211_v8, %v16826_v5 }
 0x728   : > { %v4385_v22 = vpop.f32.mrf.mxu0 }
 0x729   : > { %v4386_v7 = vadd.f32 %v16826_v5, %v4385_v22  ;;  %18234 = vmatprep.mubr.msk.f32.mxu1 %vm1956_vm1, %v4422_v50  ;;  %v4425_v49 = vmax.f32 %v4391_v46, 0.0 }
 0x72a   : > { %v18214_v6 = vpop.f32.mrf.mxu0  ;;  %18235 = vmatmul.mubr.msk.f32.gmra.mxu1 %vm1956_vm1, %v4423_v58 }
 0x72b   : > { %v4424_v3 = vmax.f32 %v4386_v7, 0.0  ;;  %v4401_v54 = vadd.f32 %v18214_v6, %v16826_v5 }
 0x72c   : > { %v4395_v61 = vpop.f32.mrf.mxu0 }
 0x72d   : > { %v4396_v0 = vadd.f32 %v16826_v5, %v4395_v61  ;;  %18237 = vmatprep.mubr.msk.f32.mxu1 %vm1956_vm1, %v4424_v3  ;;  %v4427_v25 = vmax.f32 %v4401_v54, 0.0 }
 0x72e   : > { %v18217_v57 = vpop.f32.mrf.mxu0  ;;  %18238 = vmatmul.mubr.msk.f32.gmra.mxu1 %vm1956_vm1, %v4425_v49 }
 0x72f   : > { %v4426_v51 = vmax.f32 %v4396_v0, 0.0  ;;  %v4411_v21 = vadd.f32 %v18217_v57, %v16826_v5 }
 0x730   : > { %v4405_v39 = vpop.f32.mrf.mxu0 }
 0x731   : > { %v4406_v29 = vadd.f32 %v16826_v5, %v4405_v39  ;;  %18240 = vmatprep.mubr.msk.f32.mxu1 %vm1956_vm1, %v4426_v51  ;;  %v4429_v14 = vmax.f32 %v4411_v21, 0.0 }
 0x732   : > { %18241 = vmatmul.mubr.msk.f32.gmra.mxu1 %vm1956_vm1, %v4427_v25 }
 0x733   : > { %v4428_v10 = vmax.f32 %v4406_v29, 0.0 }
 0x735   : > { %18243 = vmatprep.mubr.msk.f32.mxu1 %vm1956_vm1, %v4428_v10 }
 0x736   : > { %18244 = vmatmul.mubr.msk.f32.gmra.mxu1 %vm1956_vm1, %v4429_v14 }
 0x7cb   : > { %v18224_v11 = vpop.f32.mrf.mxu1 }
 0x7cc   : > { %v4557_v16 = vadd.f32 %v18224_v11, %v21286_v63 }
 0x7cd   : > { %v4551_v17 = vpop.f32.mrf.mxu1 }
 0x7ce   : > { %v21290_v5 = vadd.f32 %v4557_v16, %v21154_v59  ;;  %v4552_v27 = vadd.f32 %v21286_v63, %v4551_v17 }
 0x7d0   : > { %v4651_v60 = vsel %vm238_vm0, %v21290_v5, 0.0  ;;  %v21296_v18 = vadd.f32 %v4552_v27, %v21151_v62 }
 0x7d1   : > { %4652 = vadd.xlane.f32.xlu0 %v4651_v60 }
 0x7d2   : > { %v4648_v40 = vsel %vm238_vm0, %v21296_v18, 0.0 }
 0x7d3   : > { %4649 = vadd.xlane.f32.xlu1 %v4648_v40 }
 0x7de   : > { %v18227_v30 = vpop.f32.mrf.mxu1 }
 0x7df   : > { %v4567_v12 = vadd.f32 %v18227_v30, %v21286_v63 }
 0x7e0   : > { %v4561_v37 = vpop.f32.mrf.mxu1 }
 0x7e1   : > { %v21302_v59 = vadd.f32 %v4567_v12, %v21172_v38  ;;  %v4562_v15 = vadd.f32 %v21286_v63, %v4561_v37 }
 0x7e2   : > { %v18230_v43 = vpop.f32.mrf.mxu1 }
 0x7e3   : > { %v4577_v32 = vadd.f32 %v18230_v43, %v21286_v63  ;;  %v4657_v62 = vsel %vm238_vm0, %v21302_v59, 0.0  ;;  %v21309_v33 = vadd.f32 %v4562_v15, %v21163_v42 }
 0x7e4   : > { %4658 = vadd.xlane.f32.xlu0 %v4657_v62  ;;  %v4571_v4 = vpop.f32.mrf.mxu1 }
 0x7e5   : > { %v21312_v26 = vadd.f32 %v4577_v32, %v21186_v55  ;;  %v4572_v44 = vadd.f32 %v21286_v63, %v4571_v4  ;;  %v4654_v38 = vsel %vm238_vm0, %v21309_v33, 0.0 }
 0x7e6   : > { %4655 = vadd.xlane.f32.xlu1 %v4654_v38  ;;  %v18233_v31 = vpop.f32.mrf.mxu1 }
 0x7e7   : > { %v4587_v35 = vadd.f32 %v18233_v31, %v21286_v63  ;;  %v4663_v13 = vsel %vm238_vm0, %v21312_v26, 0.0  ;;  %v21321_v42 = vadd.f32 %v4572_v44, %v21176_v28 }
 0x7e8   : > { %4664 = vadd.xlane.f32.xlu0 %v4663_v13  ;;  %v4581_v9 = vpop.f32.mrf.mxu1 }
 0x7e9   : > { %v21324_v55 = vadd.f32 %v4587_v35, %v21200_v23  ;;  %v4582_v41 = vadd.f32 %v21286_v63, %v4581_v9  ;;  %v4660_v36 = vsel %vm238_vm0, %v21321_v42, 0.0 }
 0x7ea   : > { %4661 = vadd.xlane.f32.xlu1 %v4660_v36  ;;  %v18236_v47 = vpop.f32.mrf.mxu1 }
 0x7eb   : > { %v4597_v20 = vadd.f32 %v18236_v47, %v21286_v63  ;;  %v4669_v8 = vsel %vm238_vm0, %v21324_v55, 0.0  ;;  %v21333_v28 = vadd.f32 %v4582_v41, %v21190_v34 }
 0x7ec   : > { %4670 = vadd.xlane.f32.xlu0 %v4669_v8  ;;  %v4591_v50 = vpop.f32.mrf.mxu1 }
 0x7ed   : > { %v21336_v23 = vadd.f32 %v4597_v20, %v21214_v56  ;;  %v4592_v58 = vadd.f32 %v21286_v63, %v4591_v50  ;;  %v4666_v46 = vsel %vm238_vm0, %v21333_v28, 0.0 }
 0x7ee   : > { %4667 = vadd.xlane.f32.xlu1 %v4666_v46  ;;  %v18239_v22 = vpop.f32.mrf.mxu1 }
 0x7ef   : > { %v4607_v7 = vadd.f32 %v18239_v22, %v21286_v63  ;;  %v4675_v6 = vsel %vm238_vm0, %v21336_v23, 0.0  ;;  %v21345_v34 = vadd.f32 %v4592_v58, %v21204_v19 }
 0x7f0   : > { %4676 = vadd.xlane.f32.xlu0 %v4675_v6  ;;  %v4601_v3 = vpop.f32.mrf.mxu1 }
 0x7f1   : > { %v21348_v56 = vadd.f32 %v4607_v7, %v21228_v2  ;;  %v4602_v49 = vadd.f32 %v21286_v63, %v4601_v3  ;;  %v4672_v54 = vsel %vm238_vm0, %v21345_v34, 0.0 }
 0x7f2   : > { %4673 = vadd.xlane.f32.xlu1 %v4672_v54  ;;  %v18242_v61 = vpop.f32.mrf.mxu1 }
 0x7f3   : > { %v4617_v0 = vadd.f32 %v18242_v61, %v21286_v63  ;;  %v4681_v57 = vsel %vm238_vm0, %v21348_v56, 0.0  ;;  %v21357_v19 = vadd.f32 %v4602_v49, %v21218_v1 }
 0x7f4   : > { %4682 = vadd.xlane.f32.xlu0 %v4681_v57  ;;  %v4611_v51 = vpop.f32.mrf.mxu1 }
 0x7f5   : > { %v21360_v2 = vadd.f32 %v4617_v0, %v21242_v45  ;;  %v4612_v25 = vadd.f32 %v21286_v63, %v4611_v51  ;;  %v4678_v21 = vsel %vm238_vm0, %v21357_v19, 0.0 }
 0x7f6   : > { %4679 = vadd.xlane.f32.xlu1 %v4678_v21  ;;  %v18245_v39 = vpop.f32.mrf.mxu1 }
 0x7f7   : > { %v4627_v29 = vadd.f32 %v18245_v39, %v21286_v63  ;;  %v4687_v10 = vsel %vm238_vm0, %v21360_v2, 0.0  ;;  %v21369_v1 = vadd.f32 %v4612_v25, %v21232_v48 }
 0x7f8   : > { %4688 = vadd.xlane.f32.xlu0 %v4687_v10  ;;  %v4621_v14 = vpop.f32.mrf.mxu1 }
 0x7f9   : > { %v21372_v45 = vadd.f32 %v4627_v29, %v21254_v52  ;;  %v4622_v11 = vadd.f32 %v21286_v63, %v4621_v14  ;;  %v4684_v16 = vsel %vm238_vm0, %v21369_v1, 0.0 }
 0x7fa   : > { %4685 = vadd.xlane.f32.xlu1 %v4684_v16 }
 0x7fb   : > { %v4693_v17 = vsel %vm238_vm0, %v21372_v45, 0.0  ;;  %v21380_v27 = vadd.f32 %v4622_v11, %v21246_v24 }
 0x7fc   : > { %4694 = vadd.xlane.f32.xlu0 %v4693_v17 }
 0x7fd   : > { %v4690_v48 = vsel %vm238_vm0, %v21380_v27, 0.0 }
 0x7fe   : > { %4691 = vadd.xlane.f32.xlu1 %v4690_v48 }
 0x85a   : > { %v4653_v60 = vpop.xlane.xlu0 %4652 }
 0x85b   : > { %v4697_v52 = vmul.f32 0.125, %v4653_v60 }
 0x85c   : > { %v4650_v40 = vpop.xlane.xlu1 %4649 }
 0x85d   : > { %v21385_v63 = vsub.f32 %v21290_v5, %v4697_v52  ;;  %v4696_v30 = vmul.f32 0.125, %v4650_v40 }
 0x85f   : > { %v21388_v12 = vsub.f32 %v21296_v18, %v4696_v30  ;;  %v4729_v37 = vmul.f32 %v21385_v63, %v21385_v63 }
 0x861   : > { %v4747_v24 = vsel %vm238_vm0, %v4729_v37, 0.0  ;;  %v4728_v15 = vmul.f32 %v21388_v12, %v21388_v12 }
 0x862   : > { %4748 = vadd.xlane.f32.xlu0 %v4747_v24 }
 0x863   : > { %v4744_v43 = vsel %vm238_vm0, %v4728_v15, 0.0 }
 0x864   : > { %4745 = vadd.xlane.f32.xlu1 %v4744_v43 }
 0x86d   : > { %v4659_v32 = vpop.xlane.xlu0 %4658 }
 0x86e   : > { %v4699_v62 = vmul.f32 0.125, %v4659_v32 }
 0x86f   : > { %v4656_v5 = vpop.xlane.xlu1 %4655 }
 0x870   : > { %v21397_v4 = vsub.f32 %v21302_v59, %v4699_v62  ;;  %v4698_v18 = vmul.f32 0.125, %v4656_v5 }
 0x871   : > { %v4665_v44 = vpop.xlane.xlu0 %4664 }
 0x872   : > { %v21400_v38 = vsub.f32 %v21309_v33, %v4698_v18  ;;  %v4701_v31 = vmul.f32 0.125, %v4665_v44  ;;  %v4731_v35 = vmul.f32 %v21397_v4, %v21397_v4 }
 0x873   : > { %v4662_v13 = vpop.xlane.xlu1 %4661 }
 0x874   : > { %v21405_v9 = vsub.f32 %v21312_v26, %v4701_v31  ;;  %v4700_v41 = vmul.f32 0.125, %v4662_v13  ;;  %v4753_v36 = vsel %vm238_vm0, %v4731_v35, 0.0  ;;  %v4730_v59 = vmul.f32 %v21400_v38, %v21400_v38 }
 0x875   : > { %v4671_v47 = vpop.xlane.xlu0 %4670  ;;  %4754 = vadd.xlane.f32.xlu0 %v4753_v36 }
 0x876   : > { %v21411_v20 = vsub.f32 %v21321_v42, %v4700_v41  ;;  %v4703_v33 = vmul.f32 0.125, %v4671_v47  ;;  %v4750_v8 = vsel %vm238_vm0, %v4730_v59, 0.0  ;;  %v4733_v50 = vmul.f32 %v21405_v9, %v21405_v9  ;;  %v24974_v47 = vld [vmem:[#allocation34_spill] sm:$0xff] }
 0x877   : > { %4751 = vadd.xlane.f32.xlu1 %v4750_v8  ;;  %v4668_v26 = vpop.xlane.xlu1 %4667 }
 0x878   : > { %v21417_v58 = vsub.f32 %v21324_v55, %v4703_v33  ;;  %v4702_v46 = vmul.f32 0.125, %v4668_v26  ;;  %v4759_v22 = vsel %vm238_vm0, %v4733_v50, 0.0  ;;  %v4732_v7 = vmul.f32 %v21411_v20, %v21411_v20 }
 0x879   : > { %v4677_v6 = vpop.xlane.xlu0 %4676  ;;  %4760 = vadd.xlane.f32.xlu0 %v4759_v22 }
 0x87a   : > { %v21423_v42 = vsub.f32 %v21333_v28, %v4702_v46  ;;  %v4705_v3 = vmul.f32 0.125, %v4677_v6  ;;  %v4756_v49 = vsel %vm238_vm0, %v4732_v7, 0.0  ;;  %v4735_v54 = vmul.f32 %v21417_v58, %v21417_v58  ;;  %v21488_v6 = vld [vmem:[%s24824_s1 + $0x58] ss:$0 sm:$0xff] }
 0x87b   : > { %4757 = vadd.xlane.f32.xlu1 %v4756_v49  ;;  %v4674_v55 = vpop.xlane.xlu1 %4673 }
 0x87c   : > { %v21429_v61 = vsub.f32 %v21336_v23, %v4705_v3  ;;  %v4704_v0 = vmul.f32 0.125, %v4674_v55  ;;  %v4765_v57 = vsel %vm238_vm0, %v4735_v54, 0.0  ;;  %v4734_v51 = vmul.f32 %v21423_v42, %v21423_v42 }
 0x87d   : > { %v4683_v25 = vpop.xlane.xlu0 %4682  ;;  %4766 = vadd.xlane.f32.xlu0 %v4765_v57 }
 0x87e   : > { %v21435_v28 = vsub.f32 %v21345_v34, %v4704_v0  ;;  %v4707_v21 = vmul.f32 0.125, %v4683_v25  ;;  %v4762_v39 = vsel %vm238_vm0, %v4734_v51, 0.0  ;;  %v4737_v29 = vmul.f32 %v21429_v61, %v21429_v61 }
 0x87f   : > { %4763 = vadd.xlane.f32.xlu1 %v4762_v39  ;;  %v4680_v23 = vpop.xlane.xlu1 %4679 }
 0x880   : > { %v21441_v10 = vsub.f32 %v21348_v56, %v4707_v21  ;;  %v4706_v14 = vmul.f32 0.125, %v4680_v23  ;;  %v4771_v11 = vsel %vm238_vm0, %v4737_v29, 0.0  ;;  %v4736_v16 = vmul.f32 %v21435_v28, %v21435_v28  ;;  %v21496_v29 = vld [vmem:[%s24824_s1 + $0x60] ss:$0 sm:$0xff] }
 0x881   : > { %v4689_v17 = vpop.xlane.xlu0 %4688  ;;  %4772 = vadd.xlane.f32.xlu0 %v4771_v11 }
 0x882   : > { %v21447_v34 = vsub.f32 %v21357_v19, %v4706_v14  ;;  %v4709_v48 = vmul.f32 0.125, %v4689_v17  ;;  %v4768_v60 = vsel %vm238_vm0, %v4736_v16, 0.0  ;;  %v4739_v52 = vmul.f32 %v21441_v10, %v21441_v10 }
 0x883   : > { %4769 = vadd.xlane.f32.xlu1 %v4768_v60  ;;  %v4686_v56 = vpop.xlane.xlu1 %4685 }
 0x884   : > { %v21453_v40 = vsub.f32 %v21360_v2, %v4709_v48  ;;  %v4708_v30 = vmul.f32 0.125, %v4686_v56  ;;  %v4777_v37 = vsel %vm238_vm0, %v4739_v52, 0.0  ;;  %v4738_v24 = vmul.f32 %v21447_v34, %v21447_v34 }
 0x885   : > { %4778 = vadd.xlane.f32.xlu0 %v4777_v37  ;;  %v4695_v19 = vpop.xlane.xlu0 %4694 }
 0x886   : > { %v21459_v15 = vsub.f32 %v21369_v1, %v4708_v30  ;;  %v4711_v43 = vmul.f32 0.125, %v4695_v19  ;;  %v4774_v32 = vsel %vm238_vm0, %v4738_v24, 0.0  ;;  %v4741_v62 = vmul.f32 %v21453_v40, %v21453_v40  ;;  %v4898_v1 = vld [vmem:[%s24824_s1 + $0x78] sm:$0xff] }
 0x887   : > { %4775 = vadd.xlane.f32.xlu1 %v4774_v32  ;;  %v4692_v2 = vpop.xlane.xlu1 %4691  ;;  %18246 = vmatprep.subr.mxu0 %v4898_v1 }
 0x888   : > { %v21465_v5 = vsub.f32 %v21372_v45, %v4711_v43  ;;  %v4710_v18 = vmul.f32 0.125, %v4692_v2  ;;  %v4783_v44 = vsel %vm238_vm0, %v4741_v62, 0.0  ;;  %v4740_v31 = vmul.f32 %v21459_v15, %v21459_v15  ;;  %18247 = vmatpush3.msra.mxu0 %v4898_v1 }
 0x889   : > { %4784 = vadd.xlane.f32.xlu0 %v4783_v44 }
 0x88a   : > { %v21474_v35 = vsub.f32 %v21380_v27, %v4710_v18  ;;  %v4780_v13 = vsel %vm238_vm0, %v4740_v31, 0.0  ;;  %v4743_v45 = vmul.f32 %v21465_v5, %v21465_v5  ;;  %v24973_v27 = vld [vmem:[#allocation35_spill] sm:$0xff] }
 0x88b   : > { %4781 = vadd.xlane.f32.xlu1 %v4780_v13 }
 0x88c   : > { %v4789_v41 = vsel %vm238_vm0, %v4743_v45, 0.0  ;;  %v4742_v36 = vmul.f32 %v21474_v35, %v21474_v35 }
 0x88d   : > { %4790 = vadd.xlane.f32.xlu0 %v4789_v41 }
 0x88e   : > { %v4786_v59 = vsel %vm238_vm0, %v4742_v36, 0.0 }
 0x88f   : > { %4787 = vadd.xlane.f32.xlu1 %v4786_v59 }
 0x8a0   : > { %5103 = vrot.lane.b32.xlu1 %v24974_v47, %s19758_s4 }
 0x8a3   : > { %5122 = vrot.lane.b32.xlu0 %v24973_v27, %s19758_s4 }
 0x8eb   : > { %v4749_v33 = vpop.xlane.xlu0 %4748 }
 0x8ec   : > { %v4793_v8 = vmul.f32 0.125, %v4749_v33 }
 0x8ed   : > { %v4746_v50 = vpop.xlane.xlu1 %4745 }
 0x8ee   : > { %v4809_v26 = vadd.f32 1e-05, %v4793_v8  ;;  %v4792_v46 = vmul.f32 0.125, %v4746_v50 }
 0x8f0   : > { %19358 = vrsqrt.f32 %v4809_v26  ;;  %v4808_v22 = vadd.f32 1e-05, %v4792_v46 }
 0x8f2   : > { %19360 = vrsqrt.f32 %v4808_v22 }
 0x8fd   : > { %v19359_v7 = vpop.eup %19358 }
 0x8fe   : > { %v4841_v3 = vmul.f32 %v19359_v7, %v21385_v63  ;;  %v4755_v49 = vpop.xlane.xlu0 %4754 }
 0x8ff   : > { %v19361_v54 = vpop.eup %19360  ;;  %v4795_v55 = vmul.f32 0.125, %v4755_v49 }
 0x900   : > { %v4752_v0 = vpop.xlane.xlu1 %4751  ;;  %v4840_v57 = vmul.f32 %v19361_v54, %v21388_v12  ;;  %v4861_v51 = vmul.f32 %v21488_v6, %v4841_v3 }
 0x901   : > { %v4811_v25 = vadd.f32 1e-05, %v4795_v55  ;;  %v4794_v21 = vmul.f32 0.125, %v4752_v0 }
 0x902   : > { %v4761_v39 = vpop.xlane.xlu0 %4760  ;;  %v4860_v23 = vmul.f32 %v21488_v6, %v4840_v57  ;;  %v4881_v48 = vadd.f32 %v21496_v29, %v4861_v51 }
 0x903   : > { %19362 = vrsqrt.f32 %v4811_v25  ;;  %v4810_v63 = vadd.f32 1e-05, %v4794_v21  ;;  %v4797_v14 = vmul.f32 0.125, %v4761_v39 }
 0x904   : > { %v4758_v11 = vpop.xlane.xlu1 %4757  ;;  %v4880_v16 = vadd.f32 %v21496_v29, %v4860_v23 }
 0x905   : > { %19364 = vrsqrt.f32 %v4810_v63  ;;  %v4813_v12 = vadd.f32 1e-05, %v4797_v14  ;;  %v4796_v17 = vmul.f32 0.125, %v4758_v11 }
 0x906   : > { %v4767_v60 = vpop.xlane.xlu0 %4766  ;;  %18248 = vmatprep.mubr.msk.f32.mxu0 %vm238_vm0, %v4880_v16 }
 0x907   : > { %19366 = vrsqrt.f32 %v4813_v12  ;;  %v4812_v52 = vadd.f32 1e-05, %v4796_v17  ;;  %v4799_v56 = vmul.f32 0.125, %v4767_v60  ;;  %18249 = vmatmul.mubr.msk.f32.vlgmr.msra.gmra.mxu0 %vm238_vm0, %v4881_v48 }
 0x908   : > { %v4764_v30 = vpop.xlane.xlu1 %4763 }
 0x909   : > { %19368 = vrsqrt.f32 %v4812_v52  ;;  %v4815_v37 = vadd.f32 1e-05, %v4799_v56  ;;  %v4798_v24 = vmul.f32 0.125, %v4764_v30 }
 0x90a   : > { %v4773_v19 = vpop.xlane.xlu0 %4772 }
 0x90b   : > { %19370 = vrsqrt.f32 %v4815_v37  ;;  %v4814_v43 = vadd.f32 1e-05, %v4798_v24  ;;  %v4801_v32 = vmul.f32 0.125, %v4773_v19 }
 0x90c   : > { %v4770_v62 = vpop.xlane.xlu1 %4769 }
 0x90d   : > { %19372 = vrsqrt.f32 %v4814_v43  ;;  %v4817_v2 = vadd.f32 1e-05, %v4801_v32  ;;  %v4800_v18 = vmul.f32 0.125, %v4770_v62 }
 0x90e   : > { %v4779_v44 = vpop.xlane.xlu0 %4778 }
 0x90f   : > { %19374 = vrsqrt.f32 %v4817_v2  ;;  %v4816_v31 = vadd.f32 1e-05, %v4800_v18  ;;  %v4803_v1 = vmul.f32 0.125, %v4779_v44 }
 0x910   : > { %v19363_v13 = vpop.eup %19362  ;;  %v4776_v45 = vpop.xlane.xlu1 %4775 }
 0x911   : > { %19376 = vrsqrt.f32 %v4816_v31  ;;  %v4819_v41 = vadd.f32 1e-05, %v4803_v1  ;;  %v4802_v36 = vmul.f32 0.125, %v4776_v45  ;;  %v4843_v59 = vmul.f32 %v19363_v13, %v21397_v4 }
 0x912   : > { %v19365_v33 = vpop.eup %19364  ;;  %v4785_v8 = vpop.xlane.xlu0 %4784 }
 0x913   : > { %19378 = vrsqrt.f32 %v4819_v41  ;;  %v4818_v50 = vadd.f32 1e-05, %v4802_v36  ;;  %v4805_v26 = vmul.f32 0.125, %v4785_v8  ;;  %v4842_v46 = vmul.f32 %v19365_v33, %v21400_v38 }
 0x914   : > { %v19367_v22 = vpop.eup %19366  ;;  %v4782_v7 = vpop.xlane.xlu1 %4781  ;;  %v4863_v3 = vmul.f32 %v21488_v6, %v4843_v59 }
 0x915   : > { %19380 = vrsqrt.f32 %v4818_v50  ;;  %v4821_v49 = vadd.f32 1e-05, %v4805_v26  ;;  %v4804_v54 = vmul.f32 0.125, %v4782_v7  ;;  %v4862_v55 = vmul.f32 %v21488_v6, %v4842_v46 }
 0x916   : > { %v19369_v0 = vpop.eup %19368  ;;  %v4791_v57 = vpop.xlane.xlu0 %4790  ;;  %v4845_v4 = vmul.f32 %v19367_v22, %v21405_v9  ;;  %v4883_v23 = vadd.f32 %v21496_v29, %v4863_v3 }
 0x917   : > { %19382 = vrsqrt.f32 %v4821_v49  ;;  %v4820_v51 = vadd.f32 1e-05, %v4804_v54  ;;  %v4807_v25 = vmul.f32 0.125, %v4791_v57  ;;  %v4882_v21 = vadd.f32 %v21496_v29, %v4862_v55 }
 0x918   : > { %v19371_v39 = vpop.eup %19370  ;;  %v4788_v38 = vpop.xlane.xlu1 %4787  ;;  %v4844_v63 = vmul.f32 %v19369_v0, %v21411_v20  ;;  %v4865_v14 = vmul.f32 %v21488_v6, %v4845_v4  ;;  %v24872_v54 = vmov 0.0  }
 0x919   : > { %19384 = vrsqrt.f32 %v4820_v51  ;;  %v4823_v11 = vadd.f32 1e-05, %v4807_v25  ;;  %v4806_v16 = vmul.f32 0.125, %v4788_v38  ;;  %18251 = vmatprep.mubr.msk.f32.mxu0 %vm238_vm0, %v4882_v21  ;;  %v4847_v9 = vmul.f32 %v19371_v39, %v21417_v58  ;;  %18272 = vmatprep.subr.mxu1 %v24872_v54  ;;  %v21585_v51 = vld [vmem:[%s24824_s1 + $0x70] ss:$0 sm:$0xff] }
 0x91a   : > { %v19373_v12 = vpop.eup %19372  ;;  %18252 = vmatmul.mubr.msk.f32.gmra.mxu0 %vm238_vm0, %v4883_v23  ;;  %v4864_v17 = vmul.f32 %v21488_v6, %v4844_v63  ;;  %v4885_v56 = vadd.f32 %v21496_v29, %v4865_v14  ;;  %18279 = vmatprep.subr.mxu0 %v24872_v54  ;;  %v21587_v25 = vpop.permute.xlu0 %5122  ;;  %v21595_v39 = vmul.f32 %v21585_v51, %v24974_v47 }
 0x91b   : > { %19386 = vrsqrt.f32 %v4823_v11  ;;  %v4822_v48 = vadd.f32 1e-05, %v4806_v16  ;;  %v4846_v60 = vmul.f32 %v19373_v12, %v21423_v42  ;;  %v4867_v37 = vmul.f32 %v21488_v6, %v4847_v9  ;;  %18276 = vmatprep.mubr.msk.f32.mxu1 %vm19760_vm2, %v24872_v54  ;;  %24976 = vst [vmem:[#allocation37_spill] sm:$0xff] %v21587_v25 }
 0x91c   : > { %v19375_v52 = vpop.eup %19374  ;;  %v4884_v20 = vadd.f32 %v21496_v29, %v4864_v17 }
 0x91d   : > { %19388 = vrsqrt.f32 %v4822_v48  ;;  %v4866_v30 = vmul.f32 %v21488_v6, %v4846_v60  ;;  %v4849_v58 = vmul.f32 %v19375_v52, %v21429_v61  ;;  %v4887_v32 = vadd.f32 %v21496_v29, %v4867_v37 }
 0x91e   : > { %v19377_v24 = vpop.eup %19376  ;;  %18254 = vmatprep.mubr.msk.f32.mxu0 %vm238_vm0, %v4884_v20 }
 0x91f   : > { %18255 = vmatmul.mubr.msk.f32.gmra.mxu0 %vm238_vm0, %v4885_v56  ;;  %v4886_v19 = vadd.f32 %v21496_v29, %v4866_v30  ;;  %v4848_v42 = vmul.f32 %v19377_v24, %v21435_v28  ;;  %v4869_v2 = vmul.f32 %v21488_v6, %v4849_v58 }
 0x920   : > { %v19379_v43 = vpop.eup %19378 }
 0x921   : > { %18257 = vmatprep.mubr.msk.f32.mxu0 %vm238_vm0, %v4886_v19  ;;  %v4868_v62 = vmul.f32 %v21488_v6, %v4848_v42  ;;  %v4851_v61 = vmul.f32 %v19379_v43, %v21441_v10  ;;  %v4889_v28 = vadd.f32 %v21496_v29, %v4869_v2 }
 0x922   : > { %v19381_v18 = vpop.eup %19380 }
 0x923   : > { %18258 = vmatmul.mubr.msk.f32.gmra.mxu0 %vm238_vm0, %v4887_v32  ;;  %v4888_v44 = vadd.f32 %v21496_v29, %v4868_v62  ;;  %v4850_v31 = vmul.f32 %v19381_v18, %v21447_v34  ;;  %v4871_v45 = vmul.f32 %v21488_v6, %v4851_v61 }
 0x924   : > { %v19383_v1 = vpop.eup %19382 }
 0x925   : > { %18260 = vmatprep.mubr.msk.f32.mxu0 %vm238_vm0, %v4888_v44  ;;  %v4870_v13 = vmul.f32 %v21488_v6, %v4850_v31  ;;  %v4853_v41 = vmul.f32 %v19383_v1, %v21453_v40  ;;  %v4891_v34 = vadd.f32 %v21496_v29, %v4871_v45 }
 0x926   : > { %v19385_v36 = vpop.eup %19384 }
 0x927   : > { %18261 = vmatmul.mubr.msk.f32.gmra.mxu0 %vm238_vm0, %v4889_v28  ;;  %v4890_v10 = vadd.f32 %v21496_v29, %v4870_v13  ;;  %v4852_v59 = vmul.f32 %v19385_v36, %v21459_v15  ;;  %v4873_v50 = vmul.f32 %v21488_v6, %v4853_v41 }
 0x928   : > { %v19387_v33 = vpop.eup %19386 }
 0x929   : > { %18263 = vmatprep.mubr.msk.f32.mxu0 %vm238_vm0, %v4890_v10  ;;  %v4872_v8 = vmul.f32 %v21488_v6, %v4852_v59  ;;  %v4855_v26 = vmul.f32 %v19387_v33, %v21465_v5  ;;  %v4893_v15 = vadd.f32 %v21496_v29, %v4873_v50 }
 0x92a   : > { %v19389_v46 = vpop.eup %19388 }
 0x92b   : > { %18264 = vmatmul.mubr.msk.f32.gmra.mxu0 %vm238_vm0, %v4891_v34  ;;  %v4892_v40 = vadd.f32 %v21496_v29, %v4872_v8  ;;  %v4854_v22 = vmul.f32 %v19389_v46, %v21474_v35  ;;  %v4875_v3 = vmul.f32 %v21488_v6, %v4855_v26  ;;  %v21568_v35 = vld [vmem:[%s24824_s1 + $0x80] ss:$0 sm:$0xff] }
 0x92d   : > { %18266 = vmatprep.mubr.msk.f32.mxu0 %vm238_vm0, %v4892_v40  ;;  %v4874_v7 = vmul.f32 %v21488_v6, %v4854_v22  ;;  %v4895_v5 = vadd.f32 %v21496_v29, %v4875_v3  ;;  %v5102_v3 = vmul.f32 %v21585_v51, %v24973_v27 }
 0x92f   : > { %18267 = vmatmul.mubr.msk.f32.gmra.mxu0 %vm238_vm0, %v4893_v15  ;;  %v4894_v49 = vadd.f32 %v21496_v29, %v4874_v7  ;;  %v21570_v29 = vpop.permute.xlu1 %5103 }
 0x930   : > { %24975 = vst [vmem:[#allocation39_spill] sm:$0xff] %v21570_v29 }
 0x931   : > { %18269 = vmatprep.mubr.msk.f32.mxu0 %vm238_vm0, %v4894_v49 }
 0x933   : > { %18270 = vmatmul.mubr.msk.f32.gmra.mxu0 %vm238_vm0, %v4895_v5 }
 0x934   : > { %18283 = vmatprep.mubr.msk.f32.mxu0 %vm19760_vm2, %v24872_v54 }
 0x9c7   : > { %v18250_v6 = vpop.f32.mrf.mxu0 }
 0x9c8   : > { %v21573_v55 = vadd.f32 %v18250_v6, %v21568_v35 }
 0x9c9   : > { %v5018_v0 = vpop.f32.mrf.mxu0 }
 0x9ca   : > { %v21576_v57 = vadd.f32 %v21568_v35, %v5018_v0  ;;  %18273 = vmatpush3.xpose.msk.msra.mxu1 %vm238_vm0, %v21573_v55  ;;  %v5107_v4 = vmul.f32 %v21570_v29, %v21573_v55  ;;  %v5126_v38 = vmul.f32 %v21587_v25, %v21573_v55 }
 0x9cb   : > { %18274 = vmatprep.subr.mxu1 %v24872_v54 }
 0x9cc   : > { %6527 = vrot.lane.b32.xlu1 %v5107_v4, %s19755_s3  ;;  %v5106_v21 = vmul.f32 %v21570_v29, %v21576_v57  ;;  %v5125_v23 = vmul.f32 %v21587_v25, %v21576_v57 }
 0x9ce   : > { %18275 = vmatpush3.xpose.msk.msra.mxu1 %vm238_vm0, %v21576_v57  ;;  %6525 = vrot.lane.b32.xlu0 %v5106_v21, %s19755_s3 }
 0x9cf   : > { %18286 = vmatprep.subr.mxu1 %v24872_v54 }
 0x9d0   : > { %7175 = vrot.lane.b32.xlu1 %v5126_v38, %s19755_s3 }
 0x9d1   : > { %18277 = vmatmul.mubr.msk.f32.vlgmr.msra.gmra.mxu1 %vm238_vm0, %v21595_v39 }
 0x9d2   : > { %18290 = vmatprep.mubr.msk.f32.mxu1 %vm19760_vm2, %v24872_v54 }
 0x9d4   : > { %7173 = vrot.lane.b32.xlu1 %v5125_v23, %s19755_s3  ;;  %v21866_v23 = vld [vmem:[%s24824_s1 + $0x1e8] ss:$0 sm:$0xff] }
 0x9da   : > { %v18253_v63 = vpop.f32.mrf.mxu0 }
 0x9db   : > { %v21612_v14 = vadd.f32 %v18253_v63, %v21568_v35 }
 0x9dc   : > { %v5028_v11 = vpop.f32.mrf.mxu0 }
 0x9dd   : > { %18280 = vmatpush3.xpose.msk.msra.mxu0 %vm238_vm0, %v21612_v14  ;;  %v5109_v16 = vmul.f32 %v21570_v29, %v21612_v14  ;;  %v21620_v9 = vadd.f32 %v21568_v35, %v5028_v11  ;;  %v5128_v60 = vmul.f32 %v21587_v25, %v21612_v14 }
 0x9de   : > { %18281 = vmatprep.subr.mxu0 %v24872_v54 }
 0x9df   : > { %v18256_v12 = vpop.f32.mrf.mxu0  ;;  %6608 = vrot.lane.b32.xlu0 %v5109_v16, %s19755_s3  ;;  %v5108_v58 = vmul.f32 %v21570_v29, %v21620_v9  ;;  %v5127_v62 = vmul.f32 %v21587_v25, %v21620_v9 }
 0x9e0   : > { %v21624_v17 = vadd.f32 %v18256_v12, %v21568_v35 }
 0x9e1   : > { %v5038_v48 = vpop.f32.mrf.mxu0  ;;  %18282 = vmatpush3.xpose.msk.msra.mxu0 %vm238_vm0, %v21620_v9 }
 0x9e2   : > { %18287 = vmatpush3.xpose.msk.msra.mxu1 %vm238_vm0, %v21624_v17  ;;  %v5111_v52 = vmul.f32 %v21570_v29, %v21624_v17  ;;  %18293 = vmatprep.subr.mxu0 %v24872_v54  ;;  %v21638_v56 = vadd.f32 %v21568_v35, %v5038_v48  ;;  %v5130_v24 = vmul.f32 %v21587_v25, %v21624_v17 }
 0x9e3   : > { %v18259_v20 = vpop.f32.mrf.mxu0  ;;  %7256 = vrot.lane.b32.xlu0 %v5128_v60, %s19755_s3  ;;  %18288 = vmatprep.subr.mxu1 %v24872_v54 }
 0x9e4   : > { %v21641_v30 = vadd.f32 %v18259_v20, %v21568_v35  ;;  %6689 = vrot.lane.b32.xlu1 %v5111_v52, %s19755_s3  ;;  %18284 = vmatmul.mubr.msk.f32.vlgmr.msra.gmra.mxu0 %vm238_vm0, %v21595_v39  ;;  %v5110_v2 = vmul.f32 %v21570_v29, %v21638_v56  ;;  %v5129_v28 = vmul.f32 %v21587_v25, %v21638_v56 }
 0x9e5   : > { %v5048_v37 = vpop.f32.mrf.mxu0  ;;  %18297 = vmatprep.mubr.msk.f32.mxu0 %vm19760_vm2, %v24872_v54 }
 0x9e6   : > { %18289 = vmatpush3.xpose.msk.msra.mxu1 %vm238_vm0, %v21638_v56  ;;  %18294 = vmatpush3.xpose.msk.msra.mxu0 %vm238_vm0, %v21641_v30  ;;  %v21659_v42 = vadd.f32 %v21568_v35, %v5048_v37  ;;  %v5113_v1 = vmul.f32 %v21570_v29, %v21641_v30  ;;  %v5132_v10 = vmul.f32 %v21587_v25, %v21641_v30 }
 0x9e7   : > { %v18262_v19 = vpop.f32.mrf.mxu0  ;;  %6606 = vrot.lane.b32.xlu0 %v5108_v58, %s19755_s3  ;;  %18295 = vmatprep.subr.mxu0 %v24872_v54 }
 0x9e8   : > { %v21662_v43 = vadd.f32 %v18262_v19, %v21568_v35  ;;  %7337 = vrot.lane.b32.xlu1 %v5130_v24, %s19755_s3  ;;  %18300 = vmatprep.subr.mxu1 %v24872_v54  ;;  %v5112_v26 = vmul.f32 %v21570_v29, %v21659_v42  ;;  %v5131_v22 = vmul.f32 %v21587_v25, %v21659_v42 }
 0x9e9   : > { %v5058_v32 = vpop.f32.mrf.mxu0  ;;  %18291 = vmatmul.mubr.msk.f32.vlgmr.msra.gmra.mxu1 %vm238_vm0, %v21595_v39 }
 0x9ea   : > { %18296 = vmatpush3.xpose.msk.msra.mxu0 %vm238_vm0, %v21659_v42  ;;  %18301 = vmatpush3.xpose.msk.msra.mxu1 %vm238_vm0, %v21662_v43  ;;  %v21679_v18 = vadd.f32 %v21568_v35, %v5058_v32  ;;  %v5115_v59 = vmul.f32 %v21570_v29, %v21662_v43 }
 0x9eb   : > { %v18265_v61 = vpop.f32.mrf.mxu0  ;;  %7254 = vrot.lane.b32.xlu0 %v5127_v62, %s19755_s3  ;;  %18302 = vmatprep.subr.mxu1 %v24872_v54 }
 0x9ec   : > { %v21682_v44 = vadd.f32 %v18265_v61, %v21568_v35  ;;  %6687 = vrot.lane.b32.xlu1 %v5110_v2, %s19755_s3  ;;  %18307 = vmatprep.subr.mxu0 %v24872_v54  ;;  %v5114_v46 = vmul.f32 %v21570_v29, %v21679_v18 }
 0x9ed   : > { %v5068_v31 = vpop.f32.mrf.mxu0  ;;  %18298 = vmatmul.mubr.msk.f32.vlgmr.msra.gmra.mxu0 %vm238_vm0, %v21595_v39  ;;  %18304 = vmatprep.mubr.msk.f32.mxu1 %vm19760_vm2, %v24872_v54 }
 0x9ee   : > { %18303 = vmatpush3.xpose.msk.msra.mxu1 %vm238_vm0, %v21679_v18  ;;  %18308 = vmatpush3.xpose.msk.msra.mxu0 %vm238_vm0, %v21682_v44  ;;  %v21701_v45 = vadd.f32 %v21568_v35, %v5068_v31  ;;  %v5117_v15 = vmul.f32 %v21570_v29, %v21682_v44 }
 0x9ef   : > { %v18268_v13 = vpop.f32.mrf.mxu0  ;;  %6770 = vrot.lane.b32.xlu0 %v5113_v1, %s19755_s3  ;;  %18309 = vmatprep.subr.mxu0 %v24872_v54 }
 0x9f0   : > { %v21704_v41 = vadd.f32 %v18268_v13, %v21568_v35  ;;  %7335 = vrot.lane.b32.xlu1 %v5129_v28, %s19755_s3  ;;  %18314 = vmatprep.subr.mxu1 %v24872_v54  ;;  %v5116_v7 = vmul.f32 %v21570_v29, %v21701_v45 }
 0x9f1   : > { %v5078_v36 = vpop.f32.mrf.mxu0  ;;  %18305 = vmatmul.mubr.msk.f32.vlgmr.msra.gmra.mxu1 %vm238_vm0, %v21595_v39  ;;  %18311 = vmatprep.mubr.msk.f32.mxu0 %vm19760_vm2, %v24872_v54 }
 0x9f2   : > { %18310 = vmatpush3.xpose.msk.msra.mxu0 %vm238_vm0, %v21701_v45  ;;  %18315 = vmatpush3.xpose.msk.msra.mxu1 %vm238_vm0, %v21704_v41  ;;  %v21723_v34 = vadd.f32 %v21568_v35, %v5078_v36  ;;  %v5119_v49 = vmul.f32 %v21570_v29, %v21704_v41 }
 0x9f3   : > { %v18271_v33 = vpop.f32.mrf.mxu0  ;;  %7418 = vrot.lane.b32.xlu0 %v5132_v10, %s19755_s3  ;;  %18316 = vmatprep.subr.mxu1 %v24872_v54 }
 0x9f4   : > { %v21726_v8 = vadd.f32 %v18271_v33, %v21568_v35  ;;  %6851 = vrot.lane.b32.xlu1 %v5115_v59, %s19755_s3  ;;  %18321 = vmatprep.subr.mxu0 %v24872_v54 }
 0x9f5   : > { %v5088_v50 = vpop.f32.mrf.mxu0  ;;  %18312 = vmatmul.mubr.msk.f32.vlgmr.msra.gmra.mxu0 %vm238_vm0, %v21595_v39  ;;  %18318 = vmatprep.mubr.msk.f32.mxu1 %vm19760_vm2, %v24872_v54 }
 0x9f6   : > { %18317 = vmatpush3.xpose.msk.msra.mxu1 %vm238_vm0, %v21723_v34  ;;  %18322 = vmatpush3.xpose.msk.msra.mxu0 %vm238_vm0, %v21726_v8  ;;  %v21745_v40 = vadd.f32 %v21568_v35, %v5088_v50  ;;  %v5121_v5 = vmul.f32 %v21570_v29, %v21726_v8  ;;  %v5118_v35 = vmul.f32 %v21570_v29, %v21723_v34 }
 0x9f7   : > { %6768 = vrot.lane.b32.xlu0 %v5112_v26, %s19755_s3  ;;  %18323 = vmatprep.subr.mxu0 %v24872_v54 }
 0x9f8   : > { %6849 = vrot.lane.b32.xlu1 %v5114_v46, %s19755_s3  ;;  %18328 = vmatprep.subr.mxu1 %v24872_v54  ;;  %v5120_v6 = vmul.f32 %v21570_v29, %v21745_v40 }
 0x9f9   : > { %18319 = vmatmul.mubr.msk.f32.vlgmr.msra.gmra.mxu1 %vm238_vm0, %v21595_v39  ;;  %18325 = vmatprep.mubr.msk.f32.mxu0 %vm19760_vm2, %v24872_v54 }
 0x9fa   : > { %18324 = vmatpush3.xpose.msk.msra.mxu0 %vm238_vm0, %v21745_v40  ;;  %18329 = vmatpush3.xpose.msk.msra.mxu1 %vm238_vm0, %v21573_v55 }
 0x9fb   : > { %7416 = vrot.lane.b32.xlu0 %v5131_v22, %s19755_s3  ;;  %18330 = vmatprep.subr.mxu1 %v24872_v54 }
 0x9fc   : > { %6932 = vrot.lane.b32.xlu1 %v5117_v15, %s19755_s3  ;;  %18335 = vmatprep.subr.mxu0 %v24872_v54 }
 0x9fd   : > { %18326 = vmatmul.mubr.msk.f32.vlgmr.msra.gmra.mxu0 %vm238_vm0, %v21595_v39  ;;  %18332 = vmatprep.mubr.msk.f32.mxu1 %vm19760_vm2, %v24872_v54 }
 0x9fe   : > { %18331 = vmatpush3.xpose.msk.msra.mxu1 %vm238_vm0, %v21576_v57  ;;  %18336 = vmatpush3.xpose.msk.msra.mxu0 %vm238_vm0, %v21612_v14 }
 0x9ff   : > { %6930 = vrot.lane.b32.xlu0 %v5116_v7, %s19755_s3  ;;  %18337 = vmatprep.subr.mxu0 %v24872_v54 }
 0xa00   : > { %7013 = vrot.lane.b32.xlu1 %v5119_v49, %s19755_s3  ;;  %18342 = vmatprep.subr.mxu1 %v24872_v54 }
 0xa01   : > { %18333 = vmatmul.mubr.msk.f32.vlgmr.msra.gmra.mxu1 %vm238_vm0, %v5102_v3  ;;  %18339 = vmatprep.mubr.msk.f32.mxu0 %vm19760_vm2, %v24872_v54 }
 0xa02   : > { %18338 = vmatpush3.xpose.msk.msra.mxu0 %vm238_vm0, %v21620_v9  ;;  %18343 = vmatpush3.xpose.msk.msra.mxu1 %vm238_vm0, %v21624_v17 }
 0xa03   : > { %7094 = vrot.lane.b32.xlu0 %v5121_v5, %s19755_s3  ;;  %18344 = vmatprep.subr.mxu1 %v24872_v54 }
 0xa04   : > { %7011 = vrot.lane.b32.xlu1 %v5118_v35, %s19755_s3  ;;  %18349 = vmatprep.subr.mxu0 %v24872_v54 }
 0xa05   : > { %18340 = vmatmul.mubr.msk.f32.vlgmr.msra.gmra.mxu0 %vm238_vm0, %v5102_v3  ;;  %18346 = vmatprep.mubr.msk.f32.mxu1 %vm19760_vm2, %v24872_v54 }
 0xa06   : > { %18345 = vmatpush3.xpose.msk.msra.mxu1 %vm238_vm0, %v21638_v56  ;;  %18350 = vmatpush3.xpose.msk.msra.mxu0 %vm238_vm0, %v21641_v30 }
 0xa07   : > { %7092 = vrot.lane.b32.xlu0 %v5120_v6, %s19755_s3  ;;  %18351 = vmatprep.subr.mxu0 %v24872_v54 }
 0xa08   : > { %18356 = vmatprep.subr.mxu1 %v24872_v54  ;;  %18353 = vmatprep.mubr.msk.f32.mxu0 %vm19760_vm2, %v24872_v54 }
 0xa09   : > { %18347 = vmatmul.mubr.msk.f32.vlgmr.msra.gmra.mxu1 %vm238_vm0, %v5102_v3 }
 0xa0a   : > { %18352 = vmatpush3.xpose.msk.msra.mxu0 %vm238_vm0, %v21659_v42  ;;  %18357 = vmatpush3.xpose.msk.msra.mxu1 %vm238_vm0, %v21662_v43 }
 0xa0b   : > { %18358 = vmatprep.subr.mxu1 %v24872_v54  ;;  %18363 = vmatprep.subr.mxu0 %v24872_v54 }
 0xa0c   : > { %18360 = vmatprep.mubr.msk.f32.mxu1 %vm19760_vm2, %v24872_v54 }
 0xa0d   : > { %18354 = vmatmul.mubr.msk.f32.vlgmr.msra.gmra.mxu0 %vm238_vm0, %v5102_v3 }
 0xa0e   : > { %18359 = vmatpush3.xpose.msk.msra.mxu1 %vm238_vm0, %v21679_v18  ;;  %18364 = vmatpush3.xpose.msk.msra.mxu0 %vm238_vm0, %v21682_v44 }
 0xa0f   : > { %18365 = vmatprep.subr.mxu0 %v24872_v54  ;;  %18370 = vmatprep.subr.mxu1 %v24872_v54 }
 0xa10   : > { %18367 = vmatprep.mubr.msk.f32.mxu0 %vm19760_vm2, %v24872_v54 }
 0xa11   : > { %18361 = vmatmul.mubr.msk.f32.vlgmr.msra.gmra.mxu1 %vm238_vm0, %v5102_v3 }
 0xa12   : > { %18366 = vmatpush3.xpose.msk.msra.mxu0 %vm238_vm0, %v21701_v45  ;;  %18371 = vmatpush3.xpose.msk.msra.mxu1 %vm238_vm0, %v21704_v41 }
 0xa13   : > { %18372 = vmatprep.subr.mxu1 %v24872_v54  ;;  %18377 = vmatprep.subr.mxu0 %v24872_v54 }
 0xa14   : > { %18374 = vmatprep.mubr.msk.f32.mxu1 %vm19760_vm2, %v24872_v54 }
 0xa15   : > { %18368 = vmatmul.mubr.msk.f32.vlgmr.msra.gmra.mxu0 %vm238_vm0, %v5102_v3 }
 0xa16   : > { %18373 = vmatpush3.xpose.msk.msra.mxu1 %vm238_vm0, %v21723_v34  ;;  %18378 = vmatpush3.xpose.msk.msra.mxu0 %vm238_vm0, %v21726_v8 }
 0xa17   : > { %18379 = vmatprep.subr.mxu0 %v24872_v54  ;;  %18384 = vmatprep.subr.mxu1 %v24872_v54 }
 0xa18   : > { %18381 = vmatprep.mubr.msk.f32.mxu0 %vm19760_vm2, %v24872_v54 }
 0xa19   : > { %18375 = vmatmul.mubr.msk.f32.vlgmr.msra.gmra.mxu1 %vm238_vm0, %v5102_v3 }
 0xa1a   : > { %18380 = vmatpush3.xpose.msk.msra.mxu0 %vm238_vm0, %v21745_v40  ;;  %18388 = vmatprep.mubr.msk.f32.mxu1 %vm19760_vm2, %v24872_v54 }
 0xa1b   : > { %18391 = vmatprep.subr.mxu0 %v24872_v54 }
 0xa1d   : > { %18382 = vmatmul.mubr.msk.f32.vlgmr.msra.gmra.mxu0 %vm238_vm0, %v5102_v3 }
 0xa1e   : > { %18395 = vmatprep.mubr.msk.f32.mxu0 %vm19760_vm2, %v24872_v54 }
 0xa3e   : > { %v6528_v55 = vpop.permute.xlu1 %6527 }
 0xa3f   : > { %18385 = vmatpush3.msra.mxu1 %v6528_v55 }
 0xa40   : > { %18386 = vmatprep.subr.mxu1 %v24872_v54  ;;  %v6526_v0 = vpop.permute.xlu0 %6525 }
 0xa41   : > { %18387 = vmatpush3.msra.mxu1 %v6526_v0 }
 0xa42   : > { %18398 = vmatprep.subr.mxu1 %v24872_v54 }
 0xa51   : > { %v6609_v57 = vpop.permute.xlu0 %6608 }
 0xa52   : > { %18392 = vmatpush3.msra.mxu0 %v6609_v57 }
 0xa53   : > { %18393 = vmatprep.subr.mxu0 %v24872_v54 }
 0xa55   : > { %v21860_v4 = vpop.permute.xlu0 %7256 }
 0xa59   : > { %v6607_v51 = vpop.permute.xlu0 %6606 }
 0xa5a   : > { %18394 = vmatpush3.msra.mxu0 %v6607_v51 }
 0xa5b   : > { %18405 = vmatprep.subr.mxu0 %v24872_v54 }
 0xa91   : > { %v5216_v21 = vpop.f32.mrf.mxu1 }
 0xa92   : > { %v6315_v39 = vmul.f32 0.5, %v5216_v21 }
 0xa93   : > { %v18278_v38 = vpop.f32.mrf.mxu1 }
 0xa94   : > { %v21869_v63 = vadd.f32 %v21866_v23, %v6315_v39 }
 0xa96   : > { %v6347_v14 = vsel %vm1956_vm1, %v21869_v63, -inf }
 0xa97   : > { %6348 = vmax.xlane.f32.xlu0 %v6347_v14 }
 0xaa4   : > { %v5292_v11 = vpop.f32.mrf.mxu0 }
 0xaa5   : > { %v6316_v16 = vmul.f32 0.5, %v5292_v11 }
 0xaa6   : > { %v18285_v9 = vpop.f32.mrf.mxu0 }
 0xaa7   : > { %v21874_v12 = vadd.f32 %v21866_v23, %v6316_v16 }
 0xaa9   : > { %v5368_v17 = vpop.f32.mrf.mxu1  ;;  %v6350_v48 = vsel %vm1956_vm1, %v21874_v12, -inf }
 0xaaa   : > { %v6317_v60 = vmul.f32 0.5, %v5368_v17  ;;  %6351 = vmax.xlane.f32.xlu1 %v6350_v48 }
 0xaab   : > { %v18292_v52 = vpop.f32.mrf.mxu1 }
 0xaac   : > { %v21879_v20 = vadd.f32 %v21866_v23, %v6317_v60 }
 0xaad   : > { %v5444_v56 = vpop.f32.mrf.mxu0 }
 0xaae   : > { %v6318_v30 = vmul.f32 0.5, %v5444_v56  ;;  %v6353_v37 = vsel %vm1956_vm1, %v21879_v20, -inf }
 0xaaf   : > { %v18299_v58 = vpop.f32.mrf.mxu0  ;;  %6354 = vmax.xlane.f32.xlu0 %v6353_v37 }
 0xab0   : > { %v21884_v24 = vadd.f32 %v21866_v23, %v6318_v30 }
 0xab1   : > { %v5520_v19 = vpop.f32.mrf.mxu1 }
 0xab2   : > { %v6319_v42 = vmul.f32 0.5, %v5520_v19  ;;  %v6356_v32 = vsel %vm1956_vm1, %v21884_v24, -inf }
 0xab3   : > { %6357 = vmax.xlane.f32.xlu1 %v6356_v32  ;;  %v18306_v62 = vpop.f32.mrf.mxu1 }
 0xab4   : > { %v21889_v2 = vadd.f32 %v21866_v23, %v6319_v42 }
 0xab5   : > { %v5596_v61 = vpop.f32.mrf.mxu0 }
 0xab6   : > { %v6320_v31 = vmul.f32 0.5, %v5596_v61  ;;  %v6359_v1 = vsel %vm1956_vm1, %v21889_v2, -inf }
 0xab7   : > { %v18313_v28 = vpop.f32.mrf.mxu0  ;;  %6360 = vmax.xlane.f32.xlu0 %v6359_v1 }
 0xab8   : > { %v21894_v13 = vadd.f32 %v21866_v23, %v6320_v31 }
 0xab9   : > { %v5672_v36 = vpop.f32.mrf.mxu1 }
 0xaba   : > { %v6321_v10 = vmul.f32 0.5, %v5672_v36  ;;  %v6362_v59 = vsel %vm1956_vm1, %v21894_v13, -inf }
 0xabb   : > { %6363 = vmax.xlane.f32.xlu1 %v6362_v59  ;;  %v18320_v33 = vpop.f32.mrf.mxu1 }
 0xabc   : > { %v21899_v50 = vadd.f32 %v21866_v23, %v6321_v10 }
 0xabd   : > { %v5748_v26 = vpop.f32.mrf.mxu0 }
 0xabe   : > { %v6322_v46 = vmul.f32 0.5, %v5748_v26  ;;  %v6365_v22 = vsel %vm1956_vm1, %v21899_v50, -inf }
 0xabf   : > { %v18327_v15 = vpop.f32.mrf.mxu0  ;;  %6366 = vmax.xlane.f32.xlu0 %v6365_v22  ;;  %v5134_v22 = vmul.f32 %v21587_v25, %v21662_v43 }
 0xac0   : > { %v21904_v7 = vadd.f32 %v21866_v23, %v6322_v46  ;;  %v5133_v15 = vmul.f32 %v21587_v25, %v21679_v18  ;;  %v5140_v18 = vmul.f32 %v21587_v25, %v21726_v8 }
 0xac1   : > { %v5821_v3 = vpop.f32.mrf.mxu1 }
 0xac2   : > { %v6323_v49 = vmul.f32 0.5, %v5821_v3  ;;  %v6368_v5 = vsel %vm1956_vm1, %v21904_v7, -inf  ;;  %v21949_v3 = vpop.permute.xlu0 %7254 }
 0xac3   : > { %6369 = vmax.xlane.f32.xlu1 %v6368_v5  ;;  %v18334_v35 = vpop.f32.mrf.mxu1  ;;  %v21953_v5 = vpop.permute.xlu1 %7175 }
 0xac4   : > { %v21909_v6 = vadd.f32 %v21866_v23, %v6323_v49  ;;  %v5136_v49 = vmul.f32 %v21587_v25, %v21682_v44  ;;  %v5135_v35 = vmul.f32 %v21587_v25, %v21701_v45 }
 0xac5   : > { %v5891_v55 = vpop.f32.mrf.mxu0 }
 0xac6   : > { %v6324_v0 = vmul.f32 0.5, %v5891_v55  ;;  %v6371_v57 = vsel %vm1956_vm1, %v21909_v6, -inf  ;;  %v21958_v43 = vpop.permute.xlu0 %6770 }
 0xac7   : > { %v18341_v51 = vpop.f32.mrf.mxu0  ;;  %6372 = vmax.xlane.f32.xlu0 %v6371_v57  ;;  %v21961_v55 = vpop.permute.xlu1 %7173 }
 0xac8   : > { %v21914_v21 = vadd.f32 %v21866_v23, %v6324_v0 }
 0xac9   : > { %v5961_v39 = vpop.f32.mrf.mxu1 }
 0xaca   : > { %v6325_v38 = vmul.f32 0.5, %v5961_v39  ;;  %v6374_v14 = vsel %vm1956_vm1, %v21914_v21, -inf  ;;  %v21966_v0 = vpop.permute.xlu0 %7418 }
 0xacb   : > { %6375 = vmax.xlane.f32.xlu1 %v6374_v14  ;;  %v18348_v11 = vpop.f32.mrf.mxu1  ;;  %v21968_v44 = vpop.permute.xlu1 %6689 }
 0xacc   : > { %v21919_v16 = vadd.f32 %v21866_v23, %v6325_v38 }
 0xacd   : > { %v6031_v9 = vpop.f32.mrf.mxu0 }
 0xace   : > { %v6326_v17 = vmul.f32 0.5, %v6031_v9  ;;  %v6377_v48 = vsel %vm1956_vm1, %v21919_v16, -inf  ;;  %v21970_v57 = vpop.permute.xlu0 %6768 }
 0xacf   : > { %v18355_v60 = vpop.f32.mrf.mxu0  ;;  %6378 = vmax.xlane.f32.xlu0 %v6377_v48  ;;  %v21972_v51 = vpop.permute.xlu1 %7337 }
 0xad0   : > { %v21924_v52 = vadd.f32 %v21866_v23, %v6326_v17 }
 0xad1   : > { %v6101_v56 = vpop.f32.mrf.mxu1 }
 0xad2   : > { %v6327_v30 = vmul.f32 0.5, %v6101_v56  ;;  %v6380_v37 = vsel %vm1956_vm1, %v21924_v52, -inf  ;;  %v21974_v39 = vpop.permute.xlu0 %7416 }
 0xad3   : > { %6381 = vmax.xlane.f32.xlu1 %v6380_v37  ;;  %v18362_v58 = vpop.f32.mrf.mxu1  ;;  %v21976_v38 = vpop.permute.xlu1 %6687 }
 0xad4   : > { %v21929_v19 = vadd.f32 %v21866_v23, %v6327_v30 }
 0xad5   : > { %v6171_v42 = vpop.f32.mrf.mxu0 }
 0xad6   : > { %v6328_v32 = vmul.f32 0.5, %v6171_v42  ;;  %v6383_v62 = vsel %vm1956_vm1, %v21929_v19, -inf  ;;  %v21981_v11 = vpop.permute.xlu0 %6930  ;;  %v5138_v42 = vmul.f32 %v21587_v25, %v21704_v41 }
 0xad7   : > { %v18369_v61 = vpop.f32.mrf.mxu0  ;;  %6384 = vmax.xlane.f32.xlu0 %v6383_v62  ;;  %v21983_v8 = vpop.permute.xlu1 %7335 }
 0xad8   : > { %v21934_v31 = vadd.f32 %v21866_v23, %v6328_v32 }
 0xad9   : > { %v6241_v1 = vpop.f32.mrf.mxu1 }
 0xada   : > { %v6329_v28 = vmul.f32 0.5, %v6241_v1  ;;  %v6386_v36 = vsel %vm1956_vm1, %v21934_v31, -inf  ;;  %v21987_v17 = vpop.permute.xlu0 %7094 }
 0xadb   : > { %6387 = vmax.xlane.f32.xlu1 %v6386_v36  ;;  %v18376_v10 = vpop.f32.mrf.mxu1  ;;  %v21989_v48 = vpop.permute.xlu1 %6851 }
 0xadc   : > { %v21939_v59 = vadd.f32 %v21866_v23, %v6329_v28 }
 0xadd   : > { %v6311_v33 = vpop.f32.mrf.mxu0 }
 0xade   : > { %v6389_v26 = vsel %vm1956_vm1, %v21939_v59, -inf  ;;  %v6330_v45 = vmul.f32 0.5, %v6311_v33  ;;  %v21991_v60 = vpop.permute.xlu0 %7092 }
 0xadf   : > { %6390 = vmax.xlane.f32.xlu0 %v6389_v26  ;;  %v18383_v46 = vpop.f32.mrf.mxu0  ;;  %v21993_v56 = vpop.permute.xlu1 %6849 }
 0xae0   : > { %v21979_v14 = vadd.f32 %v21866_v23, %v6330_v45 }
 0xae2   : > { %v6392_v9 = vsel %vm1956_vm1, %v21979_v14, -inf }
 0xae3   : > { %v21996_v37 = vpop.permute.xlu1 %6932 }
 0xae7   : > { %v22001_v32 = vpop.permute.xlu1 %7013 }
 0xaeb   : > { %v22003_v62 = vpop.permute.xlu1 %7011 }
 0xaec   : > { %7499 = vrot.lane.b32.xlu1 %v5134_v22, %s19755_s3 }
 0xaf0   : > { %7497 = vrot.lane.b32.xlu1 %v5133_v15, %s19755_s3 }
 0xaf5   : > { %7580 = vrot.lane.b32.xlu0 %v5136_v49, %s19755_s3 }
 0xaf9   : > { %7578 = vrot.lane.b32.xlu0 %v5135_v35, %s19755_s3 }
 0xafd   : > { %7742 = vrot.lane.b32.xlu0 %v5140_v18, %s19755_s3 }
 0xb14   : > { %6393 = vmax.xlane.f32.xlu1 %v6392_v9 }
 0xb20   : > { %v6349_v30 = vpop.xlane.xlu0 %6348 }
 0xb21   : > { %v6395_v23 = vsub.f32 %v21869_v63, %v6349_v30 }
 0xb23   : > { %v6411_v58 = vmul.f32 1.442695, %v6395_v23 }
 0xb25   : > { %19390 = vpow2.f32 %v6411_v58  ;;  %7661 = vrot.lane.b32.xlu1 %v5138_v42, %s19755_s3 }
 0xb32   : > { %v22005_v61 = vpop.eup %19390 }
 0xb33   : > { %v6352_v1 = vpop.xlane.xlu1 %6351  ;;  %v6443_v28 = vsel %vm1956_vm1, %v22005_v61, 0.0 }
 0xb34   : > { %v6396_v63 = vsub.f32 %v21874_v12, %v6352_v1  ;;  %6444 = vadd.xlane.f32.xlu0 %v6443_v28 }
 0xb36   : > { %v6413_v36 = vmul.f32 1.442695, %v6396_v63 }
 0xb38   : > { %19392 = vpow2.f32 %v6413_v36  ;;  %v6355_v10 = vpop.xlane.xlu0 %6354 }
 0xb39   : > { %v6397_v41 = vsub.f32 %v21879_v20, %v6355_v10 }
 0xb3b   : > { %v6415_v33 = vmul.f32 1.442695, %v6397_v41 }
 0xb3c   : > { %v6358_v26 = vpop.xlane.xlu1 %6357 }
 0xb3d   : > { %19394 = vpow2.f32 %v6415_v33  ;;  %v6398_v46 = vsub.f32 %v21884_v24, %v6358_v26 }
 0xb3f   : > { %v6417_v22 = vmul.f32 1.442695, %v6398_v46 }
 0xb40   : > { %v6361_v15 = vpop.xlane.xlu0 %6360 }
 0xb41   : > { %19396 = vpow2.f32 %v6417_v22  ;;  %v6399_v49 = vsub.f32 %v21889_v2, %v6361_v15 }
 0xb43   : > { %v6419_v35 = vmul.f32 1.442695, %v6399_v49 }
 0xb44   : > { %v6364_v18 = vpop.xlane.xlu1 %6363 }
 0xb45   : > { %v22013_v45 = vpop.eup %19392  ;;  %19398 = vpow2.f32 %v6419_v35  ;;  %v6400_v12 = vsub.f32 %v21894_v13, %v6364_v18 }
 0xb46   : > { %v6446_v20 = vsel %vm1956_vm1, %v22013_v45, 0.0 }
 0xb47   : > { %v6421_v9 = vmul.f32 1.442695, %v6400_v12 }
 0xb48   : > { %v6367_v30 = vpop.xlane.xlu0 %6366 }
 0xb49   : > { %19400 = vpow2.f32 %v6421_v9  ;;  %v6401_v24 = vsub.f32 %v21899_v50, %v6367_v30  ;;  %6447 = vadd.xlane.f32.xlu1 %v6446_v20 }
 0xb4a   : > { %v22019_v23 = vpop.eup %19394 }
 0xb4b   : > { %v6423_v58 = vmul.f32 1.442695, %v6401_v24  ;;  %v6449_v2 = vsel %vm1956_vm1, %v22019_v23, 0.0 }
 0xb4c   : > { %v6370_v42 = vpop.xlane.xlu1 %6369  ;;  %6450 = vadd.xlane.f32.xlu0 %v6449_v2 }
 0xb4d   : > { %19402 = vpow2.f32 %v6423_v58  ;;  %v6402_v13 = vsub.f32 %v21904_v7, %v6370_v42 }
 0xb4e   : > { %v22024_v1 = vpop.eup %19396 }
 0xb4f   : > { %v6425_v28 = vmul.f32 1.442695, %v6402_v13  ;;  %v6452_v63 = vsel %vm1956_vm1, %v22024_v1, 0.0 }
 0xb50   : > { %6453 = vadd.xlane.f32.xlu1 %v6452_v63  ;;  %v6373_v50 = vpop.xlane.xlu0 %6372 }
 0xb51   : > { %19404 = vpow2.f32 %v6425_v28  ;;  %v6403_v36 = vsub.f32 %v21909_v6, %v6373_v50 }
 0xb52   : > { %v22029_v10 = vpop.eup %19398 }
 0xb53   : > { %v6427_v41 = vmul.f32 1.442695, %v6403_v36  ;;  %v6455_v33 = vsel %vm1956_vm1, %v22029_v10, 0.0 }
 0xb54   : > { %v6376_v26 = vpop.xlane.xlu1 %6375  ;;  %6456 = vadd.xlane.f32.xlu0 %v6455_v33 }
 0xb55   : > { %19406 = vpow2.f32 %v6427_v41  ;;  %v6404_v7 = vsub.f32 %v21914_v21, %v6376_v26 }
 0xb56   : > { %v22034_v46 = vpop.eup %19400 }
 0xb57   : > { %v6429_v22 = vmul.f32 1.442695, %v6404_v7  ;;  %v6458_v15 = vsel %vm1956_vm1, %v22034_v46, 0.0 }
 0xb58   : > { %6459 = vadd.xlane.f32.xlu1 %v6458_v15  ;;  %v6379_v49 = vpop.xlane.xlu0 %6378 }
 0xb59   : > { %19408 = vpow2.f32 %v6429_v22  ;;  %v6405_v6 = vsub.f32 %v21919_v16, %v6379_v49 }
 0xb5a   : > { %v22039_v35 = vpop.eup %19402 }
 0xb5b   : > { %v6431_v18 = vmul.f32 1.442695, %v6405_v6  ;;  %v6461_v12 = vsel %vm1956_vm1, %v22039_v35, 0.0 }
 0xb5c   : > { %v6382_v20 = vpop.xlane.xlu1 %6381  ;;  %6462 = vadd.xlane.f32.xlu0 %v6461_v12 }
 0xb5d   : > { %19410 = vpow2.f32 %v6431_v18  ;;  %v6406_v21 = vsub.f32 %v21924_v52, %v6382_v20  ;;  %v5139_v20 = vmul.f32 %v21587_v25, %v21745_v40 }
 0xb5e   : > { %v22044_v9 = vpop.eup %19404 }
 0xb5f   : > { %v6433_v30 = vmul.f32 1.442695, %v6406_v21  ;;  %v6464_v24 = vsel %vm1956_vm1, %v22044_v9, 0.0 }
 0xb60   : > { %6465 = vadd.xlane.f32.xlu1 %v6464_v24  ;;  %v6385_v58 = vpop.xlane.xlu0 %6384 }
 0xb61   : > { %19412 = vpow2.f32 %v6433_v30  ;;  %v6407_v16 = vsub.f32 %v21929_v19, %v6385_v58 }
 0xb62   : > { %v22049_v2 = vpop.eup %19406 }
 0xb63   : > { %v6435_v42 = vmul.f32 1.442695, %v6407_v16  ;;  %v6467_v13 = vsel %vm1956_vm1, %v22049_v2, 0.0 }
 0xb64   : > { %v6388_v28 = vpop.xlane.xlu1 %6387  ;;  %6468 = vadd.xlane.f32.xlu0 %v6467_v13 }
 0xb65   : > { %19414 = vpow2.f32 %v6435_v42  ;;  %v6408_v52 = vsub.f32 %v21934_v31, %v6388_v28 }
 0xb66   : > { %v22054_v63 = vpop.eup %19408 }
 0xb67   : > { %v6437_v50 = vmul.f32 1.442695, %v6408_v52  ;;  %v6470_v36 = vsel %vm1956_vm1, %v22054_v63, 0.0 }
 0xb68   : > { %6471 = vadd.xlane.f32.xlu1 %v6470_v36  ;;  %v6391_v41 = vpop.xlane.xlu0 %6390  ;;  %v22082_v21 = vpop.permute.xlu1 %7499  ;;  %v5137_v36 = vmul.f32 %v21587_v25, %v21723_v34 }
 0xb69   : > { %19416 = vpow2.f32 %v6437_v50  ;;  %v6409_v19 = vsub.f32 %v21939_v59, %v6391_v41 }
 0xb6a   : > { %v22059_v33 = vpop.eup %19410 }
 0xb6b   : > { %v6439_v26 = vmul.f32 1.442695, %v6409_v19  ;;  %v6473_v7 = vsel %vm1956_vm1, %v22059_v33, 0.0 }
 0xb6c   : > { %6474 = vadd.xlane.f32.xlu0 %v6473_v7  ;;  %v22084_v30 = vpop.permute.xlu1 %7497  ;;  %v22087_v42 = vpop.permute.xlu0 %7580 }
 0xb6d   : > { %19418 = vpow2.f32 %v6439_v26 }
 0xb6e   : > { %v22063_v31 = vpop.eup %19412 }
 0xb6f   : > { %v6476_v22 = vsel %vm1956_vm1, %v22063_v31, 0.0 }
 0xb70   : > { %6477 = vadd.xlane.f32.xlu1 %v6476_v22  ;;  %v22093_v40 = vpop.permute.xlu0 %7578 }
 0xb72   : > { %v22067_v15 = vpop.eup %19414 }
 0xb73   : > { %v6479_v49 = vsel %vm1956_vm1, %v22067_v15, 0.0 }
 0xb74   : > { %6480 = vadd.xlane.f32.xlu1 %v6479_v49  ;;  %v22095_v52 = vpop.permute.xlu0 %7742 }
 0xb76   : > { %v22071_v59 = vpop.eup %19416 }
 0xb77   : > { %v6482_v6 = vsel %vm1956_vm1, %v22071_v59, 0.0 }
 0xb78   : > { %6483 = vadd.xlane.f32.xlu1 %v6482_v6 }
 0xb7a   : > { %v22075_v18 = vpop.eup %19418 }
 0xb7b   : > { %v6485_v12 = vsel %vm1956_vm1, %v22075_v18, 0.0 }
 0xb7c   : > { %6486 = vadd.xlane.f32.xlu0 %v6485_v12 }
 0xb92   : > { %7740 = vrot.lane.b32.xlu0 %v5139_v20, %s19755_s3 }
 0xb9d   : > { %v6394_v24 = vpop.xlane.xlu1 %6393 }
 0xb9e   : > { %v6410_v58 = vsub.f32 %v21979_v14, %v6394_v24 }
 0xba0   : > { %v6441_v16 = vmul.f32 1.442695, %v6410_v58 }
 0xba1   : > { %v22101_v19 = vpop.permute.xlu1 %7661 }
 0xba2   : > { %19420 = vpow2.f32 %v6441_v16 }
 0xbaf   : > { %v22089_v13 = vpop.eup %19420 }
 0xbb0   : > { %v6488_v28 = vsel %vm1956_vm1, %v22089_v13, 0.0 }
 0xbb1   : > { %6489 = vadd.xlane.f32.xlu1 %v6488_v28 }
 0xbbd   : > { %v6445_v50 = vpop.xlane.xlu0 %6444 }
 0xbbe   : > { %19422 = vrcp.f32 %v6445_v50 }
 0xbc2   : > { %7659 = vrot.lane.b32.xlu1 %v5137_v36, %s19755_s3 }
 0xbcb   : > { %v19423_v14 = vpop.eup %19422 }
 0xbcc   : > { %v6507_v41 = vmul.f32 %v19423_v14, %v22005_v61 }
 0xbce   : > { %18389 = vmatmul.mubr.msk.f32.vlgmr.msra.gmra.mxu1 %vm1956_vm1, %v6507_v41 }
 0xbcf   : > { %18399 = vmatpush3.msra.mxu1 %v21968_v44  ;;  %18402 = vmatprep.mubr.msk.f32.mxu1 %vm19760_vm2, %v24872_v54 }
 0xbd0   : > { %18400 = vmatprep.subr.mxu1 %v24872_v54 }
 0xbd1   : > { %18401 = vmatpush3.msra.mxu1 %v21976_v38 }
 0xbd2   : > { %v6448_v26 = vpop.xlane.xlu1 %6447  ;;  %18412 = vmatprep.subr.mxu1 %v24872_v54 }
 0xbd3   : > { %19424 = vrcp.f32 %v6448_v26 }
 0xbd5   : > { %v6451_v34 = vpop.xlane.xlu0 %6450 }
 0xbd6   : > { %19426 = vrcp.f32 %v6451_v34 }
 0xbd9   : > { %v6454_v61 = vpop.xlane.xlu1 %6453 }
 0xbda   : > { %19428 = vrcp.f32 %v6454_v61 }
 0xbdd   : > { %v6457_v7 = vpop.xlane.xlu0 %6456 }
 0xbde   : > { %19430 = vrcp.f32 %v6457_v7 }
 0xbe0   : > { %v19425_v22 = vpop.eup %19424 }
 0xbe1   : > { %v6460_v49 = vpop.xlane.xlu1 %6459  ;;  %v6508_v44 = vmul.f32 %v19425_v22, %v22013_v45 }
 0xbe2   : > { %19432 = vrcp.f32 %v6460_v49 }
 0xbe3   : > { %v19427_v6 = vpop.eup %19426  ;;  %18396 = vmatmul.mubr.msk.f32.vlgmr.msra.gmra.mxu0 %vm1956_vm1, %v6508_v44 }
 0xbe4   : > { %18406 = vmatpush3.msra.mxu0 %v21958_v43  ;;  %v6509_v38 = vmul.f32 %v19427_v6, %v22019_v23  ;;  %18409 = vmatprep.mubr.msk.f32.mxu0 %vm19760_vm2, %v24872_v54 }
 0xbe5   : > { %18407 = vmatprep.subr.mxu0 %v24872_v54  ;;  %v6463_v12 = vpop.xlane.xlu0 %6462 }
 0xbe6   : > { %18408 = vmatpush3.msra.mxu0 %v21970_v57  ;;  %19434 = vrcp.f32 %v6463_v12  ;;  %18403 = vmatmul.mubr.msk.f32.vlgmr.msra.gmra.mxu1 %vm1956_vm1, %v6509_v38 }
 0xbe7   : > { %v19429_v45 = vpop.eup %19428  ;;  %18413 = vmatpush3.msra.mxu1 %v21989_v48  ;;  %18419 = vmatprep.subr.mxu0 %v24872_v54 }
 0xbe8   : > { %18414 = vmatprep.subr.mxu1 %v24872_v54  ;;  %v6510_v43 = vmul.f32 %v19429_v45, %v22024_v1  ;;  %18416 = vmatprep.mubr.msk.f32.mxu1 %vm19760_vm2, %v24872_v54 }
 0xbe9   : > { %18415 = vmatpush3.msra.mxu1 %v21993_v56  ;;  %v6466_v23 = vpop.xlane.xlu1 %6465 }
 0xbea   : > { %19436 = vrcp.f32 %v6466_v23  ;;  %18410 = vmatmul.mubr.msk.f32.vlgmr.msra.gmra.mxu0 %vm1956_vm1, %v6510_v43  ;;  %18426 = vmatprep.subr.mxu1 %v24872_v54 }
 0xbeb   : > { %v19431_v57 = vpop.eup %19430  ;;  %18420 = vmatpush3.msra.mxu0 %v21996_v37  ;;  %18423 = vmatprep.mubr.msk.f32.mxu0 %vm19760_vm2, %v24872_v54 }
 0xbec   : > { %18421 = vmatprep.subr.mxu0 %v24872_v54  ;;  %v6511_v48 = vmul.f32 %v19431_v57, %v22029_v10 }
 0xbed   : > { %18422 = vmatpush3.msra.mxu0 %v21981_v11  ;;  %v6469_v1 = vpop.xlane.xlu0 %6468 }
 0xbee   : > { %19438 = vrcp.f32 %v6469_v1  ;;  %18417 = vmatmul.mubr.msk.f32.vlgmr.msra.gmra.mxu1 %vm1956_vm1, %v6511_v48  ;;  %18433 = vmatprep.subr.mxu0 %v24872_v54 }
 0xbef   : > { %v19433_v56 = vpop.eup %19432  ;;  %18427 = vmatpush3.msra.mxu1 %v22001_v32  ;;  %18430 = vmatprep.mubr.msk.f32.mxu1 %vm19760_vm2, %v24872_v54 }
 0xbf0   : > { %18428 = vmatprep.subr.mxu1 %v24872_v54  ;;  %v6512_v37 = vmul.f32 %v19433_v56, %v22034_v46 }
 0xbf1   : > { %18429 = vmatpush3.msra.mxu1 %v22003_v62  ;;  %v6472_v10 = vpop.xlane.xlu1 %6471 }
 0xbf2   : > { %19440 = vrcp.f32 %v6472_v10  ;;  %18424 = vmatmul.mubr.msk.f32.vlgmr.msra.gmra.mxu0 %vm1956_vm1, %v6512_v37  ;;  %18440 = vmatprep.subr.mxu1 %v24872_v54 }
 0xbf3   : > { %v19435_v11 = vpop.eup %19434  ;;  %18434 = vmatpush3.msra.mxu0 %v21987_v17  ;;  %18437 = vmatprep.mubr.msk.f32.mxu0 %vm19760_vm2, %v24872_v54 }
 0xbf4   : > { %18435 = vmatprep.subr.mxu0 %v24872_v54  ;;  %v6513_v32 = vmul.f32 %v19435_v11, %v22039_v35 }
 0xbf5   : > { %18436 = vmatpush3.msra.mxu0 %v21991_v60  ;;  %v6475_v46 = vpop.xlane.xlu0 %6474 }
 0xbf6   : > { %19442 = vrcp.f32 %v6475_v46  ;;  %18431 = vmatmul.mubr.msk.f32.vlgmr.msra.gmra.mxu1 %vm1956_vm1, %v6513_v32  ;;  %18447 = vmatprep.subr.mxu0 %v24872_v54 }
 0xbf7   : > { %v19437_v62 = vpop.eup %19436  ;;  %18441 = vmatpush3.msra.mxu1 %v21953_v5  ;;  %18444 = vmatprep.mubr.msk.f32.mxu1 %vm19760_vm2, %v24872_v54 }
 0xbf8   : > { %18442 = vmatprep.subr.mxu1 %v24872_v54  ;;  %v6514_v17 = vmul.f32 %v19437_v62, %v22044_v9 }
 0xbf9   : > { %18443 = vmatpush3.msra.mxu1 %v21961_v55  ;;  %v6478_v35 = vpop.xlane.xlu1 %6477 }
 0xbfa   : > { %19444 = vrcp.f32 %v6478_v35  ;;  %18438 = vmatmul.mubr.msk.f32.vlgmr.msra.gmra.mxu0 %vm1956_vm1, %v6514_v17  ;;  %18454 = vmatprep.subr.mxu1 %v24872_v54 }
 0xbfb   : > { %v19439_v60 = vpop.eup %19438  ;;  %18448 = vmatpush3.msra.mxu0 %v21860_v4  ;;  %18451 = vmatprep.mubr.msk.f32.mxu0 %vm19760_vm2, %v24872_v54 }
 0xbfc   : > { %18449 = vmatprep.subr.mxu0 %v24872_v54  ;;  %v6515_v5 = vmul.f32 %v19439_v60, %v22049_v2 }
 0xbfd   : > { %18450 = vmatpush3.msra.mxu0 %v21949_v3  ;;  %v6481_v9 = vpop.xlane.xlu1 %6480 }
 0xbfe   : > { %19446 = vrcp.f32 %v6481_v9  ;;  %18445 = vmatmul.mubr.msk.f32.vlgmr.msra.gmra.mxu1 %vm1956_vm1, %v6515_v5  ;;  %18461 = vmatprep.subr.mxu0 %v24872_v54 }
 0xbff   : > { %v19441_v55 = vpop.eup %19440  ;;  %18455 = vmatpush3.msra.mxu1 %v21972_v51  ;;  %18458 = vmatprep.mubr.msk.f32.mxu1 %vm19760_vm2, %v24872_v54 }
 0xc00   : > { %18456 = vmatprep.subr.mxu1 %v24872_v54  ;;  %v6516_v4 = vmul.f32 %v19441_v55, %v22054_v63 }
 0xc01   : > { %18457 = vmatpush3.msra.mxu1 %v21983_v8  ;;  %v6484_v2 = vpop.xlane.xlu1 %6483 }
 0xc02   : > { %19448 = vrcp.f32 %v6484_v2  ;;  %18452 = vmatmul.mubr.msk.f32.vlgmr.msra.gmra.mxu0 %vm1956_vm1, %v6516_v4  ;;  %18468 = vmatprep.subr.mxu1 %v24872_v54  ;;  %v7827_v4 = vld [vmem:[%s24824_s1 + $0x288] sm:$0xff] }
 0xc03   : > { %v19443_v3 = vpop.eup %19442  ;;  %18462 = vmatpush3.msra.mxu0 %v21966_v0  ;;  %18465 = vmatprep.mubr.msk.f32.mxu0 %vm19760_vm2, %v24872_v54  ;;  %v7902_v2 = vld [vmem:[%s24824_s1 + $0x88] sm:$0xff] }
 0xc04   : > { %18463 = vmatprep.subr.mxu0 %v24872_v54  ;;  %v6517_v51 = vmul.f32 %v19443_v3, %v22059_v33 }
 0xc05   : > { %18464 = vmatpush3.msra.mxu0 %v21974_v39  ;;  %v6487_v33 = vpop.xlane.xlu0 %6486 }
 0xc06   : > { %18459 = vmatmul.mubr.msk.f32.vlgmr.msra.gmra.mxu1 %vm1956_vm1, %v6517_v51  ;;  %18475 = vmatprep.subr.mxu0 %v24872_v54  ;;  %19450 = vrcp.f32 %v6487_v33 }
 0xc07   : > { %v19445_v8 = vpop.eup %19444  ;;  %18469 = vmatpush3.msra.mxu1 %v22082_v21  ;;  %18472 = vmatprep.mubr.msk.f32.mxu1 %vm19760_vm2, %v24872_v54 }
 0xc08   : > { %18470 = vmatprep.subr.mxu1 %v24872_v54  ;;  %v6518_v0 = vmul.f32 %v19445_v8, %v22063_v31  ;;  %v16945_v8 = vld [vmem:[%s24824_s1 + $0x90] ss:$0 sm:$0xff] }
 0xc09   : > { %18471 = vmatpush3.msra.mxu1 %v22084_v30 }
 0xc0a   : > { %18466 = vmatmul.mubr.msk.f32.vlgmr.msra.gmra.mxu0 %vm1956_vm1, %v6518_v0  ;;  %18482 = vmatprep.subr.mxu1 %v24872_v54  ;;  %v16947_v0 = vld [vmem:[%s24824_s1 + $0x68] ss:$0 sm:$0xff] }
 0xc0b   : > { %v19447_v39 = vpop.eup %19446  ;;  %18476 = vmatpush3.msra.mxu0 %v22087_v42  ;;  %18479 = vmatprep.mubr.msk.f32.mxu0 %vm19760_vm2, %v24872_v54 }
 0xc0c   : > { %18477 = vmatprep.subr.mxu0 %v24872_v54  ;;  %v6519_v63 = vmul.f32 %v19447_v39, %v22067_v15  ;;  %v7741_v15 = vpop.permute.xlu0 %7740 }
 0xc0d   : > { %18478 = vmatpush3.msra.mxu0 %v22093_v40 }
 0xc0e   : > { %18473 = vmatmul.mubr.msk.f32.vlgmr.msra.gmra.mxu1 %vm1956_vm1, %v6519_v63  ;;  %18489 = vmatprep.subr.mxu0 %v24872_v54 }
 0xc0f   : > { %v19449_v31 = vpop.eup %19448  ;;  %18483 = vmatpush3.msra.mxu1 %v22101_v19  ;;  %18486 = vmatprep.mubr.msk.f32.mxu1 %vm19760_vm2, %v24872_v54 }
 0xc10   : > { %v6520_v20 = vmul.f32 %v19449_v31, %v22071_v59  ;;  %18484 = vmatprep.subr.mxu1 %v24872_v54 }
 0xc12   : > { %18480 = vmatmul.mubr.msk.f32.vlgmr.msra.gmra.mxu0 %vm1956_vm1, %v6520_v20 }
 0xc13   : > { %18490 = vmatpush3.msra.mxu0 %v22095_v52  ;;  %18493 = vmatprep.mubr.msk.f32.mxu0 %vm19760_vm2, %v24872_v54  ;;  %v19451_v30 = vpop.eup %19450 }
 0xc14   : > { %18491 = vmatprep.subr.mxu0 %v24872_v54  ;;  %v6521_v24 = vmul.f32 %v19451_v30, %v22075_v18 }
 0xc15   : > { %18492 = vmatpush3.msra.mxu0 %v7741_v15 }
 0xc16   : > { %18515 = vmatprep.subr.mxu0 %v24872_v54 }
 0xc3a   : > { %v6490_v21 = vpop.xlane.xlu1 %6489 }
 0xc3b   : > { %19452 = vrcp.f32 %v6490_v21 }
 0xc3e   : > { %v7660_v59 = vpop.permute.xlu1 %7659 }
 0xc3f   : > { %18485 = vmatpush3.msra.mxu1 %v7660_v59 }
 0xc40   : > { %18487 = vmatmul.mubr.msk.f32.vlgmr.msra.gmra.mxu1 %vm1956_vm1, %v6521_v24  ;;  %18496 = vmatprep.subr.mxu1 %v24872_v54 }
 0xc41   : > { %18512 = vmatprep.mubr.msk.f32.mxu1 %vm19760_vm2, %v24872_v54 }
 0xc48   : > { %v19453_v58 = vpop.eup %19452 }
 0xc49   : > { %v6522_v16 = vmul.f32 %v19453_v58, %v22089_v13  ;;  %v8011_v58 = vld [vmem:[%s24824_s1 + $0xa8] sm:$0xff] }
 0xc4b   : > { %18494 = vmatmul.mubr.msk.f32.vlgmr.msra.gmra.mxu0 %vm1956_vm1, %v6522_v16 }
 0xc4c   : > { %18517 = vmatprep.mubr.msk.f32.mxu0 %vm19760_vm2, %v24872_v54  ;;  %18516 = vmatpush3.msra.mxu0 %v7902_v2 }
 0xc4d   : > { %18520 = vmatprep.subr.mxu0 %v24872_v54 }
 0xc8e   : > { %v6600_v42 = vpop.f32.mrf.mxu1 }
 0xc90   : > { %v18390_v28 = vpop.f32.mrf.mxu1 }
 0xca3   : > { %v6681_v40 = vpop.f32.mrf.mxu0 }
 0xca5   : > { %v18397_v18 = vpop.f32.mrf.mxu0 }
 0xca6   : > { %v6762_v52 = vpop.f32.mrf.mxu1  ;;  %v16948_v18 = vld [vmem:[%s24824_s1 + $0x98] ss:$0 sm:$0xff] }
 0xca8   : > { %v18404_v50 = vpop.f32.mrf.mxu1 }
 0xca9   : > { %v16949_v50 = vld [vmem:[%s24824_s1 + $0xa0] ss:$0 sm:$0xff] }
 0xcaa   : > { %v6843_v36 = vpop.f32.mrf.mxu0 }
 0xcac   : > { %v18411_v14 = vpop.f32.mrf.mxu0 }
 0xcae   : > { %v6924_v41 = vpop.f32.mrf.mxu1 }
 0xcb0   : > { %v18418_v19 = vpop.f32.mrf.mxu1 }
 0xcb1   : > { %v8091_v19 = vld [vmem:[%s24824_s1 + $0xb8] sm:$0xff] }
 0xcb2   : > { %v7005_v26 = vpop.f32.mrf.mxu0 }
 0xcb4   : > { %v18425_v34 = vpop.f32.mrf.mxu0 }
 0xcb6   : > { %v7086_v61 = vpop.f32.mrf.mxu1 }
 0xcb8   : > { %v18432_v7 = vpop.f32.mrf.mxu1 }
 0xcba   : > { %v7167_v13 = vpop.f32.mrf.mxu0 }
 0xcbc   : > { %v18439_v22 = vpop.f32.mrf.mxu0 }
 0xcbd   : > { %v16952_v22 = vld [vmem:[%s24824_s1 + $0xc8] ss:$0 sm:$0xff] }
 0xcbe   : > { %v7248_v49 = vpop.f32.mrf.mxu1 }
 0xcbf   : > { %v7819_v44 = vadd.f32 %v7248_v49, %v6600_v42 }
 0xcc0   : > { %v18446_v6 = vpop.f32.mrf.mxu1 }
 0xcc2   : > { %v7329_v38 = vpop.f32.mrf.mxu0 }
 0xcc3   : > { %v7820_v12 = vadd.f32 %v7329_v38, %v6681_v40 }
 0xcc4   : > { %v18453_v45 = vpop.f32.mrf.mxu0 }
 0xcc6   : > { %v7410_v43 = vpop.f32.mrf.mxu1 }
 0xcc7   : > { %v7821_v23 = vadd.f32 %v7410_v43, %v6762_v52 }
 0xcc8   : > { %v18460_v57 = vpop.f32.mrf.mxu1 }
 0xcca   : > { %v7491_v48 = vpop.f32.mrf.mxu0 }
 0xccb   : > { %v7822_v1 = vadd.f32 %v7491_v48, %v6843_v36 }
 0xccc   : > { %v18467_v56 = vpop.f32.mrf.mxu0 }
 0xcce   : > { %v7572_v37 = vpop.f32.mrf.mxu1 }
 0xccf   : > { %v7823_v10 = vadd.f32 %v7572_v37, %v6924_v41  ;;  %v8092_v41 = vld [vmem:[%s24824_s1 + $0xc0] sm:$0xff] }
 0xcd0   : > { %v18474_v11 = vpop.f32.mrf.mxu1 }
 0xcd2   : > { %v7653_v32 = vpop.f32.mrf.mxu0 }
 0xcd3   : > { %v7824_v55 = vadd.f32 %v7653_v32, %v7005_v26  ;;  %v16950_v26 = vld [vmem:[%s24824_s1 + $0xb0] ss:$0 sm:$0xff] }
 0xcd4   : > { %v18481_v46 = vpop.f32.mrf.mxu0  ;;  %v16954_v32 = vld [vmem:[%s24824_s1 + $0xd0] ss:$0 sm:$0xff] }
 0xd00   : > { %v7734_v62 = vpop.f32.mrf.mxu1 }
 0xd01   : > { %v7825_v9 = vadd.f32 %v7734_v62, %v7086_v61  ;;  %v16955_v62 = vld [vmem:[%s24824_s1 + $0xd8] ss:$0 sm:$0xff] }
 0xd02   : > { %v18488_v17 = vpop.f32.mrf.mxu1 }
 0xd0b   : > { %v7815_v35 = vpop.f32.mrf.mxu0 }
 0xd0c   : > { %v7826_v60 = vadd.f32 %v7815_v35, %v7167_v13 }
 0xd0d   : > { %v18495_v5 = vpop.f32.mrf.mxu0 }
 0xd0e   : > { %18497 = vmatpush3.msra.mxu1 %v7826_v60  ;;  %v8282_v60 = vld [vmem:[%s24824_s1 + $0x208] sm:$0xff]  ;;  %v16956_v5 = vld [vmem:[%s24824_s1 + $0x160] ss:$0 sm:$0xff] }
 0xd0f   : > { %18498 = vmatprep.subr.mxu1 %v24872_v54 }
 0xd10   : > { %18499 = vmatpush3.msra.mxu1 %v7825_v9 }
 0xd11   : > { %18500 = vmatprep.subr.mxu1 %v24872_v54 }
 0xd12   : > { %18501 = vmatpush3.msra.mxu1 %v7824_v55 }
 0xd13   : > { %18502 = vmatprep.subr.mxu1 %v24872_v54 }
 0xd14   : > { %18503 = vmatpush3.msra.mxu1 %v7823_v10 }
 0xd15   : > { %18504 = vmatprep.subr.mxu1 %v24872_v54 }
 0xd16   : > { %18505 = vmatpush3.msra.mxu1 %v7822_v1  ;;  %v8197_v1 = vld [vmem:[%s24824_s1 + $0x158] sm:$0xff] }
 0xd17   : > { %18506 = vmatprep.subr.mxu1 %v24872_v54 }
 0xd18   : > { %18507 = vmatpush3.msra.mxu1 %v7821_v23 }
 0xd19   : > { %18508 = vmatprep.subr.mxu1 %v24872_v54 }
 0xd1a   : > { %18509 = vmatpush3.msra.mxu1 %v7820_v12 }
 0xd1b   : > { %18510 = vmatprep.subr.mxu1 %v24872_v54 }
 0xd1c   : > { %18511 = vmatpush3.msra.mxu1 %v7819_v44 }
 0xd1d   : > { %18513 = vmatmul.mubr.msk.f32.vlgmr.msra.gmra.mxu1 %vm7828_vm3, %v7827_v4 }
 0xd1e   : > { %18539 = vmatprep.mubr.msk.f32.mxu1 %vm238_vm0, %v8282_v60 }
 0xddd   : > { %v7898_v3 = vpop.f32.mrf.mxu1 }
 0xdde   : > { %18518 = vmatmul.mubr.msk.f32.vlgmr.msra.gmra.mxu0 %vm238_vm0, %v7898_v3 }
 0xddf   : > { %v18514_v51 = vpop.f32.mrf.mxu1  ;;  %18522 = vmatprep.mubr.msk.f32.mxu0 %vm19760_vm2, %v24872_v54  ;;  %18521 = vmatpush3.msra.mxu0 %v8011_v58  ;;  %v8294_v58 = vld [vmem:[%s24824_s1 + $0x268] sm:$0xff] }
 0xde0   : > { %18525 = vmatprep.subr.mxu0 %v24872_v54 }
 0xe9e   : > { %v7977_v39 = vpop.f32.mrf.mxu0 }
 0xe9f   : > { %v7978_v63 = vadd.f32 %v16945_v8, %v7977_v39  ;;  %v8284_v39 = vld [vmem:[%s24824_s1 + $0x218] sm:$0xff] }
 0xea0   : > { %v18519_v33 = vpop.f32.mrf.mxu0 }
 0xea1   : > { %v7985_v31 = vadd.f32 %v16947_v0, %v7978_v63  ;;  %v8283_v0 = vld [vmem:[%s24824_s1 + $0x210] sm:$0xff]  ;;  %v8285_v63 = vld [vmem:[%s24824_s1 + $0x220] sm:$0xff]  ;;  %v8286_v33 = vld [vmem:[%s24824_s1 + $0x228] sm:$0xff] }
 0xea3   : > { %v7988_v20 = vsel %vm238_vm0, %v7985_v31, 0.0 }
 0xea4   : > { %7989 = vadd.xlane.f32.xlu0 %v7988_v20  ;;  %v8288_v20 = vld [vmem:[%s24824_s1 + $0x238] sm:$0xff] }
 0xf2d   : > { %v7990_v15 = vpop.xlane.xlu0 %7989 }
 0xf2e   : > { %v7991_v21 = vmul.f32 0.125, %v7990_v15  ;;  %v8289_v15 = vld [vmem:[%s24824_s1 + $0x240] sm:$0xff] }
 0xf30   : > { %v7992_v30 = vsub.f32 %v7985_v31, %v7991_v21  ;;  %v8287_v31 = vld [vmem:[%s24824_s1 + $0x230] sm:$0xff]  ;;  %v8290_v21 = vld [vmem:[%s24824_s1 + $0x248] sm:$0xff] }
 0xf32   : > { %v7993_v59 = vmul.f32 %v7992_v30, %v7992_v30 }
 0xf34   : > { %v7994_v24 = vsel %vm238_vm0, %v7993_v59, 0.0  ;;  %v8292_v59 = vld [vmem:[%s24824_s1 + $0x258] sm:$0xff] }
 0xf35   : > { %7995 = vadd.xlane.f32.xlu1 %v7994_v24  ;;  %v8293_v24 = vld [vmem:[%s24824_s1 + $0x260] sm:$0xff] }
 0xfbe   : > { %v7996_v16 = vpop.xlane.xlu1 %7995 }
 0xfbf   : > { %v7997_v42 = vmul.f32 0.125, %v7996_v16  ;;  %v8295_v16 = vld [vmem:[%s24824_s1 + $0x270] sm:$0xff] }
 0xfc1   : > { %v7998_v28 = vadd.f32 1e-05, %v7997_v42  ;;  %v8296_v42 = vld [vmem:[%s24824_s1 + $0x278] sm:$0xff] }
 0xfc3   : > { %19454 = vrsqrt.f32 %v7998_v28  ;;  %v8297_v28 = vld [vmem:[%s24824_s1 + $0x280] sm:$0xff] }
 0xfd0   : > { %v19455_v40 = vpop.eup %19454 }
 0xfd1   : > { %v8000_v52 = vmul.f32 %v19455_v40, %v7992_v30  ;;  %v8291_v30 = vld [vmem:[%s24824_s1 + $0x250] sm:$0xff]  ;;  %v8607_v40 = vld [vmem:[%s24824_s1] sm:$0xff] }
 0xfd3   : > { %v8005_v36 = vmul.f32 %v16948_v18, %v8000_v52  ;;  %v19727_v52 = vld [vmem:[%s19798_s19 + $0x8] sm:$0xff] }
 0xfd5   : > { %v8010_v14 = vadd.f32 %v16949_v50, %v8005_v36  ;;  %v22366_v36 = vld [vmem:[%s24824_s1 + $0x200] ss:$0 sm:$0xff] }
 0xfd7   : > { %18523 = vmatmul.mubr.msk.f32.vlgmr.msra.gmra.mxu0 %vm238_vm0, %v8010_v14 }
 0xfd8   : > { %18529 = vmatprep.mubr.msk.f32.mxu0 %vm19760_vm2, %v24872_v54  ;;  %18526 = vmatpush3.msra.mxu0 %v8092_v41 }
 0xfd9   : > { %18527 = vmatprep.subr.mxu0 %v24872_v54 }
 0xfda   : > { %18528 = vmatpush3.msra.mxu0 %v8091_v19  ;;  %v19728_v19 = vld [vmem:[%s19798_s19] sm:$0xff] }
 0xfdb   : > { %18532 = vmatprep.subr.mxu0 %v24872_v54 }
0x1097   : > { %v8086_v34 = vpop.f32.mrf.mxu0 }
0x1098   : > { %v8087_v61 = vadd.f32 %v16950_v26, %v8086_v34 }
0x1099   : > { %v18524_v7 = vpop.f32.mrf.mxu0 }
0x109a   : > { %v8090_v13 = vmax.f32 %v8087_v61, 0.0 }
0x109c   : > { %18530 = vmatmul.mubr.msk.f32.vlgmr.msra.gmra.mxu0 %vm1956_vm1, %v8090_v13  ;;  %v19729_v13 = vld [vmem:[%s19798_s19 + $0x18] sm:$0xff] }
0x109d   : > { %18534 = vmatprep.mubr.msk.f32.mxu0 %vm19760_vm2, %v24872_v54  ;;  %18533 = vmatpush3.msra.mxu0 %v8197_v1 }
0x109e   : > { %18563 = vmatprep.subr.mxu0 %v8607_v40 }
0x115c   : > { %v8167_v49 = vpop.f32.mrf.mxu0 }
0x115d   : > { %v8168_v44 = vadd.f32 %v16952_v22, %v8167_v49 }
0x115e   : > { %v18531_v6 = vpop.f32.mrf.mxu0 }
0x115f   : > { %v8171_v38 = vadd.f32 %v8168_v44, %v8010_v14  ;;  %v24978_v44 = vld [vmem:[#allocation3_spill] sm:$0xff] }
0x1161   : > { %v8174_v12 = vsel %vm238_vm0, %v8171_v38, 0.0 }
0x1162   : > { %8175 = vadd.xlane.f32.xlu0 %v8174_v12 }
0x11eb   : > { %v8176_v45 = vpop.xlane.xlu0 %8175 }
0x11ec   : > { %v8177_v43 = vmul.f32 0.125, %v8176_v45  ;;  %v19730_v45 = vld [vmem:[%s19798_s19 + $0x10] sm:$0xff] }
0x11ee   : > { %v8178_v23 = vsub.f32 %v8171_v38, %v8177_v43 }
0x11f0   : > { %v8179_v57 = vmul.f32 %v8178_v23, %v8178_v23 }
0x11f2   : > { %v8180_v48 = vsel %vm238_vm0, %v8179_v57, 0.0  ;;  %v24979_v57 = vld [vmem:[#allocation2_spill] sm:$0xff] }
0x11f3   : > { %8181 = vadd.xlane.f32.xlu0 %v8180_v48 }
0x127c   : > { %v8182_v56 = vpop.xlane.xlu0 %8181 }
0x127d   : > { %v8183_v37 = vmul.f32 0.125, %v8182_v56 }
0x127f   : > { %v8184_v10 = vadd.f32 1e-05, %v8183_v37 }
0x1281   : > { %19456 = vrsqrt.f32 %v8184_v10  ;;  %v19731_v10 = vld [vmem:[%s19798_s19 + $0x28] sm:$0xff] }
0x128e   : > { %v19457_v11 = vpop.eup %19456 }
0x128f   : > { %v8186_v46 = vmul.f32 %v19457_v11, %v8178_v23 }
0x1291   : > { %v8191_v17 = vmul.f32 %v16954_v32, %v8186_v46  ;;  %v8575_v46 = vld [vmem:[%s24824_s1 + $0x168] sm:$0xff] }
0x1293   : > { %v8196_v35 = vadd.f32 %v16955_v62, %v8191_v17  ;;  %v8576_v62 = vld [vmem:[%s24824_s1 + $0x170] sm:$0xff] }
0x1295   : > { %18535 = vmatmul.mubr.msk.f32.vlgmr.msra.gmra.mxu0 %vm238_vm0, %v8196_v35  ;;  %v24980_v35 = vld [vmem:[#allocation5_spill] sm:$0xff] }
0x1296   : > { %18564 = vmatpush3.msra.mxu0 %v8607_v40 }
0x1355   : > { %v8272_v9 = vpop.f32.mrf.mxu0 }
0x1356   : > { %v8273_v55 = vadd.f32 %v16956_v5, %v8272_v9 }
0x1357   : > { %v18536_v4 = vpop.f32.mrf.mxu0 }
0x1358   : > { %v16958_v2 = vmul.f32 -1.442695, %v8273_v55  ;;  %v19732_v55 = vld [vmem:[%s19798_s19 + $0x20] sm:$0xff] }
0x135a   : > { %19458 = vpow2.f32 %v16958_v2 }
0x1367   : > { %v19459_v3 = vpop.eup %19458 }
0x1368   : > { %v8279_v51 = vadd.f32 1.0, %v19459_v3  ;;  %v24981_v3 = vld [vmem:[#allocation4_spill] sm:$0xff] }
0x136a   : > { %19460 = vrcp.f32 %v8279_v51 }
0x1377   : > { %v22295_v8 = vpop.eup %19460 }
0x1378   : > { %24977 = vst [vmem:[#allocation38_spill] sm:$0xff] %v22295_v8  ;;  %18537 = vmatprep.subr.mxu1 %v22295_v8 }
0x1379   : > { %18538 = vmatpush3.msra.mxu1 %v22295_v8 }
0x137a   : > { %18540 = vmatmul.mubr.msk.f32.vlgmr.msra.gmra.mxu1 %vm238_vm0, %v8283_v0  ;;  %v19733_v0 = vld [vmem:[%s19798_s19 + $0x38] sm:$0xff] }
0x137b   : > { %18542 = vmatprep.mubr.msk.f32.mxu1 %vm238_vm0, %v8284_v39 }
0x137e   : > { %18543 = vmatmul.mubr.msk.f32.gmra.mxu1 %vm238_vm0, %v8285_v63 }
0x137f   : > { %18545 = vmatprep.mubr.msk.f32.mxu1 %vm238_vm0, %v8286_v33 }
0x1382   : > { %18546 = vmatmul.mubr.msk.f32.gmra.mxu1 %vm238_vm0, %v8287_v31 }
0x1383   : > { %18548 = vmatprep.mubr.msk.f32.mxu1 %vm238_vm0, %v8288_v20 }
0x1386   : > { %18549 = vmatmul.mubr.msk.f32.gmra.mxu1 %vm238_vm0, %v8289_v15 }
0x1387   : > { %18551 = vmatprep.mubr.msk.f32.mxu1 %vm238_vm0, %v8290_v21 }
0x138a   : > { %18552 = vmatmul.mubr.msk.f32.gmra.mxu1 %vm238_vm0, %v8291_v30  ;;  %v8577_v30 = vld [vmem:[%s24824_s1 + $0x178] sm:$0xff] }
0x138b   : > { %18554 = vmatprep.mubr.msk.f32.mxu1 %vm238_vm0, %v8292_v59  ;;  %v8578_v59 = vld [vmem:[%s24824_s1 + $0x180] sm:$0xff] }
0x138e   : > { %18555 = vmatmul.mubr.msk.f32.gmra.mxu1 %vm238_vm0, %v8293_v24 }
0x138f   : > { %18557 = vmatprep.mubr.msk.f32.mxu1 %vm238_vm0, %v8294_v58 }
0x1392   : > { %18558 = vmatmul.mubr.msk.f32.gmra.mxu1 %vm238_vm0, %v8295_v16  ;;  %v19734_v16 = vld [vmem:[%s19798_s19 + $0x30] sm:$0xff] }
0x1393   : > { %18560 = vmatprep.mubr.msk.f32.mxu1 %vm238_vm0, %v8296_v42 }
0x1396   : > { %18561 = vmatmul.mubr.msk.f32.gmra.mxu1 %vm238_vm0, %v8297_v28  ;;  %v24984_v28 = vld [vmem:[#allocation7_spill] sm:$0xff] }
0x143a   : > { %v18541_v18 = vpop.f32.mrf.mxu1 }
0x143b   : > { %v8492_v50 = vsub.f32 %v18541_v18, %v19727_v52 }
0x143c   : > { %v8412_v14 = vpop.f32.mrf.mxu1 }
0x143d   : > { %v8508_v41 = vmul.f32 %v8492_v50, %v8492_v50  ;;  %v8491_v26 = vsub.f32 %v8412_v14, %v19728_v19  ;;  %v8580_v50 = vld [vmem:[%s24824_s1 + $0x190] sm:$0xff]  ;;  %v19735_v19 = vld [vmem:[%s19798_s19 + $0x48] sm:$0xff] }
0x143e   : > { %v18544_v34 = vpop.f32.mrf.mxu1 }
0x143f   : > { %v8528_v61 = vmul.f32 %v22366_v36, %v8508_v41  ;;  %v8507_v7 = vmul.f32 %v8491_v26, %v8491_v26  ;;  %v8494_v22 = vsub.f32 %v18544_v34, %v19729_v13  ;;  %v24987_v13 = vld [vmem:[#allocation6_spill] sm:$0xff] }
0x1440   : > { %v8422_v49 = vpop.f32.mrf.mxu1 }
0x1441   : > { %v8544_v6 = vadd.f32 %v8528_v61, %v24978_v44  ;;  %v8527_v38 = vmul.f32 %v22366_v36, %v8507_v7  ;;  %v8510_v12 = vmul.f32 %v8494_v22, %v8494_v22  ;;  %v8493_v43 = vsub.f32 %v8422_v49, %v19730_v45  ;;  %v24988_v44 = vld [vmem:[#allocation13_spill] sm:$0xff]  ;;  %v19736_v45 = vld [vmem:[%s19798_s19 + $0x40] sm:$0xff] }
0x1442   : > { %v18547_v23 = vpop.f32.mrf.mxu1 }
0x1443   : > { %v8543_v48 = vadd.f32 %v8527_v38, %v24979_v57  ;;  %v8530_v1 = vmul.f32 %v22366_v36, %v8510_v12  ;;  %v8509_v56 = vmul.f32 %v8493_v43, %v8493_v43  ;;  %v8560_v37 = vmul.f32 2.828427, %v8544_v6 }
0x1444   : > { %v8496_v11 = vsub.f32 %v18547_v23, %v19731_v10  ;;  %v8432_v32 = vpop.f32.mrf.mxu1  ;;  %v8579_v23 = vld [vmem:[%s24824_s1 + $0x188] sm:$0xff]  ;;  %v24990_v10 = vld [vmem:[#allocation8_spill] sm:$0xff] }
0x1445   : > { %v8559_v17 = vmul.f32 2.828427, %v8543_v48  ;;  %v8546_v60 = vadd.f32 %v8530_v1, %v24980_v35  ;;  %v8529_v5 = vmul.f32 %v22366_v36, %v8509_v56  ;;  %v8495_v4 = vsub.f32 %v8432_v32, %v19732_v55  ;;  %v24992_v55 = vld [vmem:[#allocation17_spill] sm:$0xff] }
0x1446   : > { %v8512_v9 = vmul.f32 %v8496_v11, %v8496_v11  ;;  %v18550_v2 = vpop.f32.mrf.mxu1  ;;  %v22390_v33 = vadd.f32 %v8576_v62, %v8560_v37  ;;  %v8582_v37 = vld [vmem:[%s24824_s1 + $0x1a0] sm:$0xff]  ;;  %v19737_v62 = vld [vmem:[%s19798_s19 + $0x58] sm:$0xff] }
0x1447   : > { %v8545_v51 = vadd.f32 %v8529_v5, %v24981_v3  ;;  %v8498_v39 = vsub.f32 %v18550_v2, %v19733_v0  ;;  %v22388_v63 = vadd.f32 %v8575_v46, %v8559_v17  ;;  %v8562_v31 = vmul.f32 2.828427, %v8546_v60  ;;  %v8581_v5 = vld [vmem:[%s24824_s1 + $0x198] sm:$0xff]  ;;  %v19738_v0 = vld [vmem:[%s19798_s19 + $0x50] sm:$0xff] }
0x1448   : > { %24983 = vst [vmem:[#allocation43_spill] sm:$0xff] %v22390_v33  ;;  %v8532_v20 = vmul.f32 %v22366_v36, %v8512_v9  ;;  %v8511_v15 = vmul.f32 %v8495_v4, %v8495_v4  ;;  %v8442_v21 = vpop.f32.mrf.mxu1 }
0x1449   : > { %24982 = vst [vmem:[#allocation40_spill] sm:$0xff] %v22388_v63  ;;  %v8561_v24 = vmul.f32 2.828427, %v8545_v51  ;;  %v8514_v58 = vmul.f32 %v8498_v39, %v8498_v39  ;;  %v8497_v42 = vsub.f32 %v8442_v21, %v19734_v16  ;;  %18565 = vmatprep.mubr.msk.f32.mxu0 %vm238_vm0, %v22388_v63  ;;  %v22413_v61 = vadd.f32 %v8578_v59, %v8562_v31  ;;  %v24994_v21 = vld [vmem:[#allocation15_spill] sm:$0xff] }
0x144a   : > { %v8548_v40 = vadd.f32 %v8532_v20, %v24984_v28  ;;  %v8531_v18 = vmul.f32 %v22366_v36, %v8511_v15  ;;  %v18553_v52 = vpop.f32.mrf.mxu1  ;;  %18566 = vmatmul.mubr.msk.f32.vlgmr.msra.gmra.mxu0 %vm238_vm0, %v22390_v33  ;;  %v8584_v15 = vld [vmem:[%s24824_s1 + $0x1b0] sm:$0xff]  ;;  %v19739_v59 = vld [vmem:[%s19798_s19 + $0x68] sm:$0xff] }
0x144b   : > { %v8534_v14 = vmul.f32 %v22366_v36, %v8514_v58  ;;  %v8513_v41 = vmul.f32 %v8497_v42, %v8497_v42  ;;  %v8500_v26 = vsub.f32 %v18553_v52, %v19735_v19  ;;  %v22411_v34 = vadd.f32 %v8577_v30, %v8561_v24  ;;  %24986 = vst [vmem:[#allocation42_spill] sm:$0xff] %v22413_v61  ;;  %v24997_v19 = vld [vmem:[#allocation21_spill] sm:$0xff] }
0x144c   : > { %v8564_v7 = vmul.f32 2.828427, %v8548_v40  ;;  %v8547_v22 = vadd.f32 %v8531_v18, %v24987_v13  ;;  %v8452_v49 = vpop.f32.mrf.mxu1  ;;  %v8583_v40 = vld [vmem:[%s24824_s1 + $0x1a8] sm:$0xff] }
0x144d   : > { %24985 = vst [vmem:[#allocation41_spill] sm:$0xff] %v22411_v34  ;;  %v8550_v6 = vadd.f32 %v8534_v14, %v24988_v44  ;;  %v8533_v38 = vmul.f32 %v22366_v36, %v8513_v41  ;;  %v8516_v12 = vmul.f32 %v8500_v26, %v8500_v26  ;;  %v8499_v43 = vsub.f32 %v8452_v49, %v19736_v45 }
0x144e   : > { %18568 = vmatprep.mubr.msk.f32.mxu0 %vm238_vm0, %v22411_v34  ;;  %v22424_v57 = vadd.f32 %v8580_v50, %v8564_v7  ;;  %v8563_v48 = vmul.f32 2.828427, %v8547_v22  ;;  %v18556_v1 = vpop.f32.mrf.mxu1  ;;  %v19740_v50 = vld [vmem:[%s19798_s19 + $0x60] sm:$0xff] }
0x144f   : > { %18569 = vmatmul.mubr.msk.f32.gmra.mxu0 %vm238_vm0, %v22413_v61  ;;  %v8566_v56 = vmul.f32 2.828427, %v8550_v6  ;;  %v8549_v11 = vadd.f32 %v8533_v38, %v24990_v10  ;;  %v8536_v32 = vmul.f32 %v22366_v36, %v8516_v12  ;;  %v8515_v46 = vmul.f32 %v8499_v43, %v8499_v43  ;;  %v8586_v22 = vld [vmem:[%s24824_s1 + $0x1c0] sm:$0xff]  ;;  %v19741_v6 = vld [vmem:[%s19798_s19 + $0x78] sm:$0xff]  ;;  %v24999_v43 = vld [vmem:[#allocation19_spill] sm:$0xff] }
0x1450   : > { %24989 = vst [vmem:[#allocation44_spill] sm:$0xff] %v22424_v57  ;;  %v8502_v17 = vsub.f32 %v18556_v1, %v19737_v62  ;;  %v8462_v35 = vpop.f32.mrf.mxu1  ;;  %v22434_v60 = vadd.f32 %v8579_v23, %v8563_v48  ;;  %v25000_v1 = vld [vmem:[#allocation25_spill] sm:$0xff] }
0x1451   : > { %v8565_v9 = vmul.f32 2.828427, %v8549_v11  ;;  %v8552_v4 = vadd.f32 %v8536_v32, %v24992_v55  ;;  %v8535_v2 = vmul.f32 %v22366_v36, %v8515_v46  ;;  %v22441_v3 = vadd.f32 %v8582_v37, %v8566_v56  ;;  %v19742_v11 = vld [vmem:[%s19798_s19 + $0x70] sm:$0xff]  ;;  %v8585_v46 = vld [vmem:[%s24824_s1 + $0x1b8] sm:$0xff] }
0x1452   : > { %24991 = vst [vmem:[#allocation10_spill] sm:$0xff] %v22434_v60  ;;  %v8518_v51 = vmul.f32 %v8502_v17, %v8502_v17  ;;  %v8501_v39 = vsub.f32 %v8462_v35, %v19738_v0  ;;  %18571 = vmatprep.mubr.msk.f32.mxu0 %vm238_vm0, %v22434_v60  ;;  %v18559_v31 = vpop.f32.mrf.mxu1  ;;  %v8587_v0 = vld [vmem:[%s24824_s1 + $0x1c8] sm:$0xff] }
0x1453   : > { %24993 = vst [vmem:[#allocation9_spill] sm:$0xff] %v22441_v3  ;;  %v8568_v20 = vmul.f32 2.828427, %v8552_v4  ;;  %v8551_v30 = vadd.f32 %v8535_v2, %v24994_v21  ;;  %v8504_v24 = vsub.f32 %v18559_v31, %v19739_v59  ;;  %18572 = vmatmul.mubr.msk.f32.gmra.mxu0 %vm238_vm0, %v22424_v57  ;;  %v22453_v58 = vadd.f32 %v8581_v5, %v8565_v9  ;;  %v25002_v5 = vld [vmem:[#allocation23_spill] sm:$0xff]  ;;  %v8588_v2 = vld [vmem:[%s24824_s1 + $0x1d0] sm:$0xff]  ;;  %v25004_v31 = vld [vmem:[#allocation29_spill] sm:$0xff] }
0x1454   : > { %v8538_v16 = vmul.f32 %v22366_v36, %v8518_v51  ;;  %v8517_v42 = vmul.f32 %v8501_v39, %v8501_v39  ;;  %v8472_v28 = vpop.f32.mrf.mxu1  ;;  %v25006_v59 = vld [vmem:[#allocation27_spill] sm:$0xff] }
0x1455   : > { %24995 = vst [vmem:[#allocation11_spill] sm:$0xff] %v22453_v58  ;;  %v8567_v18 = vmul.f32 2.828427, %v8551_v30  ;;  %v8520_v52 = vmul.f32 %v8504_v24, %v8504_v24  ;;  %v8503_v14 = vsub.f32 %v8472_v28, %v19740_v50  ;;  %18574 = vmatprep.mubr.msk.f32.mxu0 %vm238_vm0, %v22453_v58  ;;  %v22462_v41 = vadd.f32 %v8584_v15, %v8568_v20 }
0x1456   : > { %v8554_v26 = vadd.f32 %v8538_v16, %v24997_v19  ;;  %v8537_v7 = vmul.f32 %v22366_v36, %v8517_v42  ;;  %v18562_v13 = vpop.f32.mrf.mxu1  ;;  %v8590_v42 = vld [vmem:[%s24824_s1 + $0x1e0] sm:$0xff] }
0x1457   : > { %24996 = vst [vmem:[#allocation12_spill] sm:$0xff] %v22462_v41  ;;  %v8540_v49 = vmul.f32 %v22366_v36, %v8520_v52  ;;  %v8519_v44 = vmul.f32 %v8503_v14, %v8503_v14  ;;  %v8506_v38 = vsub.f32 %v18562_v13, %v19741_v6  ;;  %18575 = vmatmul.mubr.msk.f32.gmra.mxu0 %vm238_vm0, %v22441_v3  ;;  %v16976_v52 = vld [vmem:[%s24824_s1 + $0x8] ss:$0 sm:$0xff] }
0x1458   : > { %v22473_v12 = vadd.f32 %v8583_v40, %v8567_v18  ;;  %v8570_v45 = vmul.f32 2.828427, %v8554_v26  ;;  %v8553_v23 = vadd.f32 %v8537_v7, %v24999_v43  ;;  %v8482_v48 = vpop.f32.mrf.mxu1 }
0x1459   : > { %v8556_v56 = vadd.f32 %v8540_v49, %v25000_v1  ;;  %v8539_v37 = vmul.f32 %v22366_v36, %v8519_v44  ;;  %v8522_v10 = vmul.f32 %v8506_v38, %v8506_v38  ;;  %v8505_v32 = vsub.f32 %v8482_v48, %v19742_v11 }
0x145a   : > { %24998 = vst [vmem:[#allocation14_spill] sm:$0xff] %v22473_v12  ;;  %18577 = vmatprep.mubr.msk.f32.mxu0 %vm238_vm0, %v22473_v12  ;;  %v22484_v62 = vadd.f32 %v8586_v22, %v8570_v45  ;;  %v8569_v17 = vmul.f32 2.828427, %v8553_v23 }
0x145b   : > { %v8572_v35 = vmul.f32 2.828427, %v8556_v56  ;;  %v8555_v9 = vadd.f32 %v8539_v37, %v25002_v5  ;;  %v8542_v55 = vmul.f32 %v22366_v36, %v8522_v10  ;;  %v8521_v4 = vmul.f32 %v8505_v32, %v8505_v32  ;;  %18578 = vmatmul.mubr.msk.f32.gmra.mxu0 %vm238_vm0, %v22462_v41 }
0x145c   : > { %25001 = vst [vmem:[#allocation16_spill] sm:$0xff] %v22484_v62  ;;  %v22493_v51 = vadd.f32 %v8585_v46, %v8569_v17 }
0x145d   : > { %v8571_v39 = vmul.f32 2.828427, %v8555_v9  ;;  %v8558_v20 = vadd.f32 %v8542_v55, %v25004_v31  ;;  %v8541_v15 = vmul.f32 %v22366_v36, %v8521_v4  ;;  %v22502_v21 = vadd.f32 %v8588_v2, %v8572_v35  ;;  %v8589_v36 = vld [vmem:[%s24824_s1 + $0x1d8] sm:$0xff] }
0x145e   : > { %25003 = vst [vmem:[#allocation18_spill] sm:$0xff] %v22493_v51  ;;  %18580 = vmatprep.mubr.msk.f32.mxu0 %vm238_vm0, %v22493_v51 }
0x145f   : > { %25005 = vst [vmem:[#allocation20_spill] sm:$0xff] %v22502_v21  ;;  %v8574_v30 = vmul.f32 2.828427, %v8558_v20  ;;  %v8557_v24 = vadd.f32 %v8541_v15, %v25006_v59  ;;  %18581 = vmatmul.mubr.msk.f32.gmra.mxu0 %vm238_vm0, %v22484_v62  ;;  %v22507_v16 = vadd.f32 %v8587_v0, %v8571_v39 }
0x1461   : > { %25007 = vst [vmem:[#allocation22_spill] sm:$0xff] %v22507_v16  ;;  %v8573_v28 = vmul.f32 2.828427, %v8557_v24  ;;  %18583 = vmatprep.mubr.msk.f32.mxu0 %vm238_vm0, %v22507_v16  ;;  %v22517_v40 = vadd.f32 %v8590_v42, %v8574_v30  ;;  %v25010_v30 = vld [vmem:[#allocation36_spill] sm:$0xff] }
0x1463   : > { %25008 = vst [vmem:[#allocation24_spill] sm:$0xff] %v22517_v40  ;;  %18584 = vmatmul.mubr.msk.f32.gmra.mxu0 %vm238_vm0, %v22502_v21  ;;  %v22521_v18 = vadd.f32 %v8589_v36, %v8573_v28 }
0x1465   : > { %25009 = vst [vmem:[#allocation26_spill] sm:$0xff] %v22521_v18  ;;  %18586 = vmatprep.mubr.msk.f32.mxu0 %vm238_vm0, %v22521_v18 }
0x1467   : > { %18587 = vmatmul.mubr.msk.f32.gmra.mxu0 %vm238_vm0, %v22517_v40 }
0x150a   : > { %v18567_v50 = vpop.f32.mrf.mxu0 }
0x150b   : > { %v22530_v14 = vadd.f32 %v18567_v50, %v16976_v52 }
0x150c   : > { %v8727_v19 = vpop.f32.mrf.mxu0 }
0x150d   : > { %v22532_v26 = vadd.f32 %v16976_v52, %v8727_v19  ;;  %8874 = vrot.lane.b32.xlu1 %v22530_v14, %s19755_s3  ;;  %v8839_v24 = vmul.f32 %v22530_v14, %v25010_v30 }
0x150f   : > { %v18570_v7 = vpop.f32.mrf.mxu0  ;;  %8872 = vrot.lane.b32.xlu0 %v22532_v26, %s19755_s3  ;;  %v8806_v22 = vmul.f32 %v22532_v26, %v24974_v47  ;;  %v8838_v59 = vmul.f32 %v22532_v26, %v25010_v30 }
0x1510   : > { %v22536_v13 = vadd.f32 %v18570_v7, %v16976_v52 }
0x1511   : > { %v8737_v49 = vpop.f32.mrf.mxu0  ;;  %18593 = vmatprep.mubr.msk.f32.mxu1 %vm238_vm0, %v8806_v22 }
0x1512   : > { %v22542_v44 = vadd.f32 %v16976_v52, %v8737_v49  ;;  %8965 = vrot.lane.b32.xlu1 %v22536_v13, %s19755_s3  ;;  %v8841_v36 = vmul.f32 %v22536_v13, %v25010_v30 }
0x1513   : > { %v18573_v6 = vpop.f32.mrf.mxu0 }
0x1514   : > { %v8808_v38 = vmul.f32 %v22542_v44, %v24974_v47  ;;  %v22549_v45 = vadd.f32 %v18573_v6, %v16976_v52 }
0x1515   : > { %v8747_v43 = vpop.f32.mrf.mxu0 }
0x1516   : > { %8963 = vrot.lane.b32.xlu1 %v22542_v44, %s19755_s3  ;;  %18600 = vmatprep.mubr.msk.f32.mxu0 %vm238_vm0, %v8808_v38  ;;  %v22556_v23 = vadd.f32 %v16976_v52, %v8747_v43  ;;  %v8843_v42 = vmul.f32 %v22549_v45, %v25010_v30  ;;  %v8857_v38 = vmul.f32 %v22536_v13, %v20317_v53 }
0x1517   : > { %9056 = vrot.lane.b32.xlu0 %v22549_v45, %s19755_s3  ;;  %v18576_v48 = vpop.f32.mrf.mxu0 }
0x1518   : > { %v22558_v1 = vadd.f32 %v18576_v48, %v16976_v52  ;;  %v8842_v19 = vmul.f32 %v22556_v23, %v25010_v30  ;;  %v8859_v48 = vmul.f32 %v22549_v45, %v20317_v53 }
0x1519   : > { %v8757_v56 = vpop.f32.mrf.mxu0 }
0x151a   : > { %9054 = vrot.lane.b32.xlu1 %v22556_v23, %s19755_s3  ;;  %v22564_v37 = vadd.f32 %v16976_v52, %v8757_v56  ;;  %v8845_v28 = vmul.f32 %v22558_v1, %v25010_v30 }
0x151b   : > { %9147 = vrot.lane.b32.xlu0 %v22558_v1, %s19755_s3  ;;  %v18579_v10 = vpop.f32.mrf.mxu0 }
0x151c   : > { %v22566_v11 = vadd.f32 %v18579_v10, %v16976_v52  ;;  %v8844_v50 = vmul.f32 %v22564_v37, %v25010_v30  ;;  %v8861_v10 = vmul.f32 %v22558_v1, %v20317_v53 }
0x151d   : > { %v8767_v32 = vpop.f32.mrf.mxu0 }
0x151e   : > { %9145 = vrot.lane.b32.xlu1 %v22564_v37, %s19755_s3  ;;  %v22572_v46 = vadd.f32 %v16976_v52, %v8767_v32  ;;  %v8847_v22 = vmul.f32 %v22566_v11, %v25010_v30  ;;  %v8855_v32 = vmul.f32 %v22530_v14, %v20317_v53 }
0x151f   : > { %9238 = vrot.lane.b32.xlu0 %v22566_v11, %s19755_s3  ;;  %v18582_v17 = vpop.f32.mrf.mxu0 }
0x1520   : > { %v22574_v35 = vadd.f32 %v18582_v17, %v16976_v52  ;;  %v8846_v6 = vmul.f32 %v22572_v46, %v25010_v30  ;;  %v8863_v17 = vmul.f32 %v22566_v11, %v20317_v53 }
0x1521   : > { %v8777_v5 = vpop.f32.mrf.mxu0 }
0x1522   : > { %9236 = vrot.lane.b32.xlu1 %v22572_v46, %s19755_s3  ;;  %v22580_v9 = vadd.f32 %v16976_v52, %v8777_v5  ;;  %v8849_v7 = vmul.f32 %v22574_v35, %v25010_v30  ;;  %v8854_v5 = vmul.f32 %v22532_v26, %v20317_v53 }
0x1523   : > { %9329 = vrot.lane.b32.xlu0 %v22574_v35, %s19755_s3  ;;  %v18585_v55 = vpop.f32.mrf.mxu0 }
0x1524   : > { %v22582_v4 = vadd.f32 %v18585_v55, %v16976_v52  ;;  %v8848_v49 = vmul.f32 %v22580_v9, %v25010_v30  ;;  %v8865_v55 = vmul.f32 %v22574_v35, %v20317_v53 }
0x1525   : > { %v8787_v2 = vpop.f32.mrf.mxu0 }
0x1526   : > { %9327 = vrot.lane.b32.xlu1 %v22580_v9, %s19755_s3  ;;  %v22588_v0 = vadd.f32 %v16976_v52, %v8787_v2  ;;  %v8851_v43 = vmul.f32 %v22582_v4, %v25010_v30  ;;  %v8856_v2 = vmul.f32 %v22542_v44, %v20317_v53 }
0x1527   : > { %9420 = vrot.lane.b32.xlu0 %v22582_v4, %s19755_s3  ;;  %v18588_v39 = vpop.f32.mrf.mxu0 }
0x1528   : > { %v22590_v31 = vadd.f32 %v18588_v39, %v16976_v52  ;;  %v8850_v56 = vmul.f32 %v22588_v0, %v25010_v30 }
0x1529   : > { %v8797_v20 = vpop.f32.mrf.mxu0 }
0x152a   : > { %9418 = vrot.lane.b32.xlu1 %v22588_v0, %s19755_s3  ;;  %v22596_v15 = vadd.f32 %v16976_v52, %v8797_v20  ;;  %v8840_v52 = vmul.f32 %v22542_v44, %v25010_v30  ;;  %v8853_v39 = vmul.f32 %v22590_v31, %v25010_v30  ;;  %v8858_v20 = vmul.f32 %v22556_v23, %v20317_v53 }
0x152b   : > { %9511 = vrot.lane.b32.xlu0 %v22590_v31, %s19755_s3 }
0x152e   : > { %9509 = vrot.lane.b32.xlu1 %v22596_v15, %s19755_s3 }
0x152f   : > { %10664 = vrot.lane.b32.xlu0 %v8838_v59, %s19757_s5  ;;  %v8852_v59 = vmul.f32 %v22596_v15, %v25010_v30 }
0x1532   : > { %10666 = vrot.lane.b32.xlu1 %v8839_v24, %s19757_s5  ;;  %v8860_v24 = vmul.f32 %v22564_v37, %v20317_v53 }
0x1533   : > { %10844 = vrot.lane.b32.xlu0 %v8843_v42, %s19757_s5  ;;  %v8862_v42 = vmul.f32 %v22572_v46, %v20317_v53 }
0x1536   : > { %10755 = vrot.lane.b32.xlu1 %v8841_v36, %s19757_s5  ;;  %v8864_v36 = vmul.f32 %v22580_v9, %v20317_v53 }
0x1537   : > { %10933 = vrot.lane.b32.xlu0 %v8845_v28, %s19757_s5 }
0x153a   : > { %10753 = vrot.lane.b32.xlu1 %v8840_v52, %s19757_s5 }
0x153b   : > { %10931 = vrot.lane.b32.xlu0 %v8844_v50, %s19757_s5  ;;  %v8807_v50 = vmul.f32 %v22530_v14, %v24974_v47 }
0x153e   : > { %10842 = vrot.lane.b32.xlu1 %v8842_v19, %s19757_s5 }
0x153f   : > { %11111 = vrot.lane.b32.xlu0 %v8849_v7, %s19757_s5 }
0x1542   : > { %11022 = vrot.lane.b32.xlu1 %v8847_v22, %s19757_s5  ;;  %v8810_v22 = vmul.f32 %v22556_v23, %v24974_v47 }
0x1543   : > { %11109 = vrot.lane.b32.xlu0 %v8848_v49, %s19757_s5  ;;  %v8809_v49 = vmul.f32 %v22536_v13, %v24974_v47 }
0x1546   : > { %11020 = vrot.lane.b32.xlu1 %v8846_v6, %s19757_s5 }
0x1547   : > { %11467 = vrot.lane.b32.xlu0 %v8857_v38, %s19757_s5  ;;  %v8812_v38 = vmul.f32 %v22564_v37, %v24974_v47 }
0x154a   : > { %11200 = vrot.lane.b32.xlu1 %v8851_v43, %s19757_s5 }
0x154b   : > { %11556 = vrot.lane.b32.xlu0 %v8859_v48, %s19757_s5  ;;  %v8811_v48 = vmul.f32 %v22549_v45, %v24974_v47 }
0x154e   : > { %11198 = vrot.lane.b32.xlu1 %v8850_v56, %s19757_s5 }
0x154f   : > { %11645 = vrot.lane.b32.xlu0 %v8861_v10, %s19757_s5 }
0x1552   : > { %11378 = vrot.lane.b32.xlu1 %v8855_v32, %s19757_s5  ;;  %v8814_v32 = vmul.f32 %v22572_v46, %v24974_v47 }
0x1553   : > { %11734 = vrot.lane.b32.xlu0 %v8863_v17, %s19757_s5  ;;  %v8813_v17 = vmul.f32 %v22558_v1, %v24974_v47 }
0x1556   : > { %11376 = vrot.lane.b32.xlu1 %v8854_v5, %s19757_s5 }
0x1557   : > { %11823 = vrot.lane.b32.xlu0 %v8865_v55, %s19757_s5 }
0x155a   : > { %11465 = vrot.lane.b32.xlu1 %v8856_v2, %s19757_s5  ;;  %v8816_v2 = vmul.f32 %v22580_v9, %v24974_v47 }
0x155b   : > { %11289 = vrot.lane.b32.xlu0 %v8853_v39, %s19757_s5  ;;  %v8815_v39 = vmul.f32 %v22566_v11, %v24974_v47 }
0x155e   : > { %11554 = vrot.lane.b32.xlu1 %v8858_v20, %s19757_s5 }
0x155f   : > { %11287 = vrot.lane.b32.xlu0 %v8852_v59, %s19757_s5 }
0x1562   : > { %11643 = vrot.lane.b32.xlu1 %v8860_v24, %s19757_s5  ;;  %v8818_v24 = vmul.f32 %v22588_v0, %v24974_v47 }
0x1566   : > { %11732 = vrot.lane.b32.xlu1 %v8862_v42, %s19757_s5  ;;  %v8817_v42 = vmul.f32 %v22574_v35, %v24974_v47 }
0x156a   : > { %11821 = vrot.lane.b32.xlu1 %v8864_v36, %s19757_s5 }
0x157f   : > { %v22684_v30 = vpop.permute.xlu1 %8874 }
0x1580   : > { %18589 = vmatprep.subr.msk.mxu1 %vm238_vm0, %v22684_v30 }
0x1581   : > { %18590 = vmatpush3.xpose.msk.msra.mxu1 %vm238_vm0, %v22684_v30  ;;  %v22690_v28 = vpop.permute.xlu0 %8872 }
0x1582   : > { %18591 = vmatprep.subr.msk.mxu1 %vm238_vm0, %v22690_v28 }
0x1584   : > { %v22694_v52 = vpop.permute.xlu1 %8965 }
0x1585   : > { %18596 = vmatprep.subr.msk.mxu0 %vm238_vm0, %v22694_v52  ;;  %18592 = vmatpush3.xpose.msk.msra.mxu1 %vm238_vm0, %v22690_v28 }
0x1586   : > { %18597 = vmatpush3.xpose.msk.msra.mxu0 %vm238_vm0, %v22694_v52 }
0x1588   : > { %v22704_v19 = vpop.permute.xlu1 %8963  ;;  %18594 = vmatmul.mubr.msk.f32.vlgmr.msra.gmra.mxu1 %vm238_vm0, %v8807_v50 }
0x1589   : > { %v22706_v7 = vpop.permute.xlu0 %9056  ;;  %18598 = vmatprep.subr.msk.mxu0 %vm238_vm0, %v22704_v19  ;;  %18607 = vmatprep.mubr.msk.f32.mxu1 %vm238_vm0, %v8810_v22  ;;  %v8820_v22 = vmul.f32 %v22596_v15, %v24974_v47 }
0x158a   : > { %18603 = vmatprep.subr.msk.mxu1 %vm238_vm0, %v22706_v7  ;;  %18599 = vmatpush3.xpose.msk.msra.mxu0 %vm238_vm0, %v22704_v19 }
0x158b   : > { %18604 = vmatpush3.xpose.msk.msra.mxu1 %vm238_vm0, %v22706_v7 }
0x158c   : > { %v22722_v6 = vpop.permute.xlu1 %9054 }
0x158d   : > { %v22726_v43 = vpop.permute.xlu0 %9147  ;;  %18601 = vmatmul.mubr.msk.f32.vlgmr.msra.gmra.mxu0 %vm238_vm0, %v8809_v49  ;;  %18605 = vmatprep.subr.msk.mxu1 %vm238_vm0, %v22722_v6  ;;  %v8819_v49 = vmul.f32 %v22582_v4, %v24974_v47 }
0x158e   : > { %18610 = vmatprep.subr.msk.mxu0 %vm238_vm0, %v22726_v43  ;;  %18614 = vmatprep.mubr.msk.f32.mxu0 %vm238_vm0, %v8812_v38 }
0x158f   : > { %18606 = vmatpush3.xpose.msk.msra.mxu1 %vm238_vm0, %v22722_v6  ;;  %18611 = vmatpush3.xpose.msk.msra.mxu0 %vm238_vm0, %v22726_v43 }
0x1590   : > { %v22740_v56 = vpop.permute.xlu1 %9145 }
0x1591   : > { %v22742_v10 = vpop.permute.xlu0 %9238  ;;  %18612 = vmatprep.subr.msk.mxu0 %vm238_vm0, %v22740_v56 }
0x1592   : > { %18608 = vmatmul.mubr.msk.f32.vlgmr.msra.gmra.mxu1 %vm238_vm0, %v8811_v48  ;;  %18617 = vmatprep.subr.msk.mxu1 %vm238_vm0, %v22742_v10  ;;  %v8822_v48 = vmul.f32 %v22532_v26, %v24973_v27  ;;  %v8824_v26 = vmul.f32 %v22542_v44, %v24973_v27  ;;  %v8826_v44 = vmul.f32 %v22556_v23, %v24973_v27 }
0x1593   : > { %18613 = vmatpush3.xpose.msk.msra.mxu0 %vm238_vm0, %v22740_v56  ;;  %18618 = vmatpush3.xpose.msk.msra.mxu1 %vm238_vm0, %v22742_v10  ;;  %v8828_v23 = vmul.f32 %v22564_v37, %v24973_v27  ;;  %v8830_v37 = vmul.f32 %v22572_v46, %v24973_v27  ;;  %v8832_v46 = vmul.f32 %v22580_v9, %v24973_v27 }
0x1594   : > { %18621 = vmatprep.mubr.msk.f32.mxu1 %vm238_vm0, %v8814_v32  ;;  %v22758_v5 = vpop.permute.xlu1 %9236  ;;  %v8821_v32 = vmul.f32 %v22590_v31, %v24974_v47  ;;  %v8834_v9 = vmul.f32 %v22588_v0, %v24973_v27 }
0x1595   : > { %v22760_v55 = vpop.permute.xlu0 %9329  ;;  %18619 = vmatprep.subr.msk.mxu1 %vm238_vm0, %v22758_v5 }
0x1596   : > { %18615 = vmatmul.mubr.msk.f32.vlgmr.msra.gmra.mxu0 %vm238_vm0, %v8813_v17  ;;  %18624 = vmatprep.subr.msk.mxu0 %vm238_vm0, %v22760_v55 }
0x1597   : > { %18620 = vmatpush3.xpose.msk.msra.mxu1 %vm238_vm0, %v22758_v5  ;;  %18625 = vmatpush3.xpose.msk.msra.mxu0 %vm238_vm0, %v22760_v55 }
0x1598   : > { %18628 = vmatprep.mubr.msk.f32.mxu0 %vm238_vm0, %v8816_v2  ;;  %v22776_v20 = vpop.permute.xlu1 %9327  ;;  %v22943_v2 = vld [vmem:[%s24824_s1 + $0x1e8] ss:$0 sm:$0xff] }
0x1599   : > { %v22778_v59 = vpop.permute.xlu0 %9420  ;;  %18626 = vmatprep.subr.msk.mxu0 %vm238_vm0, %v22776_v20 }
0x159a   : > { %18622 = vmatmul.mubr.msk.f32.vlgmr.msra.gmra.mxu1 %vm238_vm0, %v8815_v39  ;;  %18631 = vmatprep.subr.msk.mxu1 %vm238_vm0, %v22778_v59 }
0x159b   : > { %18627 = vmatpush3.xpose.msk.msra.mxu0 %vm238_vm0, %v22776_v20  ;;  %18632 = vmatpush3.xpose.msk.msra.mxu1 %vm238_vm0, %v22778_v59 }
0x159c   : > { %18635 = vmatprep.mubr.msk.f32.mxu1 %vm238_vm0, %v8818_v24  ;;  %v22794_v36 = vpop.permute.xlu1 %9418 }
0x159d   : > { %v22796_v50 = vpop.permute.xlu0 %9511  ;;  %18633 = vmatprep.subr.msk.mxu1 %vm238_vm0, %v22794_v36 }
0x159e   : > { %18629 = vmatmul.mubr.msk.f32.vlgmr.msra.gmra.mxu0 %vm238_vm0, %v8817_v42  ;;  %18638 = vmatprep.subr.msk.mxu0 %vm238_vm0, %v22796_v50 }
0x159f   : > { %18634 = vmatpush3.xpose.msk.msra.mxu1 %vm238_vm0, %v22794_v36  ;;  %18639 = vmatpush3.xpose.msk.msra.mxu0 %vm238_vm0, %v22796_v50 }
0x15a0   : > { %18642 = vmatprep.mubr.msk.f32.mxu0 %vm238_vm0, %v8820_v22  ;;  %18645 = vmatprep.subr.msk.mxu1 %vm238_vm0, %v22684_v30  ;;  %v22814_v38 = vpop.permute.xlu1 %9509 }
0x15a1   : > { %18640 = vmatprep.subr.msk.mxu0 %vm238_vm0, %v22814_v38 }
0x15a2   : > { %18636 = vmatmul.mubr.msk.f32.vlgmr.msra.gmra.mxu1 %vm238_vm0, %v8819_v49 }
0x15a3   : > { %18641 = vmatpush3.xpose.msk.msra.mxu0 %vm238_vm0, %v22814_v38  ;;  %18646 = vmatpush3.xpose.msk.msra.mxu1 %vm238_vm0, %v22684_v30  ;;  %v8823_v30 = vmul.f32 %v22530_v14, %v24973_v27  ;;  %v8825_v14 = vmul.f32 %v22536_v13, %v24973_v27  ;;  %v8827_v13 = vmul.f32 %v22549_v45, %v24973_v27 }
0x15a4   : > { %18649 = vmatprep.mubr.msk.f32.mxu1 %vm238_vm0, %v8822_v48  ;;  %18647 = vmatprep.subr.msk.mxu1 %vm238_vm0, %v22690_v28  ;;  %v8829_v45 = vmul.f32 %v22558_v1, %v24973_v27  ;;  %v8831_v1 = vmul.f32 %v22566_v11, %v24973_v27  ;;  %v8833_v11 = vmul.f32 %v22574_v35, %v24973_v27 }
0x15a5   : > { %18652 = vmatprep.subr.msk.mxu0 %vm238_vm0, %v22694_v52  ;;  %v8835_v35 = vmul.f32 %v22582_v4, %v24973_v27 }
0x15a6   : > { %18643 = vmatmul.mubr.msk.f32.vlgmr.msra.gmra.mxu0 %vm238_vm0, %v8821_v32 }
0x15a7   : > { %18648 = vmatpush3.xpose.msk.msra.mxu1 %vm238_vm0, %v22690_v28  ;;  %18653 = vmatpush3.xpose.msk.msra.mxu0 %vm238_vm0, %v22694_v52  ;;  %v10667_v28 = vpop.permute.xlu1 %10666  ;;  %v10665_v52 = vpop.permute.xlu0 %10664 }
0x15a8   : > { %18656 = vmatprep.mubr.msk.f32.mxu0 %vm238_vm0, %v8824_v26  ;;  %18654 = vmatprep.subr.msk.mxu0 %vm238_vm0, %v22704_v19 }
0x15a9   : > { %18659 = vmatprep.subr.msk.mxu1 %vm238_vm0, %v22706_v7 }
0x15aa   : > { %18650 = vmatmul.mubr.msk.f32.vlgmr.msra.gmra.mxu1 %vm238_vm0, %v8823_v30 }
0x15ab   : > { %18655 = vmatpush3.xpose.msk.msra.mxu0 %vm238_vm0, %v22704_v19  ;;  %18660 = vmatpush3.xpose.msk.msra.mxu1 %vm238_vm0, %v22706_v7  ;;  %v8836_v19 = vmul.f32 %v22596_v15, %v24973_v27  ;;  %v10756_v7 = vpop.permute.xlu1 %10755 }
0x15ac   : > { %18663 = vmatprep.mubr.msk.f32.mxu1 %vm238_vm0, %v8826_v44  ;;  %18661 = vmatprep.subr.msk.mxu1 %vm238_vm0, %v22722_v6 }
0x15ad   : > { %18666 = vmatprep.subr.msk.mxu0 %vm238_vm0, %v22726_v43 }
0x15ae   : > { %18657 = vmatmul.mubr.msk.f32.vlgmr.msra.gmra.mxu0 %vm238_vm0, %v8825_v14 }
0x15af   : > { %18662 = vmatpush3.xpose.msk.msra.mxu1 %vm238_vm0, %v22722_v6  ;;  %18667 = vmatpush3.xpose.msk.msra.mxu0 %vm238_vm0, %v22726_v43  ;;  %v22929_v6 = vpop.permute.xlu0 %10844  ;;  %v8837_v43 = vmul.f32 %v22590_v31, %v24973_v27 }
0x15b0   : > { %18670 = vmatprep.mubr.msk.f32.mxu0 %vm238_vm0, %v8828_v23  ;;  %18668 = vmatprep.subr.msk.mxu0 %vm238_vm0, %v22740_v56 }
0x15b1   : > { %18673 = vmatprep.subr.msk.mxu1 %vm238_vm0, %v22742_v10 }
0x15b2   : > { %18664 = vmatmul.mubr.msk.f32.vlgmr.msra.gmra.mxu1 %vm238_vm0, %v8827_v13 }
0x15b3   : > { %18669 = vmatpush3.xpose.msk.msra.mxu0 %vm238_vm0, %v22740_v56  ;;  %18674 = vmatpush3.xpose.msk.msra.mxu1 %vm238_vm0, %v22742_v10  ;;  %v10754_v56 = vpop.permute.xlu1 %10753  ;;  %v22937_v10 = vpop.permute.xlu0 %10933 }
0x15b4   : > { %18677 = vmatprep.mubr.msk.f32.mxu1 %vm238_vm0, %v8830_v37  ;;  %18675 = vmatprep.subr.msk.mxu1 %vm238_vm0, %v22758_v5 }
0x15b5   : > { %18680 = vmatprep.subr.msk.mxu0 %vm238_vm0, %v22760_v55 }
0x15b6   : > { %18671 = vmatmul.mubr.msk.f32.vlgmr.msra.gmra.mxu0 %vm238_vm0, %v8829_v45 }
0x15b7   : > { %18676 = vmatpush3.xpose.msk.msra.mxu1 %vm238_vm0, %v22758_v5  ;;  %18681 = vmatpush3.xpose.msk.msra.mxu0 %vm238_vm0, %v22760_v55 }
0x15b8   : > { %18684 = vmatprep.mubr.msk.f32.mxu0 %vm238_vm0, %v8832_v46  ;;  %18682 = vmatprep.subr.msk.mxu0 %vm238_vm0, %v22776_v20 }
0x15b9   : > { %18687 = vmatprep.subr.msk.mxu1 %vm238_vm0, %v22778_v59 }
0x15ba   : > { %18678 = vmatmul.mubr.msk.f32.vlgmr.msra.gmra.mxu1 %vm238_vm0, %v8831_v1 }
0x15bb   : > { %18683 = vmatpush3.xpose.msk.msra.mxu0 %vm238_vm0, %v22776_v20  ;;  %18688 = vmatpush3.xpose.msk.msra.mxu1 %vm238_vm0, %v22778_v59 }
0x15bc   : > { %18691 = vmatprep.mubr.msk.f32.mxu1 %vm238_vm0, %v8834_v9  ;;  %18689 = vmatprep.subr.msk.mxu1 %vm238_vm0, %v22794_v36 }
0x15bd   : > { %18694 = vmatprep.subr.msk.mxu0 %vm238_vm0, %v22796_v50 }
0x15be   : > { %18685 = vmatmul.mubr.msk.f32.vlgmr.msra.gmra.mxu0 %vm238_vm0, %v8833_v11 }
0x15bf   : > { %18690 = vmatpush3.xpose.msk.msra.mxu1 %vm238_vm0, %v22794_v36  ;;  %18695 = vmatpush3.xpose.msk.msra.mxu0 %vm238_vm0, %v22796_v50 }
0x15c0   : > { %18698 = vmatprep.mubr.msk.f32.mxu0 %vm238_vm0, %v8836_v19  ;;  %18696 = vmatprep.subr.msk.mxu0 %vm238_vm0, %v22814_v38 }
0x15c1   : > { %18701 = vmatprep.subr.mxu1 %v10667_v28 }
0x15c2   : > { %18692 = vmatmul.mubr.msk.f32.vlgmr.msra.gmra.mxu1 %vm238_vm0, %v8835_v35 }
0x15c3   : > { %18697 = vmatpush3.xpose.msk.msra.mxu0 %vm238_vm0, %v22814_v38  ;;  %18702 = vmatpush3.msra.mxu1 %v10667_v28 }
0x15c4   : > { %18703 = vmatprep.subr.mxu1 %v10665_v52  ;;  %18708 = vmatprep.subr.mxu0 %v10756_v7 }
0x15c5   : > { %18704 = vmatpush3.msra.mxu1 %v10665_v52 }
0x15c6   : > { %18699 = vmatmul.mubr.msk.f32.vlgmr.msra.gmra.mxu0 %vm238_vm0, %v8837_v43  ;;  %18715 = vmatprep.subr.mxu1 %v22929_v6 }
0x15c7   : > { %18709 = vmatpush3.msra.mxu0 %v10756_v7 }
0x15c8   : > { %18710 = vmatprep.subr.mxu0 %v10754_v56 }
0x15c9   : > { %18711 = vmatpush3.msra.mxu0 %v10754_v56 }
0x15ca   : > { %18722 = vmatprep.subr.mxu0 %v22937_v10 }
0x1648   : > { %v18595_v17 = vpop.f32.mrf.mxu1 }
0x1649   : > { %v10247_v5 = vmul.f32 0.5, %v18595_v17 }
0x164a   : > { %v8952_v55 = vpop.f32.mrf.mxu1 }
0x164b   : > { %v22946_v39 = vadd.f32 %v22943_v2, %v10247_v5  ;;  %v10246_v20 = vmul.f32 0.5, %v8952_v55 }
0x164d   : > { %v18602_v59 = vpop.f32.mrf.mxu0  ;;  %v22949_v24 = vadd.f32 %v22943_v2, %v10246_v20  ;;  %v10313_v36 = vsel %vm1956_vm1, %v22946_v39, -inf }
0x164e   : > { %v10249_v42 = vmul.f32 0.5, %v18602_v59  ;;  %10314 = vmax.xlane.f32.xlu1 %v10313_v36 }
0x164f   : > { %v9043_v50 = vpop.f32.mrf.mxu0  ;;  %v10310_v38 = vsel %vm1956_vm1, %v22949_v24, -inf }
0x1650   : > { %v22954_v22 = vadd.f32 %v22943_v2, %v10249_v42  ;;  %v10248_v49 = vmul.f32 0.5, %v9043_v50  ;;  %10311 = vmax.xlane.f32.xlu0 %v10310_v38 }
0x1652   : > { %v22959_v48 = vadd.f32 %v22943_v2, %v10248_v49  ;;  %v18609_v32 = vpop.f32.mrf.mxu1  ;;  %v10319_v26 = vsel %vm1956_vm1, %v22954_v22, -inf }
0x1653   : > { %v10251_v30 = vmul.f32 0.5, %v18609_v32  ;;  %10320 = vmax.xlane.f32.xlu1 %v10319_v26 }
0x1654   : > { %v9134_v44 = vpop.f32.mrf.mxu1  ;;  %v10316_v14 = vsel %vm1956_vm1, %v22959_v48, -inf }
0x1655   : > { %v22966_v23 = vadd.f32 %v22943_v2, %v10251_v30  ;;  %v10250_v13 = vmul.f32 0.5, %v9134_v44  ;;  %10317 = vmax.xlane.f32.xlu0 %v10316_v14 }
0x1656   : > { %v18616_v37 = vpop.f32.mrf.mxu0 }
0x1657   : > { %v10253_v45 = vmul.f32 0.5, %v18616_v37  ;;  %v22969_v46 = vadd.f32 %v22943_v2, %v10250_v13  ;;  %v10325_v9 = vsel %vm1956_vm1, %v22966_v23, -inf }
0x1658   : > { %v9225_v1 = vpop.f32.mrf.mxu0 }
0x1659   : > { %v22974_v28 = vadd.f32 %v22943_v2, %v10253_v45  ;;  %v10252_v11 = vmul.f32 0.5, %v9225_v1  ;;  %10326 = vmax.xlane.f32.xlu0 %v10325_v9  ;;  %v10322_v56 = vsel %vm1956_vm1, %v22969_v46, -inf }
0x165a   : > { %v18623_v52 = vpop.f32.mrf.mxu1 }
0x165b   : > { %v22977_v19 = vadd.f32 %v22943_v2, %v10252_v11  ;;  %v10255_v35 = vmul.f32 0.5, %v18623_v52  ;;  %v10331_v7 = vsel %vm1956_vm1, %v22974_v28, -inf }
0x165c   : > { %10332 = vmax.xlane.f32.xlu1 %v10331_v7  ;;  %v9316_v43 = vpop.f32.mrf.mxu1 }
0x165d   : > { %v22984_v17 = vadd.f32 %v22943_v2, %v10255_v35  ;;  %v10254_v5 = vmul.f32 0.5, %v9316_v43  ;;  %10323 = vmax.xlane.f32.xlu0 %v10322_v56  ;;  %v10328_v59 = vsel %vm1956_vm1, %v22977_v19, -inf }
0x165e   : > { %v18630_v55 = vpop.f32.mrf.mxu0 }
0x165f   : > { %v10257_v20 = vmul.f32 0.5, %v18630_v55  ;;  %v22989_v42 = vadd.f32 %v22943_v2, %v10254_v5  ;;  %v10337_v50 = vsel %vm1956_vm1, %v22984_v17, -inf }
0x1660   : > { %v9407_v36 = vpop.f32.mrf.mxu0  ;;  %10329 = vmax.xlane.f32.xlu1 %v10328_v59 }
0x1661   : > { %v22994_v49 = vadd.f32 %v22943_v2, %v10257_v20  ;;  %v10256_v38 = vmul.f32 0.5, %v9407_v36  ;;  %10338 = vmax.xlane.f32.xlu0 %v10337_v50  ;;  %v10334_v13 = vsel %vm1956_vm1, %v22989_v42, -inf }
0x1662   : > { %v18637_v32 = vpop.f32.mrf.mxu1 }
0x1663   : > { %v22997_v26 = vadd.f32 %v22943_v2, %v10256_v38  ;;  %v10259_v30 = vmul.f32 0.5, %v18637_v32  ;;  %v10343_v44 = vsel %vm1956_vm1, %v22994_v49, -inf }
0x1664   : > { %10344 = vmax.xlane.f32.xlu1 %v10343_v44  ;;  %v9498_v14 = vpop.f32.mrf.mxu1 }
0x1665   : > { %v23004_v37 = vadd.f32 %v22943_v2, %v10259_v30  ;;  %v10258_v45 = vmul.f32 0.5, %v9498_v14  ;;  %10335 = vmax.xlane.f32.xlu0 %v10334_v13  ;;  %v10340_v11 = vsel %vm1956_vm1, %v22997_v26, -inf }
0x1666   : > { %v18644_v1 = vpop.f32.mrf.mxu0 }
0x1667   : > { %v10261_v9 = vmul.f32 0.5, %v18644_v1  ;;  %v23009_v52 = vadd.f32 %v22943_v2, %v10258_v45  ;;  %v10349_v7 = vsel %vm1956_vm1, %v23004_v37, -inf }
0x1668   : > { %v9589_v35 = vpop.f32.mrf.mxu0  ;;  %10341 = vmax.xlane.f32.xlu1 %v10340_v11 }
0x1669   : > { %v23014_v43 = vadd.f32 %v22943_v2, %v10261_v9  ;;  %v10260_v56 = vmul.f32 0.5, %v9589_v35  ;;  %10350 = vmax.xlane.f32.xlu0 %v10349_v7  ;;  %v10346_v50 = vsel %vm1956_vm1, %v23009_v52, -inf }
0x166a   : > { %v18651_v5 = vpop.f32.mrf.mxu1 }
0x166b   : > { %v23017_v55 = vadd.f32 %v22943_v2, %v10260_v56  ;;  %v10263_v20 = vmul.f32 0.5, %v18651_v5  ;;  %v10355_v59 = vsel %vm1956_vm1, %v23014_v43, -inf }
0x166c   : > { %10356 = vmax.xlane.f32.xlu1 %v10355_v59  ;;  %v9670_v36 = vpop.f32.mrf.mxu1 }
0x166d   : > { %v23024_v38 = vadd.f32 %v22943_v2, %v10263_v20  ;;  %v10262_v32 = vmul.f32 0.5, %v9670_v36  ;;  %10347 = vmax.xlane.f32.xlu0 %v10346_v50  ;;  %v10352_v44 = vsel %vm1956_vm1, %v23017_v55, -inf }
0x166e   : > { %v18658_v30 = vpop.f32.mrf.mxu0 }
0x166f   : > { %v23029_v14 = vadd.f32 %v22943_v2, %v10262_v32  ;;  %v10265_v13 = vmul.f32 0.5, %v18658_v30  ;;  %v10361_v1 = vsel %vm1956_vm1, %v23024_v38, -inf }
0x1670   : > { %v9751_v45 = vpop.f32.mrf.mxu0  ;;  %10353 = vmax.xlane.f32.xlu1 %v10352_v44 }
0x1671   : > { %v10264_v9 = vmul.f32 0.5, %v9751_v45  ;;  %10362 = vmax.xlane.f32.xlu0 %v10361_v1  ;;  %v23037_v7 = vadd.f32 %v22943_v2, %v10265_v13  ;;  %v10358_v20 = vsel %vm1956_vm1, %v23029_v14, -inf }
0x1672   : > { %v18665_v11 = vpop.f32.mrf.mxu1 }
0x1673   : > { %v23034_v35 = vadd.f32 %v22943_v2, %v10264_v9  ;;  %v10267_v56 = vmul.f32 0.5, %v18665_v11  ;;  %v10367_v45 = vsel %vm1956_vm1, %v23037_v7, -inf }
0x1674   : > { %v9832_v5 = vpop.f32.mrf.mxu1 }
0x1675   : > { %v10266_v59 = vmul.f32 0.5, %v9832_v5  ;;  %v10364_v36 = vsel %vm1956_vm1, %v23034_v35, -inf  ;;  %10359 = vmax.xlane.f32.xlu0 %v10358_v20  ;;  %v23047_v30 = vadd.f32 %v22943_v2, %v10267_v56 }
0x1676   : > { %v18672_v50 = vpop.f32.mrf.mxu0  ;;  %10365 = vmax.xlane.f32.xlu1 %v10364_v36 }
0x1677   : > { %v23044_v32 = vadd.f32 %v22943_v2, %v10266_v59  ;;  %v10269_v44 = vmul.f32 0.5, %v18672_v50  ;;  %v10373_v36 = vsel %vm1956_vm1, %v23047_v30, -inf }
0x1678   : > { %v9913_v13 = vpop.f32.mrf.mxu0 }
0x1679   : > { %v10268_v1 = vmul.f32 0.5, %v9913_v13  ;;  %10368 = vmax.xlane.f32.xlu0 %v10367_v45  ;;  %v10370_v9 = vsel %vm1956_vm1, %v23044_v32, -inf  ;;  %v23057_v20 = vadd.f32 %v22943_v2, %v10269_v44 }
0x167a   : > { %10371 = vmax.xlane.f32.xlu1 %v10370_v9  ;;  %v18679_v11 = vpop.f32.mrf.mxu1 }
0x167b   : > { %v23054_v5 = vadd.f32 %v22943_v2, %v10268_v1  ;;  %v10271_v56 = vmul.f32 0.5, %v18679_v11  ;;  %v10379_v11 = vsel %vm1956_vm1, %v23057_v20, -inf }
0x167c   : > { %v9994_v59 = vpop.f32.mrf.mxu1 }
0x167d   : > { %v10270_v50 = vmul.f32 0.5, %v9994_v59  ;;  %10374 = vmax.xlane.f32.xlu0 %v10373_v36  ;;  %v10376_v13 = vsel %vm1956_vm1, %v23054_v5, -inf  ;;  %v23067_v1 = vadd.f32 %v22943_v2, %v10271_v56 }
0x167e   : > { %v18686_v45 = vpop.f32.mrf.mxu0  ;;  %10377 = vmax.xlane.f32.xlu1 %v10376_v13 }
0x167f   : > { %v23064_v9 = vadd.f32 %v22943_v2, %v10270_v50  ;;  %v10273_v44 = vmul.f32 0.5, %v18686_v45  ;;  %v10385_v45 = vsel %vm1956_vm1, %v23067_v1, -inf }
0x1680   : > { %v10075_v54 = vpop.f32.mrf.mxu0 }
0x1681   : > { %v10272_v8 = vmul.f32 0.5, %v10075_v54  ;;  %10380 = vmax.xlane.f32.xlu0 %v10379_v11  ;;  %v10382_v59 = vsel %vm1956_vm1, %v23064_v9, -inf  ;;  %v23077_v50 = vadd.f32 %v22943_v2, %v10273_v44 }
0x1682   : > { %10383 = vmax.xlane.f32.xlu1 %v10382_v59  ;;  %v18693_v36 = vpop.f32.mrf.mxu1 }
0x1683   : > { %v23074_v13 = vadd.f32 %v22943_v2, %v10272_v8  ;;  %v10275_v56 = vmul.f32 0.5, %v18693_v36  ;;  %v10391_v36 = vsel %vm1956_vm1, %v23077_v50, -inf }
0x1684   : > { %v10156_v27 = vpop.f32.mrf.mxu1 }
0x1685   : > { %v10274_v25 = vmul.f32 0.5, %v10156_v27  ;;  %10386 = vmax.xlane.f32.xlu0 %v10385_v45  ;;  %v10388_v54 = vsel %vm1956_vm1, %v23074_v13, -inf  ;;  %v23087_v8 = vadd.f32 %v22943_v2, %v10275_v56 }
0x1686   : > { %v18700_v11 = vpop.f32.mrf.mxu0  ;;  %10389 = vmax.xlane.f32.xlu1 %v10388_v54 }
0x1687   : > { %v23084_v59 = vadd.f32 %v22943_v2, %v10274_v25  ;;  %v10277_v44 = vmul.f32 0.5, %v18700_v11  ;;  %v10397_v56 = vsel %vm1956_vm1, %v23087_v8, -inf  ;;  %v23105_v11 = vpop.permute.xlu1 %10842 }
0x1688   : > { %v10237_v47 = vpop.f32.mrf.mxu0 }
0x1689   : > { %v10276_v29 = vmul.f32 0.5, %v10237_v47  ;;  %10392 = vmax.xlane.f32.xlu0 %v10391_v36  ;;  %v10394_v27 = vsel %vm1956_vm1, %v23084_v59, -inf  ;;  %v23097_v25 = vadd.f32 %v22943_v2, %v10277_v44  ;;  %v23114_v44 = vpop.permute.xlu0 %10931 }
0x168a   : > { %10395 = vmax.xlane.f32.xlu1 %v10394_v27 }
0x168b   : > { %v23094_v45 = vadd.f32 %v22943_v2, %v10276_v29  ;;  %v10403_v47 = vsel %vm1956_vm1, %v23097_v25, -inf  ;;  %v23107_v36 = vpop.permute.xlu1 %11022  ;;  %v8866_v29 = vmul.f32 %v22588_v0, %v20317_v53 }
0x168d   : > { %10398 = vmax.xlane.f32.xlu0 %v10397_v56  ;;  %v10400_v54 = vsel %vm1956_vm1, %v23094_v45, -inf  ;;  %v8867_v56 = vmul.f32 %v22582_v4, %v20317_v53 }
0x168e   : > { %10401 = vmax.xlane.f32.xlu1 %v10400_v54  ;;  %v23120_v54 = vpop.permute.xlu0 %11111 }
0x168f   : > { %v23111_v2 = vpop.permute.xlu1 %11020 }
0x1691   : > { %10404 = vmax.xlane.f32.xlu0 %v10403_v47 }
0x1692   : > { %v23125_v40 = vpop.permute.xlu0 %11109 }
0x1693   : > { %v23116_v27 = vpop.permute.xlu1 %11200 }
0x1696   : > { %v23129_v18 = vpop.permute.xlu0 %11467 }
0x1697   : > { %v23123_v47 = vpop.permute.xlu1 %11198 }
0x169a   : > { %v23133_v21 = vpop.permute.xlu0 %11556 }
0x169b   : > { %v23127_v0 = vpop.permute.xlu1 %11378  ;;  %25011 = vst [vmem:[#allocation28_spill] sm:$0xff] %v23133_v21 }
0x169e   : > { %v23137_v62 = vpop.permute.xlu0 %11645 }
0x169f   : > { %11910 = vrot.lane.b32.xlu1 %v8866_v29, %s19757_s5  ;;  %v23131_v29 = vpop.permute.xlu1 %11376  ;;  %25013 = vst [vmem:[#allocation31_spill] sm:$0xff] %v23137_v62 }
0x16a2   : > { %v23141_v51 = vpop.permute.xlu0 %11734 }
0x16a3   : > { %v23135_v16 = vpop.permute.xlu1 %11465  ;;  %25015 = vst [vmem:[#allocation33_spill] sm:$0xff] %v23141_v51 }
0x16a4   : > { %25012 = vst [vmem:[#allocation30_spill] sm:$0xff] %v23135_v16 }
0x16a6   : > { %v23145_v41 = vpop.permute.xlu0 %11823 }
0x16a7   : > { %11912 = vrot.lane.b32.xlu0 %v8867_v56, %s19757_s5  ;;  %v23139_v4 = vpop.permute.xlu1 %11554  ;;  %25017 = vst [vmem:[#allocation2_spill] sm:$0xff] %v23145_v41 }
0x16a8   : > { %25014 = vst [vmem:[#allocation32_spill] sm:$0xff] %v23139_v4 }
0x16aa   : > { %v23149_v3 = vpop.permute.xlu0 %11289 }
0x16ab   : > { %v23143_v56 = vpop.permute.xlu1 %11643 }
0x16ac   : > { %25016 = vst [vmem:[#allocation3_spill] sm:$0xff] %v23143_v56 }
0x16ae   : > { %v23153_v57 = vpop.permute.xlu0 %11287 }
0x16af   : > { %v23147_v12 = vpop.permute.xlu1 %11732 }
0x16b0   : > { %25018 = vst [vmem:[#allocation5_spill] sm:$0xff] %v23147_v12 }
0x16b3   : > { %v23151_v58 = vpop.permute.xlu1 %11821 }
0x16b4   : > { %25019 = vst [vmem:[#allocation4_spill] sm:$0xff] %v23151_v58 }
0x16d7   : > { %v10315_v60 = vpop.xlane.xlu1 %10314 }
0x16d8   : > { %v10407_v61 = vsub.f32 %v22946_v39, %v10315_v60 }
0x16d9   : > { %v10312_v34 = vpop.xlane.xlu0 %10311 }
0x16da   : > { %v10440_v63 = vmul.f32 1.442695, %v10407_v61  ;;  %v10406_v33 = vsub.f32 %v22949_v24, %v10312_v34 }
0x16dc   : > { %v10321_v51 = vpop.xlane.xlu1 %10320  ;;  %19462 = vpow2.f32 %v10440_v63  ;;  %v10438_v56 = vmul.f32 1.442695, %v10406_v33 }
0x16dd   : > { %v10409_v41 = vsub.f32 %v22954_v22, %v10321_v51 }
0x16de   : > { %v10318_v4 = vpop.xlane.xlu0 %10317  ;;  %19464 = vpow2.f32 %v10438_v56 }
0x16df   : > { %v10444_v12 = vmul.f32 1.442695, %v10409_v41  ;;  %v10408_v62 = vsub.f32 %v22959_v48, %v10318_v4 }
0x16e1   : > { %19466 = vpow2.f32 %v10444_v12  ;;  %v10442_v58 = vmul.f32 1.442695, %v10408_v62 }
0x16e2   : > { %v10327_v16 = vpop.xlane.xlu0 %10326 }
0x16e3   : > { %v10411_v21 = vsub.f32 %v22966_v23, %v10327_v16  ;;  %19468 = vpow2.f32 %v10442_v58 }
0x16e5   : > { %v10448_v60 = vmul.f32 1.442695, %v10411_v21  ;;  %v10333_v61 = vpop.xlane.xlu1 %10332 }
0x16e6   : > { %v10413_v34 = vsub.f32 %v22974_v28, %v10333_v61  ;;  %v10324_v39 = vpop.xlane.xlu0 %10323 }
0x16e7   : > { %19470 = vpow2.f32 %v10448_v60  ;;  %v10410_v63 = vsub.f32 %v22969_v46, %v10324_v39 }
0x16e8   : > { %v10452_v33 = vmul.f32 1.442695, %v10413_v34 }
0x16e9   : > { %v10446_v51 = vmul.f32 1.442695, %v10410_v63  ;;  %v10330_v24 = vpop.xlane.xlu1 %10329  ;;  %v23162_v41 = vpop.eup %19462 }
0x16ea   : > { %19472 = vpow2.f32 %v10452_v33  ;;  %v10412_v12 = vsub.f32 %v22977_v19, %v10330_v24  ;;  %v10339_v62 = vpop.xlane.xlu0 %10338  ;;  %v10505_v21 = vsel %vm1956_vm1, %v23162_v41, 0.0 }
0x16eb   : > { %19474 = vpow2.f32 %v10446_v51  ;;  %v10415_v58 = vsub.f32 %v22984_v17, %v10339_v62  ;;  %v23168_v16 = vpop.eup %19464  ;;  %10506 = vadd.xlane.f32.xlu0 %v10505_v21 }
0x16ec   : > { %v10450_v22 = vmul.f32 1.442695, %v10412_v12  ;;  %v10502_v46 = vsel %vm1956_vm1, %v23168_v16, 0.0 }
0x16ed   : > { %v10456_v48 = vmul.f32 1.442695, %v10415_v58  ;;  %v10345_v23 = vpop.xlane.xlu1 %10344  ;;  %10503 = vadd.xlane.f32.xlu1 %v10502_v46 }
0x16ee   : > { %v23172_v28 = vpop.eup %19466  ;;  %19476 = vpow2.f32 %v10450_v22  ;;  %v10417_v19 = vsub.f32 %v22994_v49, %v10345_v23  ;;  %v10336_v4 = vpop.xlane.xlu0 %10335 }
0x16ef   : > { %19478 = vpow2.f32 %v10456_v48  ;;  %v10414_v17 = vsub.f32 %v22989_v42, %v10336_v4  ;;  %v10511_v34 = vsel %vm1956_vm1, %v23172_v28, 0.0 }
0x16f0   : > { %v10460_v56 = vmul.f32 1.442695, %v10417_v19  ;;  %v23178_v39 = vpop.eup %19468 }
0x16f1   : > { %v10454_v60 = vmul.f32 1.442695, %v10414_v17  ;;  %v10342_v61 = vpop.xlane.xlu1 %10341  ;;  %10512 = vadd.xlane.f32.xlu1 %v10511_v34  ;;  %v10508_v58 = vsel %vm1956_vm1, %v23178_v39, 0.0 }
0x16f2   : > { %19480 = vpow2.f32 %v10460_v56  ;;  %v10416_v63 = vsub.f32 %v22997_v26, %v10342_v61  ;;  %v10351_v33 = vpop.xlane.xlu0 %10350 }
0x16f3   : > { %19482 = vpow2.f32 %v10454_v60  ;;  %v10419_v49 = vsub.f32 %v23004_v37, %v10351_v33 }
0x16f4   : > { %v23182_v51 = vpop.eup %19470  ;;  %v10458_v24 = vmul.f32 1.442695, %v10416_v63 }
0x16f5   : > { %v10464_v42 = vmul.f32 1.442695, %v10419_v49  ;;  %v10357_v12 = vpop.xlane.xlu1 %10356  ;;  %v10517_v62 = vsel %vm1956_vm1, %v23182_v51, 0.0  ;;  %10509 = vadd.xlane.f32.xlu1 %v10508_v58 }
0x16f6   : > { %19484 = vpow2.f32 %v10458_v24  ;;  %v10421_v21 = vsub.f32 %v23014_v43, %v10357_v12  ;;  %v10348_v26 = vpop.xlane.xlu0 %10347  ;;  %10518 = vadd.xlane.f32.xlu0 %v10517_v62 }
0x16f7   : > { %v23189_v22 = vpop.eup %19472  ;;  %19486 = vpow2.f32 %v10464_v42  ;;  %v10418_v37 = vsub.f32 %v23009_v52, %v10348_v26 }
0x16f8   : > { %v23192_v48 = vpop.eup %19474  ;;  %v10468_v23 = vmul.f32 1.442695, %v10421_v21  ;;  %v10523_v17 = vsel %vm1956_vm1, %v23189_v22, 0.0 }
0x16f9   : > { %v10462_v46 = vmul.f32 1.442695, %v10418_v37  ;;  %v10354_v19 = vpop.xlane.xlu1 %10353  ;;  %v10514_v4 = vsel %vm1956_vm1, %v23192_v48, 0.0  ;;  %10524 = vadd.xlane.f32.xlu1 %v10523_v17 }
0x16fa   : > { %19488 = vpow2.f32 %v10468_v23  ;;  %v10420_v43 = vsub.f32 %v23017_v55, %v10354_v19  ;;  %v10363_v56 = vpop.xlane.xlu0 %10362  ;;  %10515 = vadd.xlane.f32.xlu0 %v10514_v4 }
0x16fb   : > { %v23199_v60 = vpop.eup %19476  ;;  %19490 = vpow2.f32 %v10462_v46  ;;  %v10423_v52 = vsub.f32 %v23024_v38, %v10363_v56 }
0x16fc   : > { %v23202_v61 = vpop.eup %19478  ;;  %v10466_v34 = vmul.f32 1.442695, %v10420_v43  ;;  %v10520_v49 = vsel %vm1956_vm1, %v23199_v60, 0.0 }
0x16fd   : > { %v10472_v63 = vmul.f32 1.442695, %v10423_v52  ;;  %v10529_v33 = vsel %vm1956_vm1, %v23202_v61, 0.0  ;;  %10521 = vadd.xlane.f32.xlu1 %v10520_v49 }
0x16fe   : > { %19492 = vpow2.f32 %v10466_v34  ;;  %v10360_v55 = vpop.xlane.xlu0 %10359  ;;  %10530 = vadd.xlane.f32.xlu0 %v10529_v33 }
0x16ff   : > { %v23208_v24 = vpop.eup %19480  ;;  %19494 = vpow2.f32 %v10472_v63  ;;  %v10366_v42 = vpop.xlane.xlu1 %10365  ;;  %v10422_v38 = vsub.f32 %v23029_v14, %v10360_v55 }
0x1700   : > { %v23211_v12 = vpop.eup %19482  ;;  %v10424_v62 = vsub.f32 %v23034_v35, %v10366_v42  ;;  %v10535_v26 = vsel %vm1956_vm1, %v23208_v24, 0.0 }
0x1701   : > { %v10470_v58 = vmul.f32 1.442695, %v10422_v38  ;;  %v10526_v21 = vsel %vm1956_vm1, %v23211_v12, 0.0  ;;  %10536 = vadd.xlane.f32.xlu1 %v10535_v26 }
0x1702   : > { %v10474_v37 = vmul.f32 1.442695, %v10424_v62  ;;  %v10369_v23 = vpop.xlane.xlu0 %10368  ;;  %10527 = vadd.xlane.f32.xlu0 %v10526_v21 }
0x1703   : > { %v23218_v46 = vpop.eup %19484  ;;  %19496 = vpow2.f32 %v10470_v58  ;;  %v10425_v14 = vsub.f32 %v23037_v7, %v10369_v23  ;;  %v10372_v19 = vpop.xlane.xlu1 %10371 }
0x1704   : > { %v23221_v4 = vpop.eup %19486  ;;  %19498 = vpow2.f32 %v10474_v37  ;;  %v10426_v35 = vsub.f32 %v23044_v32, %v10372_v19  ;;  %v10532_v56 = vsel %vm1956_vm1, %v23218_v46, 0.0 }
0x1705   : > { %v10476_v17 = vmul.f32 1.442695, %v10425_v14  ;;  %v10541_v43 = vsel %vm1956_vm1, %v23221_v4, 0.0  ;;  %10533 = vadd.xlane.f32.xlu1 %v10532_v56 }
0x1706   : > { %v10478_v52 = vmul.f32 1.442695, %v10426_v35  ;;  %v10375_v34 = vpop.xlane.xlu0 %10374  ;;  %10542 = vadd.xlane.f32.xlu0 %v10541_v43 }
0x1707   : > { %v23228_v63 = vpop.eup %19488  ;;  %19500 = vpow2.f32 %v10476_v17  ;;  %v10427_v7 = vsub.f32 %v23047_v30, %v10375_v34  ;;  %v10378_v33 = vpop.xlane.xlu1 %10377 }
0x1708   : > { %v23231_v49 = vpop.eup %19490  ;;  %19502 = vpow2.f32 %v10478_v52  ;;  %v10428_v32 = vsub.f32 %v23054_v5, %v10378_v33  ;;  %v10547_v38 = vsel %vm1956_vm1, %v23228_v63, 0.0 }
0x1709   : > { %v10480_v55 = vmul.f32 1.442695, %v10427_v7  ;;  %v10538_v42 = vsel %vm1956_vm1, %v23231_v49, 0.0  ;;  %10548 = vadd.xlane.f32.xlu1 %v10547_v38 }
0x170a   : > { %v10482_v62 = vmul.f32 1.442695, %v10428_v32  ;;  %v10381_v58 = vpop.xlane.xlu0 %10380  ;;  %10539 = vadd.xlane.f32.xlu0 %v10538_v42 }
0x170b   : > { %v23238_v21 = vpop.eup %19492  ;;  %19504 = vpow2.f32 %v10480_v55  ;;  %v10429_v30 = vsub.f32 %v23057_v20, %v10381_v58  ;;  %v10384_v26 = vpop.xlane.xlu1 %10383 }
0x170c   : > { %v23241_v37 = vpop.eup %19494  ;;  %19506 = vpow2.f32 %v10482_v62  ;;  %v10430_v5 = vsub.f32 %v23064_v9, %v10384_v26  ;;  %v10544_v19 = vsel %vm1956_vm1, %v23238_v21, 0.0 }
0x170d   : > { %v10484_v23 = vmul.f32 1.442695, %v10429_v30  ;;  %v10553_v14 = vsel %vm1956_vm1, %v23241_v37, 0.0  ;;  %10545 = vadd.xlane.f32.xlu1 %v10544_v19 }
0x170e   : > { %v10486_v35 = vmul.f32 1.442695, %v10430_v5  ;;  %v10387_v17 = vpop.xlane.xlu0 %10386  ;;  %10554 = vadd.xlane.f32.xlu0 %v10553_v14 }
0x170f   : > { %19508 = vpow2.f32 %v10484_v23  ;;  %v10431_v20 = vsub.f32 %v23067_v1, %v10387_v17  ;;  %v10390_v43 = vpop.xlane.xlu1 %10389 }
0x1710   : > { %v23249_v56 = vpop.eup %19496  ;;  %v10432_v52 = vsub.f32 %v23074_v13, %v10390_v43  ;;  %19510 = vpow2.f32 %v10486_v35 }
0x1711   : > { %v23252_v9 = vpop.eup %19498  ;;  %v10488_v34 = vmul.f32 1.442695, %v10431_v20  ;;  %v10550_v7 = vsel %vm1956_vm1, %v23249_v56, 0.0 }
0x1712   : > { %v10490_v33 = vmul.f32 1.442695, %v10432_v52  ;;  %v10393_v32 = vpop.xlane.xlu0 %10392  ;;  %10551 = vadd.xlane.f32.xlu0 %v10550_v7  ;;  %v10556_v55 = vsel %vm1956_vm1, %v23252_v9, 0.0 }
0x1713   : > { %19512 = vpow2.f32 %v10488_v34  ;;  %v10433_v1 = vsub.f32 %v23077_v50, %v10393_v32  ;;  %10557 = vadd.xlane.f32.xlu1 %v10556_v55  ;;  %v10396_v42 = vpop.xlane.xlu1 %10395 }
0x1714   : > { %v23259_v38 = vpop.eup %19500  ;;  %v10434_v13 = vsub.f32 %v23084_v59, %v10396_v42  ;;  %19514 = vpow2.f32 %v10490_v33 }
0x1715   : > { %v23262_v62 = vpop.eup %19502  ;;  %v10492_v58 = vmul.f32 1.442695, %v10433_v1  ;;  %v10559_v30 = vsel %vm1956_vm1, %v23259_v38, 0.0 }
0x1716   : > { %v10494_v26 = vmul.f32 1.442695, %v10434_v13  ;;  %10560 = vadd.xlane.f32.xlu0 %v10559_v30  ;;  %v10399_v5 = vpop.xlane.xlu0 %10398  ;;  %v10562_v23 = vsel %vm1956_vm1, %v23262_v62, 0.0 }
0x1717   : > { %19516 = vpow2.f32 %v10492_v58  ;;  %v10435_v50 = vsub.f32 %v23087_v8, %v10399_v5  ;;  %10563 = vadd.xlane.f32.xlu1 %v10562_v23  ;;  %v10402_v14 = vpop.xlane.xlu1 %10401 }
0x1718   : > { %v23269_v19 = vpop.eup %19504  ;;  %v10436_v59 = vsub.f32 %v23094_v45, %v10402_v14  ;;  %19518 = vpow2.f32 %v10494_v26 }
0x1719   : > { %v23272_v35 = vpop.eup %19506  ;;  %v10496_v17 = vmul.f32 1.442695, %v10435_v50  ;;  %v10565_v20 = vsel %vm1956_vm1, %v23269_v19, 0.0 }
0x171a   : > { %v10498_v43 = vmul.f32 1.442695, %v10436_v59  ;;  %10566 = vadd.xlane.f32.xlu0 %v10565_v20  ;;  %v10405_v52 = vpop.xlane.xlu0 %10404  ;;  %v10568_v34 = vsel %vm1956_vm1, %v23272_v35, 0.0 }
0x171b   : > { %19520 = vpow2.f32 %v10496_v17  ;;  %v10437_v8 = vsub.f32 %v23097_v25, %v10405_v52  ;;  %10569 = vadd.xlane.f32.xlu1 %v10568_v34  ;;  %v8869_v52 = vmul.f32 %v22590_v31, %v20317_v53 }
0x171c   : > { %v23279_v7 = vpop.eup %19508  ;;  %19522 = vpow2.f32 %v10498_v43  ;;  %v8868_v43 = vmul.f32 %v22596_v15, %v20317_v53 }
0x171d   : > { %v10500_v45 = vmul.f32 1.442695, %v10437_v8  ;;  %v10571_v33 = vsel %vm1956_vm1, %v23279_v7, 0.0  ;;  %v23283_v32 = vpop.eup %19510  ;;  %v23323_v8 = vpop.permute.xlu1 %11910 }
0x171e   : > { %10572 = vadd.xlane.f32.xlu0 %v10571_v33  ;;  %v10574_v1 = vsel %vm1956_vm1, %v23283_v32, 0.0  ;;  %v23321_v34 = vpop.permute.xlu0 %11912 }
0x171f   : > { %19524 = vpow2.f32 %v10500_v45 }
0x1720   : > { %v23285_v55 = vpop.eup %19512 }
0x1721   : > { %v10577_v25 = vsel %vm1956_vm1, %v23285_v55, 0.0  ;;  %v23291_v42 = vpop.eup %19514 }
0x1722   : > { %10575 = vadd.xlane.f32.xlu0 %v10574_v1  ;;  %10578 = vadd.xlane.f32.xlu1 %v10577_v25  ;;  %v10580_v58 = vsel %vm1956_vm1, %v23291_v42, 0.0 }
0x1724   : > { %v23293_v13 = vpop.eup %19516 }
0x1725   : > { %v10583_v30 = vsel %vm1956_vm1, %v23293_v13, 0.0  ;;  %v23299_v26 = vpop.eup %19518 }
0x1726   : > { %10581 = vadd.xlane.f32.xlu0 %v10580_v58  ;;  %10584 = vadd.xlane.f32.xlu1 %v10583_v30  ;;  %v10586_v50 = vsel %vm1956_vm1, %v23299_v26, 0.0 }
0x1728   : > { %v23301_v5 = vpop.eup %19520 }
0x1729   : > { %v10589_v23 = vsel %vm1956_vm1, %v23301_v5, 0.0  ;;  %v23307_v14 = vpop.eup %19522 }
0x172a   : > { %10590 = vadd.xlane.f32.xlu1 %v10589_v23  ;;  %10587 = vadd.xlane.f32.xlu0 %v10586_v50  ;;  %v10592_v20 = vsel %vm1956_vm1, %v23307_v14, 0.0 }
0x172c   : > { %v23309_v59 = vpop.eup %19524 }
0x172d   : > { %v10595_v17 = vsel %vm1956_vm1, %v23309_v59, 0.0 }
0x172e   : > { %10596 = vadd.xlane.f32.xlu1 %v10595_v17  ;;  %10593 = vadd.xlane.f32.xlu0 %v10592_v20 }
0x173f   : > { %11999 = vrot.lane.b32.xlu1 %v8868_v43, %s19757_s5 }
0x1744   : > { %12001 = vrot.lane.b32.xlu0 %v8869_v52, %s19757_s5 }
0x1774   : > { %v10507_v45 = vpop.xlane.xlu0 %10506 }
0x1775   : > { %19526 = vrcp.f32 %v10507_v45 }
0x1776   : > { %v10504_v33 = vpop.xlane.xlu1 %10503 }
0x1777   : > { %19528 = vrcp.f32 %v10504_v33 }
0x177a   : > { %v10513_v1 = vpop.xlane.xlu1 %10512 }
0x177b   : > { %19530 = vrcp.f32 %v10513_v1 }
0x177e   : > { %v10510_v58 = vpop.xlane.xlu1 %10509 }
0x177f   : > { %v10519_v25 = vpop.xlane.xlu0 %10518  ;;  %19532 = vrcp.f32 %v10510_v58 }
0x1780   : > { %19534 = vrcp.f32 %v10519_v25 }
0x1782   : > { %v10525_v30 = vpop.xlane.xlu1 %10524  ;;  %v19527_v23 = vpop.eup %19526 }
0x1783   : > { %v10516_v15 = vpop.xlane.xlu0 %10515  ;;  %v10631_v50 = vmul.f32 %v19527_v23, %v23162_v41 }
0x1784   : > { %19536 = vrcp.f32 %v10516_v15  ;;  %v19529_v53 = vpop.eup %19528 }
0x1785   : > { %v10630_v31 = vmul.f32 %v19529_v53, %v23168_v16  ;;  %19538 = vrcp.f32 %v10525_v30 }
0x1786   : > { %v10522_v20 = vpop.xlane.xlu1 %10521 }
0x1787   : > { %v10531_v17 = vpop.xlane.xlu0 %10530  ;;  %18705 = vmatprep.mubr.msk.f32.mxu1 %vm1956_vm1, %v10630_v31  ;;  %19540 = vrcp.f32 %v10522_v20 }
0x1788   : > { %18706 = vmatmul.mubr.msk.f32.vlgmr.msra.gmra.mxu1 %vm1956_vm1, %v10631_v50  ;;  %19542 = vrcp.f32 %v10531_v17  ;;  %v19531_v16 = vpop.eup %19530 }
0x1789   : > { %18716 = vmatpush3.msra.mxu1 %v22929_v6  ;;  %v10633_v58 = vmul.f32 %v19531_v16, %v23172_v28 }
0x178a   : > { %18717 = vmatprep.subr.mxu1 %v23105_v11  ;;  %v10537_v52 = vpop.xlane.xlu1 %10536 }
0x178b   : > { %v10528_v43 = vpop.xlane.xlu0 %10527  ;;  %18718 = vmatpush3.msra.mxu1 %v23105_v11 }
0x178c   : > { %19544 = vrcp.f32 %v10528_v43  ;;  %18729 = vmatprep.subr.mxu1 %v23107_v36  ;;  %v19533_v41 = vpop.eup %19532 }
0x178d   : > { %v10632_v1 = vmul.f32 %v19533_v41, %v23178_v39  ;;  %v19535_v25 = vpop.eup %19534  ;;  %19546 = vrcp.f32 %v10537_v52 }
0x178e   : > { %v10534_v33 = vpop.xlane.xlu1 %10533  ;;  %v10635_v15 = vmul.f32 %v19535_v25, %v23182_v51 }
0x178f   : > { %v10543_v45 = vpop.xlane.xlu0 %10542  ;;  %19548 = vrcp.f32 %v10534_v33  ;;  %18712 = vmatprep.mubr.msk.f32.mxu0 %vm1956_vm1, %v10632_v1 }
0x1790   : > { %18713 = vmatmul.mubr.msk.f32.vlgmr.msra.gmra.mxu0 %vm1956_vm1, %v10633_v58  ;;  %19550 = vrcp.f32 %v10543_v45  ;;  %v25020_v45 = vld [vmem:[#allocation28_spill] sm:$0xff]  ;;  %v25021_v58 = vld [vmem:[#allocation30_spill] sm:$0xff] }
0x1791   : > { %v19537_v6 = vpop.eup %19536  ;;  %18723 = vmatpush3.msra.mxu0 %v22937_v10 }
0x1792   : > { %v10634_v11 = vmul.f32 %v19537_v6, %v23192_v48  ;;  %v10549_v23 = vpop.xlane.xlu1 %10548  ;;  %18724 = vmatprep.subr.mxu0 %v23114_v44  ;;  %v19539_v28 = vpop.eup %19538  ;;  %v25022_v6 = vld [vmem:[#allocation31_spill] sm:$0xff] }
0x1793   : > { %v10540_v30 = vpop.xlane.xlu0 %10539  ;;  %18725 = vmatpush3.msra.mxu0 %v23114_v44  ;;  %v10637_v31 = vmul.f32 %v19539_v28, %v23189_v22  ;;  %v25024_v28 = vld [vmem:[#allocation33_spill] sm:$0xff] }
0x1794   : > { %19552 = vrcp.f32 %v10540_v30  ;;  %18719 = vmatprep.mubr.msk.f32.mxu1 %vm1956_vm1, %v10634_v11  ;;  %v19541_v39 = vpop.eup %19540  ;;  %18736 = vmatprep.subr.mxu0 %v23120_v54 }
0x1795   : > { %18720 = vmatmul.mubr.msk.f32.vlgmr.msra.gmra.mxu1 %vm1956_vm1, %v10635_v15  ;;  %v10636_v48 = vmul.f32 %v19541_v39, %v23199_v60  ;;  %v19543_v53 = vpop.eup %19542  ;;  %19554 = vrcp.f32 %v10549_v23  ;;  %v25023_v15 = vld [vmem:[#allocation32_spill] sm:$0xff]  ;;  %v25025_v39 = vld [vmem:[#allocation3_spill] sm:$0xff] }
0x1796   : > { %18730 = vmatpush3.msra.mxu1 %v23107_v36  ;;  %v10546_v51 = vpop.xlane.xlu1 %10545  ;;  %v10639_v50 = vmul.f32 %v19543_v53, %v23202_v61  ;;  %v25026_v53 = vld [vmem:[#allocation2_spill] sm:$0xff] }
0x1797   : > { %18731 = vmatprep.subr.mxu1 %v23111_v2  ;;  %v10555_v10 = vpop.xlane.xlu0 %10554  ;;  %19556 = vrcp.f32 %v10546_v51  ;;  %18726 = vmatprep.mubr.msk.f32.mxu0 %vm1956_vm1, %v10636_v48 }
0x1798   : > { %18732 = vmatpush3.msra.mxu1 %v23111_v2  ;;  %18727 = vmatmul.mubr.msk.f32.vlgmr.msra.gmra.mxu0 %vm1956_vm1, %v10637_v31  ;;  %19558 = vrcp.f32 %v10555_v10  ;;  %v25027_v31 = vld [vmem:[#allocation5_spill] sm:$0xff] }
0x1799   : > { %v19545_v44 = vpop.eup %19544  ;;  %18743 = vmatprep.subr.mxu1 %v23116_v27  ;;  %18737 = vmatpush3.msra.mxu0 %v23120_v54 }
0x179a   : > { %v10638_v36 = vmul.f32 %v19545_v44, %v23211_v12  ;;  %18738 = vmatprep.subr.mxu0 %v23125_v40  ;;  %v19547_v22 = vpop.eup %19546 }
0x179b   : > { %v10552_v60 = vpop.xlane.xlu0 %10551  ;;  %18739 = vmatpush3.msra.mxu0 %v23125_v40  ;;  %v10641_v20 = vmul.f32 %v19547_v22, %v23208_v24 }
0x179c   : > { %19560 = vrcp.f32 %v10552_v60  ;;  %v10558_v2 = vpop.xlane.xlu1 %10557  ;;  %18733 = vmatprep.mubr.msk.f32.mxu1 %vm1956_vm1, %v10638_v36  ;;  %v19549_v17 = vpop.eup %19548  ;;  %18750 = vmatprep.subr.mxu0 %v23149_v3  ;;  %v25028_v60 = vld [vmem:[#allocation4_spill] sm:$0xff] }
0x179d   : > { %19562 = vrcp.f32 %v10558_v2  ;;  %18734 = vmatmul.mubr.msk.f32.vlgmr.msra.gmra.mxu1 %vm1956_vm1, %v10639_v50  ;;  %v10640_v61 = vmul.f32 %v19549_v17, %v23218_v46  ;;  %v19551_v12 = vpop.eup %19550 }
0x179e   : > { %18744 = vmatpush3.msra.mxu1 %v23116_v27  ;;  %v10643_v52 = vmul.f32 %v19551_v12, %v23221_v4 }
0x179f   : > { %18745 = vmatprep.subr.mxu1 %v23123_v47  ;;  %v10561_v54 = vpop.xlane.xlu0 %10560  ;;  %18740 = vmatprep.mubr.msk.f32.mxu0 %vm1956_vm1, %v10640_v61 }
0x17a0   : > { %19564 = vrcp.f32 %v10561_v54  ;;  %18746 = vmatpush3.msra.mxu1 %v23123_v47  ;;  %v10564_v40 = vpop.xlane.xlu1 %10563  ;;  %18741 = vmatmul.mubr.msk.f32.vlgmr.msra.gmra.mxu0 %vm1956_vm1, %v10641_v20 }
0x17a1   : > { %v19553_v43 = vpop.eup %19552  ;;  %19566 = vrcp.f32 %v10564_v40  ;;  %18757 = vmatprep.subr.mxu1 %v23127_v0  ;;  %18751 = vmatpush3.msra.mxu0 %v23149_v3 }
0x17a2   : > { %v10642_v27 = vmul.f32 %v19553_v43, %v23231_v49  ;;  %18752 = vmatprep.subr.mxu0 %v23153_v57  ;;  %v19555_v24 = vpop.eup %19554 }
0x17a3   : > { %v10567_v46 = vpop.xlane.xlu0 %10566  ;;  %18753 = vmatpush3.msra.mxu0 %v23153_v57  ;;  %v10645_v41 = vmul.f32 %v19555_v24, %v23228_v63 }
0x17a4   : > { %19568 = vrcp.f32 %v10567_v46  ;;  %v10570_v47 = vpop.xlane.xlu1 %10569  ;;  %18747 = vmatprep.mubr.msk.f32.mxu1 %vm1956_vm1, %v10642_v27  ;;  %v19557_v16 = vpop.eup %19556  ;;  %18764 = vmatprep.subr.mxu0 %v23129_v18 }
0x17a5   : > { %19570 = vrcp.f32 %v10570_v47  ;;  %18748 = vmatmul.mubr.msk.f32.vlgmr.msra.gmra.mxu1 %vm1956_vm1, %v10643_v52  ;;  %v10644_v4 = vmul.f32 %v19557_v16, %v23238_v21  ;;  %v19559_v49 = vpop.eup %19558 }
0x17a6   : > { %18758 = vmatpush3.msra.mxu1 %v23127_v0  ;;  %v10647_v63 = vmul.f32 %v19559_v49, %v23241_v37 }
0x17a7   : > { %18759 = vmatprep.subr.mxu1 %v23131_v29  ;;  %v10573_v3 = vpop.xlane.xlu0 %10572  ;;  %18754 = vmatprep.mubr.msk.f32.mxu0 %vm1956_vm1, %v10644_v4 }
0x17a8   : > { %19572 = vrcp.f32 %v10573_v3  ;;  %18760 = vmatpush3.msra.mxu1 %v23131_v29  ;;  %18755 = vmatmul.mubr.msk.f32.vlgmr.msra.gmra.mxu0 %vm1956_vm1, %v10645_v41 }
0x17a9   : > { %v19561_v57 = vpop.eup %19560  ;;  %18771 = vmatprep.subr.mxu1 %v25020_v45  ;;  %18765 = vmatpush3.msra.mxu0 %v23129_v18 }
0x17aa   : > { %v19563_v33 = vpop.eup %19562  ;;  %v10646_v0 = vmul.f32 %v19561_v57, %v23249_v56  ;;  %18766 = vmatprep.subr.mxu0 %v25021_v58 }
0x17ab   : > { %v10576_v1 = vpop.xlane.xlu0 %10575  ;;  %v10579_v21 = vpop.xlane.xlu1 %10578  ;;  %v10648_v25 = vmul.f32 %v19563_v33, %v23252_v9  ;;  %18767 = vmatpush3.msra.mxu0 %v25021_v58 }
0x17ac   : > { %19574 = vrcp.f32 %v10576_v1  ;;  %18761 = vmatprep.mubr.msk.f32.mxu1 %vm1956_vm1, %v10646_v0  ;;  %18778 = vmatprep.subr.mxu0 %v25022_v6 }
0x17ad   : > { %v19565_v29 = vpop.eup %19564  ;;  %19576 = vrcp.f32 %v10579_v21  ;;  %18768 = vmatprep.mubr.msk.f32.mxu0 %vm1956_vm1, %v10648_v25  ;;  %18762 = vmatmul.mubr.msk.f32.vlgmr.msra.gmra.mxu1 %vm1956_vm1, %v10647_v63 }
0x17ae   : > { %v19567_v56 = vpop.eup %19566  ;;  %v10649_v18 = vmul.f32 %v19565_v29, %v23259_v38  ;;  %18772 = vmatpush3.msra.mxu1 %v25020_v45 }
0x17af   : > { %v10582_v37 = vpop.xlane.xlu0 %10581  ;;  %v10585_v9 = vpop.xlane.xlu1 %10584  ;;  %v10650_v11 = vmul.f32 %v19567_v56, %v23262_v62  ;;  %18773 = vmatprep.subr.mxu1 %v25023_v15 }
0x17b0   : > { %19578 = vrcp.f32 %v10582_v37  ;;  %18769 = vmatmul.mubr.msk.f32.vlgmr.msra.gmra.mxu0 %vm1956_vm1, %v10649_v18  ;;  %18774 = vmatpush3.msra.mxu1 %v25023_v15 }
0x17b1   : > { %v19569_v30 = vpop.eup %19568  ;;  %19580 = vrcp.f32 %v10585_v9  ;;  %18775 = vmatprep.mubr.msk.f32.mxu1 %vm1956_vm1, %v10650_v11  ;;  %18779 = vmatpush3.msra.mxu0 %v25022_v6 }
0x17b2   : > { %v19571_v38 = vpop.eup %19570  ;;  %v10651_v23 = vmul.f32 %v19569_v30, %v23269_v19  ;;  %18785 = vmatprep.subr.mxu1 %v25024_v28  ;;  %18780 = vmatprep.subr.mxu0 %v25025_v39 }
0x17b3   : > { %v10588_v62 = vpop.xlane.xlu0 %10587  ;;  %v10591_v10 = vpop.xlane.xlu1 %10590  ;;  %v10652_v51 = vmul.f32 %v19571_v38, %v23272_v35  ;;  %18781 = vmatpush3.msra.mxu0 %v25025_v39 }
0x17b4   : > { %19582 = vrcp.f32 %v10588_v62  ;;  %18776 = vmatmul.mubr.msk.f32.vlgmr.msra.gmra.mxu1 %vm1956_vm1, %v10651_v23  ;;  %18792 = vmatprep.subr.mxu0 %v25026_v53 }
0x17b5   : > { %v19573_v48 = vpop.eup %19572  ;;  %19584 = vrcp.f32 %v10591_v10  ;;  %18782 = vmatprep.mubr.msk.f32.mxu0 %vm1956_vm1, %v10652_v51  ;;  %18786 = vmatpush3.msra.mxu1 %v25024_v28 }
0x17b6   : > { %v10653_v19 = vmul.f32 %v19573_v48, %v23279_v7  ;;  %18787 = vmatprep.subr.mxu1 %v25027_v31 }
0x17b7   : > { %v10594_v44 = vpop.xlane.xlu0 %10593  ;;  %v10597_v36 = vpop.xlane.xlu1 %10596  ;;  %18788 = vmatpush3.msra.mxu1 %v25027_v31 }
0x17b8   : > { %19586 = vrcp.f32 %v10594_v44  ;;  %18783 = vmatmul.mubr.msk.f32.vlgmr.msra.gmra.mxu0 %vm1956_vm1, %v10653_v19  ;;  %18799 = vmatprep.subr.mxu1 %v23321_v34 }
0x17b9   : > { %v19575_v35 = vpop.eup %19574  ;;  %19588 = vrcp.f32 %v10597_v36  ;;  %18793 = vmatpush3.msra.mxu0 %v25026_v53 }
0x17ba   : > { %v19577_v50 = vpop.eup %19576  ;;  %18794 = vmatprep.subr.mxu0 %v25028_v60  ;;  %v10654_v7 = vmul.f32 %v19575_v35, %v23283_v32 }
0x17bb   : > { %v10655_v2 = vmul.f32 %v19577_v50, %v23285_v55  ;;  %18795 = vmatpush3.msra.mxu0 %v25028_v60  ;;  %v12002_v22 = vpop.permute.xlu0 %12001  ;;  %v12000_v20 = vpop.permute.xlu1 %11999 }
0x17bc   : > { %18789 = vmatprep.mubr.msk.f32.mxu1 %vm1956_vm1, %v10654_v7  ;;  %18806 = vmatprep.subr.mxu0 %v12002_v22 }
0x17bd   : > { %v19579_v17 = vpop.eup %19578  ;;  %18790 = vmatmul.mubr.msk.f32.vlgmr.msra.gmra.mxu1 %vm1956_vm1, %v10655_v2  ;;  %v23461_v2 = vld [vmem:[%s24824_s1 + $0x18] ss:$0 sm:$0xff] }
0x17be   : > { %v19581_v54 = vpop.eup %19580  ;;  %18800 = vmatpush3.msra.mxu1 %v23321_v34  ;;  %v10656_v61 = vmul.f32 %v19579_v17, %v23291_v42 }
0x17bf   : > { %v10657_v12 = vmul.f32 %v19581_v54, %v23293_v13  ;;  %18801 = vmatprep.subr.mxu1 %v23323_v8 }
0x17c0   : > { %18802 = vmatpush3.msra.mxu1 %v23323_v8  ;;  %18796 = vmatprep.mubr.msk.f32.mxu0 %vm1956_vm1, %v10656_v61  ;;  %v25029_v61 = vld [vmem:[#allocation43_spill] sm:$0xff] }
0x17c1   : > { %v19583_v32 = vpop.eup %19582  ;;  %18797 = vmatmul.mubr.msk.f32.vlgmr.msra.gmra.mxu0 %vm1956_vm1, %v10657_v12 }
0x17c2   : > { %v19585_v55 = vpop.eup %19584  ;;  %18807 = vmatpush3.msra.mxu0 %v12002_v22  ;;  %v10658_v40 = vmul.f32 %v19583_v32, %v23299_v26  ;;  %v12102_v26 = vld [vmem:[%s24824_s1 + $0x10] sm:$0xff] }
0x17c3   : > { %v10659_v34 = vmul.f32 %v19585_v55, %v23301_v5  ;;  %18808 = vmatprep.subr.mxu0 %v12000_v20  ;;  %18813 = vmatprep.subr.mxu1 %v12102_v26 }
0x17c4   : > { %18809 = vmatpush3.msra.mxu0 %v12000_v20  ;;  %18803 = vmatprep.mubr.msk.f32.mxu1 %vm1956_vm1, %v10658_v40  ;;  %v25030_v20 = vld [vmem:[#allocation40_spill] sm:$0xff] }
0x17c5   : > { %v19587_v42 = vpop.eup %19586  ;;  %18804 = vmatmul.mubr.msk.f32.vlgmr.msra.gmra.mxu1 %vm1956_vm1, %v10659_v34 }
0x17c6   : > { %v19589_v13 = vpop.eup %19588  ;;  %v10660_v8 = vmul.f32 %v19587_v42, %v23307_v14  ;;  %18814 = vmatpush3.msra.mxu1 %v12102_v26 }
0x17c7   : > { %v10661_v43 = vmul.f32 %v19589_v13, %v23309_v59 }
0x17c8   : > { %18810 = vmatprep.mubr.msk.f32.mxu0 %vm1956_vm1, %v10660_v8 }
0x17c9   : > { %18811 = vmatmul.mubr.msk.f32.vlgmr.msra.gmra.mxu0 %vm1956_vm1, %v10661_v43 }
0x1848   : > { %v18707_v5 = vpop.f32.mrf.mxu1 }
0x184a   : > { %v10742_v52 = vpop.f32.mrf.mxu1 }
0x1850   : > { %v18714_v27 = vpop.f32.mrf.mxu0 }
0x1852   : > { %v10831_v46 = vpop.f32.mrf.mxu0 }
0x1855   : > { %v18721_v47 = vpop.f32.mrf.mxu1 }
0x1857   : > { %v10920_v16 = vpop.f32.mrf.mxu1 }
0x1858   : > { %v18728_v24 = vpop.f32.mrf.mxu0 }
0x185a   : > { %v11009_v14 = vpop.f32.mrf.mxu0 }
0x185d   : > { %v18735_v3 = vpop.f32.mrf.mxu1 }
0x185f   : > { %v11098_v4 = vpop.f32.mrf.mxu1 }
0x1860   : > { %v18742_v59 = vpop.f32.mrf.mxu0 }
0x1862   : > { %v11187_v49 = vpop.f32.mrf.mxu0 }
0x1865   : > { %v18749_v41 = vpop.f32.mrf.mxu1 }
0x1867   : > { %v11276_v45 = vpop.f32.mrf.mxu1 }
0x1868   : > { %v18756_v57 = vpop.f32.mrf.mxu0 }
0x186a   : > { %v11365_v33 = vpop.f32.mrf.mxu0 }
0x186d   : > { %v18763_v0 = vpop.f32.mrf.mxu1 }
0x186e   : > { %v12087_v63 = vadd.f32 %v18763_v0, %v18707_v5  ;;  %v25031_v5 = vld [vmem:[#allocation41_spill] sm:$0xff] }
0x186f   : > { %v11454_v1 = vpop.f32.mrf.mxu1 }
0x1870   : > { %v18770_v21 = vpop.f32.mrf.mxu0  ;;  %v12086_v25 = vadd.f32 %v11454_v1, %v10742_v52 }
0x1871   : > { %v12089_v18 = vadd.f32 %v18770_v21, %v18714_v27 }
0x1872   : > { %v11543_v58 = vpop.f32.mrf.mxu0  ;;  %18815 = vmatprep.mubr.msk.f32.mxu1 %vm238_vm0, %v12086_v25  ;;  %v25035_v25 = vld [vmem:[#allocation11_spill] sm:$0xff] }
0x1873   : > { %v12088_v29 = vadd.f32 %v11543_v58, %v10831_v46  ;;  %18816 = vmatmul.mubr.msk.f32.vlgmr.msra.gmra.mxu1 %vm238_vm0, %v12087_v63 }
0x1874   : > { %v18777_v56 = vpop.f32.mrf.mxu1 }
0x1875   : > { %18818 = vmatprep.mubr.msk.f32.mxu1 %vm238_vm0, %v12088_v29  ;;  %v12091_v11 = vadd.f32 %v18777_v56, %v18721_v47  ;;  %v25032_v47 = vld [vmem:[#allocation42_spill] sm:$0xff]  ;;  %v25036_v56 = vld [vmem:[#allocation9_spill] sm:$0xff] }
0x1876   : > { %v11632_v6 = vpop.f32.mrf.mxu1 }
0x1877   : > { %v12090_v37 = vadd.f32 %v11632_v6, %v10920_v16  ;;  %18819 = vmatmul.mubr.msk.f32.gmra.mxu1 %vm238_vm0, %v12089_v18 }
0x1878   : > { %v18784_v9 = vpop.f32.mrf.mxu0 }
0x1879   : > { %18821 = vmatprep.mubr.msk.f32.mxu1 %vm238_vm0, %v12090_v37  ;;  %v12093_v23 = vadd.f32 %v18784_v9, %v18728_v24 }
0x187a   : > { %v11721_v15 = vpop.f32.mrf.mxu0 }
0x187b   : > { %v12092_v30 = vadd.f32 %v11721_v15, %v11009_v14  ;;  %18822 = vmatmul.mubr.msk.f32.gmra.mxu1 %vm238_vm0, %v12091_v11  ;;  %v25037_v15 = vld [vmem:[#allocation14_spill] sm:$0xff] }
0x187d   : > { %v18791_v38 = vpop.f32.mrf.mxu1  ;;  %18824 = vmatprep.mubr.msk.f32.mxu1 %vm238_vm0, %v12092_v30 }
0x187e   : > { %v12095_v10 = vadd.f32 %v18791_v38, %v18735_v3 }
0x187f   : > { %v11810_v28 = vpop.f32.mrf.mxu1  ;;  %18825 = vmatmul.mubr.msk.f32.gmra.mxu1 %vm238_vm0, %v12093_v23 }
0x1880   : > { %v12094_v39 = vadd.f32 %v11810_v28, %v11098_v4  ;;  %v25038_v28 = vld [vmem:[#allocation12_spill] sm:$0xff] }
0x1881   : > { %v18798_v62 = vpop.f32.mrf.mxu0 }
0x1882   : > { %18827 = vmatprep.mubr.msk.f32.mxu1 %vm238_vm0, %v12094_v39  ;;  %v12097_v19 = vadd.f32 %v18798_v62, %v18742_v59  ;;  %v25033_v59 = vld [vmem:[#allocation10_spill] sm:$0xff] }
0x1883   : > { %v11899_v51 = vpop.f32.mrf.mxu0  ;;  %18828 = vmatmul.mubr.msk.f32.gmra.mxu1 %vm238_vm0, %v12095_v10 }
0x1884   : > { %v12096_v48 = vadd.f32 %v11899_v51, %v11187_v49  ;;  %v25034_v49 = vld [vmem:[#allocation44_spill] sm:$0xff] }
0x1885   : > { %v18805_v53 = vpop.f32.mrf.mxu1 }
0x1886   : > { %18830 = vmatprep.mubr.msk.f32.mxu1 %vm238_vm0, %v12096_v48  ;;  %v12099_v35 = vadd.f32 %v18805_v53, %v18749_v41  ;;  %v25039_v53 = vld [vmem:[#allocation18_spill] sm:$0xff] }
0x1887   : > { %v11988_v31 = vpop.f32.mrf.mxu1  ;;  %18831 = vmatmul.mubr.msk.f32.gmra.mxu1 %vm238_vm0, %v12097_v19 }
0x1888   : > { %v12098_v44 = vadd.f32 %v11988_v31, %v11276_v45  ;;  %v25040_v31 = vld [vmem:[#allocation16_spill] sm:$0xff] }
0x1889   : > { %v18812_v36 = vpop.f32.mrf.mxu0 }
0x188a   : > { %18833 = vmatprep.mubr.msk.f32.mxu1 %vm238_vm0, %v12098_v44  ;;  %v12101_v7 = vadd.f32 %v18812_v36, %v18756_v57 }
0x188b   : > { %v12077_v50 = vpop.f32.mrf.mxu0  ;;  %18834 = vmatmul.mubr.msk.f32.gmra.mxu1 %vm238_vm0, %v12099_v35 }
0x188c   : > { %v12100_v60 = vadd.f32 %v12077_v50, %v11365_v33 }
0x188e   : > { %18836 = vmatprep.mubr.msk.f32.mxu1 %vm238_vm0, %v12100_v60 }
0x188f   : > { %18837 = vmatmul.mubr.msk.f32.gmra.mxu1 %vm238_vm0, %v12101_v7 }
0x1933   : > { %v18817_v22 = vpop.f32.mrf.mxu1 }
0x1934   : > { %v12228_v17 = vadd.f32 %v18817_v22, %v23461_v2 }
0x1935   : > { %v12222_v54 = vpop.f32.mrf.mxu1 }
0x1936   : > { %v23465_v12 = vadd.f32 %v12228_v17, %v25029_v61  ;;  %v12223_v32 = vadd.f32 %v23461_v2, %v12222_v54  ;;  %v25041_v17 = vld [vmem:[#allocation22_spill] sm:$0xff] }
0x1937   : > { %v18820_v55 = vpop.f32.mrf.mxu1 }
0x1938   : > { %v23469_v40 = vadd.f32 %v12223_v32, %v25030_v20  ;;  %v12322_v34 = vsel %vm238_vm0, %v23465_v12, 0.0  ;;  %v12238_v13 = vadd.f32 %v18820_v55, %v23461_v2  ;;  %v25042_v55 = vld [vmem:[#allocation20_spill] sm:$0xff] }
0x1939   : > { %12323 = vadd.xlane.f32.xlu1 %v12322_v34  ;;  %v12232_v42 = vpop.f32.mrf.mxu1 }
0x193a   : > { %v12233_v8 = vadd.f32 %v23461_v2, %v12232_v42  ;;  %v12319_v43 = vsel %vm238_vm0, %v23469_v40, 0.0  ;;  %v23482_v24 = vadd.f32 %v12238_v13, %v25032_v47 }
0x193b   : > { %v18823_v26 = vpop.f32.mrf.mxu1  ;;  %12320 = vadd.xlane.f32.xlu0 %v12319_v43 }
0x193c   : > { %v23478_v27 = vadd.f32 %v12233_v8, %v25031_v5  ;;  %v12248_v52 = vadd.f32 %v18823_v26, %v23461_v2  ;;  %v12328_v1 = vsel %vm238_vm0, %v23482_v24, 0.0  ;;  %v25043_v8 = vld [vmem:[#allocation26_spill] sm:$0xff]  ;;  %v25044_v26 = vld [vmem:[#allocation24_spill] sm:$0xff] }
0x193d   : > { %v12242_v46 = vpop.f32.mrf.mxu1 }
0x193e   : > { %v12243_v16 = vadd.f32 %v23461_v2, %v12242_v46  ;;  %v12325_v14 = vsel %vm238_vm0, %v23478_v27, 0.0  ;;  %v23491_v41 = vadd.f32 %v12248_v52, %v25034_v49 }
0x193f   : > { %v18826_v3 = vpop.f32.mrf.mxu1  ;;  %12326 = vadd.xlane.f32.xlu0 %v12325_v14 }
0x1940   : > { %v23488_v4 = vadd.f32 %v12243_v16, %v25033_v59  ;;  %v12258_v45 = vadd.f32 %v18826_v3, %v23461_v2  ;;  %v12334_v29 = vsel %vm238_vm0, %v23491_v41, 0.0 }
0x1941   : > { %v12252_v57 = vpop.f32.mrf.mxu1 }
0x1942   : > { %v12253_v33 = vadd.f32 %v23461_v2, %v12252_v57  ;;  %v12331_v0 = vsel %vm238_vm0, %v23488_v4, 0.0  ;;  %v23505_v18 = vadd.f32 %v12258_v45, %v25036_v56 }
0x1943   : > { %v18829_v21 = vpop.f32.mrf.mxu1  ;;  %12332 = vadd.xlane.f32.xlu1 %v12331_v0  ;;  %12329 = vadd.xlane.f32.xlu0 %v12328_v1 }
0x1944   : > { %v23500_v63 = vadd.f32 %v12253_v33, %v25035_v25  ;;  %v12268_v6 = vadd.f32 %v18829_v21, %v23461_v2  ;;  %v12340_v51 = vsel %vm238_vm0, %v23505_v18, 0.0 }
0x1945   : > { %v12262_v58 = vpop.f32.mrf.mxu1 }
0x1946   : > { %v12263_v37 = vadd.f32 %v23461_v2, %v12262_v58  ;;  %v12337_v9 = vsel %vm238_vm0, %v23500_v63, 0.0  ;;  %v23516_v39 = vadd.f32 %v12268_v6, %v25038_v28 }
0x1947   : > { %v18832_v11 = vpop.f32.mrf.mxu1  ;;  %12338 = vadd.xlane.f32.xlu1 %v12337_v9  ;;  %12335 = vadd.xlane.f32.xlu0 %v12334_v29 }
0x1948   : > { %v23512_v30 = vadd.f32 %v12263_v37, %v25037_v15  ;;  %v12278_v38 = vadd.f32 %v18832_v11, %v23461_v2  ;;  %v12346_v7 = vsel %vm238_vm0, %v23516_v39, 0.0 }
0x1949   : > { %v12272_v23 = vpop.f32.mrf.mxu1 }
0x194a   : > { %v12273_v62 = vadd.f32 %v23461_v2, %v12272_v23  ;;  %v12343_v10 = vsel %vm238_vm0, %v23512_v30, 0.0  ;;  %v23527_v44 = vadd.f32 %v12278_v38, %v25040_v31 }
0x194b   : > { %12344 = vadd.xlane.f32.xlu1 %v12343_v10  ;;  %12341 = vadd.xlane.f32.xlu0 %v12340_v51  ;;  %v18835_v48 = vpop.f32.mrf.mxu1 }
0x194c   : > { %v23524_v19 = vadd.f32 %v12273_v62, %v25039_v53  ;;  %v12288_v35 = vadd.f32 %v18835_v48, %v23461_v2  ;;  %v12352_v32 = vsel %vm238_vm0, %v23527_v44, 0.0 }
0x194d   : > { %v12282_v36 = vpop.f32.mrf.mxu1 }
0x194e   : > { %v12283_v50 = vadd.f32 %v23461_v2, %v12282_v36  ;;  %v12349_v60 = vsel %vm238_vm0, %v23524_v19, 0.0  ;;  %v23541_v20 = vadd.f32 %v12288_v35, %v25042_v55 }
0x194f   : > { %12350 = vadd.xlane.f32.xlu1 %v12349_v60  ;;  %12347 = vadd.xlane.f32.xlu0 %v12346_v7  ;;  %v18838_v22 = vpop.f32.mrf.mxu1 }
0x1950   : > { %v23536_v54 = vadd.f32 %v12283_v50, %v25041_v17  ;;  %v12298_v34 = vadd.f32 %v18838_v22, %v23461_v2  ;;  %v12358_v52 = vsel %vm238_vm0, %v23541_v20, 0.0 }
0x1951   : > { %v12292_v61 = vpop.f32.mrf.mxu1 }
0x1952   : > { %v12293_v42 = vadd.f32 %v23461_v2, %v12292_v61  ;;  %v12355_v13 = vsel %vm238_vm0, %v23536_v54, 0.0  ;;  %v23551_v5 = vadd.f32 %v12298_v34, %v25044_v26 }
0x1953   : > { %12353 = vadd.xlane.f32.xlu0 %v12352_v32  ;;  %12356 = vadd.xlane.f32.xlu1 %v12355_v13 }
0x1954   : > { %v23548_v43 = vadd.f32 %v12293_v42, %v25043_v8  ;;  %v12364_v2 = vsel %vm238_vm0, %v23551_v5, 0.0 }
0x1956   : > { %v12361_v46 = vsel %vm238_vm0, %v23548_v43, 0.0 }
0x1957   : > { %12359 = vadd.xlane.f32.xlu0 %v12358_v52  ;;  %12362 = vadd.xlane.f32.xlu1 %v12361_v46 }
0x195b   : > { %12365 = vadd.xlane.f32.xlu0 %v12364_v2 }
0x19c2   : > { %v12324_v47 = vpop.xlane.xlu1 %12323 }
0x19c3   : > { %v12368_v16 = vmul.f32 0.125, %v12324_v47 }
0x19c4   : > { %v12321_v14 = vpop.xlane.xlu0 %12320 }
0x19c5   : > { %v23560_v3 = vsub.f32 %v23465_v12, %v12368_v16  ;;  %v12367_v59 = vmul.f32 0.125, %v12321_v14 }
0x19c7   : > { %v23563_v49 = vsub.f32 %v23469_v40, %v12367_v59  ;;  %v12400_v57 = vmul.f32 %v23560_v3, %v23560_v3 }
0x19c8   : > { %v12327_v45 = vpop.xlane.xlu0 %12326 }
0x19c9   : > { %v12369_v33 = vmul.f32 0.125, %v12327_v45  ;;  %v12418_v0 = vsel %vm238_vm0, %v12400_v57, 0.0  ;;  %v12399_v1 = vmul.f32 %v23563_v49, %v23563_v49 }
0x19ca   : > { %12419 = vadd.xlane.f32.xlu0 %v12418_v0 }
0x19cb   : > { %v23571_v21 = vsub.f32 %v23478_v27, %v12369_v33  ;;  %v12415_v12 = vsel %vm238_vm0, %v12399_v1, 0.0 }
0x19cc   : > { %v12330_v25 = vpop.xlane.xlu0 %12329  ;;  %12416 = vadd.xlane.f32.xlu1 %v12415_v12  ;;  %v12333_v40 = vpop.xlane.xlu1 %12332 }
0x19cd   : > { %v12370_v58 = vmul.f32 0.125, %v12330_v25  ;;  %v12371_v29 = vmul.f32 0.125, %v12333_v40  ;;  %v12401_v56 = vmul.f32 %v23571_v21, %v23571_v21 }
0x19cf   : > { %v23577_v6 = vsub.f32 %v23482_v24, %v12370_v58  ;;  %v23580_v37 = vsub.f32 %v23488_v4, %v12371_v29  ;;  %v12421_v9 = vsel %vm238_vm0, %v12401_v56, 0.0 }
0x19d0   : > { %v12336_v27 = vpop.xlane.xlu0 %12335  ;;  %12422 = vadd.xlane.f32.xlu1 %v12421_v9  ;;  %v12339_v11 = vpop.xlane.xlu1 %12338 }
0x19d1   : > { %v12372_v15 = vmul.f32 0.125, %v12336_v27  ;;  %v12373_v38 = vmul.f32 0.125, %v12339_v11  ;;  %v12402_v23 = vmul.f32 %v23577_v6, %v23577_v6  ;;  %v12403_v28 = vmul.f32 %v23580_v37, %v23580_v37  ;;  %v12567_v11 = vld [vmem:[%s24824_s1 + $0x30] sm:$0xff] }
0x19d2   : > { %18839 = vmatprep.subr.mxu0 %v12567_v11 }
0x19d3   : > { %v23588_v62 = vsub.f32 %v23491_v41, %v12372_v15  ;;  %v23591_v24 = vsub.f32 %v23500_v63, %v12373_v38  ;;  %v12424_v4 = vsel %vm238_vm0, %v12402_v23, 0.0  ;;  %v12427_v10 = vsel %vm238_vm0, %v12403_v28, 0.0  ;;  %18840 = vmatpush3.msra.mxu0 %v12567_v11 }
0x19d4   : > { %v12342_v51 = vpop.xlane.xlu0 %12341  ;;  %12425 = vadd.xlane.f32.xlu0 %v12424_v4  ;;  %12428 = vadd.xlane.f32.xlu1 %v12427_v10  ;;  %v12345_v48 = vpop.xlane.xlu1 %12344 }
0x19d5   : > { %v12374_v53 = vmul.f32 0.125, %v12342_v51  ;;  %v12375_v31 = vmul.f32 0.125, %v12345_v48  ;;  %v12404_v36 = vmul.f32 %v23588_v62, %v23588_v62  ;;  %v12405_v41 = vmul.f32 %v23591_v24, %v23591_v24 }
0x19d7   : > { %v23600_v35 = vsub.f32 %v23505_v18, %v12374_v53  ;;  %v23603_v63 = vsub.f32 %v23512_v30, %v12375_v31  ;;  %v12430_v50 = vsel %vm238_vm0, %v12404_v36, 0.0  ;;  %v12433_v60 = vsel %vm238_vm0, %v12405_v41, 0.0 }
0x19d8   : > { %v12348_v7 = vpop.xlane.xlu0 %12347  ;;  %12431 = vadd.xlane.f32.xlu0 %v12430_v50  ;;  %12434 = vadd.xlane.f32.xlu1 %v12433_v60  ;;  %v12351_v22 = vpop.xlane.xlu1 %12350 }
0x19d9   : > { %v12376_v17 = vmul.f32 0.125, %v12348_v7  ;;  %v12377_v61 = vmul.f32 0.125, %v12351_v22  ;;  %v12406_v32 = vmul.f32 %v23600_v35, %v23600_v35  ;;  %v12407_v18 = vmul.f32 %v23603_v63, %v23603_v63 }
0x19db   : > { %v23612_v55 = vsub.f32 %v23516_v39, %v12376_v17  ;;  %v23615_v30 = vsub.f32 %v23524_v19, %v12377_v61  ;;  %v12436_v34 = vsel %vm238_vm0, %v12406_v32, 0.0  ;;  %v12439_v42 = vsel %vm238_vm0, %v12407_v18, 0.0 }
0x19dc   : > { %v12354_v13 = vpop.xlane.xlu0 %12353  ;;  %12437 = vadd.xlane.f32.xlu0 %v12436_v34  ;;  %12440 = vadd.xlane.f32.xlu1 %v12439_v42  ;;  %v12357_v8 = vpop.xlane.xlu1 %12356 }
0x19dd   : > { %v12378_v26 = vmul.f32 0.125, %v12354_v13  ;;  %v12379_v52 = vmul.f32 0.125, %v12357_v8  ;;  %v12408_v46 = vmul.f32 %v23612_v55, %v23612_v55  ;;  %v12409_v39 = vmul.f32 %v23615_v30, %v23615_v30  ;;  %v23661_v8 = vld [vmem:[%s24824_s1 + $0x20] ss:$0 sm:$0xff] }
0x19df   : > { %v23624_v2 = vsub.f32 %v23527_v44, %v12378_v26  ;;  %v23627_v19 = vsub.f32 %v23536_v54, %v12379_v52  ;;  %v12442_v47 = vsel %vm238_vm0, %v12408_v46, 0.0  ;;  %v12445_v16 = vsel %vm238_vm0, %v12409_v39, 0.0 }
0x19e0   : > { %v12360_v14 = vpop.xlane.xlu0 %12359  ;;  %12443 = vadd.xlane.f32.xlu0 %v12442_v47  ;;  %12446 = vadd.xlane.f32.xlu1 %v12445_v16  ;;  %v12363_v59 = vpop.xlane.xlu1 %12362 }
0x19e1   : > { %v12380_v57 = vmul.f32 0.125, %v12360_v14  ;;  %v12381_v45 = vmul.f32 0.125, %v12363_v59  ;;  %v12410_v33 = vmul.f32 %v23624_v2, %v23624_v2  ;;  %v12411_v44 = vmul.f32 %v23627_v19, %v23627_v19 }
0x19e3   : > { %v23636_v0 = vsub.f32 %v23541_v20, %v12380_v57  ;;  %v23639_v54 = vsub.f32 %v23548_v43, %v12381_v45  ;;  %v12448_v1 = vsel %vm238_vm0, %v12410_v33, 0.0  ;;  %v12451_v12 = vsel %vm238_vm0, %v12411_v44, 0.0 }
0x19e4   : > { %v12366_v25 = vpop.xlane.xlu0 %12365  ;;  %12449 = vadd.xlane.f32.xlu0 %v12448_v1  ;;  %12452 = vadd.xlane.f32.xlu1 %v12451_v12 }
0x19e5   : > { %v12382_v40 = vmul.f32 0.125, %v12366_v25  ;;  %v12412_v58 = vmul.f32 %v23636_v0, %v23636_v0  ;;  %v12413_v29 = vmul.f32 %v23639_v54, %v23639_v54 }
0x19e7   : > { %v23648_v20 = vsub.f32 %v23551_v5, %v12382_v40  ;;  %v12454_v43 = vsel %vm238_vm0, %v12412_v58, 0.0  ;;  %v12457_v56 = vsel %vm238_vm0, %v12413_v29, 0.0 }
0x19e8   : > { %12455 = vadd.xlane.f32.xlu0 %v12454_v43  ;;  %12458 = vadd.xlane.f32.xlu1 %v12457_v56 }
0x19e9   : > { %v12414_v9 = vmul.f32 %v23648_v20, %v23648_v20 }
0x19eb   : > { %v12460_v27 = vsel %vm238_vm0, %v12414_v9, 0.0 }
0x19ec   : > { %12461 = vadd.xlane.f32.xlu0 %v12460_v27 }
0x1a53   : > { %v12420_v5 = vpop.xlane.xlu0 %12419 }
0x1a54   : > { %v12464_v15 = vmul.f32 0.125, %v12420_v5 }
0x1a55   : > { %v12417_v38 = vpop.xlane.xlu1 %12416 }
0x1a56   : > { %v12480_v23 = vadd.f32 1e-05, %v12464_v15  ;;  %v12463_v28 = vmul.f32 0.125, %v12417_v38 }
0x1a58   : > { %19590 = vrsqrt.f32 %v12480_v23  ;;  %v12479_v4 = vadd.f32 1e-05, %v12463_v28 }
0x1a59   : > { %v12423_v10 = vpop.xlane.xlu1 %12422 }
0x1a5a   : > { %19592 = vrsqrt.f32 %v12479_v4  ;;  %v12465_v51 = vmul.f32 0.125, %v12423_v10 }
0x1a5c   : > { %v12481_v48 = vadd.f32 1e-05, %v12465_v51 }
0x1a5d   : > { %v12426_v53 = vpop.xlane.xlu0 %12425  ;;  %v12429_v31 = vpop.xlane.xlu1 %12428 }
0x1a5e   : > { %19594 = vrsqrt.f32 %v12481_v48  ;;  %v12466_v36 = vmul.f32 0.125, %v12426_v53  ;;  %v12467_v41 = vmul.f32 0.125, %v12429_v31 }
0x1a60   : > { %v12482_v50 = vadd.f32 1e-05, %v12466_v36  ;;  %v12483_v60 = vadd.f32 1e-05, %v12467_v41 }
0x1a61   : > { %v12432_v7 = vpop.xlane.xlu0 %12431  ;;  %v12435_v22 = vpop.xlane.xlu1 %12434 }
0x1a62   : > { %19596 = vrsqrt.f32 %v12482_v50  ;;  %v12468_v17 = vmul.f32 0.125, %v12432_v7  ;;  %v12469_v61 = vmul.f32 0.125, %v12435_v22 }
0x1a63   : > { %19598 = vrsqrt.f32 %v12483_v60 }
0x1a64   : > { %v12484_v32 = vadd.f32 1e-05, %v12468_v17  ;;  %v12485_v18 = vadd.f32 1e-05, %v12469_v61 }
0x1a65   : > { %v19591_v34 = vpop.eup %19590  ;;  %v12438_v42 = vpop.xlane.xlu0 %12437 }
0x1a66   : > { %v12441_v13 = vpop.xlane.xlu1 %12440  ;;  %v12512_v26 = vmul.f32 %v19591_v34, %v23560_v3  ;;  %19600 = vrsqrt.f32 %v12484_v32  ;;  %v12470_v52 = vmul.f32 0.125, %v12438_v42  ;;  %v23669_v3 = vld [vmem:[%s24824_s1 + $0x28] ss:$0 sm:$0xff] }
0x1a67   : > { %v12471_v46 = vmul.f32 0.125, %v12441_v13  ;;  %v19593_v39 = vpop.eup %19592  ;;  %19602 = vrsqrt.f32 %v12485_v18 }
0x1a68   : > { %v12486_v47 = vadd.f32 1e-05, %v12470_v52  ;;  %v12511_v14 = vmul.f32 %v19593_v39, %v23563_v49  ;;  %v12532_v59 = vmul.f32 %v23661_v8, %v12512_v26 }
0x1a69   : > { %v12487_v16 = vadd.f32 1e-05, %v12471_v46  ;;  %v12444_v57 = vpop.xlane.xlu0 %12443 }
0x1a6a   : > { %v12447_v45 = vpop.xlane.xlu1 %12446  ;;  %19604 = vrsqrt.f32 %v12486_v47  ;;  %v12472_v33 = vmul.f32 0.125, %v12444_v57  ;;  %v12531_v1 = vmul.f32 %v23661_v8, %v12511_v14  ;;  %v23677_v56 = vadd.f32 %v23669_v3, %v12532_v59 }
0x1a6b   : > { %v12473_v44 = vmul.f32 0.125, %v12447_v45  ;;  %v19595_v12 = vpop.eup %19594  ;;  %19606 = vrsqrt.f32 %v12487_v16 }
0x1a6c   : > { %v12488_v25 = vadd.f32 1e-05, %v12472_v33  ;;  %v23673_v49 = vadd.f32 %v23669_v3, %v12531_v1  ;;  %v12513_v58 = vmul.f32 %v19595_v12, %v23571_v21 }
0x1a6d   : > { %v12489_v40 = vadd.f32 1e-05, %v12473_v44  ;;  %v12450_v29 = vpop.xlane.xlu0 %12449 }
0x1a6e   : > { %v12453_v43 = vpop.xlane.xlu1 %12452  ;;  %19608 = vrsqrt.f32 %v12488_v25  ;;  %v12474_v9 = vmul.f32 0.125, %v12450_v29  ;;  %18841 = vmatprep.mubr.msk.f32.mxu0 %vm238_vm0, %v23673_v49  ;;  %v12533_v11 = vmul.f32 %v23661_v8, %v12513_v58 }
0x1a6f   : > { %v12475_v27 = vmul.f32 0.125, %v12453_v43  ;;  %v19597_v5 = vpop.eup %19596  ;;  %19610 = vrsqrt.f32 %v12489_v40  ;;  %18842 = vmatmul.mubr.msk.f32.vlgmr.msra.gmra.mxu0 %vm238_vm0, %v23677_v56 }
0x1a70   : > { %v19599_v15 = vpop.eup %19598  ;;  %v12490_v21 = vadd.f32 1e-05, %v12474_v9  ;;  %v23685_v23 = vadd.f32 %v23669_v3, %v12533_v11  ;;  %v12514_v28 = vmul.f32 %v19597_v5, %v23577_v6 }
0x1a71   : > { %v12491_v38 = vadd.f32 1e-05, %v12475_v27  ;;  %v12456_v4 = vpop.xlane.xlu0 %12455  ;;  %v12515_v51 = vmul.f32 %v19599_v15, %v23580_v37 }
0x1a72   : > { %v12459_v10 = vpop.xlane.xlu1 %12458  ;;  %19612 = vrsqrt.f32 %v12490_v21  ;;  %v12476_v48 = vmul.f32 0.125, %v12456_v4  ;;  %18844 = vmatprep.mubr.msk.f32.mxu0 %vm238_vm0, %v23685_v23  ;;  %v12534_v31 = vmul.f32 %v23661_v8, %v12514_v28  ;;  %v12782_v4 = vld [vmem:[%s24824_s1 + $0x40] sm:$0xff] }
0x1a73   : > { %v12477_v53 = vmul.f32 0.125, %v12459_v10  ;;  %v19601_v36 = vpop.eup %19600  ;;  %19614 = vrsqrt.f32 %v12491_v38  ;;  %v12535_v41 = vmul.f32 %v23661_v8, %v12515_v51 }
0x1a74   : > { %v19603_v50 = vpop.eup %19602  ;;  %v12492_v60 = vadd.f32 1e-05, %v12476_v48  ;;  %v23694_v6 = vadd.f32 %v23669_v3, %v12534_v31  ;;  %v12516_v37 = vmul.f32 %v19601_v36, %v23588_v62 }
0x1a75   : > { %v12493_v7 = vadd.f32 1e-05, %v12477_v53  ;;  %v12462_v22 = vpop.xlane.xlu0 %12461  ;;  %v23698_v17 = vadd.f32 %v23669_v3, %v12535_v41  ;;  %v12517_v61 = vmul.f32 %v19603_v50, %v23591_v24 }
0x1a76   : > { %19616 = vrsqrt.f32 %v12492_v60  ;;  %v12478_v32 = vmul.f32 0.125, %v12462_v22  ;;  %18845 = vmatmul.mubr.msk.f32.gmra.mxu0 %vm238_vm0, %v23694_v6  ;;  %v12536_v18 = vmul.f32 %v23661_v8, %v12516_v37 }
0x1a77   : > { %v19605_v34 = vpop.eup %19604  ;;  %19618 = vrsqrt.f32 %v12493_v7  ;;  %18847 = vmatprep.mubr.msk.f32.mxu0 %vm238_vm0, %v23698_v17  ;;  %v12537_v62 = vmul.f32 %v23661_v8, %v12517_v61 }
0x1a78   : > { %v19607_v42 = vpop.eup %19606  ;;  %v12494_v13 = vadd.f32 1e-05, %v12478_v32  ;;  %v23708_v26 = vadd.f32 %v23669_v3, %v12536_v18  ;;  %v12518_v24 = vmul.f32 %v19605_v34, %v23600_v35 }
0x1a79   : > { %v23712_v52 = vadd.f32 %v23669_v3, %v12537_v62  ;;  %v12519_v46 = vmul.f32 %v19607_v42, %v23603_v63 }
0x1a7a   : > { %19620 = vrsqrt.f32 %v12494_v13  ;;  %18848 = vmatmul.mubr.msk.f32.gmra.mxu0 %vm238_vm0, %v23708_v26  ;;  %v12538_v39 = vmul.f32 %v23661_v8, %v12518_v24 }
0x1a7b   : > { %v19609_v47 = vpop.eup %19608  ;;  %18850 = vmatprep.mubr.msk.f32.mxu0 %vm238_vm0, %v23712_v52  ;;  %v12539_v16 = vmul.f32 %v23661_v8, %v12519_v46 }
0x1a7c   : > { %v19611_v14 = vpop.eup %19610  ;;  %v23722_v35 = vadd.f32 %v23669_v3, %v12538_v39  ;;  %v12520_v59 = vmul.f32 %v19609_v47, %v23612_v55 }
0x1a7d   : > { %v23726_v63 = vadd.f32 %v23669_v3, %v12539_v16  ;;  %v12521_v57 = vmul.f32 %v19611_v14, %v23615_v30 }
0x1a7e   : > { %18851 = vmatmul.mubr.msk.f32.gmra.mxu0 %vm238_vm0, %v23722_v35  ;;  %v12540_v45 = vmul.f32 %v23661_v8, %v12520_v59 }
0x1a7f   : > { %v19613_v33 = vpop.eup %19612  ;;  %18853 = vmatprep.mubr.msk.f32.mxu0 %vm238_vm0, %v23726_v63  ;;  %v12541_v44 = vmul.f32 %v23661_v8, %v12521_v57 }
0x1a80   : > { %v19615_v1 = vpop.eup %19614  ;;  %v23736_v12 = vadd.f32 %v23669_v3, %v12540_v45  ;;  %v12522_v55 = vmul.f32 %v19613_v33, %v23624_v2 }
0x1a81   : > { %v23740_v25 = vadd.f32 %v23669_v3, %v12541_v44  ;;  %v12523_v30 = vmul.f32 %v19615_v1, %v23627_v19 }
0x1a82   : > { %18854 = vmatmul.mubr.msk.f32.gmra.mxu0 %vm238_vm0, %v23736_v12  ;;  %v12542_v40 = vmul.f32 %v23661_v8, %v12522_v55 }
0x1a83   : > { %v19617_v58 = vpop.eup %19616  ;;  %18856 = vmatprep.mubr.msk.f32.mxu0 %vm238_vm0, %v23740_v25  ;;  %v12543_v29 = vmul.f32 %v23661_v8, %v12523_v30 }
0x1a84   : > { %v19619_v43 = vpop.eup %19618  ;;  %v23750_v9 = vadd.f32 %v23669_v3, %v12542_v40  ;;  %v12524_v2 = vmul.f32 %v19617_v58, %v23636_v0 }
0x1a85   : > { %v23754_v27 = vadd.f32 %v23669_v3, %v12543_v29  ;;  %v12525_v19 = vmul.f32 %v19619_v43, %v23639_v54 }
0x1a86   : > { %18857 = vmatmul.mubr.msk.f32.gmra.mxu0 %vm238_vm0, %v23750_v9  ;;  %v12544_v11 = vmul.f32 %v23661_v8, %v12524_v2 }
0x1a87   : > { %v19621_v5 = vpop.eup %19620  ;;  %18859 = vmatprep.mubr.msk.f32.mxu0 %vm238_vm0, %v23754_v27  ;;  %v12545_v15 = vmul.f32 %v23661_v8, %v12525_v19 }
0x1a88   : > { %v23764_v21 = vadd.f32 %v23669_v3, %v12544_v11  ;;  %v12526_v0 = vmul.f32 %v19621_v5, %v23648_v20  ;;  %v12783_v20 = vld [vmem:[%s24824_s1 + $0x48] sm:$0xff] }
0x1a89   : > { %v23768_v38 = vadd.f32 %v23669_v3, %v12545_v15  ;;  %18865 = vmatprep.subr.mxu1 %v12783_v20 }
0x1a8a   : > { %18860 = vmatmul.mubr.msk.f32.gmra.mxu0 %vm238_vm0, %v23764_v21  ;;  %v12546_v54 = vmul.f32 %v23661_v8, %v12526_v0  ;;  %18866 = vmatpush3.msra.mxu1 %v12783_v20  ;;  %v25045_v8 = vmov 0.0  }
0x1a8b   : > { %18862 = vmatprep.mubr.msk.f32.mxu0 %vm238_vm0, %v23768_v38  ;;  %18867 = vmatprep.subr.mxu1 %v12782_v4 }
0x1a8c   : > { %v23776_v28 = vadd.f32 %v23669_v3, %v12546_v54  ;;  %18868 = vmatpush3.msra.mxu1 %v12782_v4  ;;  %v17108_v3 = vld [vmem:[%s24824_s1 + $0x38] ss:$0 sm:$0xff] }
0x1a8d   : > { %18919 = vmatprep.subr.mxu1 %v25045_v8 }
0x1a8e   : > { %18863 = vmatmul.mubr.msk.f32.gmra.mxu0 %vm238_vm0, %v23776_v28 }
0x1b2f   : > { %v18843_v10 = vpop.f32.mrf.mxu0 }
0x1b30   : > { %v12693_v51 = vadd.f32 %v18843_v10, %v17108_v3 }
0x1b31   : > { %v12687_v48 = vpop.f32.mrf.mxu0 }
0x1b32   : > { %v12688_v53 = vadd.f32 %v17108_v3, %v12687_v48  ;;  %v12767_v36 = vmax.f32 %v12693_v51, 0.0  ;;  %v23811_v48 = vld [vmem:[%s24824_s1 + $0x50] ss:$0 sm:$0xff] }
0x1b34   : > { %v12766_v31 = vmax.f32 %v12688_v53, 0.0 }
0x1b36   : > { %v18846_v41 = vpop.f32.mrf.mxu0  ;;  %18869 = vmatprep.mubr.msk.f32.mxu1 %vm1956_vm1, %v12766_v31 }
0x1b37   : > { %18870 = vmatmul.mubr.msk.f32.vlgmr.msra.gmra.mxu1 %vm1956_vm1, %v12767_v36  ;;  %v12703_v50 = vadd.f32 %v18846_v41, %v17108_v3 }
0x1b38   : > { %v12697_v60 = vpop.f32.mrf.mxu0 }
0x1b39   : > { %v12698_v7 = vadd.f32 %v17108_v3, %v12697_v60  ;;  %v12769_v61 = vmax.f32 %v12703_v50, 0.0 }
0x1b3a   : > { %v18849_v37 = vpop.f32.mrf.mxu0 }
0x1b3b   : > { %v12768_v22 = vmax.f32 %v12698_v7, 0.0  ;;  %v12713_v32 = vadd.f32 %v18849_v37, %v17108_v3 }
0x1b3c   : > { %v12707_v18 = vpop.f32.mrf.mxu0 }
0x1b3d   : > { %v12708_v34 = vadd.f32 %v17108_v3, %v12707_v18  ;;  %18872 = vmatprep.mubr.msk.f32.mxu1 %vm1956_vm1, %v12768_v22  ;;  %v12771_v13 = vmax.f32 %v12713_v32, 0.0 }
0x1b3e   : > { %v18852_v62 = vpop.f32.mrf.mxu0  ;;  %18873 = vmatmul.mubr.msk.f32.gmra.mxu1 %vm1956_vm1, %v12769_v61 }
0x1b3f   : > { %v12770_v42 = vmax.f32 %v12708_v34, 0.0  ;;  %v12723_v24 = vadd.f32 %v18852_v62, %v17108_v3 }
0x1b40   : > { %v12717_v46 = vpop.f32.mrf.mxu0 }
0x1b41   : > { %v12718_v39 = vadd.f32 %v17108_v3, %v12717_v46  ;;  %18875 = vmatprep.mubr.msk.f32.mxu1 %vm1956_vm1, %v12770_v42  ;;  %v12773_v14 = vmax.f32 %v12723_v24, 0.0 }
0x1b42   : > { %v18855_v47 = vpop.f32.mrf.mxu0  ;;  %18876 = vmatmul.mubr.msk.f32.gmra.mxu1 %vm1956_vm1, %v12771_v13 }
0x1b43   : > { %v12772_v16 = vmax.f32 %v12718_v39, 0.0  ;;  %v12733_v59 = vadd.f32 %v18855_v47, %v17108_v3 }
0x1b44   : > { %v12727_v57 = vpop.f32.mrf.mxu0 }
0x1b45   : > { %v12728_v45 = vadd.f32 %v17108_v3, %v12727_v57  ;;  %18878 = vmatprep.mubr.msk.f32.mxu1 %vm1956_vm1, %v12772_v16  ;;  %v12775_v1 = vmax.f32 %v12733_v59, 0.0 }
0x1b46   : > { %v18858_v33 = vpop.f32.mrf.mxu0  ;;  %18879 = vmatmul.mubr.msk.f32.gmra.mxu1 %vm1956_vm1, %v12773_v14 }
0x1b47   : > { %v12774_v44 = vmax.f32 %v12728_v45, 0.0  ;;  %v12743_v55 = vadd.f32 %v18858_v33, %v17108_v3 }
0x1b48   : > { %v12737_v30 = vpop.f32.mrf.mxu0 }
0x1b49   : > { %v12738_v40 = vadd.f32 %v17108_v3, %v12737_v30  ;;  %18881 = vmatprep.mubr.msk.f32.mxu1 %vm1956_vm1, %v12774_v44  ;;  %v12777_v43 = vmax.f32 %v12743_v55, 0.0 }
0x1b4a   : > { %v18861_v58 = vpop.f32.mrf.mxu0  ;;  %18882 = vmatmul.mubr.msk.f32.gmra.mxu1 %vm1956_vm1, %v12775_v1 }
0x1b4b   : > { %v12776_v29 = vmax.f32 %v12738_v40, 0.0  ;;  %v12753_v2 = vadd.f32 %v18861_v58, %v17108_v3 }
0x1b4c   : > { %v12747_v19 = vpop.f32.mrf.mxu0 }
0x1b4d   : > { %v12748_v11 = vadd.f32 %v17108_v3, %v12747_v19  ;;  %18884 = vmatprep.mubr.msk.f32.mxu1 %vm1956_vm1, %v12776_v29  ;;  %v12779_v0 = vmax.f32 %v12753_v2, 0.0 }
0x1b4e   : > { %v18864_v5 = vpop.f32.mrf.mxu0  ;;  %18885 = vmatmul.mubr.msk.f32.gmra.mxu1 %vm1956_vm1, %v12777_v43 }
0x1b4f   : > { %v12778_v15 = vmax.f32 %v12748_v11, 0.0  ;;  %v12763_v54 = vadd.f32 %v18864_v5, %v17108_v3 }
0x1b50   : > { %v12757_v20 = vpop.f32.mrf.mxu0 }
0x1b51   : > { %v12758_v4 = vadd.f32 %v17108_v3, %v12757_v20  ;;  %18887 = vmatprep.mubr.msk.f32.mxu1 %vm1956_vm1, %v12778_v15  ;;  %v12781_v51 = vmax.f32 %v12763_v54, 0.0 }
0x1b52   : > { %18888 = vmatmul.mubr.msk.f32.gmra.mxu1 %vm1956_vm1, %v12779_v0 }
0x1b53   : > { %v12780_v10 = vmax.f32 %v12758_v4, 0.0 }
0x1b55   : > { %18890 = vmatprep.mubr.msk.f32.mxu1 %vm1956_vm1, %v12780_v10 }
0x1b56   : > { %18891 = vmatmul.mubr.msk.f32.gmra.mxu1 %vm1956_vm1, %v12781_v51 }
0x1b57   : > { %18923 = vmatprep.mubr.msk.f32.mxu1 %vm19760_vm2, %v25045_v8 }
0x1bf7   : > { %v18871_v53 = vpop.f32.mrf.mxu1 }
0x1bf8   : > { %v12909_v3 = vadd.f32 %v18871_v53, %v23811_v48 }
0x1bf9   : > { %v12903_v31 = vpop.f32.mrf.mxu1 }
0x1bfa   : > { %v23815_v36 = vadd.f32 %v12909_v3, %v23677_v56  ;;  %v12904_v41 = vadd.f32 %v23811_v48, %v12903_v31 }
0x1bfc   : > { %v23819_v50 = vadd.f32 %v12904_v41, %v23673_v49  ;;  %v13003_v60 = vsel %vm238_vm0, %v23815_v36, 0.0 }
0x1bfd   : > { %13004 = vadd.xlane.f32.xlu0 %v13003_v60 }
0x1bfe   : > { %v18874_v7 = vpop.f32.mrf.mxu1  ;;  %v13000_v37 = vsel %vm238_vm0, %v23819_v50, 0.0 }
0x1bff   : > { %v12919_v22 = vadd.f32 %v18874_v7, %v23811_v48  ;;  %13001 = vadd.xlane.f32.xlu1 %v13000_v37 }
0x1c00   : > { %v12913_v61 = vpop.f32.mrf.mxu1 }
0x1c01   : > { %v23827_v56 = vadd.f32 %v12919_v22, %v23694_v6  ;;  %v12914_v32 = vadd.f32 %v23811_v48, %v12913_v61 }
0x1c02   : > { %v18877_v18 = vpop.f32.mrf.mxu1 }
0x1c03   : > { %v23831_v49 = vadd.f32 %v12914_v32, %v23685_v23  ;;  %v12929_v34 = vadd.f32 %v18877_v18, %v23811_v48  ;;  %v13009_v62 = vsel %vm238_vm0, %v23827_v56, 0.0 }
0x1c04   : > { %13010 = vadd.xlane.f32.xlu0 %v13009_v62  ;;  %v12923_v42 = vpop.f32.mrf.mxu1 }
0x1c05   : > { %v23837_v13 = vadd.f32 %v12929_v34, %v23708_v26  ;;  %v12924_v24 = vadd.f32 %v23811_v48, %v12923_v42  ;;  %v13006_v6 = vsel %vm238_vm0, %v23831_v49, 0.0 }
0x1c06   : > { %13007 = vadd.xlane.f32.xlu1 %v13006_v6  ;;  %v18880_v46 = vpop.f32.mrf.mxu1 }
0x1c07   : > { %v23843_v23 = vadd.f32 %v12924_v24, %v23698_v17  ;;  %v12939_v39 = vadd.f32 %v18880_v46, %v23811_v48  ;;  %v13015_v47 = vsel %vm238_vm0, %v23837_v13, 0.0 }
0x1c08   : > { %13016 = vadd.xlane.f32.xlu0 %v13015_v47  ;;  %v12933_v16 = vpop.f32.mrf.mxu1 }
0x1c09   : > { %v23849_v26 = vadd.f32 %v12939_v39, %v23722_v35  ;;  %v12934_v14 = vadd.f32 %v23811_v48, %v12933_v16  ;;  %v13012_v59 = vsel %vm238_vm0, %v23843_v23, 0.0 }
0x1c0a   : > { %13013 = vadd.xlane.f32.xlu1 %v13012_v59  ;;  %v18883_v57 = vpop.f32.mrf.mxu1 }
0x1c0b   : > { %v23855_v17 = vadd.f32 %v12934_v14, %v23712_v52  ;;  %v12949_v45 = vadd.f32 %v18883_v57, %v23811_v48  ;;  %v13021_v33 = vsel %vm238_vm0, %v23849_v26, 0.0 }
0x1c0c   : > { %13022 = vadd.xlane.f32.xlu0 %v13021_v33  ;;  %v12943_v44 = vpop.f32.mrf.mxu1 }
0x1c0d   : > { %v23861_v35 = vadd.f32 %v12949_v45, %v23736_v12  ;;  %v12944_v1 = vadd.f32 %v23811_v48, %v12943_v44  ;;  %v13018_v55 = vsel %vm238_vm0, %v23855_v17, 0.0 }
0x1c0e   : > { %13019 = vadd.xlane.f32.xlu1 %v13018_v55  ;;  %v18886_v30 = vpop.f32.mrf.mxu1 }
0x1c0f   : > { %v23867_v52 = vadd.f32 %v12944_v1, %v23726_v63  ;;  %v12959_v40 = vadd.f32 %v18886_v30, %v23811_v48  ;;  %v13027_v58 = vsel %vm238_vm0, %v23861_v35, 0.0 }
0x1c10   : > { %13028 = vadd.xlane.f32.xlu0 %v13027_v58  ;;  %v12953_v29 = vpop.f32.mrf.mxu1 }
0x1c11   : > { %v23873_v12 = vadd.f32 %v12959_v40, %v23750_v9  ;;  %v12954_v43 = vadd.f32 %v23811_v48, %v12953_v29  ;;  %v13024_v2 = vsel %vm238_vm0, %v23867_v52, 0.0 }
0x1c12   : > { %13025 = vadd.xlane.f32.xlu1 %v13024_v2  ;;  %v18889_v19 = vpop.f32.mrf.mxu1 }
0x1c13   : > { %v23879_v63 = vadd.f32 %v12954_v43, %v23740_v25  ;;  %v12969_v11 = vadd.f32 %v18889_v19, %v23811_v48  ;;  %v13033_v5 = vsel %vm238_vm0, %v23873_v12, 0.0 }
0x1c14   : > { %13034 = vadd.xlane.f32.xlu0 %v13033_v5  ;;  %v12963_v15 = vpop.f32.mrf.mxu1 }
0x1c15   : > { %v23885_v9 = vadd.f32 %v12969_v11, %v23764_v21  ;;  %v12964_v0 = vadd.f32 %v23811_v48, %v12963_v15  ;;  %v13030_v54 = vsel %vm238_vm0, %v23879_v63, 0.0 }
0x1c16   : > { %13031 = vadd.xlane.f32.xlu1 %v13030_v54  ;;  %v18892_v20 = vpop.f32.mrf.mxu1 }
0x1c17   : > { %v23891_v25 = vadd.f32 %v12964_v0, %v23754_v27  ;;  %v12979_v4 = vadd.f32 %v18892_v20, %v23811_v48  ;;  %v13039_v10 = vsel %vm238_vm0, %v23885_v9, 0.0 }
0x1c18   : > { %13040 = vadd.xlane.f32.xlu0 %v13039_v10  ;;  %v12973_v51 = vpop.f32.mrf.mxu1 }
0x1c19   : > { %v23897_v21 = vadd.f32 %v12979_v4, %v23776_v28  ;;  %v12974_v53 = vadd.f32 %v23811_v48, %v12973_v51  ;;  %v13036_v3 = vsel %vm238_vm0, %v23891_v25, 0.0 }
0x1c1a   : > { %13037 = vadd.xlane.f32.xlu1 %v13036_v3 }
0x1c1b   : > { %v23903_v31 = vadd.f32 %v12974_v53, %v23768_v38  ;;  %v13045_v27 = vsel %vm238_vm0, %v23897_v21, 0.0 }
0x1c1c   : > { %13046 = vadd.xlane.f32.xlu0 %v13045_v27 }
0x1c1d   : > { %v13042_v41 = vsel %vm238_vm0, %v23903_v31, 0.0 }
0x1c1e   : > { %13043 = vadd.xlane.f32.xlu1 %v13042_v41 }
0x1c86   : > { %v13005_v60 = vpop.xlane.xlu0 %13004 }
0x1c87   : > { %v13049_v28 = vmul.f32 0.125, %v13005_v60 }
0x1c88   : > { %v13002_v7 = vpop.xlane.xlu1 %13001 }
0x1c89   : > { %v23910_v48 = vsub.f32 %v23815_v36, %v13049_v28  ;;  %v13048_v37 = vmul.f32 0.125, %v13002_v7 }
0x1c8b   : > { %v23913_v22 = vsub.f32 %v23819_v50, %v13048_v37  ;;  %v13081_v38 = vmul.f32 %v23910_v48, %v23910_v48 }
0x1c8d   : > { %v13011_v61 = vpop.xlane.xlu0 %13010  ;;  %v13099_v32 = vsel %vm238_vm0, %v13081_v38, 0.0  ;;  %v13080_v18 = vmul.f32 %v23913_v22, %v23913_v22 }
0x1c8e   : > { %v13051_v34 = vmul.f32 0.125, %v13011_v61  ;;  %13100 = vadd.xlane.f32.xlu0 %v13099_v32 }
0x1c8f   : > { %v13008_v62 = vpop.xlane.xlu1 %13007  ;;  %v13096_v42 = vsel %vm238_vm0, %v13080_v18, 0.0 }
0x1c90   : > { %v23922_v36 = vsub.f32 %v23827_v56, %v13051_v34  ;;  %v13050_v24 = vmul.f32 0.125, %v13008_v62  ;;  %13097 = vadd.xlane.f32.xlu1 %v13096_v42 }
0x1c91   : > { %v13017_v50 = vpop.xlane.xlu0 %13016 }
0x1c92   : > { %v23925_v6 = vsub.f32 %v23831_v49, %v13050_v24  ;;  %v13053_v46 = vmul.f32 0.125, %v13017_v50  ;;  %v13083_v39 = vmul.f32 %v23922_v36, %v23922_v36 }
0x1c93   : > { %v13014_v47 = vpop.xlane.xlu1 %13013 }
0x1c94   : > { %v23930_v16 = vsub.f32 %v23837_v13, %v13053_v46  ;;  %v13052_v14 = vmul.f32 0.125, %v13014_v47  ;;  %v13105_v59 = vsel %vm238_vm0, %v13083_v39, 0.0  ;;  %v13082_v56 = vmul.f32 %v23925_v6, %v23925_v6 }
0x1c95   : > { %v13023_v57 = vpop.xlane.xlu0 %13022  ;;  %13106 = vadd.xlane.f32.xlu0 %v13105_v59 }
0x1c96   : > { %v23936_v45 = vsub.f32 %v23843_v23, %v13052_v14  ;;  %v13055_v49 = vmul.f32 0.125, %v13023_v57  ;;  %v13102_v33 = vsel %vm238_vm0, %v13082_v56, 0.0  ;;  %v13085_v44 = vmul.f32 %v23930_v16, %v23930_v16 }
0x1c97   : > { %13103 = vadd.xlane.f32.xlu1 %v13102_v33  ;;  %v13020_v13 = vpop.xlane.xlu1 %13019 }
0x1c98   : > { %v23942_v1 = vsub.f32 %v23849_v26, %v13055_v49  ;;  %v13054_v55 = vmul.f32 0.125, %v13020_v13  ;;  %v13111_v30 = vsel %vm238_vm0, %v13085_v44, 0.0  ;;  %v13084_v40 = vmul.f32 %v23936_v45, %v23936_v45 }
0x1c99   : > { %v13029_v58 = vpop.xlane.xlu0 %13028  ;;  %13112 = vadd.xlane.f32.xlu0 %v13111_v30 }
0x1c9a   : > { %v23948_v23 = vsub.f32 %v23855_v17, %v13054_v55  ;;  %v13057_v29 = vmul.f32 0.125, %v13029_v58  ;;  %v13108_v43 = vsel %vm238_vm0, %v13084_v40, 0.0  ;;  %v13087_v2 = vmul.f32 %v23942_v1, %v23942_v1 }
0x1c9b   : > { %13109 = vadd.xlane.f32.xlu1 %v13108_v43  ;;  %v13026_v26 = vpop.xlane.xlu1 %13025 }
0x1c9c   : > { %v23954_v19 = vsub.f32 %v23861_v35, %v13057_v29  ;;  %v13056_v11 = vmul.f32 0.125, %v13026_v26  ;;  %v13117_v5 = vsel %vm238_vm0, %v13087_v2, 0.0  ;;  %v13086_v15 = vmul.f32 %v23948_v23, %v23948_v23 }
0x1c9d   : > { %v13035_v0 = vpop.xlane.xlu0 %13034  ;;  %13118 = vadd.xlane.f32.xlu0 %v13117_v5 }
0x1c9e   : > { %v23960_v17 = vsub.f32 %v23867_v52, %v13056_v11  ;;  %v13059_v54 = vmul.f32 0.125, %v13035_v0  ;;  %v13114_v20 = vsel %vm238_vm0, %v13086_v15, 0.0  ;;  %v13089_v4 = vmul.f32 %v23954_v19, %v23954_v19 }
0x1c9f   : > { %13115 = vadd.xlane.f32.xlu1 %v13114_v20  ;;  %v13032_v35 = vpop.xlane.xlu1 %13031 }
0x1ca0   : > { %v23966_v10 = vsub.f32 %v23873_v12, %v13059_v54  ;;  %v13058_v51 = vmul.f32 0.125, %v13032_v35  ;;  %v13123_v53 = vsel %vm238_vm0, %v13089_v4, 0.0  ;;  %v13088_v3 = vmul.f32 %v23960_v17, %v23960_v17 }
0x1ca1   : > { %v13041_v27 = vpop.xlane.xlu0 %13040  ;;  %13124 = vadd.xlane.f32.xlu0 %v13123_v53 }
0x1ca2   : > { %v23972_v52 = vsub.f32 %v23879_v63, %v13058_v51  ;;  %v13061_v41 = vmul.f32 0.125, %v13041_v27  ;;  %v13120_v60 = vsel %vm238_vm0, %v13088_v3, 0.0  ;;  %v13091_v28 = vmul.f32 %v23966_v10, %v23966_v10  ;;  %v24012_v51 = vld [vmem:[%s24824_s1 + $0x58] ss:$0 sm:$0xff] }
0x1ca3   : > { %13121 = vadd.xlane.f32.xlu1 %v13120_v60  ;;  %v13038_v12 = vpop.xlane.xlu1 %13037 }
0x1ca4   : > { %v23978_v7 = vsub.f32 %v23885_v9, %v13061_v41  ;;  %v13060_v37 = vmul.f32 0.125, %v13038_v12  ;;  %v13129_v38 = vsel %vm238_vm0, %v13091_v28, 0.0  ;;  %v13090_v61 = vmul.f32 %v23972_v52, %v23972_v52 }
0x1ca5   : > { %13130 = vadd.xlane.f32.xlu0 %v13129_v38  ;;  %v13047_v63 = vpop.xlane.xlu0 %13046 }
0x1ca6   : > { %v23984_v32 = vsub.f32 %v23891_v25, %v13060_v37  ;;  %v13063_v18 = vmul.f32 0.125, %v13047_v63  ;;  %v13126_v34 = vsel %vm238_vm0, %v13090_v61, 0.0  ;;  %v13093_v62 = vmul.f32 %v23978_v7, %v23978_v7  ;;  %v24020_v63 = vld [vmem:[%s24824_s1 + $0x60] ss:$0 sm:$0xff] }
0x1ca7   : > { %13127 = vadd.xlane.f32.xlu1 %v13126_v34  ;;  %v13044_v9 = vpop.xlane.xlu1 %13043 }
0x1ca8   : > { %v23990_v42 = vsub.f32 %v23897_v21, %v13063_v18  ;;  %v13062_v24 = vmul.f32 0.125, %v13044_v9  ;;  %v13135_v50 = vsel %vm238_vm0, %v13093_v62, 0.0  ;;  %v13092_v46 = vmul.f32 %v23984_v32, %v23984_v32 }
0x1ca9   : > { %13136 = vadd.xlane.f32.xlu0 %v13135_v50 }
0x1caa   : > { %v23996_v25 = vsub.f32 %v23903_v31, %v13062_v24  ;;  %v13132_v39 = vsel %vm238_vm0, %v13092_v46, 0.0  ;;  %v13095_v47 = vmul.f32 %v23990_v42, %v23990_v42  ;;  %v13250_v31 = vld [vmem:[%s24824_s1 + $0xf0] sm:$0xff] }
0x1cab   : > { %13133 = vadd.xlane.f32.xlu1 %v13132_v39  ;;  %18893 = vmatprep.subr.mxu0 %v13250_v31 }
0x1cac   : > { %v13141_v14 = vsel %vm238_vm0, %v13095_v47, 0.0  ;;  %v13094_v21 = vmul.f32 %v23996_v25, %v23996_v25  ;;  %18894 = vmatpush3.msra.mxu0 %v13250_v31 }
0x1cad   : > { %13142 = vadd.xlane.f32.xlu0 %v13141_v14  ;;  %18926 = vmatprep.subr.mxu0 %v25045_v8 }
0x1cae   : > { %v13138_v59 = vsel %vm238_vm0, %v13094_v21, 0.0 }
0x1caf   : > { %13139 = vadd.xlane.f32.xlu1 %v13138_v59 }
0x1d17   : > { %v13101_v56 = vpop.xlane.xlu0 %13100 }
0x1d18   : > { %v13145_v57 = vmul.f32 0.125, %v13101_v56 }
0x1d19   : > { %v13098_v49 = vpop.xlane.xlu1 %13097 }
0x1d1a   : > { %v13161_v33 = vadd.f32 1e-05, %v13145_v57  ;;  %v13144_v44 = vmul.f32 0.125, %v13098_v49 }
0x1d1c   : > { %19622 = vrsqrt.f32 %v13161_v33  ;;  %v13160_v13 = vadd.f32 1e-05, %v13144_v44 }
0x1d1e   : > { %19624 = vrsqrt.f32 %v13160_v13  ;;  %v13107_v55 = vpop.xlane.xlu0 %13106 }
0x1d1f   : > { %v13147_v30 = vmul.f32 0.125, %v13107_v55 }
0x1d20   : > { %v13104_v40 = vpop.xlane.xlu1 %13103 }
0x1d21   : > { %v13163_v58 = vadd.f32 1e-05, %v13147_v30  ;;  %v13146_v29 = vmul.f32 0.125, %v13104_v40 }
0x1d22   : > { %v13113_v43 = vpop.xlane.xlu0 %13112 }
0x1d23   : > { %19626 = vrsqrt.f32 %v13163_v58  ;;  %v13162_v2 = vadd.f32 1e-05, %v13146_v29  ;;  %v13149_v26 = vmul.f32 0.125, %v13113_v43 }
0x1d24   : > { %v13110_v11 = vpop.xlane.xlu1 %13109 }
0x1d25   : > { %19628 = vrsqrt.f32 %v13162_v2  ;;  %v13165_v5 = vadd.f32 1e-05, %v13149_v26  ;;  %v13148_v15 = vmul.f32 0.125, %v13110_v11 }
0x1d26   : > { %v13119_v0 = vpop.xlane.xlu0 %13118 }
0x1d27   : > { %19630 = vrsqrt.f32 %v13165_v5  ;;  %v13164_v54 = vadd.f32 1e-05, %v13148_v15  ;;  %v13151_v20 = vmul.f32 0.125, %v13119_v0 }
0x1d28   : > { %v13116_v4 = vpop.xlane.xlu1 %13115 }
0x1d29   : > { %v19623_v35 = vpop.eup %19622  ;;  %19632 = vrsqrt.f32 %v13164_v54  ;;  %v13167_v53 = vadd.f32 1e-05, %v13151_v20  ;;  %v13150_v3 = vmul.f32 0.125, %v13116_v4 }
0x1d2a   : > { %v13193_v27 = vmul.f32 %v19623_v35, %v23910_v48  ;;  %v13125_v41 = vpop.xlane.xlu0 %13124 }
0x1d2b   : > { %v19625_v60 = vpop.eup %19624  ;;  %19634 = vrsqrt.f32 %v13167_v53  ;;  %v13166_v28 = vadd.f32 1e-05, %v13150_v3  ;;  %v13153_v12 = vmul.f32 0.125, %v13125_v41 }
0x1d2c   : > { %v13213_v37 = vmul.f32 %v24012_v51, %v13193_v27  ;;  %v13122_v38 = vpop.xlane.xlu1 %13121  ;;  %v13192_v61 = vmul.f32 %v19625_v60, %v23913_v22 }
0x1d2d   : > { %19636 = vrsqrt.f32 %v13166_v28  ;;  %v13169_v18 = vadd.f32 1e-05, %v13153_v12  ;;  %v13152_v34 = vmul.f32 0.125, %v13122_v38 }
0x1d2e   : > { %v13131_v62 = vpop.xlane.xlu0 %13130  ;;  %v13212_v48 = vmul.f32 %v24012_v51, %v13192_v61  ;;  %v13233_v46 = vadd.f32 %v24020_v63, %v13213_v37 }
0x1d2f   : > { %19638 = vrsqrt.f32 %v13169_v18  ;;  %v13168_v9 = vadd.f32 1e-05, %v13152_v34  ;;  %v13155_v24 = vmul.f32 0.125, %v13131_v62 }
0x1d30   : > { %v19627_v50 = vpop.eup %19626  ;;  %v13128_v39 = vpop.xlane.xlu1 %13127  ;;  %v13232_v22 = vadd.f32 %v24020_v63, %v13212_v48 }
0x1d31   : > { %v13195_v47 = vmul.f32 %v19627_v50, %v23922_v36  ;;  %19640 = vrsqrt.f32 %v13168_v9  ;;  %v13171_v14 = vadd.f32 1e-05, %v13155_v24  ;;  %v13154_v21 = vmul.f32 0.125, %v13128_v39 }
0x1d32   : > { %v19629_v59 = vpop.eup %19628  ;;  %v13137_v31 = vpop.xlane.xlu0 %13136  ;;  %18895 = vmatprep.mubr.msk.f32.mxu0 %vm238_vm0, %v13232_v22 }
0x1d33   : > { %19642 = vrsqrt.f32 %v13171_v14  ;;  %v13170_v56 = vadd.f32 1e-05, %v13154_v21  ;;  %v13157_v57 = vmul.f32 0.125, %v13137_v31  ;;  %18896 = vmatmul.mubr.msk.f32.vlgmr.msra.gmra.mxu0 %vm238_vm0, %v13233_v46  ;;  %v13194_v49 = vmul.f32 %v19629_v59, %v23925_v6 }
0x1d34   : > { %v19631_v33 = vpop.eup %19630  ;;  %v13134_v44 = vpop.xlane.xlu1 %13133  ;;  %v13215_v13 = vmul.f32 %v24012_v51, %v13195_v47 }
0x1d35   : > { %v13197_v36 = vmul.f32 %v19631_v33, %v23930_v16  ;;  %19644 = vrsqrt.f32 %v13170_v56  ;;  %v13173_v55 = vadd.f32 1e-05, %v13157_v57  ;;  %v13156_v30 = vmul.f32 0.125, %v13134_v44 }
0x1d36   : > { %v19633_v40 = vpop.eup %19632  ;;  %v13143_v58 = vpop.xlane.xlu0 %13142  ;;  %v13214_v29 = vmul.f32 %v24012_v51, %v13194_v49  ;;  %v13235_v15 = vadd.f32 %v24020_v63, %v13215_v13 }
0x1d37   : > { %19646 = vrsqrt.f32 %v13173_v55  ;;  %v13172_v43 = vadd.f32 1e-05, %v13156_v30  ;;  %v13159_v2 = vmul.f32 0.125, %v13143_v58  ;;  %v13196_v26 = vmul.f32 %v19633_v40, %v23936_v45  ;;  %v24103_v40 = vld [vmem:[%s24824_s1 + $0xe8] ss:$0 sm:$0xff] }
0x1d38   : > { %v19635_v11 = vpop.eup %19634  ;;  %v13140_v6 = vpop.xlane.xlu1 %13139  ;;  %v13234_v5 = vadd.f32 %v24020_v63, %v13214_v29  ;;  %v13217_v16 = vmul.f32 %v24012_v51, %v13197_v36  ;;  %v25047_v29 = vld [vmem:[#allocation34_spill] sm:$0xff] }
0x1d39   : > { %v13199_v0 = vmul.f32 %v19635_v11, %v23942_v1  ;;  %19648 = vrsqrt.f32 %v13172_v43  ;;  %v13175_v54 = vadd.f32 1e-05, %v13159_v2  ;;  %v13158_v20 = vmul.f32 0.125, %v13140_v6  ;;  %v25048_v2 = vld [vmem:[#allocation37_spill] sm:$0xff] }
0x1d3a   : > { %v19637_v4 = vpop.eup %19636  ;;  %18898 = vmatprep.mubr.msk.f32.mxu0 %vm238_vm0, %v13234_v5  ;;  %v13216_v35 = vmul.f32 %v24012_v51, %v13196_v26  ;;  %v13237_v41 = vadd.f32 %v24020_v63, %v13217_v16  ;;  %v24111_v43 = vmul.f32 %v24103_v40, %v25047_v29  ;;  %v24382_v29 = vld [vmem:[%s24824_s1 + $0x1e8] ss:$0 sm:$0xff] }
0x1d3b   : > { %19650 = vrsqrt.f32 %v13175_v54  ;;  %v13174_v45 = vadd.f32 1e-05, %v13158_v20  ;;  %18899 = vmatmul.mubr.msk.f32.gmra.mxu0 %vm238_vm0, %v13235_v15  ;;  %v13198_v53 = vmul.f32 %v19637_v4, %v23948_v23  ;;  %v13219_v28 = vmul.f32 %v24012_v51, %v13199_v0 }
0x1d3c   : > { %v19639_v3 = vpop.eup %19638  ;;  %v13236_v27 = vadd.f32 %v24020_v63, %v13216_v35 }
0x1d3d   : > { %v13201_v1 = vmul.f32 %v19639_v3, %v23954_v19  ;;  %19652 = vrsqrt.f32 %v13174_v45  ;;  %v13218_v60 = vmul.f32 %v24012_v51, %v13198_v53  ;;  %v13239_v19 = vadd.f32 %v24020_v63, %v13219_v28 }
0x1d3e   : > { %v19641_v12 = vpop.eup %19640  ;;  %18901 = vmatprep.mubr.msk.f32.mxu0 %vm238_vm0, %v13236_v27 }
0x1d3f   : > { %18902 = vmatmul.mubr.msk.f32.gmra.mxu0 %vm238_vm0, %v13237_v41  ;;  %v13238_v37 = vadd.f32 %v24020_v63, %v13218_v60  ;;  %v13200_v23 = vmul.f32 %v19641_v12, %v23960_v17  ;;  %v13221_v34 = vmul.f32 %v24012_v51, %v13201_v1 }
0x1d40   : > { %v19643_v38 = vpop.eup %19642 }
0x1d41   : > { %v13203_v61 = vmul.f32 %v19643_v38, %v23966_v10  ;;  %18904 = vmatprep.mubr.msk.f32.mxu0 %vm238_vm0, %v13238_v37  ;;  %v13220_v18 = vmul.f32 %v24012_v51, %v13200_v23  ;;  %v13241_v10 = vadd.f32 %v24020_v63, %v13221_v34 }
0x1d42   : > { %v19645_v62 = vpop.eup %19644 }
0x1d43   : > { %18905 = vmatmul.mubr.msk.f32.gmra.mxu0 %vm238_vm0, %v13239_v19  ;;  %v13240_v48 = vadd.f32 %v24020_v63, %v13220_v18  ;;  %v13202_v9 = vmul.f32 %v19645_v62, %v23972_v52  ;;  %v13223_v46 = vmul.f32 %v24012_v51, %v13203_v61 }
0x1d44   : > { %v19647_v24 = vpop.eup %19646 }
0x1d45   : > { %v13205_v17 = vmul.f32 %v19647_v24, %v23978_v7  ;;  %18907 = vmatprep.mubr.msk.f32.mxu0 %vm238_vm0, %v13240_v48  ;;  %v13222_v50 = vmul.f32 %v24012_v51, %v13202_v9  ;;  %v13243_v7 = vadd.f32 %v24020_v63, %v13223_v46 }
0x1d46   : > { %v19649_v39 = vpop.eup %19648 }
0x1d47   : > { %18908 = vmatmul.mubr.msk.f32.gmra.mxu0 %vm238_vm0, %v13241_v10  ;;  %v13242_v22 = vadd.f32 %v24020_v63, %v13222_v50  ;;  %v13204_v47 = vmul.f32 %v19649_v39, %v23984_v32  ;;  %v13225_v59 = vmul.f32 %v24012_v51, %v13205_v17 }
0x1d48   : > { %v19651_v14 = vpop.eup %19650 }
0x1d49   : > { %v13207_v52 = vmul.f32 %v19651_v14, %v23990_v42  ;;  %18910 = vmatprep.mubr.msk.f32.mxu0 %vm238_vm0, %v13242_v22  ;;  %v13224_v21 = vmul.f32 %v24012_v51, %v13204_v47  ;;  %v13245_v32 = vadd.f32 %v24020_v63, %v13225_v59 }
0x1d4a   : > { %v19653_v31 = vpop.eup %19652 }
0x1d4b   : > { %18911 = vmatmul.mubr.msk.f32.gmra.mxu0 %vm238_vm0, %v13243_v7  ;;  %v13244_v56 = vadd.f32 %v24020_v63, %v13224_v21  ;;  %v13206_v57 = vmul.f32 %v19653_v31, %v23996_v25  ;;  %v13227_v49 = vmul.f32 %v24012_v51, %v13207_v52  ;;  %v24088_v25 = vld [vmem:[%s24824_s1 + $0xf8] ss:$0 sm:$0xff] }
0x1d4d   : > { %18913 = vmatprep.mubr.msk.f32.mxu0 %vm238_vm0, %v13244_v56  ;;  %v13226_v42 = vmul.f32 %v24012_v51, %v13206_v57  ;;  %v13247_v44 = vadd.f32 %v24020_v63, %v13227_v49  ;;  %v25049_v57 = vld [vmem:[#allocation35_spill] sm:$0xff] }
0x1d4f   : > { %18914 = vmatmul.mubr.msk.f32.gmra.mxu0 %vm238_vm0, %v13245_v32  ;;  %v13246_v33 = vadd.f32 %v24020_v63, %v13226_v42  ;;  %v25046_v63 = vld [vmem:[#allocation39_spill] sm:$0xff]  ;;  %v13454_v32 = vmul.f32 %v24103_v40, %v25049_v57 }
0x1d51   : > { %18916 = vmatprep.mubr.msk.f32.mxu0 %vm238_vm0, %v13246_v33 }
0x1d53   : > { %18917 = vmatmul.mubr.msk.f32.gmra.mxu0 %vm238_vm0, %v13247_v44 }
0x1d54   : > { %18930 = vmatprep.mubr.msk.f32.mxu0 %vm19760_vm2, %v25045_v8 }
0x1df3   : > { %v18897_v13 = vpop.f32.mrf.mxu0 }
0x1df4   : > { %v24091_v51 = vadd.f32 %v18897_v13, %v24088_v25 }
0x1df5   : > { %v13370_v36 = vpop.f32.mrf.mxu0 }
0x1df6   : > { %v24094_v55 = vadd.f32 %v24088_v25, %v13370_v36  ;;  %18920 = vmatpush3.xpose.msk.msra.mxu1 %vm238_vm0, %v24091_v51  ;;  %v13456_v30 = vmul.f32 %v24091_v51, %v25046_v63  ;;  %v13472_v26 = vmul.f32 %v24091_v51, %v25048_v2 }
0x1df7   : > { %18921 = vmatprep.subr.mxu1 %v25045_v8 }
0x1df8   : > { %14873 = vrot.lane.b32.xlu1 %v13456_v30, %s19755_s3  ;;  %v13455_v58 = vmul.f32 %v24094_v55, %v25046_v63  ;;  %v13471_v16 = vmul.f32 %v24094_v55, %v25048_v2 }
0x1dfa   : > { %18922 = vmatpush3.xpose.msk.msra.mxu1 %vm238_vm0, %v24094_v55  ;;  %14871 = vrot.lane.b32.xlu0 %v13455_v58, %s19755_s3 }
0x1dfb   : > { %v18900_v11 = vpop.f32.mrf.mxu0  ;;  %18933 = vmatprep.subr.mxu1 %v25045_v8 }
0x1dfc   : > { %v24120_v6 = vadd.f32 %v18900_v11, %v24088_v25  ;;  %15521 = vrot.lane.b32.xlu1 %v13472_v26, %s19755_s3 }
0x1dfd   : > { %v13380_v5 = vpop.f32.mrf.mxu0  ;;  %18924 = vmatmul.mubr.msk.f32.vlgmr.msra.gmra.mxu1 %vm238_vm0, %v24111_v43 }
0x1dfe   : > { %18927 = vmatpush3.xpose.msk.msra.mxu0 %vm238_vm0, %v24120_v6  ;;  %v13458_v15 = vmul.f32 %v24120_v6, %v25046_v63  ;;  %18937 = vmatprep.mubr.msk.f32.mxu1 %vm19760_vm2, %v25045_v8  ;;  %v24135_v54 = vadd.f32 %v24088_v25, %v13380_v5  ;;  %v13474_v35 = vmul.f32 %v24120_v6, %v25048_v2 }
0x1dff   : > { %v18903_v0 = vpop.f32.mrf.mxu0  ;;  %18928 = vmatprep.subr.mxu0 %v25045_v8 }
0x1e00   : > { %v24138_v20 = vadd.f32 %v18903_v0, %v24088_v25  ;;  %14954 = vrot.lane.b32.xlu0 %v13458_v15, %s19755_s3  ;;  %15519 = vrot.lane.b32.xlu1 %v13471_v16, %s19755_s3  ;;  %v13457_v1 = vmul.f32 %v24135_v54, %v25046_v63  ;;  %v13473_v38 = vmul.f32 %v24135_v54, %v25048_v2 }
0x1e01   : > { %v13390_v4 = vpop.f32.mrf.mxu0 }
0x1e02   : > { %18929 = vmatpush3.xpose.msk.msra.mxu0 %vm238_vm0, %v24135_v54  ;;  %18934 = vmatpush3.xpose.msk.msra.mxu1 %vm238_vm0, %v24138_v20  ;;  %v13460_v45 = vmul.f32 %v24138_v20, %v25046_v63  ;;  %v24153_v3 = vadd.f32 %v24088_v25, %v13390_v4  ;;  %v13476_v60 = vmul.f32 %v24138_v20, %v25048_v2 }
0x1e03   : > { %v18906_v53 = vpop.f32.mrf.mxu0  ;;  %18935 = vmatprep.subr.mxu1 %v25045_v8  ;;  %18940 = vmatprep.subr.mxu0 %v25045_v8 }
0x1e04   : > { %v24156_v27 = vadd.f32 %v18906_v53, %v24088_v25  ;;  %15602 = vrot.lane.b32.xlu0 %v13474_v35, %s19755_s3  ;;  %15035 = vrot.lane.b32.xlu1 %v13460_v45, %s19755_s3  ;;  %v13459_v61 = vmul.f32 %v24153_v3, %v25046_v63  ;;  %v13475_v9 = vmul.f32 %v24153_v3, %v25048_v2 }
0x1e05   : > { %v13400_v41 = vpop.f32.mrf.mxu0  ;;  %18931 = vmatmul.mubr.msk.f32.vlgmr.msra.gmra.mxu0 %vm238_vm0, %v24111_v43 }
0x1e06   : > { %18936 = vmatpush3.xpose.msk.msra.mxu1 %vm238_vm0, %v24153_v3  ;;  %18941 = vmatpush3.xpose.msk.msra.mxu0 %vm238_vm0, %v24156_v27  ;;  %v24173_v12 = vadd.f32 %v24088_v25, %v13400_v41  ;;  %v13462_v48 = vmul.f32 %v24156_v27, %v25046_v63  ;;  %v13478_v46 = vmul.f32 %v24156_v27, %v25048_v2 }
0x1e07   : > { %v18909_v28 = vpop.f32.mrf.mxu0  ;;  %18942 = vmatprep.subr.mxu0 %v25045_v8  ;;  %18947 = vmatprep.subr.mxu1 %v25045_v8 }
0x1e08   : > { %v24176_v37 = vadd.f32 %v18909_v28, %v24088_v25  ;;  %14952 = vrot.lane.b32.xlu0 %v13457_v1, %s19755_s3  ;;  %15683 = vrot.lane.b32.xlu1 %v13476_v60, %s19755_s3  ;;  %v13461_v7 = vmul.f32 %v24173_v12, %v25046_v63  ;;  %v13477_v31 = vmul.f32 %v24173_v12, %v25048_v2 }
0x1e09   : > { %v13410_v23 = vpop.f32.mrf.mxu0  ;;  %18938 = vmatmul.mubr.msk.f32.vlgmr.msra.gmra.mxu1 %vm238_vm0, %v24111_v43  ;;  %18944 = vmatprep.mubr.msk.f32.mxu0 %vm19760_vm2, %v25045_v8 }
0x1e0a   : > { %18943 = vmatpush3.xpose.msk.msra.mxu0 %vm238_vm0, %v24173_v12  ;;  %18948 = vmatpush3.xpose.msk.msra.mxu1 %vm238_vm0, %v24176_v37  ;;  %v24195_v18 = vadd.f32 %v24088_v25, %v13410_v23  ;;  %v13464_v39 = vmul.f32 %v24176_v37, %v25046_v63 }
0x1e0b   : > { %v18912_v19 = vpop.f32.mrf.mxu0  ;;  %18949 = vmatprep.subr.mxu1 %v25045_v8  ;;  %18954 = vmatprep.subr.mxu0 %v25045_v8 }
0x1e0c   : > { %v24198_v34 = vadd.f32 %v18912_v19, %v24088_v25  ;;  %15600 = vrot.lane.b32.xlu0 %v13473_v38, %s19755_s3  ;;  %15033 = vrot.lane.b32.xlu1 %v13459_v61, %s19755_s3  ;;  %v13463_v21 = vmul.f32 %v24195_v18, %v25046_v63 }
0x1e0d   : > { %v13420_v62 = vpop.f32.mrf.mxu0  ;;  %18945 = vmatmul.mubr.msk.f32.vlgmr.msra.gmra.mxu0 %vm238_vm0, %v24111_v43  ;;  %18951 = vmatprep.mubr.msk.f32.mxu1 %vm19760_vm2, %v25045_v8 }
0x1e0e   : > { %18950 = vmatpush3.xpose.msk.msra.mxu1 %vm238_vm0, %v24195_v18  ;;  %18955 = vmatpush3.xpose.msk.msra.mxu0 %vm238_vm0, %v24198_v34  ;;  %v24217_v17 = vadd.f32 %v24088_v25, %v13420_v62  ;;  %v13466_v56 = vmul.f32 %v24198_v34, %v25046_v63 }
0x1e0f   : > { %v18915_v24 = vpop.f32.mrf.mxu0  ;;  %18956 = vmatprep.subr.mxu0 %v25045_v8  ;;  %18961 = vmatprep.subr.mxu1 %v25045_v8 }
0x1e10   : > { %v24220_v10 = vadd.f32 %v18915_v24, %v24088_v25  ;;  %15116 = vrot.lane.b32.xlu0 %v13462_v48, %s19755_s3  ;;  %15681 = vrot.lane.b32.xlu1 %v13475_v9, %s19755_s3  ;;  %v13465_v42 = vmul.f32 %v24217_v17, %v25046_v63 }
0x1e11   : > { %v13430_v50 = vpop.f32.mrf.mxu0  ;;  %18952 = vmatmul.mubr.msk.f32.vlgmr.msra.gmra.mxu1 %vm238_vm0, %v24111_v43  ;;  %18958 = vmatprep.mubr.msk.f32.mxu0 %vm19760_vm2, %v25045_v8 }
0x1e12   : > { %18957 = vmatpush3.xpose.msk.msra.mxu0 %vm238_vm0, %v24217_v17  ;;  %18962 = vmatpush3.xpose.msk.msra.mxu1 %vm238_vm0, %v24220_v10  ;;  %v24239_v47 = vadd.f32 %v24088_v25, %v13430_v50  ;;  %v13468_v49 = vmul.f32 %v24220_v10, %v25046_v63 }
0x1e13   : > { %v18918_v22 = vpop.f32.mrf.mxu0  ;;  %18963 = vmatprep.subr.mxu1 %v25045_v8  ;;  %18968 = vmatprep.subr.mxu0 %v25045_v8 }
0x1e14   : > { %v24242_v14 = vadd.f32 %v18918_v22, %v24088_v25  ;;  %15764 = vrot.lane.b32.xlu0 %v13478_v46, %s19755_s3  ;;  %15197 = vrot.lane.b32.xlu1 %v13464_v39, %s19755_s3  ;;  %v13467_v44 = vmul.f32 %v24239_v47, %v25046_v63 }
0x1e15   : > { %v13440_v52 = vpop.f32.mrf.mxu0  ;;  %18959 = vmatmul.mubr.msk.f32.vlgmr.msra.gmra.mxu0 %vm238_vm0, %v24111_v43  ;;  %18965 = vmatprep.mubr.msk.f32.mxu1 %vm19760_vm2, %v25045_v8 }
0x1e16   : > { %18964 = vmatpush3.xpose.msk.msra.mxu1 %vm238_vm0, %v24239_v47  ;;  %18969 = vmatpush3.xpose.msk.msra.mxu0 %vm238_vm0, %v24242_v14  ;;  %v24261_v59 = vadd.f32 %v24088_v25, %v13440_v52  ;;  %v13470_v33 = vmul.f32 %v24242_v14, %v25046_v63 }
0x1e17   : > { %18970 = vmatprep.subr.mxu0 %v25045_v8  ;;  %18975 = vmatprep.subr.mxu1 %v25045_v8 }
0x1e18   : > { %15114 = vrot.lane.b32.xlu0 %v13461_v7, %s19755_s3  ;;  %15195 = vrot.lane.b32.xlu1 %v13463_v21, %s19755_s3  ;;  %v13469_v25 = vmul.f32 %v24261_v59, %v25046_v63 }
0x1e19   : > { %18966 = vmatmul.mubr.msk.f32.vlgmr.msra.gmra.mxu1 %vm238_vm0, %v24111_v43  ;;  %18972 = vmatprep.mubr.msk.f32.mxu0 %vm19760_vm2, %v25045_v8 }
0x1e1a   : > { %18971 = vmatpush3.xpose.msk.msra.mxu0 %vm238_vm0, %v24261_v59  ;;  %18976 = vmatpush3.xpose.msk.msra.mxu1 %vm238_vm0, %v24091_v51 }
0x1e1b   : > { %18977 = vmatprep.subr.mxu1 %v25045_v8  ;;  %18982 = vmatprep.subr.mxu0 %v25045_v8 }
0x1e1c   : > { %15762 = vrot.lane.b32.xlu0 %v13477_v31, %s19755_s3  ;;  %15278 = vrot.lane.b32.xlu1 %v13466_v56, %s19755_s3 }
0x1e1d   : > { %18973 = vmatmul.mubr.msk.f32.vlgmr.msra.gmra.mxu0 %vm238_vm0, %v24111_v43  ;;  %18979 = vmatprep.mubr.msk.f32.mxu1 %vm19760_vm2, %v25045_v8 }
0x1e1e   : > { %18978 = vmatpush3.xpose.msk.msra.mxu1 %vm238_vm0, %v24094_v55  ;;  %18983 = vmatpush3.xpose.msk.msra.mxu0 %vm238_vm0, %v24120_v6 }
0x1e1f   : > { %18984 = vmatprep.subr.mxu0 %v25045_v8  ;;  %18989 = vmatprep.subr.mxu1 %v25045_v8 }
0x1e20   : > { %15276 = vrot.lane.b32.xlu0 %v13465_v42, %s19755_s3  ;;  %15359 = vrot.lane.b32.xlu1 %v13468_v49, %s19755_s3 }
0x1e21   : > { %18980 = vmatmul.mubr.msk.f32.vlgmr.msra.gmra.mxu1 %vm238_vm0, %v13454_v32  ;;  %18986 = vmatprep.mubr.msk.f32.mxu0 %vm19760_vm2, %v25045_v8 }
0x1e22   : > { %18985 = vmatpush3.xpose.msk.msra.mxu0 %vm238_vm0, %v24135_v54  ;;  %18990 = vmatpush3.xpose.msk.msra.mxu1 %vm238_vm0, %v24138_v20 }
0x1e23   : > { %18991 = vmatprep.subr.mxu1 %v25045_v8  ;;  %18996 = vmatprep.subr.mxu0 %v25045_v8 }
0x1e24   : > { %15440 = vrot.lane.b32.xlu0 %v13470_v33, %s19755_s3  ;;  %15357 = vrot.lane.b32.xlu1 %v13467_v44, %s19755_s3 }
0x1e25   : > { %18987 = vmatmul.mubr.msk.f32.vlgmr.msra.gmra.mxu0 %vm238_vm0, %v13454_v32  ;;  %18993 = vmatprep.mubr.msk.f32.mxu1 %vm19760_vm2, %v25045_v8 }
0x1e26   : > { %18992 = vmatpush3.xpose.msk.msra.mxu1 %vm238_vm0, %v24153_v3  ;;  %18997 = vmatpush3.xpose.msk.msra.mxu0 %vm238_vm0, %v24156_v27 }
0x1e27   : > { %18998 = vmatprep.subr.mxu0 %v25045_v8  ;;  %19003 = vmatprep.subr.mxu1 %v25045_v8 }
0x1e28   : > { %15438 = vrot.lane.b32.xlu0 %v13469_v25, %s19755_s3  ;;  %19000 = vmatprep.mubr.msk.f32.mxu0 %vm19760_vm2, %v25045_v8 }
0x1e29   : > { %18994 = vmatmul.mubr.msk.f32.vlgmr.msra.gmra.mxu1 %vm238_vm0, %v13454_v32 }
0x1e2a   : > { %18999 = vmatpush3.xpose.msk.msra.mxu0 %vm238_vm0, %v24173_v12  ;;  %19004 = vmatpush3.xpose.msk.msra.mxu1 %vm238_vm0, %v24176_v37 }
0x1e2b   : > { %19005 = vmatprep.subr.mxu1 %v25045_v8  ;;  %19010 = vmatprep.subr.mxu0 %v25045_v8 }
0x1e2c   : > { %19007 = vmatprep.mubr.msk.f32.mxu1 %vm19760_vm2, %v25045_v8 }
0x1e2d   : > { %19001 = vmatmul.mubr.msk.f32.vlgmr.msra.gmra.mxu0 %vm238_vm0, %v13454_v32 }
0x1e2e   : > { %19006 = vmatpush3.xpose.msk.msra.mxu1 %vm238_vm0, %v24195_v18  ;;  %19011 = vmatpush3.xpose.msk.msra.mxu0 %vm238_vm0, %v24198_v34 }
0x1e2f   : > { %19012 = vmatprep.subr.mxu0 %v25045_v8  ;;  %19017 = vmatprep.subr.mxu1 %v25045_v8 }
0x1e30   : > { %19014 = vmatprep.mubr.msk.f32.mxu0 %vm19760_vm2, %v25045_v8 }
0x1e31   : > { %19008 = vmatmul.mubr.msk.f32.vlgmr.msra.gmra.mxu1 %vm238_vm0, %v13454_v32 }
0x1e32   : > { %19013 = vmatpush3.xpose.msk.msra.mxu0 %vm238_vm0, %v24217_v17  ;;  %19018 = vmatpush3.xpose.msk.msra.mxu1 %vm238_vm0, %v24220_v10 }
0x1e33   : > { %19019 = vmatprep.subr.mxu1 %v25045_v8  ;;  %19024 = vmatprep.subr.mxu0 %v25045_v8 }
0x1e34   : > { %19021 = vmatprep.mubr.msk.f32.mxu1 %vm19760_vm2, %v25045_v8 }
0x1e35   : > { %19015 = vmatmul.mubr.msk.f32.vlgmr.msra.gmra.mxu0 %vm238_vm0, %v13454_v32 }
0x1e36   : > { %19020 = vmatpush3.xpose.msk.msra.mxu1 %vm238_vm0, %v24239_v47  ;;  %19025 = vmatpush3.xpose.msk.msra.mxu0 %vm238_vm0, %v24242_v14 }
0x1e37   : > { %19026 = vmatprep.subr.mxu0 %v25045_v8  ;;  %19031 = vmatprep.subr.mxu1 %v25045_v8 }
0x1e38   : > { %19028 = vmatprep.mubr.msk.f32.mxu0 %vm19760_vm2, %v25045_v8 }
0x1e39   : > { %19022 = vmatmul.mubr.msk.f32.vlgmr.msra.gmra.mxu1 %vm238_vm0, %v13454_v32 }
0x1e3a   : > { %19027 = vmatpush3.xpose.msk.msra.mxu0 %vm238_vm0, %v24261_v59  ;;  %19035 = vmatprep.mubr.msk.f32.mxu1 %vm19760_vm2, %v25045_v8 }
0x1e3b   : > { %19038 = vmatprep.subr.mxu0 %v25045_v8 }
0x1e3d   : > { %19029 = vmatmul.mubr.msk.f32.vlgmr.msra.gmra.mxu0 %vm238_vm0, %v13454_v32 }
0x1e3e   : > { %19042 = vmatprep.mubr.msk.f32.mxu0 %vm19760_vm2, %v25045_v8 }
0x1e6a   : > { %v14874_v13 = vpop.permute.xlu1 %14873 }
0x1e6b   : > { %19032 = vmatpush3.msra.mxu1 %v14874_v13 }
0x1e6c   : > { %v14872_v51 = vpop.permute.xlu0 %14871  ;;  %19033 = vmatprep.subr.mxu1 %v25045_v8 }
0x1e6d   : > { %19034 = vmatpush3.msra.mxu1 %v14872_v51 }
0x1e6e   : > { %19045 = vmatprep.subr.mxu1 %v25045_v8 }
0x1e72   : > { %v14955_v36 = vpop.permute.xlu0 %14954 }
0x1e73   : > { %19039 = vmatpush3.msra.mxu0 %v14955_v36 }
0x1e74   : > { %19040 = vmatprep.subr.mxu0 %v25045_v8 }
0x1e76   : > { %v24376_v55 = vpop.permute.xlu0 %15602 }
0x1e7a   : > { %v14953_v63 = vpop.permute.xlu0 %14952 }
0x1e7b   : > { %19041 = vmatpush3.msra.mxu0 %v14953_v63 }
0x1e7c   : > { %19052 = vmatprep.subr.mxu0 %v25045_v8 }
0x1ebd   : > { %v13562_v30 = vpop.f32.mrf.mxu1 }
0x1ebe   : > { %v14661_v40 = vmul.f32 0.5, %v13562_v30 }
0x1ebf   : > { %v18925_v58 = vpop.f32.mrf.mxu1 }
0x1ec0   : > { %v24385_v43 = vadd.f32 %v24382_v29, %v14661_v40 }
0x1ec2   : > { %v14693_v26 = vsel %vm1956_vm1, %v24385_v43, -inf }
0x1ec3   : > { %14694 = vmax.xlane.f32.xlu0 %v14693_v26 }
0x1ec5   : > { %v13638_v11 = vpop.f32.mrf.mxu0 }
0x1ec6   : > { %v14662_v6 = vmul.f32 0.5, %v13638_v11 }
0x1ec7   : > { %v18932_v5 = vpop.f32.mrf.mxu0 }
0x1ec8   : > { %v24390_v15 = vadd.f32 %v24382_v29, %v14662_v6 }
0x1ec9   : > { %v13714_v16 = vpop.f32.mrf.mxu1 }
0x1eca   : > { %v14663_v0 = vmul.f32 0.5, %v13714_v16  ;;  %v14696_v54 = vsel %vm1956_vm1, %v24390_v15, -inf }
0x1ecb   : > { %14697 = vmax.xlane.f32.xlu1 %v14696_v54  ;;  %v18939_v20 = vpop.f32.mrf.mxu1 }
0x1ecc   : > { %v24395_v4 = vadd.f32 %v24382_v29, %v14663_v0 }
0x1ecd   : > { %v13790_v35 = vpop.f32.mrf.mxu0 }
0x1ece   : > { %v14664_v45 = vmul.f32 0.5, %v13790_v35  ;;  %v14699_v53 = vsel %vm1956_vm1, %v24395_v4, -inf }
0x1ecf   : > { %14700 = vmax.xlane.f32.xlu0 %v14699_v53  ;;  %v18946_v3 = vpop.f32.mrf.mxu0 }
0x1ed0   : > { %v24400_v27 = vadd.f32 %v24382_v29, %v14664_v45 }
0x1ed1   : > { %v13866_v41 = vpop.f32.mrf.mxu1 }
0x1ed2   : > { %v14665_v1 = vmul.f32 0.5, %v13866_v41  ;;  %v14702_v60 = vsel %vm1956_vm1, %v24400_v27, -inf }
0x1ed3   : > { %14703 = vmax.xlane.f32.xlu1 %v14702_v60  ;;  %v18953_v28 = vpop.f32.mrf.mxu1 }
0x1ed4   : > { %v24405_v12 = vadd.f32 %v24382_v29, %v14665_v1 }
0x1ed5   : > { %v13942_v23 = vpop.f32.mrf.mxu0 }
0x1ed6   : > { %v14666_v38 = vmul.f32 0.5, %v13942_v23  ;;  %v14705_v61 = vsel %vm1956_vm1, %v24405_v12, -inf }
0x1ed7   : > { %14706 = vmax.xlane.f32.xlu0 %v14705_v61  ;;  %v18960_v19 = vpop.f32.mrf.mxu0 }
0x1ed8   : > { %v24410_v62 = vadd.f32 %v24382_v29, %v14666_v38 }
0x1ed9   : > { %v14018_v48 = vpop.f32.mrf.mxu1 }
0x1eda   : > { %v14667_v9 = vmul.f32 0.5, %v14018_v48  ;;  %v14708_v24 = vsel %vm1956_vm1, %v24410_v62, -inf }
0x1edb   : > { %14709 = vmax.xlane.f32.xlu1 %v14708_v24  ;;  %v18967_v50 = vpop.f32.mrf.mxu1  ;;  %v13480_v24 = vmul.f32 %v24176_v37, %v25048_v2 }
0x1edc   : > { %v24415_v46 = vadd.f32 %v24382_v29, %v14667_v9  ;;  %v13479_v50 = vmul.f32 %v24195_v18, %v25048_v2  ;;  %v24478_v18 = vpop.permute.xlu0 %15600 }
0x1edd   : > { %v14094_v39 = vpop.f32.mrf.mxu0 }
0x1ede   : > { %v14668_v22 = vmul.f32 0.5, %v14094_v39  ;;  %v14711_v52 = vsel %vm1956_vm1, %v24415_v46, -inf  ;;  %v13482_v39 = vmul.f32 %v24198_v34, %v25048_v2 }
0x1edf   : > { %14712 = vmax.xlane.f32.xlu0 %v14711_v52  ;;  %v18974_v7 = vpop.f32.mrf.mxu0  ;;  %v13481_v52 = vmul.f32 %v24217_v17, %v25048_v2 }
0x1ee0   : > { %v24420_v21 = vadd.f32 %v24382_v29, %v14668_v22  ;;  %v24467_v22 = vpop.permute.xlu1 %15521  ;;  %v13486_v7 = vmul.f32 %v24242_v14, %v25048_v2  ;;  %v24482_v34 = vpop.permute.xlu0 %15116 }
0x1ee1   : > { %v14167_v31 = vpop.f32.mrf.mxu1 }
0x1ee2   : > { %v14669_v56 = vmul.f32 0.5, %v14167_v31  ;;  %v14714_v57 = vsel %vm1956_vm1, %v24420_v21, -inf }
0x1ee3   : > { %14715 = vmax.xlane.f32.xlu1 %v14714_v57  ;;  %v18981_v32 = vpop.f32.mrf.mxu1 }
0x1ee4   : > { %v24425_v42 = vadd.f32 %v24382_v29, %v14669_v56  ;;  %v24473_v37 = vpop.permute.xlu1 %15519  ;;  %v24486_v32 = vpop.permute.xlu0 %15764 }
0x1ee5   : > { %v14237_v49 = vpop.f32.mrf.mxu0 }
0x1ee6   : > { %v14670_v33 = vmul.f32 0.5, %v14237_v49  ;;  %v14717_v44 = vsel %vm1956_vm1, %v24425_v42, -inf }
0x1ee7   : > { %14718 = vmax.xlane.f32.xlu0 %v14717_v44  ;;  %v18988_v25 = vpop.f32.mrf.mxu0 }
0x1ee8   : > { %v24430_v13 = vadd.f32 %v24382_v29, %v14670_v33  ;;  %v24480_v31 = vpop.permute.xlu1 %15035  ;;  %v24493_v33 = vpop.permute.xlu0 %15114 }
0x1ee9   : > { %v14307_v51 = vpop.f32.mrf.mxu1 }
0x1eea   : > { %v14671_v36 = vmul.f32 0.5, %v14307_v51  ;;  %v14720_v63 = vsel %vm1956_vm1, %v24430_v13, -inf }
0x1eeb   : > { %14721 = vmax.xlane.f32.xlu1 %v14720_v63  ;;  %v18995_v30 = vpop.f32.mrf.mxu1 }
0x1eec   : > { %v24435_v40 = vadd.f32 %v24382_v29, %v14671_v36  ;;  %v24484_v56 = vpop.permute.xlu1 %15683  ;;  %v24499_v25 = vpop.permute.xlu0 %15762 }
0x1eed   : > { %v14377_v58 = vpop.f32.mrf.mxu0 }
0x1eee   : > { %v14672_v26 = vmul.f32 0.5, %v14377_v58  ;;  %v14723_v11 = vsel %vm1956_vm1, %v24435_v40, -inf }
0x1eef   : > { %14724 = vmax.xlane.f32.xlu0 %v14723_v11  ;;  %v19002_v6 = vpop.f32.mrf.mxu0 }
0x1ef0   : > { %v24440_v5 = vadd.f32 %v24382_v29, %v14672_v26  ;;  %v24488_v17 = vpop.permute.xlu1 %15033  ;;  %v24503_v36 = vpop.permute.xlu0 %15276 }
0x1ef1   : > { %v14447_v16 = vpop.f32.mrf.mxu1 }
0x1ef2   : > { %v14673_v0 = vmul.f32 0.5, %v14447_v16  ;;  %v14726_v54 = vsel %vm1956_vm1, %v24440_v5, -inf }
0x1ef3   : > { %14727 = vmax.xlane.f32.xlu1 %v14726_v54  ;;  %v19009_v20 = vpop.f32.mrf.mxu1 }
0x1ef4   : > { %v24445_v35 = vadd.f32 %v24382_v29, %v14673_v0  ;;  %v24497_v44 = vpop.permute.xlu1 %15681  ;;  %v24507_v30 = vpop.permute.xlu0 %15440 }
0x1ef5   : > { %v14517_v45 = vpop.f32.mrf.mxu0 }
0x1ef6   : > { %v14674_v53 = vmul.f32 0.5, %v14517_v45  ;;  %v14729_v3 = vsel %vm1956_vm1, %v24445_v35, -inf }
0x1ef7   : > { %14730 = vmax.xlane.f32.xlu0 %v14729_v3  ;;  %v19016_v41 = vpop.f32.mrf.mxu0 }
0x1ef8   : > { %v24450_v1 = vadd.f32 %v24382_v29, %v14674_v53  ;;  %v24501_v51 = vpop.permute.xlu1 %15197  ;;  %v24514_v26 = vpop.permute.xlu0 %15438 }
0x1ef9   : > { %v14587_v60 = vpop.f32.mrf.mxu1 }
0x1efa   : > { %v14675_v28 = vmul.f32 0.5, %v14587_v60  ;;  %v14732_v23 = vsel %vm1956_vm1, %v24450_v1, -inf }
0x1efb   : > { %14733 = vmax.xlane.f32.xlu1 %v14732_v23  ;;  %v19023_v38 = vpop.f32.mrf.mxu1 }
0x1efc   : > { %v24455_v61 = vadd.f32 %v24382_v29, %v14675_v28  ;;  %v24505_v63 = vpop.permute.xlu1 %15195 }
0x1efd   : > { %v14657_v19 = vpop.f32.mrf.mxu0 }
0x1efe   : > { %v14735_v48 = vsel %vm1956_vm1, %v24455_v61, -inf  ;;  %v14676_v57 = vmul.f32 0.5, %v14657_v19 }
0x1eff   : > { %14736 = vmax.xlane.f32.xlu0 %v14735_v48  ;;  %v19030_v9 = vpop.f32.mrf.mxu0 }
0x1f00   : > { %v24491_v49 = vadd.f32 %v24382_v29, %v14676_v57  ;;  %v13484_v29 = vmul.f32 %v24220_v10, %v25048_v2  ;;  %v24511_v58 = vpop.permute.xlu1 %15278 }
0x1f02   : > { %v14738_v14 = vsel %vm1956_vm1, %v24491_v49, -inf }
0x1f04   : > { %v24516_v11 = vpop.permute.xlu1 %15359 }
0x1f08   : > { %v24519_v54 = vpop.permute.xlu1 %15357 }
0x1f0c   : > { %15845 = vrot.lane.b32.xlu1 %v13480_v24, %s19755_s3 }
0x1f10   : > { %15843 = vrot.lane.b32.xlu1 %v13479_v50, %s19755_s3 }
0x1f15   : > { %15926 = vrot.lane.b32.xlu0 %v13482_v39, %s19755_s3 }
0x1f19   : > { %15924 = vrot.lane.b32.xlu0 %v13481_v52, %s19755_s3 }
0x1f1d   : > { %16088 = vrot.lane.b32.xlu0 %v13486_v7, %s19755_s3 }
0x1f34   : > { %14739 = vmax.xlane.f32.xlu1 %v14738_v14 }
0x1f45   : > { %16007 = vrot.lane.b32.xlu1 %v13484_v29, %s19755_s3 }
0x1f4c   : > { %v14695_v6 = vpop.xlane.xlu0 %14694 }
0x1f4d   : > { %v14741_v16 = vsub.f32 %v24385_v43, %v14695_v6 }
0x1f4f   : > { %v14757_v0 = vmul.f32 1.442695, %v14741_v16 }
0x1f51   : > { %19654 = vpow2.f32 %v14757_v0 }
0x1f54   : > { %v14698_v20 = vpop.xlane.xlu1 %14697 }
0x1f55   : > { %v14742_v45 = vsub.f32 %v24390_v15, %v14698_v20 }
0x1f57   : > { %v14759_v53 = vmul.f32 1.442695, %v14742_v45 }
0x1f58   : > { %v14701_v10 = vpop.xlane.xlu0 %14700 }
0x1f59   : > { %19656 = vpow2.f32 %v14759_v53  ;;  %v14743_v3 = vsub.f32 %v24395_v4, %v14701_v10 }
0x1f5b   : > { %v14761_v41 = vmul.f32 1.442695, %v14743_v3 }
0x1f5c   : > { %v14704_v60 = vpop.xlane.xlu1 %14703 }
0x1f5d   : > { %19658 = vpow2.f32 %v14761_v41  ;;  %v14744_v28 = vsub.f32 %v24400_v27, %v14704_v60 }
0x1f5e   : > { %v24524_v23 = vpop.eup %19654 }
0x1f5f   : > { %v14763_v43 = vmul.f32 1.442695, %v14744_v28  ;;  %v14789_v38 = vsel %vm1956_vm1, %v24524_v23, 0.0 }
0x1f60   : > { %v14707_v19 = vpop.xlane.xlu0 %14706  ;;  %14790 = vadd.xlane.f32.xlu0 %v14789_v38 }
0x1f61   : > { %19660 = vpow2.f32 %v14763_v43  ;;  %v14745_v15 = vsub.f32 %v24405_v12, %v14707_v19 }
0x1f63   : > { %v14765_v48 = vmul.f32 1.442695, %v14745_v15 }
0x1f64   : > { %v14710_v9 = vpop.xlane.xlu1 %14709 }
0x1f65   : > { %19662 = vpow2.f32 %v14765_v48  ;;  %v14746_v4 = vsub.f32 %v24410_v62, %v14710_v9 }
0x1f66   : > { %v24530_v24 = vpop.eup %19656 }
0x1f67   : > { %v14767_v50 = vmul.f32 1.442695, %v14746_v4  ;;  %v14792_v27 = vsel %vm1956_vm1, %v24530_v24, 0.0 }
0x1f68   : > { %v14713_v39 = vpop.xlane.xlu0 %14712 }
0x1f69   : > { %19664 = vpow2.f32 %v14767_v50  ;;  %v14747_v52 = vsub.f32 %v24415_v46, %v14713_v39  ;;  %14793 = vadd.xlane.f32.xlu1 %v14792_v27 }
0x1f6a   : > { %v24535_v7 = vpop.eup %19658 }
0x1f6b   : > { %v14769_v57 = vmul.f32 1.442695, %v14747_v52  ;;  %v14795_v12 = vsel %vm1956_vm1, %v24535_v7, 0.0 }
0x1f6c   : > { %14796 = vadd.xlane.f32.xlu0 %v14795_v12  ;;  %v14716_v14 = vpop.xlane.xlu1 %14715 }
0x1f6d   : > { %19666 = vpow2.f32 %v14769_v57  ;;  %v14748_v62 = vsub.f32 %v24420_v21, %v14716_v14 }
0x1f6e   : > { %v24540_v29 = vpop.eup %19660 }
0x1f6f   : > { %v14771_v6 = vmul.f32 1.442695, %v14748_v62  ;;  %v14798_v16 = vsel %vm1956_vm1, %v24540_v29, 0.0 }
0x1f70   : > { %v14719_v0 = vpop.xlane.xlu0 %14718  ;;  %14799 = vadd.xlane.f32.xlu1 %v14798_v16 }
0x1f71   : > { %19668 = vpow2.f32 %v14771_v6  ;;  %v14749_v46 = vsub.f32 %v24425_v42, %v14719_v0 }
0x1f72   : > { %v24545_v20 = vpop.eup %19662 }
0x1f73   : > { %v14773_v45 = vmul.f32 1.442695, %v14749_v46  ;;  %v14801_v53 = vsel %vm1956_vm1, %v24545_v20, 0.0 }
0x1f74   : > { %14802 = vadd.xlane.f32.xlu0 %v14801_v53  ;;  %v14722_v10 = vpop.xlane.xlu1 %14721 }
0x1f75   : > { %19670 = vpow2.f32 %v14773_v45  ;;  %v14750_v21 = vsub.f32 %v24430_v13, %v14722_v10 }
0x1f76   : > { %v24550_v3 = vpop.eup %19664 }
0x1f77   : > { %v14775_v41 = vmul.f32 1.442695, %v14750_v21  ;;  %v14804_v60 = vsel %vm1956_vm1, %v24550_v3, 0.0 }
0x1f78   : > { %v14725_v28 = vpop.xlane.xlu0 %14724  ;;  %14805 = vadd.xlane.f32.xlu1 %v14804_v60 }
0x1f79   : > { %19672 = vpow2.f32 %v14775_v41  ;;  %v14751_v42 = vsub.f32 %v24435_v40, %v14725_v28  ;;  %v13485_v28 = vmul.f32 %v24261_v59, %v25048_v2 }
0x1f7a   : > { %v24555_v43 = vpop.eup %19666 }
0x1f7b   : > { %v14777_v38 = vmul.f32 1.442695, %v14751_v42  ;;  %v14807_v19 = vsel %vm1956_vm1, %v24555_v43, 0.0 }
0x1f7c   : > { %14808 = vadd.xlane.f32.xlu0 %v14807_v19  ;;  %v14728_v15 = vpop.xlane.xlu1 %14727 }
0x1f7d   : > { %19674 = vpow2.f32 %v14777_v38  ;;  %v14752_v13 = vsub.f32 %v24440_v5, %v14728_v15 }
0x1f7e   : > { %v24560_v48 = vpop.eup %19668 }
0x1f7f   : > { %v14779_v9 = vmul.f32 1.442695, %v14752_v13  ;;  %v14810_v4 = vsel %vm1956_vm1, %v24560_v48, 0.0 }
0x1f80   : > { %v14731_v50 = vpop.xlane.xlu0 %14730  ;;  %14811 = vadd.xlane.f32.xlu1 %v14810_v4 }
0x1f81   : > { %19676 = vpow2.f32 %v14779_v9  ;;  %v14753_v40 = vsub.f32 %v24445_v35, %v14731_v50 }
0x1f82   : > { %v24565_v27 = vpop.eup %19670 }
0x1f83   : > { %v14781_v39 = vmul.f32 1.442695, %v14753_v40  ;;  %v14813_v52 = vsel %vm1956_vm1, %v24565_v27, 0.0  ;;  %v13483_v40 = vmul.f32 %v24239_v47, %v25048_v2 }
0x1f84   : > { %14814 = vadd.xlane.f32.xlu0 %v14813_v52  ;;  %v14734_v57 = vpop.xlane.xlu1 %14733 }
0x1f85   : > { %19678 = vpow2.f32 %v14781_v39  ;;  %v14754_v5 = vsub.f32 %v24450_v1, %v14734_v57 }
0x1f86   : > { %v24570_v12 = vpop.eup %19672 }
0x1f87   : > { %v14783_v14 = vmul.f32 1.442695, %v14754_v5  ;;  %v14816_v62 = vsel %vm1956_vm1, %v24570_v12, 0.0 }
0x1f88   : > { %v14737_v6 = vpop.xlane.xlu0 %14736  ;;  %14817 = vadd.xlane.f32.xlu1 %v14816_v62  ;;  %v24598_v42 = vpop.permute.xlu1 %15845 }
0x1f89   : > { %19680 = vpow2.f32 %v14783_v14  ;;  %v14755_v35 = vsub.f32 %v24455_v61, %v14737_v6 }
0x1f8a   : > { %v24575_v16 = vpop.eup %19674 }
0x1f8b   : > { %v14785_v0 = vmul.f32 1.442695, %v14755_v35  ;;  %v14819_v46 = vsel %vm1956_vm1, %v24575_v16, 0.0 }
0x1f8c   : > { %14820 = vadd.xlane.f32.xlu0 %v14819_v46  ;;  %v24600_v38 = vpop.permute.xlu1 %15843  ;;  %v24607_v50 = vpop.permute.xlu0 %15926 }
0x1f8d   : > { %19682 = vpow2.f32 %v14785_v0 }
0x1f8e   : > { %v24579_v1 = vpop.eup %19676 }
0x1f8f   : > { %v14822_v45 = vsel %vm1956_vm1, %v24579_v1, 0.0 }
0x1f90   : > { %14823 = vadd.xlane.f32.xlu1 %v14822_v45  ;;  %v24609_v59 = vpop.permute.xlu0 %15924 }
0x1f92   : > { %v24583_v53 = vpop.eup %19678 }
0x1f93   : > { %v14825_v10 = vsel %vm1956_vm1, %v24583_v53, 0.0 }
0x1f94   : > { %14826 = vadd.xlane.f32.xlu1 %v14825_v10  ;;  %v24614_v39 = vpop.permute.xlu0 %16088 }
0x1f96   : > { %v24587_v61 = vpop.eup %19680 }
0x1f97   : > { %v14828_v21 = vsel %vm1956_vm1, %v24587_v61, 0.0 }
0x1f98   : > { %14829 = vadd.xlane.f32.xlu1 %v14828_v21 }
0x1f9a   : > { %v24591_v41 = vpop.eup %19682 }
0x1f9b   : > { %v14831_v60 = vsel %vm1956_vm1, %v24591_v41, 0.0 }
0x1f9c   : > { %14832 = vadd.xlane.f32.xlu0 %v14831_v60 }
0x1fb2   : > { %16086 = vrot.lane.b32.xlu0 %v13485_v28, %s19755_s3 }
0x1fbd   : > { %v14740_v19 = vpop.xlane.xlu1 %14739 }
0x1fbe   : > { %v14756_v15 = vsub.f32 %v24491_v49, %v14740_v19 }
0x1fc0   : > { %v14787_v13 = vmul.f32 1.442695, %v14756_v15 }
0x1fc1   : > { %v24616_v52 = vpop.permute.xlu1 %16007 }
0x1fc2   : > { %19684 = vpow2.f32 %v14787_v13 }
0x1fcf   : > { %v24603_v9 = vpop.eup %19684 }
0x1fd0   : > { %v14834_v4 = vsel %vm1956_vm1, %v24603_v9, 0.0 }
0x1fd1   : > { %14835 = vadd.xlane.f32.xlu1 %v14834_v4 }
0x1fe2   : > { %16005 = vrot.lane.b32.xlu1 %v13483_v40, %s19755_s3 }
0x1fe9   : > { %v14791_v49 = vpop.xlane.xlu0 %14790 }
0x1fea   : > { %19686 = vrcp.f32 %v14791_v49 }
0x1ff2   : > { %v14794_v57 = vpop.xlane.xlu1 %14793 }
0x1ff3   : > { %19688 = vrcp.f32 %v14794_v57 }
0x1ff5   : > { %v14797_v5 = vpop.xlane.xlu0 %14796 }
0x1ff6   : > { %19690 = vrcp.f32 %v14797_v5 }
0x1ff7   : > { %v19687_v14 = vpop.eup %19686 }
0x1ff8   : > { %v14853_v62 = vmul.f32 %v19687_v14, %v24524_v23 }
0x1ff9   : > { %v14800_v6 = vpop.xlane.xlu1 %14799 }
0x1ffa   : > { %19692 = vrcp.f32 %v14800_v6  ;;  %19036 = vmatmul.mubr.msk.f32.vlgmr.msra.gmra.mxu1 %vm1956_vm1, %v14853_v62 }
0x1ffb   : > { %19046 = vmatpush3.msra.mxu1 %v24480_v31  ;;  %19049 = vmatprep.mubr.msk.f32.mxu1 %vm19760_vm2, %v25045_v8 }
0x1ffc   : > { %19047 = vmatprep.subr.mxu1 %v25045_v8 }
0x1ffd   : > { %v14803_v2 = vpop.xlane.xlu0 %14802  ;;  %19048 = vmatpush3.msra.mxu1 %v24488_v17 }
0x1ffe   : > { %19694 = vrcp.f32 %v14803_v2  ;;  %19059 = vmatprep.subr.mxu1 %v25045_v8 }
0x2000   : > { %v19689_v47 = vpop.eup %19688 }
0x2001   : > { %v14854_v23 = vmul.f32 %v19689_v47, %v24530_v24  ;;  %v14806_v35 = vpop.xlane.xlu1 %14805 }
0x2002   : > { %19696 = vrcp.f32 %v14806_v35 }
0x2003   : > { %v19691_v0 = vpop.eup %19690  ;;  %19043 = vmatmul.mubr.msk.f32.vlgmr.msra.gmra.mxu0 %vm1956_vm1, %v14854_v23 }
0x2004   : > { %v14855_v31 = vmul.f32 %v19691_v0, %v24535_v7  ;;  %19053 = vmatpush3.msra.mxu0 %v24482_v34  ;;  %19056 = vmatprep.mubr.msk.f32.mxu0 %vm19760_vm2, %v25045_v8 }
0x2005   : > { %19054 = vmatprep.subr.mxu0 %v25045_v8  ;;  %v14809_v17 = vpop.xlane.xlu0 %14808 }
0x2006   : > { %19698 = vrcp.f32 %v14809_v17  ;;  %19055 = vmatpush3.msra.mxu0 %v24493_v33  ;;  %19050 = vmatmul.mubr.msk.f32.vlgmr.msra.gmra.mxu1 %vm1956_vm1, %v14855_v31 }
0x2007   : > { %v19693_v24 = vpop.eup %19692  ;;  %19060 = vmatpush3.msra.mxu1 %v24501_v51  ;;  %19066 = vmatprep.subr.mxu0 %v25045_v8 }
0x2008   : > { %v14856_v7 = vmul.f32 %v19693_v24, %v24540_v29  ;;  %19061 = vmatprep.subr.mxu1 %v25045_v8  ;;  %19063 = vmatprep.mubr.msk.f32.mxu1 %vm19760_vm2, %v25045_v8 }
0x2009   : > { %19062 = vmatpush3.msra.mxu1 %v24505_v63  ;;  %v14812_v34 = vpop.xlane.xlu1 %14811 }
0x200a   : > { %19700 = vrcp.f32 %v14812_v34  ;;  %19057 = vmatmul.mubr.msk.f32.vlgmr.msra.gmra.mxu0 %vm1956_vm1, %v14856_v7  ;;  %19073 = vmatprep.subr.mxu1 %v25045_v8 }
0x200b   : > { %v19695_v33 = vpop.eup %19694  ;;  %19067 = vmatpush3.msra.mxu0 %v24511_v58  ;;  %19070 = vmatprep.mubr.msk.f32.mxu0 %vm19760_vm2, %v25045_v8 }
0x200c   : > { %v14857_v51 = vmul.f32 %v19695_v33, %v24545_v20  ;;  %19068 = vmatprep.subr.mxu0 %v25045_v8 }
0x200d   : > { %19069 = vmatpush3.msra.mxu0 %v24503_v36  ;;  %v14815_v29 = vpop.xlane.xlu0 %14814 }
0x200e   : > { %19702 = vrcp.f32 %v14815_v29  ;;  %19064 = vmatmul.mubr.msk.f32.vlgmr.msra.gmra.mxu1 %vm1956_vm1, %v14857_v51  ;;  %19080 = vmatprep.subr.mxu0 %v25045_v8 }
0x200f   : > { %v19697_v63 = vpop.eup %19696  ;;  %19074 = vmatpush3.msra.mxu1 %v24516_v11  ;;  %19077 = vmatprep.mubr.msk.f32.mxu1 %vm19760_vm2, %v25045_v8 }
0x2010   : > { %v14858_v58 = vmul.f32 %v19697_v63, %v24550_v3  ;;  %19075 = vmatprep.subr.mxu1 %v25045_v8 }
0x2011   : > { %19076 = vmatpush3.msra.mxu1 %v24519_v54  ;;  %v14818_v20 = vpop.xlane.xlu1 %14817 }
0x2012   : > { %19704 = vrcp.f32 %v14818_v20  ;;  %19071 = vmatmul.mubr.msk.f32.vlgmr.msra.gmra.mxu0 %vm1956_vm1, %v14858_v58  ;;  %19087 = vmatprep.subr.mxu1 %v25045_v8 }
0x2013   : > { %v19699_v36 = vpop.eup %19698  ;;  %19081 = vmatpush3.msra.mxu0 %v24507_v30  ;;  %19084 = vmatprep.mubr.msk.f32.mxu0 %vm19760_vm2, %v25045_v8 }
0x2014   : > { %v14859_v11 = vmul.f32 %v19699_v36, %v24555_v43  ;;  %19082 = vmatprep.subr.mxu0 %v25045_v8 }
0x2015   : > { %19083 = vmatpush3.msra.mxu0 %v24514_v26  ;;  %v14821_v3 = vpop.xlane.xlu0 %14820 }
0x2016   : > { %19706 = vrcp.f32 %v14821_v3  ;;  %19078 = vmatmul.mubr.msk.f32.vlgmr.msra.gmra.mxu1 %vm1956_vm1, %v14859_v11  ;;  %19094 = vmatprep.subr.mxu0 %v25045_v8 }
0x2017   : > { %v19701_v54 = vpop.eup %19700  ;;  %19088 = vmatpush3.msra.mxu1 %v24467_v22  ;;  %19091 = vmatprep.mubr.msk.f32.mxu1 %vm19760_vm2, %v25045_v8 }
0x2018   : > { %v14860_v30 = vmul.f32 %v19701_v54, %v24560_v48  ;;  %19089 = vmatprep.subr.mxu1 %v25045_v8 }
0x2019   : > { %19090 = vmatpush3.msra.mxu1 %v24473_v37  ;;  %v14824_v43 = vpop.xlane.xlu1 %14823 }
0x201a   : > { %19708 = vrcp.f32 %v14824_v43  ;;  %19085 = vmatmul.mubr.msk.f32.vlgmr.msra.gmra.mxu0 %vm1956_vm1, %v14860_v30  ;;  %19101 = vmatprep.subr.mxu1 %v25045_v8  ;;  %v16173_v43 = vld [vmem:[%s24824_s1 + $0x288] sm:$0xff] }
0x201b   : > { %v19703_v26 = vpop.eup %19702  ;;  %19095 = vmatpush3.msra.mxu0 %v24376_v55  ;;  %19098 = vmatprep.mubr.msk.f32.mxu0 %vm19760_vm2, %v25045_v8 }
0x201c   : > { %v14861_v22 = vmul.f32 %v19703_v26, %v24565_v27  ;;  %19096 = vmatprep.subr.mxu0 %v25045_v8  ;;  %v16247_v26 = vld [vmem:[%s24824_s1 + $0x100] sm:$0xff] }
0x201d   : > { %19097 = vmatpush3.msra.mxu0 %v24478_v18  ;;  %v14827_v48 = vpop.xlane.xlu1 %14826 }
0x201e   : > { %19710 = vrcp.f32 %v14827_v48  ;;  %19092 = vmatmul.mubr.msk.f32.vlgmr.msra.gmra.mxu1 %vm1956_vm1, %v14861_v22  ;;  %19108 = vmatprep.subr.mxu0 %v25045_v8 }
0x201f   : > { %v19705_v37 = vpop.eup %19704  ;;  %19102 = vmatpush3.msra.mxu1 %v24484_v56  ;;  %19105 = vmatprep.mubr.msk.f32.mxu1 %vm19760_vm2, %v25045_v8 }
0x2020   : > { %v14862_v55 = vmul.f32 %v19705_v37, %v24570_v12  ;;  %19103 = vmatprep.subr.mxu1 %v25045_v8  ;;  %v17227_v37 = vld [vmem:[%s24824_s1 + $0x108] ss:$0 sm:$0xff] }
0x2021   : > { %19104 = vmatpush3.msra.mxu1 %v24497_v44  ;;  %v14830_v27 = vpop.xlane.xlu1 %14829 }
0x2022   : > { %19712 = vrcp.f32 %v14830_v27  ;;  %19099 = vmatmul.mubr.msk.f32.vlgmr.msra.gmra.mxu0 %vm1956_vm1, %v14862_v55  ;;  %19115 = vmatprep.subr.mxu1 %v25045_v8  ;;  %v17229_v55 = vld [vmem:[%s24824_s1 + $0xe0] ss:$0 sm:$0xff] }
0x2023   : > { %v19707_v18 = vpop.eup %19706  ;;  %19109 = vmatpush3.msra.mxu0 %v24486_v32  ;;  %19112 = vmatprep.mubr.msk.f32.mxu0 %vm19760_vm2, %v25045_v8 }
0x2024   : > { %v14863_v56 = vmul.f32 %v19707_v18, %v24575_v16  ;;  %19110 = vmatprep.subr.mxu0 %v25045_v8 }
0x2025   : > { %19111 = vmatpush3.msra.mxu0 %v24499_v25  ;;  %v14833_v16 = vpop.xlane.xlu0 %14832 }
0x2026   : > { %19106 = vmatmul.mubr.msk.f32.vlgmr.msra.gmra.mxu1 %vm1956_vm1, %v14863_v56  ;;  %19122 = vmatprep.subr.mxu0 %v25045_v8  ;;  %19714 = vrcp.f32 %v14833_v16 }
0x2027   : > { %v19709_v44 = vpop.eup %19708  ;;  %19116 = vmatpush3.msra.mxu1 %v24598_v42  ;;  %19119 = vmatprep.mubr.msk.f32.mxu1 %vm19760_vm2, %v25045_v8 }
0x2028   : > { %v14864_v32 = vmul.f32 %v19709_v44, %v24579_v1  ;;  %19117 = vmatprep.subr.mxu1 %v25045_v8 }
0x2029   : > { %19118 = vmatpush3.msra.mxu1 %v24600_v38  ;;  %v16087_v45 = vpop.permute.xlu0 %16086 }
0x202a   : > { %19113 = vmatmul.mubr.msk.f32.vlgmr.msra.gmra.mxu0 %vm1956_vm1, %v14864_v32  ;;  %19129 = vmatprep.subr.mxu1 %v25045_v8 }
0x202b   : > { %v19711_v25 = vpop.eup %19710  ;;  %19123 = vmatpush3.msra.mxu0 %v24607_v50  ;;  %19126 = vmatprep.mubr.msk.f32.mxu0 %vm19760_vm2, %v25045_v8 }
0x202c   : > { %v14865_v12 = vmul.f32 %v19711_v25, %v24583_v53  ;;  %19124 = vmatprep.subr.mxu0 %v25045_v8 }
0x202d   : > { %19125 = vmatpush3.msra.mxu0 %v24609_v59 }
0x202e   : > { %19120 = vmatmul.mubr.msk.f32.vlgmr.msra.gmra.mxu1 %vm1956_vm1, %v14865_v12  ;;  %19136 = vmatprep.subr.mxu0 %v25045_v8 }
0x202f   : > { %v19713_v46 = vpop.eup %19712  ;;  %19130 = vmatpush3.msra.mxu1 %v24616_v52  ;;  %19133 = vmatprep.mubr.msk.f32.mxu1 %vm19760_vm2, %v25045_v8 }
0x2030   : > { %v14866_v1 = vmul.f32 %v19713_v46, %v24587_v61  ;;  %19131 = vmatprep.subr.mxu1 %v25045_v8 }
0x2032   : > { %19127 = vmatmul.mubr.msk.f32.vlgmr.msra.gmra.mxu0 %vm1956_vm1, %v14866_v1 }
0x2033   : > { %19137 = vmatpush3.msra.mxu0 %v24614_v39  ;;  %19140 = vmatprep.mubr.msk.f32.mxu0 %vm19760_vm2, %v25045_v8  ;;  %v19715_v10 = vpop.eup %19714 }
0x2034   : > { %19138 = vmatprep.subr.mxu0 %v25045_v8  ;;  %v14867_v61 = vmul.f32 %v19715_v10, %v24591_v41 }
0x2035   : > { %19139 = vmatpush3.msra.mxu0 %v16087_v45  ;;  %v16356_v45 = vld [vmem:[%s24824_s1 + $0x120] sm:$0xff] }
0x2036   : > { %19162 = vmatprep.subr.mxu0 %v25045_v8 }
0x205a   : > { %v14836_v53 = vpop.xlane.xlu1 %14835 }
0x205b   : > { %19716 = vrcp.f32 %v14836_v53 }
0x205e   : > { %v16006_v21 = vpop.permute.xlu1 %16005 }
0x205f   : > { %19132 = vmatpush3.msra.mxu1 %v16006_v21 }
0x2060   : > { %19134 = vmatmul.mubr.msk.f32.vlgmr.msra.gmra.mxu1 %vm1956_vm1, %v14867_v61  ;;  %19143 = vmatprep.subr.mxu1 %v25045_v8 }
0x2061   : > { %19159 = vmatprep.mubr.msk.f32.mxu1 %vm19760_vm2, %v25045_v8 }
0x2068   : > { %v19717_v60 = vpop.eup %19716 }
0x2069   : > { %v14868_v28 = vmul.f32 %v19717_v60, %v24603_v9  ;;  %v17230_v60 = vld [vmem:[%s24824_s1 + $0x110] ss:$0 sm:$0xff] }
0x206b   : > { %19141 = vmatmul.mubr.msk.f32.vlgmr.msra.gmra.mxu0 %vm1956_vm1, %v14868_v28 }
0x206c   : > { %19164 = vmatprep.mubr.msk.f32.mxu0 %vm19760_vm2, %v25045_v8  ;;  %19163 = vmatpush3.msra.mxu0 %v16247_v26  ;;  %v19746_v26 = vld [vmem:[%s24824_s1 + $0x200] ss:$0 sm:$0xff] }
0x206d   : > { %19167 = vmatprep.subr.mxu0 %v25045_v8 }
0x20ba   : > { %v14946_v42 = vpop.f32.mrf.mxu1 }
0x20bc   : > { %v19037_v38 = vpop.f32.mrf.mxu1 }
0x20c3   : > { %v15027_v41 = vpop.f32.mrf.mxu0 }
0x20c5   : > { %v19044_v19 = vpop.f32.mrf.mxu0 }
0x20c6   : > { %v15108_v15 = vpop.f32.mrf.mxu1  ;;  %v16437_v19 = vld [vmem:[%s24824_s1 + $0x138] sm:$0xff] }
0x20c8   : > { %v19051_v13 = vpop.f32.mrf.mxu1 }
0x20c9   : > { %v17232_v13 = vld [vmem:[%s24824_s1 + $0x128] ss:$0 sm:$0xff] }
0x20ca   : > { %v15189_v4 = vpop.f32.mrf.mxu0 }
0x20cc   : > { %v19058_v50 = vpop.f32.mrf.mxu0 }
0x20ce   : > { %v15270_v59 = vpop.f32.mrf.mxu1 }
0x20d0   : > { %v19065_v40 = vpop.f32.mrf.mxu1 }
0x20d2   : > { %v15351_v39 = vpop.f32.mrf.mxu0 }
0x20d4   : > { %v19072_v49 = vpop.f32.mrf.mxu0 }
0x20d6   : > { %v15432_v52 = vpop.f32.mrf.mxu1 }
0x20d8   : > { %v19079_v57 = vpop.f32.mrf.mxu1 }
0x20da   : > { %v15513_v9 = vpop.f32.mrf.mxu0 }
0x20dc   : > { %v19086_v5 = vpop.f32.mrf.mxu0 }
0x20de   : > { %v15594_v14 = vpop.f32.mrf.mxu1 }
0x20df   : > { %v16165_v62 = vadd.f32 %v15594_v14, %v14946_v42  ;;  %v17231_v42 = vld [vmem:[%s24824_s1 + $0x118] ss:$0 sm:$0xff] }
0x20e0   : > { %v19093_v6 = vpop.f32.mrf.mxu1 }
0x20e2   : > { %v15675_v2 = vpop.f32.mrf.mxu0 }
0x20e3   : > { %v16166_v47 = vadd.f32 %v15675_v2, %v15027_v41 }
0x20e4   : > { %v19100_v23 = vpop.f32.mrf.mxu0 }
0x20e6   : > { %v15756_v35 = vpop.f32.mrf.mxu1 }
0x20e7   : > { %v16167_v0 = vadd.f32 %v15756_v35, %v15108_v15  ;;  %v16436_v15 = vld [vmem:[%s24824_s1 + $0x130] sm:$0xff] }
0x20e8   : > { %v19107_v31 = vpop.f32.mrf.mxu1 }
0x20ea   : > { %v15837_v17 = vpop.f32.mrf.mxu0 }
0x20eb   : > { %v16168_v24 = vadd.f32 %v15837_v17, %v15189_v4  ;;  %v17236_v17 = vld [vmem:[%s24824_s1 + $0x148] ss:$0 sm:$0xff] }
0x20ec   : > { %v19114_v7 = vpop.f32.mrf.mxu0 }
0x20ed   : > { %v17237_v7 = vld [vmem:[%s24824_s1 + $0x150] ss:$0 sm:$0xff] }
0x20ee   : > { %v15918_v34 = vpop.f32.mrf.mxu1 }
0x20ef   : > { %v16169_v33 = vadd.f32 %v15918_v34, %v15270_v59 }
0x20f0   : > { %v19121_v51 = vpop.f32.mrf.mxu1 }
0x20f1   : > { %v17238_v51 = vld [vmem:[%s24824_s1 + $0x160] ss:$0 sm:$0xff] }
0x20f2   : > { %v15999_v29 = vpop.f32.mrf.mxu0 }
0x20f3   : > { %v16170_v30 = vadd.f32 %v15999_v29, %v15351_v39  ;;  %v17234_v39 = vld [vmem:[%s24824_s1 + $0x140] ss:$0 sm:$0xff] }
0x20f4   : > { %v19128_v63 = vpop.f32.mrf.mxu0 }
0x2120   : > { %v16080_v58 = vpop.f32.mrf.mxu1 }
0x2121   : > { %v16171_v54 = vadd.f32 %v16080_v58, %v15432_v52 }
0x2122   : > { %v19135_v20 = vpop.f32.mrf.mxu1 }
0x212b   : > { %v16161_v36 = vpop.f32.mrf.mxu0 }
0x212c   : > { %v16172_v11 = vadd.f32 %v16161_v36, %v15513_v9 }
0x212d   : > { %v19142_v3 = vpop.f32.mrf.mxu0 }
0x212e   : > { %19144 = vmatpush3.msra.mxu1 %v16172_v11 }
0x212f   : > { %19145 = vmatprep.subr.mxu1 %v25045_v8 }
0x2130   : > { %19146 = vmatpush3.msra.mxu1 %v16171_v54  ;;  %v19745_v54 = vld [vmem:[%s24824_s1 + $0x1f8] ss:$0 sm:$0xff] }
0x2131   : > { %19147 = vmatprep.subr.mxu1 %v25045_v8 }
0x2132   : > { %19148 = vmatpush3.msra.mxu1 %v16170_v30  ;;  %v25050_v30 = vld [vmem:[#allocation38_spill] sm:$0xff] }
0x2133   : > { %19149 = vmatprep.subr.mxu1 %v25045_v8 }
0x2134   : > { %19150 = vmatpush3.msra.mxu1 %v16169_v33 }
0x2135   : > { %19151 = vmatprep.subr.mxu1 %v25045_v8 }
0x2136   : > { %19152 = vmatpush3.msra.mxu1 %v16168_v24 }
0x2137   : > { %19153 = vmatprep.subr.mxu1 %v25045_v8 }
0x2138   : > { %19154 = vmatpush3.msra.mxu1 %v16167_v0 }
0x2139   : > { %19155 = vmatprep.subr.mxu1 %v25045_v8 }
0x213a   : > { %19156 = vmatpush3.msra.mxu1 %v16166_v47 }
0x213b   : > { %19157 = vmatprep.subr.mxu1 %v25045_v8 }
0x213c   : > { %19158 = vmatpush3.msra.mxu1 %v16165_v62 }
0x213d   : > { %19160 = vmatmul.mubr.msk.f32.vlgmr.msra.gmra.mxu1 %vm7828_vm3, %v16173_v43  ;;  %v16627_v43 = vmul.f32 %v19745_v54, %v25050_v30 }
0x21fd   : > { %v16243_v22 = vpop.f32.mrf.mxu1 }
0x21fe   : > { %19165 = vmatmul.mubr.msk.f32.vlgmr.msra.gmra.mxu0 %vm238_vm0, %v16243_v22 }
0x21ff   : > { %v19161_v48 = vpop.f32.mrf.mxu1  ;;  %19169 = vmatprep.mubr.msk.f32.mxu0 %vm19760_vm2, %v25045_v8  ;;  %19168 = vmatpush3.msra.mxu0 %v16356_v45 }
0x2200   : > { %19172 = vmatprep.subr.mxu0 %v25045_v8 }
0x22be   : > { %v16322_v27 = vpop.f32.mrf.mxu0 }
0x22bf   : > { %v16323_v18 = vadd.f32 %v17227_v37, %v16322_v27 }
0x22c0   : > { %v19166_v56 = vpop.f32.mrf.mxu0 }
0x22c1   : > { %v16330_v44 = vadd.f32 %v17229_v55, %v16323_v18 }
0x22c3   : > { %v16333_v32 = vsel %vm238_vm0, %v16330_v44, 0.0 }
0x22c4   : > { %16334 = vadd.xlane.f32.xlu0 %v16333_v32 }
0x234d   : > { %v16335_v25 = vpop.xlane.xlu0 %16334 }
0x234e   : > { %v16336_v12 = vmul.f32 0.125, %v16335_v25 }
0x2350   : > { %v16337_v16 = vsub.f32 %v16330_v44, %v16336_v12 }
0x2352   : > { %v16338_v46 = vmul.f32 %v16337_v16, %v16337_v16 }
0x2354   : > { %v16339_v1 = vsel %vm238_vm0, %v16338_v46, 0.0 }
0x2355   : > { %16340 = vadd.xlane.f32.xlu1 %v16339_v1 }
0x23de   : > { %v16341_v53 = vpop.xlane.xlu1 %16340 }
0x23df   : > { %v16342_v10 = vmul.f32 0.125, %v16341_v53 }
0x23e1   : > { %v16343_v61 = vadd.f32 1e-05, %v16342_v10 }
0x23e3   : > { %19718 = vrsqrt.f32 %v16343_v61 }
0x23f0   : > { %v19719_v21 = vpop.eup %19718 }
0x23f1   : > { %v16345_v28 = vmul.f32 %v19719_v21, %v16337_v16 }
0x23f3   : > { %v16350_v38 = vmul.f32 %v17230_v60, %v16345_v28 }
0x23f5   : > { %v16355_v41 = vadd.f32 %v17231_v42, %v16350_v38 }
0x23f7   : > { %19170 = vmatmul.mubr.msk.f32.vlgmr.msra.gmra.mxu0 %vm238_vm0, %v16355_v41 }
0x23f8   : > { %19176 = vmatprep.mubr.msk.f32.mxu0 %vm19760_vm2, %v25045_v8  ;;  %19173 = vmatpush3.msra.mxu0 %v16437_v19 }
0x23f9   : > { %19174 = vmatprep.subr.mxu0 %v25045_v8 }
0x23fa   : > { %19175 = vmatpush3.msra.mxu0 %v16436_v15 }
0x23fb   : > { %19179 = vmatprep.subr.mxu0 %v25045_v8 }
0x24b7   : > { %v16431_v4 = vpop.f32.mrf.mxu0 }
0x24b8   : > { %v16432_v50 = vadd.f32 %v17232_v13, %v16431_v4 }
0x24b9   : > { %v19171_v59 = vpop.f32.mrf.mxu0 }
0x24ba   : > { %v16435_v40 = vmax.f32 %v16432_v50, 0.0 }
0x24bc   : > { %19177 = vmatmul.mubr.msk.f32.vlgmr.msra.gmra.mxu0 %vm1956_vm1, %v16435_v40 }
0x24bd   : > { %19181 = vmatprep.mubr.msk.f32.mxu0 %vm19760_vm2, %v25045_v8  ;;  %v16542_v8 = vld [vmem:[%s24824_s1 + $0x158] sm:$0xff] }
0x24be   : > { %19180 = vmatpush3.msra.mxu0 %v16542_v8 }
0x257c   : > { %v16512_v49 = vpop.f32.mrf.mxu0 }
0x257d   : > { %v16513_v52 = vadd.f32 %v17234_v39, %v16512_v49 }
0x257e   : > { %v19178_v57 = vpop.f32.mrf.mxu0 }
0x257f   : > { %v16516_v9 = vadd.f32 %v16513_v52, %v16355_v41 }
0x2581   : > { %v16519_v5 = vsel %vm238_vm0, %v16516_v9, 0.0 }
0x2582   : > { %16520 = vadd.xlane.f32.xlu0 %v16519_v5 }
0x260b   : > { %v16521_v14 = vpop.xlane.xlu0 %16520 }
0x260c   : > { %v16522_v62 = vmul.f32 0.125, %v16521_v14 }
0x260e   : > { %v16523_v6 = vsub.f32 %v16516_v9, %v16522_v62 }
0x2610   : > { %v16524_v2 = vmul.f32 %v16523_v6, %v16523_v6 }
0x2612   : > { %v16525_v47 = vsel %vm238_vm0, %v16524_v2, 0.0 }
0x2613   : > { %16526 = vadd.xlane.f32.xlu0 %v16525_v47 }
0x269c   : > { %v16527_v23 = vpop.xlane.xlu0 %16526 }
0x269d   : > { %v16528_v35 = vmul.f32 0.125, %v16527_v23 }
0x269f   : > { %v16529_v0 = vadd.f32 1e-05, %v16528_v35 }
0x26a1   : > { %19720 = vrsqrt.f32 %v16529_v0 }
0x26ae   : > { %v19721_v31 = vpop.eup %19720 }
0x26af   : > { %v16531_v24 = vmul.f32 %v19721_v31, %v16523_v6 }
0x26b1   : > { %v16536_v34 = vmul.f32 %v17236_v17, %v16531_v24 }
0x26b3   : > { %v16541_v33 = vadd.f32 %v17237_v7, %v16536_v34 }
0x26b5   : > { %19182 = vmatmul.mubr.msk.f32.vlgmr.msra.gmra.mxu0 %vm238_vm0, %v16541_v33 }
0x2775   : > { %v16617_v29 = vpop.f32.mrf.mxu0 }
0x2776   : > { %v16618_v63 = vadd.f32 %v17238_v51, %v16617_v29 }
0x2777   : > { %v19183_v58 = vpop.f32.mrf.mxu0 }
0x2778   : > { %v17240_v20 = vmul.f32 -1.442695, %v16618_v63 }
0x277a   : > { %19722 = vpow2.f32 %v17240_v20 }
0x2787   : > { %v19723_v36 = vpop.eup %19722 }
0x2788   : > { %v16624_v11 = vadd.f32 1.0, %v19723_v36 }
0x278a   : > { %19724 = vrcp.f32 %v16624_v11 }
0x2797   : > { %v19725_v3 = vpop.eup %19724 }
0x2798   : > { %v16628_v22 = vmul.f32 %v19746_v26, %v19725_v3 }
0x279a   : > { %v16629_v48 = vadd.f32 %v16628_v22, %v16627_v43 }
0x279c   : > { %16630 = vst.msk [vmem:[%s143_s17] sm:$0xff] %vm238_vm0, %v16629_v48 }
0x279d PF: > { %s12_s9 = sadd.s32 1, %s19753_s9  }
0x279e   : > { %p9_p5 = scmp.ge.s32.totalorder %s12_s9, 4  }
0x27a0   :  { %11 = sbr.rel (!%p9_p5) target bundleno = 1 (0x1), region = 58 }

</bundles_post_ra>
